<compile_context>
chip_gen: v7x
topology: tpu7x:2x2x1
jax: 0.10.0
libtpu: 0.0.40
codegen_flags: <defaults>
</compile_context>

<pallas_src>
import functools

import jax
import jax.numpy as jnp
from jax.experimental import pallas as pl
from jax.experimental.pallas import tpu as pltpu


def _round_up(v, m):
    return ((v + m - 1) // m) * m


# --------------- Path A: single pass, whole reordered tensor resident in VMEM -------

def _fused_single_pass_kernel(gamma_ref, beta_ref, w_ref, x_ref, out_ref, *, inv_count, eps):
    """BN stats + BN + ReLU + 2x2 avg-pool + 1x1 conv with x VMEM-resident.

    x_ref: (4, Mp, C_in) -- cohort k = 2*(h%2)+(w%2); rows are (n, ho, wo).
    Stats use MXU reductions (ones @ x); the apply phase re-reads the resident
    VMEM copy, so HBM sees exactly one read of the activation.
    """
    rows = x_ref.shape[1]
    c_in = x_ref.shape[2]
    ones = jnp.ones((1, rows), jnp.float32)

    s1 = jnp.zeros((1, c_in), jnp.float32)
    s2 = jnp.zeros((1, c_in), jnp.float32)
    for k in range(4):                                    # static unroll, 4 cohorts
        xk = x_ref[k].astype(jnp.float32)                 # cast after load (bf16-in OK)
        s1 = s1 + jnp.dot(ones, xk, preferred_element_type=jnp.float32)
        s2 = s2 + jnp.dot(ones, xk * xk, preferred_element_type=jnp.float32)

    mean = s1 * inv_count
    # TODO(synk): E[x^2]-mean^2 in f32 can lose precision when |mean| >> std at huge N*H*W.
    var = s2 * inv_count - mean * mean                    # biased, as BatchNorm uses
    scale = gamma_ref[...].astype(jnp.float32) * jax.lax.rsqrt(var + eps)
    shift = beta_ref[...].astype(jnp.float32) - mean * scale

    acc = None
    for k in range(4):
        xk = jnp.maximum(x_ref[k].astype(jnp.float32) * scale + shift, 0.0)  # BN + ReLU
        acc = xk if acc is None else acc + xk             # 2x2 pool (sum; 1/4 folded in w)
    # TODO(synk): Dropout2d(p=0.1) is identity in eval mode; train-mode RNG dropout not implemented.
    out = jnp.dot(acc, w_ref[...], preferred_element_type=jnp.float32)
    out_ref[...] = out.astype(out_ref.dtype)


# --------------- Path B: tiled apply kernel (stats done by fused XLA reductions) ----

def _apply_kernel(scale_ref, shift_ref, w_ref, x_ref, out_ref):
    """Folded BN(scale/shift) + ReLU + 2x2 avg-pool + 1x1 conv for one row tile."""
    s = scale_ref[...]                                    # (1, C_in) f32
    b = shift_ref[...]                                    # (1, C_in) f32
    acc = None
    for k in range(4):                                    # static unroll, 4 cohorts
        xk = jnp.maximum(x_ref[k].astype(jnp.float32) * s + b, 0.0)
        acc = xk if acc is None else acc + xk
    out = jnp.dot(acc, w_ref[...], preferred_element_type=jnp.float32)
    out_ref[...] = out.astype(out_ref.dtype)


def _choose_tile(mp, c_in, itemsize, tile_rows, in_dbuf_budget):
    """Row-tile: multiple of 8, capped by the lane-padded double-buffered VMEM
    footprint and by tile_rows, and small enough that the grid has >= 4 steps
    (>= 2 per v7x TensorCore) whenever mp allows."""
    c_pad = _round_up(c_in, 128)
    cap = max(8, in_dbuf_budget // (2 * 4 * c_pad * itemsize))
    tm = min(tile_rows, cap)
    tm = min(tm, max(8, -(-mp // 4)))                     # aim for >= 4 grid steps
    return max(8, (tm // 8) * 8)


def densenet_transition_down(x_nchw, gamma, beta, conv_w, *, eps=1e-5,
                             tile_rows=1024, single_pass_bytes=6 << 20,
                             force_tiled=False):
    """x_nchw: (N, C_in, H, W); conv_w: (C_in, C_out). Returns (N, C_out, H//2, W//2)."""
    n, c_in, h, w = x_nchw.shape
    c_out = conv_w.shape[1]
    assert h % 2 == 0 and w % 2 == 0
    hp, wp = h // 2, w // 2
    mp = n * hp * wp                        # pooled-pixel count (output rows)
    m_total = n * h * w                     # total pixels (BN statistics count)
    out_dtype = x_nchw.dtype
    itemsize = jnp.dtype(x_nchw.dtype).itemsize
    c_pad = _round_up(c_in, 128)
    cout_pad = _round_up(c_out, 128)

    # Reorder NCHW -> (4, Mp, C_in): cohort k = 2*(h%2)+(w%2); rows are (n, ho, wo).
    # Input dtype is preserved through HBM and the kernel DMA (no f32 up-cast here).
    x6 = x_nchw.reshape(n, c_in, hp, 2, wp, 2)
    x3 = jnp.transpose(x6, (3, 5, 0, 2, 4, 1)).reshape(4, mp, c_in)

    w_scaled = conv_w.astype(jnp.float32) * 0.25          # fold avg-pool's 1/4 into w

    x3_f32_bytes = 4 * mp * c_pad * 4                     # lane-padded, f32-equivalent
    use_single_pass = (not force_tiled) and (x3_f32_bytes <= single_pass_bytes)

    if use_single_pass:
        # ---- Path A: one pallas_call, x3 resident in VMEM, stats in-kernel ----------
        kernel = functools.partial(_fused_single_pass_kernel,
                                   inv_count=1.0 / float(m_total), eps=float(eps))
        out2d = pl.pallas_call(
            kernel,
            out_shape=jax.ShapeDtypeStruct((mp, c_out), out_dtype),
            grid=(1,),
            in_specs=[pl.BlockSpec((1, c_in), lambda i: (0, 0)),
                      pl.BlockSpec((1, c_in), lambda i: (0, 0)),
                      pl.BlockSpec((c_in, c_out), lambda i: (0, 0)),
                      pl.BlockSpec((4, mp, c_in), lambda i: (0, 0, 0))],
            out_specs=pl.BlockSpec((mp, c_out), lambda i: (0, 0)),
            compiler_params=pltpu.CompilerParams(vmem_limit_bytes=32 << 20),
        )(gamma.reshape(1, c_in), beta.reshape(1, c_in), w_scaled, x3)
    else:
        # ---- Path B: stats via fused XLA reductions + tiled Pallas apply ------------
        tm = _choose_tile(mp, c_in, itemsize, tile_rows, in_dbuf_budget=8 << 20)
        mp_pad = _round_up(mp, tm)
        if mp_pad != mp:                                   # zero rows: sums unaffected
            x3 = jnp.pad(x3, ((0, 0), (0, mp_pad - mp), (0, 0)))
        nt = mp_pad // tm

        # Per-channel sum / sum-of-squares in plain jnp so XLA fuses the reductions
        # into the transpose producer (drops the old standalone stats pallas_call).
        x3f = x3.astype(jnp.float32)
        s1 = jnp.sum(x3f, axis=(0, 1))
        s2 = jnp.sum(x3f * x3f, axis=(0, 1))
        cnt = jnp.float32(m_total)
        mean = s1 / cnt
        var = s2 / cnt - mean * mean                       # biased (BatchNorm)
        scale = gamma.astype(jnp.float32) * jax.lax.rsqrt(var + eps)
        shift = beta.astype(jnp.float32) - mean * scale

        # VMEM budget from *lane-padded* block sizes (input/output double-buffered).
        in_block = 4 * tm * c_pad * itemsize
        out_block = tm * cout_pad * jnp.dtype(out_dtype).itemsize
        small = (2 * 8 * c_pad + c_pad * cout_pad) * 4
        need = 2 * (in_block + out_block) + 2 * small
        vmem_limit = int(min(64 << 20, max(16 << 20, 2 * need)))

        out2d_pad = pl.pallas_call(
            _apply_kernel,
            out_shape=jax.ShapeDtypeStruct((mp_pad, c_out), out_dtype),
            grid=(nt,),
            in_specs=[pl.BlockSpec((1, c_in), lambda t: (0, 0)),
                      pl.BlockSpec((1, c_in), lambda t: (0, 0)),
                      pl.BlockSpec((c_in, c_out), lambda t: (0, 0)),
                      pl.BlockSpec((4, tm, c_in), lambda t: (0, t, 0))],
            out_specs=pl.BlockSpec((tm, c_out), lambda t: (t, 0)),
            compiler_params=pltpu.CompilerParams(
                dimension_semantics=("parallel",),
                vmem_limit_bytes=vmem_limit),
        )(scale.reshape(1, c_in), shift.reshape(1, c_in), w_scaled, x3)
        out2d = out2d_pad[:mp]

    out = out2d.reshape(n, hp, wp, c_out)                 # rows were (n, ho, wo)
    return jnp.transpose(out, (0, 3, 1, 2))               # back to NCHW


def _reference(x_nchw, gamma, beta, conv_w, eps=1e-5):
    """Plain-JAX reference matching the PyTorch forward (eval-mode dropout)."""
    x = x_nchw.astype(jnp.float32)
    mean = jnp.mean(x, axis=(0, 2, 3), keepdims=True)
    var = jnp.mean((x - mean) ** 2, axis=(0, 2, 3), keepdims=True)
    xn = (x - mean) / jnp.sqrt(var + eps)
    xn = xn * gamma[None, :, None, None] + beta[None, :, None, None]
    xr = jnp.maximum(xn, 0.0)
    y = jnp.einsum("nchw,cd->ndhw", xr, conv_w)
    nn_, d, h, w = y.shape
    return y.reshape(nn_, d, h // 2, 2, w // 2, 2).mean(axis=(3, 5))


if __name__ == "__main__":
    key = jax.random.PRNGKey(0)
    k1, k2, k3, k4 = jax.random.split(key, 4)

    N, C_IN, H, W = 4, 40, 32, 32
    C_OUT = int(0.1 * C_IN)  # compression_factor=0.1 -> 4

    x = jax.random.normal(k1, (N, C_IN, H, W), dtype=jnp.float32)
    # BatchNorm affine params (PyTorch default weight=1, bias=0; perturbed deterministically)
    gamma = 1.0 + 0.1 * jax.random.normal(k2, (C_IN,), dtype=jnp.float32)
    beta = 0.1 * jax.random.normal(k3, (C_IN,), dtype=jnp.float32)
    # kaiming_normal_ on Conv2d weight (C_out, C_in, 1, 1): std = sqrt(2 / fan_in)
    conv_w = jax.random.normal(k4, (C_IN, C_OUT), dtype=jnp.float32) * jnp.sqrt(2.0 / C_IN)

    ref = _reference(x, gamma, beta, conv_w)

    # Path A (single-pass, VMEM-resident) -- selected automatically for this shape.
    fn = jax.jit(densenet_transition_down)
    out = jax.block_until_ready(fn(x, gamma, beta, conv_w))
    assert out.shape == (N, C_OUT, H // 2, W // 2), out.shape
    assert jnp.allclose(out, ref, rtol=1e-4, atol=1e-4), float(jnp.max(jnp.abs(out - ref)))

    # Path B (tiled two-phase) -- exercised explicitly so the large-tensor path stays healthy.
    fn_tiled = jax.jit(functools.partial(densenet_transition_down,
                                         force_tiled=True, tile_rows=256))
    out_t = jax.block_until_ready(fn_tiled(x, gamma, beta, conv_w))
    assert jnp.allclose(out_t, ref, rtol=1e-4, atol=1e-4), float(jnp.max(jnp.abs(out_t - ref)))

    print("KERNEL_OK")
</pallas_src>

<mosaic_0001>
module attributes {stable_mosaic.version = 11 : i64} {
  func.func @_fused_single_pass_kernel(%arg0: i32, %arg1: memref<1x40xf32, #tpu.memory_space<vmem>>, %arg2: memref<1x40xf32, #tpu.memory_space<vmem>>, %arg3: memref<40x4xf32, #tpu.memory_space<vmem>>, %arg4: memref<4x1024x40xf32, #tpu.memory_space<vmem>>, %arg5: memref<1024x4xf32, #tpu.memory_space<vmem>>) attributes {dimension_semantics = [#tpu.dimension_semantics<arbitrary>], iteration_bounds = array<i64: 1>, scalar_prefetch = 0 : i64, scratch_operands = 0 : i64, tpu.core_type = #tpu.core_type<tc>, window_params = [{pipeline_mode = #tpu.pipeline_mode<synchronous>, transform_indices = @transform_0, window_bounds = array<i64: 1, 40>}, {pipeline_mode = #tpu.pipeline_mode<synchronous>, transform_indices = @transform_1, window_bounds = array<i64: 1, 40>}, {pipeline_mode = #tpu.pipeline_mode<synchronous>, transform_indices = @transform_2, window_bounds = array<i64: 40, 4>}, {pipeline_mode = #tpu.pipeline_mode<synchronous>, transform_indices = @transform_3, window_bounds = array<i64: 4, 1024, 40>}, {pipeline_mode = #tpu.pipeline_mode<synchronous>, transform_indices = @transform_4, window_bounds = array<i64: 1024, 4>}]} {
    %cst = arith.constant 1.000000e+00 : f32
    %0 = vector.broadcast %cst : f32 to vector<1x1024xf32>
    %cst_0 = arith.constant 0.000000e+00 : f32
    %1 = vector.broadcast %cst_0 : f32 to vector<1x40xf32>
    %cst_1 = arith.constant 0.000000e+00 : f32
    %2 = vector.broadcast %cst_1 : f32 to vector<1x40xf32>
    %c0 = arith.constant 0 : index
    %c0_2 = arith.constant 0 : index
    %c0_3 = arith.constant 0 : index
    %3 = vector.load %arg4[%c0, %c0_2, %c0_3] : memref<4x1024x40xf32, #tpu.memory_space<vmem>>, vector<1x1024x40xf32>
    %4 = vector.shape_cast %3 : vector<1x1024x40xf32> to vector<1024x40xf32>
    %cst_4 = arith.constant dense<0.000000e+00> : vector<1x40xf32>
    %5 = tpu.matmul %0, %4, %cst_4 {dimension_numbers = #tpu.dot_dimension_numbers<[1], [0], [0], [1], [0, 0, 1, 1], [], []>} : vector<1x1024xf32>, vector<1024x40xf32>, vector<1x40xf32> -> vector<1x40xf32>
    %6 = arith.addf %1, %5 : vector<1x40xf32>
    %7 = arith.mulf %4, %4 : vector<1024x40xf32>
    %cst_5 = arith.constant dense<0.000000e+00> : vector<1x40xf32>
    %8 = tpu.matmul %0, %7, %cst_5 {dimension_numbers = #tpu.dot_dimension_numbers<[1], [0], [0], [1], [0, 0, 1, 1], [], []>} : vector<1x1024xf32>, vector<1024x40xf32>, vector<1x40xf32> -> vector<1x40xf32>
    %9 = arith.addf %2, %8 : vector<1x40xf32>
    %c1 = arith.constant 1 : index
    %c0_6 = arith.constant 0 : index
    %c0_7 = arith.constant 0 : index
    %10 = vector.load %arg4[%c1, %c0_6, %c0_7] : memref<4x1024x40xf32, #tpu.memory_space<vmem>>, vector<1x1024x40xf32>
    %11 = vector.shape_cast %10 : vector<1x1024x40xf32> to vector<1024x40xf32>
    %cst_8 = arith.constant dense<0.000000e+00> : vector<1x40xf32>
    %12 = tpu.matmul %0, %11, %cst_8 {dimension_numbers = #tpu.dot_dimension_numbers<[1], [0], [0], [1], [0, 0, 1, 1], [], []>} : vector<1x1024xf32>, vector<1024x40xf32>, vector<1x40xf32> -> vector<1x40xf32>
    %13 = arith.addf %6, %12 : vector<1x40xf32>
    %14 = arith.mulf %11, %11 : vector<1024x40xf32>
    %cst_9 = arith.constant dense<0.000000e+00> : vector<1x40xf32>
    %15 = tpu.matmul %0, %14, %cst_9 {dimension_numbers = #tpu.dot_dimension_numbers<[1], [0], [0], [1], [0, 0, 1, 1], [], []>} : vector<1x1024xf32>, vector<1024x40xf32>, vector<1x40xf32> -> vector<1x40xf32>
    %16 = arith.addf %9, %15 : vector<1x40xf32>
    %c2 = arith.constant 2 : index
    %c0_10 = arith.constant 0 : index
    %c0_11 = arith.constant 0 : index
    %17 = vector.load %arg4[%c2, %c0_10, %c0_11] : memref<4x1024x40xf32, #tpu.memory_space<vmem>>, vector<1x1024x40xf32>
    %18 = vector.shape_cast %17 : vector<1x1024x40xf32> to vector<1024x40xf32>
    %cst_12 = arith.constant dense<0.000000e+00> : vector<1x40xf32>
    %19 = tpu.matmul %0, %18, %cst_12 {dimension_numbers = #tpu.dot_dimension_numbers<[1], [0], [0], [1], [0, 0, 1, 1], [], []>} : vector<1x1024xf32>, vector<1024x40xf32>, vector<1x40xf32> -> vector<1x40xf32>
    %20 = arith.addf %13, %19 : vector<1x40xf32>
    %21 = arith.mulf %18, %18 : vector<1024x40xf32>
    %cst_13 = arith.constant dense<0.000000e+00> : vector<1x40xf32>
    %22 = tpu.matmul %0, %21, %cst_13 {dimension_numbers = #tpu.dot_dimension_numbers<[1], [0], [0], [1], [0, 0, 1, 1], [], []>} : vector<1x1024xf32>, vector<1024x40xf32>, vector<1x40xf32> -> vector<1x40xf32>
    %23 = arith.addf %16, %22 : vector<1x40xf32>
    %c3 = arith.constant 3 : index
    %c0_14 = arith.constant 0 : index
    %c0_15 = arith.constant 0 : index
    %24 = vector.load %arg4[%c3, %c0_14, %c0_15] : memref<4x1024x40xf32, #tpu.memory_space<vmem>>, vector<1x1024x40xf32>
    %25 = vector.shape_cast %24 : vector<1x1024x40xf32> to vector<1024x40xf32>
    %cst_16 = arith.constant dense<0.000000e+00> : vector<1x40xf32>
    %26 = tpu.matmul %0, %25, %cst_16 {dimension_numbers = #tpu.dot_dimension_numbers<[1], [0], [0], [1], [0, 0, 1, 1], [], []>} : vector<1x1024xf32>, vector<1024x40xf32>, vector<1x40xf32> -> vector<1x40xf32>
    %27 = arith.addf %20, %26 : vector<1x40xf32>
    %28 = arith.mulf %25, %25 : vector<1024x40xf32>
    %cst_17 = arith.constant dense<0.000000e+00> : vector<1x40xf32>
    %29 = tpu.matmul %0, %28, %cst_17 {dimension_numbers = #tpu.dot_dimension_numbers<[1], [0], [0], [1], [0, 0, 1, 1], [], []>} : vector<1x1024xf32>, vector<1024x40xf32>, vector<1x40xf32> -> vector<1x40xf32>
    %30 = arith.addf %23, %29 : vector<1x40xf32>
    %cst_18 = arith.constant 2.44140625E-4 : f32
    %31 = vector.broadcast %cst_18 : f32 to vector<1x40xf32>
    %32 = arith.mulf %27, %31 : vector<1x40xf32>
    %cst_19 = arith.constant 2.44140625E-4 : f32
    %33 = vector.broadcast %cst_19 : f32 to vector<1x40xf32>
    %34 = arith.mulf %30, %33 : vector<1x40xf32>
    %35 = arith.mulf %32, %32 : vector<1x40xf32>
    %36 = arith.subf %34, %35 : vector<1x40xf32>
    %c0_20 = arith.constant 0 : index
    %c0_21 = arith.constant 0 : index
    %37 = vector.load %arg1[%c0_20, %c0_21] : memref<1x40xf32, #tpu.memory_space<vmem>>, vector<1x40xf32>
    %cst_22 = arith.constant 9.99999974E-6 : f32
    %38 = vector.broadcast %cst_22 : f32 to vector<1x40xf32>
    %39 = arith.addf %36, %38 : vector<1x40xf32>
    %40 = math.rsqrt %39 : vector<1x40xf32>
    %41 = arith.mulf %37, %40 : vector<1x40xf32>
    %c0_23 = arith.constant 0 : index
    %c0_24 = arith.constant 0 : index
    %42 = vector.load %arg2[%c0_23, %c0_24] : memref<1x40xf32, #tpu.memory_space<vmem>>, vector<1x40xf32>
    %43 = arith.mulf %32, %41 : vector<1x40xf32>
    %44 = arith.subf %42, %43 : vector<1x40xf32>
    %c0_25 = arith.constant 0 : index
    %c0_26 = arith.constant 0 : index
    %c0_27 = arith.constant 0 : index
    %45 = vector.load %arg4[%c0_25, %c0_26, %c0_27] : memref<4x1024x40xf32, #tpu.memory_space<vmem>>, vector<1x1024x40xf32>
    %46 = vector.shape_cast %45 : vector<1x1024x40xf32> to vector<1024x40xf32>
    %47 = vector.broadcast %41 : vector<1x40xf32> to vector<1024x40xf32>
    %48 = arith.mulf %46, %47 : vector<1024x40xf32>
    %49 = vector.broadcast %44 : vector<1x40xf32> to vector<1024x40xf32>
    %50 = arith.addf %48, %49 : vector<1024x40xf32>
    %cst_28 = arith.constant 0.000000e+00 : f32
    %51 = vector.broadcast %cst_28 : f32 to vector<1024x40xf32>
    %52 = arith.maximumf %50, %51 : vector<1024x40xf32>
    %c1_29 = arith.constant 1 : index
    %c0_30 = arith.constant 0 : index
    %c0_31 = arith.constant 0 : index
    %53 = vector.load %arg4[%c1_29, %c0_30, %c0_31] : memref<4x1024x40xf32, #tpu.memory_space<vmem>>, vector<1x1024x40xf32>
    %54 = vector.shape_cast %53 : vector<1x1024x40xf32> to vector<1024x40xf32>
    %55 = vector.broadcast %41 : vector<1x40xf32> to vector<1024x40xf32>
    %56 = arith.mulf %54, %55 : vector<1024x40xf32>
    %57 = vector.broadcast %44 : vector<1x40xf32> to vector<1024x40xf32>
    %58 = arith.addf %56, %57 : vector<1024x40xf32>
    %cst_32 = arith.constant 0.000000e+00 : f32
    %59 = vector.broadcast %cst_32 : f32 to vector<1024x40xf32>
    %60 = arith.maximumf %58, %59 : vector<1024x40xf32>
    %61 = arith.addf %52, %60 : vector<1024x40xf32>
    %c2_33 = arith.constant 2 : index
    %c0_34 = arith.constant 0 : index
    %c0_35 = arith.constant 0 : index
    %62 = vector.load %arg4[%c2_33, %c0_34, %c0_35] : memref<4x1024x40xf32, #tpu.memory_space<vmem>>, vector<1x1024x40xf32>
    %63 = vector.shape_cast %62 : vector<1x1024x40xf32> to vector<1024x40xf32>
    %64 = vector.broadcast %41 : vector<1x40xf32> to vector<1024x40xf32>
    %65 = arith.mulf %63, %64 : vector<1024x40xf32>
    %66 = vector.broadcast %44 : vector<1x40xf32> to vector<1024x40xf32>
    %67 = arith.addf %65, %66 : vector<1024x40xf32>
    %cst_36 = arith.constant 0.000000e+00 : f32
    %68 = vector.broadcast %cst_36 : f32 to vector<1024x40xf32>
    %69 = arith.maximumf %67, %68 : vector<1024x40xf32>
    %70 = arith.addf %61, %69 : vector<1024x40xf32>
    %c3_37 = arith.constant 3 : index
    %c0_38 = arith.constant 0 : index
    %c0_39 = arith.constant 0 : index
    %71 = vector.load %arg4[%c3_37, %c0_38, %c0_39] : memref<4x1024x40xf32, #tpu.memory_space<vmem>>, vector<1x1024x40xf32>
    %72 = vector.shape_cast %71 : vector<1x1024x40xf32> to vector<1024x40xf32>
    %73 = vector.broadcast %41 : vector<1x40xf32> to vector<1024x40xf32>
    %74 = arith.mulf %72, %73 : vector<1024x40xf32>
    %75 = vector.broadcast %44 : vector<1x40xf32> to vector<1024x40xf32>
    %76 = arith.addf %74, %75 : vector<1024x40xf32>
    %cst_40 = arith.constant 0.000000e+00 : f32
    %77 = vector.broadcast %cst_40 : f32 to vector<1024x40xf32>
    %78 = arith.maximumf %76, %77 : vector<1024x40xf32>
    %79 = arith.addf %70, %78 : vector<1024x40xf32>
    %c0_41 = arith.constant 0 : index
    %c0_42 = arith.constant 0 : index
    %80 = vector.load %arg3[%c0_41, %c0_42] : memref<40x4xf32, #tpu.memory_space<vmem>>, vector<40x4xf32>
    %cst_43 = arith.constant dense<0.000000e+00> : vector<1024x4xf32>
    %81 = tpu.matmul %79, %80, %cst_43 {dimension_numbers = #tpu.dot_dimension_numbers<[1], [0], [0], [1], [0, 0, 1, 1], [], []>} : vector<1024x40xf32>, vector<40x4xf32>, vector<1024x4xf32> -> vector<1024x4xf32>
    %c0_44 = arith.constant 0 : index
    %c0_45 = arith.constant 0 : index
    %82 = vector.load %arg5[%c0_44, %c0_45] : memref<1024x4xf32, #tpu.memory_space<vmem>>, vector<1024x4xf32>
    tpu.vector_store %arg5[%c0_44, %c0_45], %81 {strides = array<i32>} : memref<1024x4xf32, #tpu.memory_space<vmem>>, vector<1024x4xf32>,
    return
  }
  func.func @transform_0(%arg0: i32) -> (i32, i32) {
    %c0_i32 = arith.constant 0 : i32
    %c0_i32_0 = arith.constant 0 : i32
    %c0_i32_1 = arith.constant 0 : i32
    return %c0_i32, %c0_i32_0 : i32, i32
  }
  func.func @transform_1(%arg0: i32) -> (i32, i32) {
    %c0_i32 = arith.constant 0 : i32
    %c0_i32_0 = arith.constant 0 : i32
    %c0_i32_1 = arith.constant 0 : i32
    return %c0_i32, %c0_i32_0 : i32, i32
  }
  func.func @transform_2(%arg0: i32) -> (i32, i32) {
    %c0_i32 = arith.constant 0 : i32
    %c0_i32_0 = arith.constant 0 : i32
    %c0_i32_1 = arith.constant 0 : i32
    return %c0_i32, %c0_i32_0 : i32, i32
  }
  func.func @transform_3(%arg0: i32) -> (i32, i32, i32) {
    %c0_i32 = arith.constant 0 : i32
    %c0_i32_0 = arith.constant 0 : i32
    %c0_i32_1 = arith.constant 0 : i32
    %c0_i32_2 = arith.constant 0 : i32
    return %c0_i32, %c0_i32_0, %c0_i32_1 : i32, i32, i32
  }
  func.func @transform_4(%arg0: i32) -> (i32, i32) {
    %c0_i32 = arith.constant 0 : i32
    %c0_i32_0 = arith.constant 0 : i32
    %c0_i32_1 = arith.constant 0 : i32
    return %c0_i32, %c0_i32_0 : i32, i32
  }
}

</mosaic_0001>

<bundles_post_ra>
// kernel: densenet_transition_down.1
= control target key start
LH: loop header
LB: loop body
LE: loop exit
PB: predicated region body
PF: predicated region fallthrough
CT: control target
= control target key end

     0   :  { %v19685_v3 = vmov 1.0   ;;  %vm5236_vm0 = vcmask 326656   ;;  %vm6326_vm1 = vcmask 31744   ;;  %s19680_s3 = inlined_call_operand.vmem [shape: f32[4,1024,40], index: 3, kind: input, shape index: {}]   ;;  %s19681_s0 = inlined_call_operand.vmem [shape: f32[1,40], index: 0, kind: input, shape index: {}]   ;;  %s19682_s1 = inlined_call_operand.vmem [shape: f32[1,40], index: 1, kind: input, shape index: {}]   ;;  %s19683_s2 = inlined_call_operand.vmem [shape: f32[40,4], index: 2, kind: input, shape index: {}]   ;;  %s19684_s4 = inlined_call_operand.vmem [shape: f32[1024,4], index: 4, kind: output, shape index: {}]  }
   0x1   :  { %v10261_v0 = vld [vmem:[%s19680_s3 + $0x480] sm:$0xff]  ;;  %v10266_v1 = vld [vmem:[%s19680_s3 + $0x488] sm:$0xff]  ;;  %466 = vmatprep.mubr.f32.mxu0 %v19685_v3  ;;  %536 = vmatprep.mubr.f32.mxu1 %v19685_v3  ;;  %v6477_v12 = vld [vmem:[%s19680_s3 + $0x490] sm:$0xff] }
   0x2   :  { %v6507_v2 = vld [vmem:[%s19680_s3 + $0x580] sm:$0xff]  ;;  %v8426_v4 = vpack.c.bf16 %v10266_v1, %v10261_v0  ;;  %v10278_v5 = vld [vmem:[%s19680_s3 + $0x588] sm:$0xff]  ;;  %v6478_v14 = vld [vmem:[%s19680_s3 + $0x498] sm:$0xff] }
   0x3   :  { %v6459_v6 = vld [vmem:[%s19680_s3 + $0x400] sm:$0xff]  ;;  %v6460_v7 = vld [vmem:[%s19680_s3 + $0x408] sm:$0xff]  ;;  %v8458_v8 = vpack.c.bf16 %v10278_v5, %v6507_v2  ;;  %v6509_v15 = vld [vmem:[%s19680_s3 + $0x590] sm:$0xff]  ;;  %v8430_v17 = vpack.c.bf16 %v6478_v14, %v6477_v12 }
   0x4   :  { %v8428_v9 = vpack.c.bf16 %v6460_v7, %v6459_v6  ;;  %v6491_v10 = vld [vmem:[%s19680_s3 + $0x500] sm:$0xff]  ;;  %v6492_v11 = vld [vmem:[%s19680_s3 + $0x508] sm:$0xff]  ;;  %8427 = vmatprep.subr.bf16.mxu0 %v8426_v4  ;;  %v6510_v16 = vld [vmem:[%s19680_s3 + $0x598] sm:$0xff] }
   0x5   :  { %v8460_v13 = vpack.c.bf16 %v6492_v11, %v6491_v10  ;;  %8459 = vmatprep.subr.bf16.mxu1 %v8458_v8  ;;  %v8462_v18 = vpack.c.bf16 %v6510_v16, %v6509_v15  ;;  %v6461_v19 = vld [vmem:[%s19680_s3 + $0x410] sm:$0xff]  ;;  %v6462_v20 = vld [vmem:[%s19680_s3 + $0x418] sm:$0xff]  ;;  %v6479_v24 = vld [vmem:[%s19680_s3 + $0x4a0] sm:$0xff] }
   0x6   :  { %8429 = vmatpush3.bf16.msra.mxu0 %v8428_v9  ;;  %v6493_v21 = vld [vmem:[%s19680_s3 + $0x510] sm:$0xff]  ;;  %v8432_v22 = vpack.c.bf16 %v6462_v20, %v6461_v19  ;;  %v6494_v23 = vld [vmem:[%s19680_s3 + $0x518] sm:$0xff]  ;;  %v6480_v25 = vld [vmem:[%s19680_s3 + $0x4a8] sm:$0xff] }
   0x7   :  { %8461 = vmatpush3.bf16.msra.mxu1 %v8460_v13  ;;  %8431 = vmatprep.subr.bf16.mxu0 %v8430_v17  ;;  %v8464_v26 = vpack.c.bf16 %v6494_v23, %v6493_v21  ;;  %v8434_v27 = vpack.c.bf16 %v6480_v25, %v6479_v24  ;;  %v6511_v28 = vld [vmem:[%s19680_s3 + $0x5a0] sm:$0xff]  ;;  %v6512_v29 = vld [vmem:[%s19680_s3 + $0x5a8] sm:$0xff]  ;;  %v6481_v36 = vld [vmem:[%s19680_s3 + $0x4b0] sm:$0xff] }
   0x8   :  { %8463 = vmatprep.subr.bf16.mxu1 %v8462_v18  ;;  %v6463_v30 = vld [vmem:[%s19680_s3 + $0x420] sm:$0xff]  ;;  %v8466_v31 = vpack.c.bf16 %v6512_v29, %v6511_v28  ;;  %v6464_v32 = vld [vmem:[%s19680_s3 + $0x428] sm:$0xff]  ;;  %v6482_v37 = vld [vmem:[%s19680_s3 + $0x4b8] sm:$0xff] }
   0x9   :  { %v6495_v33 = vld [vmem:[%s19680_s3 + $0x520] sm:$0xff]  ;;  %v6496_v34 = vld [vmem:[%s19680_s3 + $0x528] sm:$0xff]  ;;  %v8436_v35 = vpack.c.bf16 %v6464_v32, %v6463_v30  ;;  %v6513_v38 = vld [vmem:[%s19680_s3 + $0x5b0] sm:$0xff]  ;;  %v8438_v40 = vpack.c.bf16 %v6482_v37, %v6481_v36 }
   0xa   :  { %8433 = vmatpush3.bf16.msra.mxu0 %v8432_v22  ;;  %v8468_v39 = vpack.c.bf16 %v6496_v34, %v6495_v33  ;;  %v6514_v41 = vld [vmem:[%s19680_s3 + $0x5b8] sm:$0xff]  ;;  %v6465_v42 = vld [vmem:[%s19680_s3 + $0x430] sm:$0xff]  ;;  %v6483_v47 = vld [vmem:[%s19680_s3 + $0x4c0] sm:$0xff] }
   0xb   :  { %8465 = vmatpush3.bf16.msra.mxu1 %v8464_v26  ;;  %8435 = vmatprep.subr.bf16.mxu0 %v8434_v27  ;;  %v6466_v43 = vld [vmem:[%s19680_s3 + $0x438] sm:$0xff]  ;;  %v8470_v44 = vpack.c.bf16 %v6514_v41, %v6513_v38  ;;  %v6497_v45 = vld [vmem:[%s19680_s3 + $0x530] sm:$0xff]  ;;  %v6484_v48 = vld [vmem:[%s19680_s3 + $0x4c8] sm:$0xff] }
   0xc   :  { %8467 = vmatprep.subr.bf16.mxu1 %v8466_v31  ;;  %v6498_v46 = vld [vmem:[%s19680_s3 + $0x538] sm:$0xff]  ;;  %v6515_v49 = vld [vmem:[%s19680_s3 + $0x5c0] sm:$0xff]  ;;  %v6516_v50 = vld [vmem:[%s19680_s3 + $0x5c8] sm:$0xff]  ;;  %v8440_v51 = vpack.c.bf16 %v6466_v43, %v6465_v42  ;;  %v8442_v53 = vpack.c.bf16 %v6484_v48, %v6483_v47 }
   0xd   :  { %v8472_v52 = vpack.c.bf16 %v6498_v46, %v6497_v45  ;;  %v6467_v54 = vld [vmem:[%s19680_s3 + $0x440] sm:$0xff]  ;;  %v6468_v55 = vld [vmem:[%s19680_s3 + $0x448] sm:$0xff]  ;;  %v8474_v57 = vpack.c.bf16 %v6516_v50, %v6515_v49  ;;  %v6485_v59 = vld [vmem:[%s19680_s3 + $0x4d0] sm:$0xff] }
   0xe   :  { %8437 = vmatpush3.bf16.msra.mxu0 %v8436_v35  ;;  %v6499_v56 = vld [vmem:[%s19680_s3 + $0x540] sm:$0xff]  ;;  %v6500_v58 = vld [vmem:[%s19680_s3 + $0x548] sm:$0xff]  ;;  %v6486_v60 = vld [vmem:[%s19680_s3 + $0x4d8] sm:$0xff]  ;;  %v8444_v63 = vpack.c.bf16 %v6468_v55, %v6467_v54 }
   0xf   :  { %8469 = vmatpush3.bf16.msra.mxu1 %v8468_v39  ;;  %8439 = vmatprep.subr.bf16.mxu0 %v8438_v40  ;;  %v6517_v61 = vld [vmem:[%s19680_s3 + $0x5d0] sm:$0xff]  ;;  %v6518_v62 = vld [vmem:[%s19680_s3 + $0x5d8] sm:$0xff]  ;;  %v8476_v2 = vpack.c.bf16 %v6500_v58, %v6499_v56  ;;  %v8446_v4 = vpack.c.bf16 %v6486_v60, %v6485_v59  ;;  %v6487_v11 = vld [vmem:[%s19680_s3 + $0x4e0] sm:$0xff] }
  0x10   :  { %8471 = vmatprep.subr.bf16.mxu1 %v8470_v44  ;;  %v6469_v6 = vld [vmem:[%s19680_s3 + $0x450] sm:$0xff]  ;;  %v6470_v7 = vld [vmem:[%s19680_s3 + $0x458] sm:$0xff]  ;;  %v8478_v9 = vpack.c.bf16 %v6518_v62, %v6517_v61  ;;  %v6488_v12 = vld [vmem:[%s19680_s3 + $0x4e8] sm:$0xff] }
  0x11   :  { %v6501_v8 = vld [vmem:[%s19680_s3 + $0x550] sm:$0xff]  ;;  %v6502_v10 = vld [vmem:[%s19680_s3 + $0x558] sm:$0xff]  ;;  %v6519_v13 = vld [vmem:[%s19680_s3 + $0x5e0] sm:$0xff]  ;;  %v8448_v15 = vpack.c.bf16 %v6470_v7, %v6469_v6  ;;  %v8450_v17 = vpack.c.bf16 %v6488_v12, %v6487_v11 }
  0x12   :  { %8441 = vmatpush3.bf16.msra.mxu0 %v8440_v51  ;;  %v6520_v14 = vld [vmem:[%s19680_s3 + $0x5e8] sm:$0xff]  ;;  %v8480_v16 = vpack.c.bf16 %v6502_v10, %v6501_v8  ;;  %v6471_v18 = vld [vmem:[%s19680_s3 + $0x460] sm:$0xff]  ;;  %v6489_v23 = vld [vmem:[%s19680_s3 + $0x4f0] sm:$0xff] }
  0x13   :  { %8473 = vmatpush3.bf16.msra.mxu1 %v8472_v52  ;;  %8443 = vmatprep.subr.bf16.mxu0 %v8442_v53  ;;  %v6472_v19 = vld [vmem:[%s19680_s3 + $0x468] sm:$0xff]  ;;  %v6503_v20 = vld [vmem:[%s19680_s3 + $0x560] sm:$0xff]  ;;  %v8482_v21 = vpack.c.bf16 %v6520_v14, %v6519_v13  ;;  %v6490_v24 = vld [vmem:[%s19680_s3 + $0x4f8] sm:$0xff] }
  0x14   :  { %8475 = vmatprep.subr.bf16.mxu1 %v8474_v57  ;;  %v6504_v22 = vld [vmem:[%s19680_s3 + $0x568] sm:$0xff]  ;;  %v6521_v25 = vld [vmem:[%s19680_s3 + $0x5f0] sm:$0xff]  ;;  %v6522_v26 = vld [vmem:[%s19680_s3 + $0x5f8] sm:$0xff]  ;;  %v8452_v27 = vpack.c.bf16 %v6472_v19, %v6471_v18  ;;  %v8454_v29 = vpack.c.bf16 %v6490_v24, %v6489_v23 }
  0x15   :  { %v8484_v28 = vpack.c.bf16 %v6504_v22, %v6503_v20  ;;  %v6473_v30 = vld [vmem:[%s19680_s3 + $0x470] sm:$0xff]  ;;  %v6474_v31 = vld [vmem:[%s19680_s3 + $0x478] sm:$0xff]  ;;  %v8486_v33 = vpack.c.bf16 %v6522_v26, %v6521_v25  ;;  %v6539_v35 = vld [vmem:[%s19680_s3 + $0x680] sm:$0xff] }
  0x16   :  { %8445 = vmatpush3.bf16.msra.mxu0 %v8444_v63  ;;  %v6505_v32 = vld [vmem:[%s19680_s3 + $0x570] sm:$0xff]  ;;  %v6506_v34 = vld [vmem:[%s19680_s3 + $0x578] sm:$0xff]  ;;  %v6540_v36 = vld [vmem:[%s19680_s3 + $0x688] sm:$0xff]  ;;  %v8456_v39 = vpack.c.bf16 %v6474_v31, %v6473_v30 }
  0x17   :  { %8477 = vmatpush3.bf16.msra.mxu1 %v8476_v2  ;;  %8447 = vmatprep.subr.bf16.mxu0 %v8446_v4  ;;  %v6571_v37 = vld [vmem:[%s19680_s3 + $0x780] sm:$0xff]  ;;  %v6572_v38 = vld [vmem:[%s19680_s3 + $0x788] sm:$0xff]  ;;  %v8488_v40 = vpack.c.bf16 %v6506_v34, %v6505_v32  ;;  %v8490_v41 = vpack.c.bf16 %v6540_v36, %v6539_v35  ;;  %v6541_v47 = vld [vmem:[%s19680_s3 + $0x690] sm:$0xff] }
  0x18   :  { %8479 = vmatprep.subr.bf16.mxu1 %v8478_v9  ;;  %v6523_v42 = vld [vmem:[%s19680_s3 + $0x600] sm:$0xff]  ;;  %v6524_v43 = vld [vmem:[%s19680_s3 + $0x608] sm:$0xff]  ;;  %v8522_v45 = vpack.c.bf16 %v6572_v38, %v6571_v37  ;;  %v6542_v48 = vld [vmem:[%s19680_s3 + $0x698] sm:$0xff] }
  0x19   :  { %v6555_v44 = vld [vmem:[%s19680_s3 + $0x700] sm:$0xff]  ;;  %v6556_v46 = vld [vmem:[%s19680_s3 + $0x708] sm:$0xff]  ;;  %v6573_v49 = vld [vmem:[%s19680_s3 + $0x790] sm:$0xff]  ;;  %v8492_v51 = vpack.c.bf16 %v6524_v43, %v6523_v42  ;;  %v8494_v53 = vpack.c.bf16 %v6542_v48, %v6541_v47 }
  0x1a   :  { %8449 = vmatpush3.bf16.msra.mxu0 %v8448_v15  ;;  %v6574_v50 = vld [vmem:[%s19680_s3 + $0x798] sm:$0xff]  ;;  %v8524_v52 = vpack.c.bf16 %v6556_v46, %v6555_v44  ;;  %v6525_v54 = vld [vmem:[%s19680_s3 + $0x610] sm:$0xff]  ;;  %v6543_v59 = vld [vmem:[%s19680_s3 + $0x6a0] sm:$0xff] }
  0x1b   :  { %8481 = vmatpush3.bf16.msra.mxu1 %v8480_v16  ;;  %8451 = vmatprep.subr.bf16.mxu0 %v8450_v17  ;;  %v6526_v55 = vld [vmem:[%s19680_s3 + $0x618] sm:$0xff]  ;;  %v6557_v56 = vld [vmem:[%s19680_s3 + $0x710] sm:$0xff]  ;;  %v8526_v57 = vpack.c.bf16 %v6574_v50, %v6573_v49  ;;  %v6544_v60 = vld [vmem:[%s19680_s3 + $0x6a8] sm:$0xff] }
  0x1c   :  { %8483 = vmatprep.subr.bf16.mxu1 %v8482_v21  ;;  %v6558_v58 = vld [vmem:[%s19680_s3 + $0x718] sm:$0xff]  ;;  %v6575_v61 = vld [vmem:[%s19680_s3 + $0x7a0] sm:$0xff]  ;;  %v6576_v62 = vld [vmem:[%s19680_s3 + $0x7a8] sm:$0xff]  ;;  %v8496_v63 = vpack.c.bf16 %v6526_v55, %v6525_v54  ;;  %v8498_v4 = vpack.c.bf16 %v6544_v60, %v6543_v59 }
  0x1d   :  { %v8528_v2 = vpack.c.bf16 %v6558_v58, %v6557_v56  ;;  %v6527_v6 = vld [vmem:[%s19680_s3 + $0x620] sm:$0xff]  ;;  %v6528_v7 = vld [vmem:[%s19680_s3 + $0x628] sm:$0xff]  ;;  %v8530_v9 = vpack.c.bf16 %v6576_v62, %v6575_v61  ;;  %v6545_v11 = vld [vmem:[%s19680_s3 + $0x6b0] sm:$0xff] }
  0x1e   :  { %8453 = vmatpush3.bf16.msra.mxu0 %v8452_v27  ;;  %v6559_v8 = vld [vmem:[%s19680_s3 + $0x720] sm:$0xff]  ;;  %v6560_v10 = vld [vmem:[%s19680_s3 + $0x728] sm:$0xff]  ;;  %v6546_v12 = vld [vmem:[%s19680_s3 + $0x6b8] sm:$0xff]  ;;  %v8500_v15 = vpack.c.bf16 %v6528_v7, %v6527_v6 }
  0x1f   :  { %8485 = vmatpush3.bf16.msra.mxu1 %v8484_v28  ;;  %8455 = vmatprep.subr.bf16.mxu0 %v8454_v29  ;;  %v6577_v13 = vld [vmem:[%s19680_s3 + $0x7b0] sm:$0xff]  ;;  %v6578_v14 = vld [vmem:[%s19680_s3 + $0x7b8] sm:$0xff]  ;;  %v8532_v16 = vpack.c.bf16 %v6560_v10, %v6559_v8  ;;  %v8502_v17 = vpack.c.bf16 %v6546_v12, %v6545_v11  ;;  %v6547_v23 = vld [vmem:[%s19680_s3 + $0x6c0] sm:$0xff] }
  0x20   :  { %8487 = vmatprep.subr.bf16.mxu1 %v8486_v33  ;;  %v6529_v18 = vld [vmem:[%s19680_s3 + $0x630] sm:$0xff]  ;;  %v6530_v19 = vld [vmem:[%s19680_s3 + $0x638] sm:$0xff]  ;;  %v8534_v21 = vpack.c.bf16 %v6578_v14, %v6577_v13  ;;  %v6548_v24 = vld [vmem:[%s19680_s3 + $0x6c8] sm:$0xff] }
  0x21   :  { %v6561_v20 = vld [vmem:[%s19680_s3 + $0x730] sm:$0xff]  ;;  %v6562_v22 = vld [vmem:[%s19680_s3 + $0x738] sm:$0xff]  ;;  %v6579_v25 = vld [vmem:[%s19680_s3 + $0x7c0] sm:$0xff]  ;;  %v8504_v27 = vpack.c.bf16 %v6530_v19, %v6529_v18  ;;  %v8506_v29 = vpack.c.bf16 %v6548_v24, %v6547_v23 }
  0x22   :  { %8457 = vmatpush3.bf16.msra.mxu0 %v8456_v39  ;;  %v6580_v26 = vld [vmem:[%s19680_s3 + $0x7c8] sm:$0xff]  ;;  %v8536_v28 = vpack.c.bf16 %v6562_v22, %v6561_v20  ;;  %v6531_v30 = vld [vmem:[%s19680_s3 + $0x640] sm:$0xff]  ;;  %v6549_v35 = vld [vmem:[%s19680_s3 + $0x6d0] sm:$0xff] }
  0x23   :  { %8489 = vmatpush3.bf16.msra.mxu1 %v8488_v40  ;;  %8491 = vmatprep.subr.bf16.mxu0 %v8490_v41  ;;  %v6532_v31 = vld [vmem:[%s19680_s3 + $0x648] sm:$0xff]  ;;  %v6563_v32 = vld [vmem:[%s19680_s3 + $0x740] sm:$0xff]  ;;  %v8538_v33 = vpack.c.bf16 %v6580_v26, %v6579_v25  ;;  %v6550_v36 = vld [vmem:[%s19680_s3 + $0x6d8] sm:$0xff] }
  0x24   :  { %8523 = vmatprep.subr.bf16.mxu1 %v8522_v45  ;;  %v6564_v34 = vld [vmem:[%s19680_s3 + $0x748] sm:$0xff]  ;;  %v6581_v37 = vld [vmem:[%s19680_s3 + $0x7d0] sm:$0xff]  ;;  %v6582_v38 = vld [vmem:[%s19680_s3 + $0x7d8] sm:$0xff]  ;;  %v8508_v39 = vpack.c.bf16 %v6532_v31, %v6531_v30  ;;  %v8510_v41 = vpack.c.bf16 %v6550_v36, %v6549_v35 }
  0x25   :  { %467 = vmatmul.mubr.f32.vlgmr.msra.gmra.mrb[0].mxu0 %v19685_v3  ;;  %v8540_v40 = vpack.c.bf16 %v6564_v34, %v6563_v32  ;;  %v6533_v42 = vld [vmem:[%s19680_s3 + $0x650] sm:$0xff]  ;;  %v6534_v43 = vld [vmem:[%s19680_s3 + $0x658] sm:$0xff]  ;;  %v8542_v45 = vpack.c.bf16 %v6582_v38, %v6581_v37  ;;  %v6551_v47 = vld [vmem:[%s19680_s3 + $0x6e0] sm:$0xff] }
  0x26   :  { %537 = vmatmul.mubr.f32.vlgmr.msra.gmra.mrb[0].mxu1 %v19685_v3  ;;  %8493 = vmatpush3.bf16.msra.mxu0 %v8492_v51  ;;  %v6565_v44 = vld [vmem:[%s19680_s3 + $0x750] sm:$0xff]  ;;  %v6566_v46 = vld [vmem:[%s19680_s3 + $0x758] sm:$0xff]  ;;  %v6552_v48 = vld [vmem:[%s19680_s3 + $0x6e8] sm:$0xff]  ;;  %v8512_v51 = vpack.c.bf16 %v6534_v43, %v6533_v42 }
  0x27   :  { %8525 = vmatpush3.bf16.msra.mxu1 %v8524_v52  ;;  %8495 = vmatprep.subr.bf16.mxu0 %v8494_v53  ;;  %v6583_v49 = vld [vmem:[%s19680_s3 + $0x7e0] sm:$0xff]  ;;  %v6584_v50 = vld [vmem:[%s19680_s3 + $0x7e8] sm:$0xff]  ;;  %v8544_v52 = vpack.c.bf16 %v6566_v46, %v6565_v44  ;;  %v8514_v53 = vpack.c.bf16 %v6552_v48, %v6551_v47  ;;  %v6553_v59 = vld [vmem:[%s19680_s3 + $0x6f0] sm:$0xff] }
  0x28   :  { %8527 = vmatprep.subr.bf16.mxu1 %v8526_v57  ;;  %606 = vmatprep.mubr.f32.mxu0 %v19685_v3  ;;  %v6535_v54 = vld [vmem:[%s19680_s3 + $0x660] sm:$0xff]  ;;  %v6536_v55 = vld [vmem:[%s19680_s3 + $0x668] sm:$0xff]  ;;  %v8546_v57 = vpack.c.bf16 %v6584_v50, %v6583_v49  ;;  %v6554_v60 = vld [vmem:[%s19680_s3 + $0x6f8] sm:$0xff] }
  0x29   :  { %676 = vmatprep.mubr.f32.mxu1 %v19685_v3  ;;  %v6567_v56 = vld [vmem:[%s19680_s3 + $0x760] sm:$0xff]  ;;  %v6568_v58 = vld [vmem:[%s19680_s3 + $0x768] sm:$0xff]  ;;  %v6585_v61 = vld [vmem:[%s19680_s3 + $0x7f0] sm:$0xff] }
  0x2a   :  { %8497 = vmatpush3.bf16.msra.mxu0 %v8496_v63  ;;  %v6586_v62 = vld [vmem:[%s19680_s3 + $0x7f8] sm:$0xff]  ;;  %v8516_v63 = vpack.c.bf16 %v6536_v55, %v6535_v54  ;;  %v6537_v6 = vld [vmem:[%s19680_s3 + $0x670] sm:$0xff]  ;;  %v33_v11 = vld [vmem:[%s19680_s3 + $0x80] sm:$0xff] }
  0x2b   :  { %8529 = vmatpush3.bf16.msra.mxu1 %v8528_v2  ;;  %8499 = vmatprep.subr.bf16.mxu0 %v8498_v4  ;;  %v8548_v2 = vpack.c.bf16 %v6568_v58, %v6567_v56  ;;  %v8518_v4 = vpack.c.bf16 %v6554_v60, %v6553_v59  ;;  %v6538_v7 = vld [vmem:[%s19680_s3 + $0x678] sm:$0xff]  ;;  %v6569_v8 = vld [vmem:[%s19680_s3 + $0x770] sm:$0xff]  ;;  %v34_v12 = vld [vmem:[%s19680_s3 + $0x88] sm:$0xff] }
  0x2c   :  { %8531 = vmatprep.subr.bf16.mxu1 %v8530_v9  ;;  %v8550_v9 = vpack.c.bf16 %v6586_v62, %v6585_v61  ;;  %v6570_v10 = vld [vmem:[%s19680_s3 + $0x778] sm:$0xff]  ;;  %v65_v13 = vld [vmem:[%s19680_s3 + $0x180] sm:$0xff]  ;;  %v66_v14 = vld [vmem:[%s19680_s3 + $0x188] sm:$0xff] }
  0x2d   :  { %v17_v18 = vld [vmem:[%s19680_s3] sm:$0xff]  ;;  %v18_v19 = vld [vmem:[%s19680_s3 + $0x8] sm:$0xff]  ;;  %v35_v23 = vld [vmem:[%s19680_s3 + $0x90] sm:$0xff] }
  0x2e   :  { %8501 = vmatpush3.bf16.msra.mxu0 %v8500_v15  ;;  %v8520_v15 = vpack.c.bf16 %v6538_v7, %v6537_v6  ;;  %v49_v20 = vld [vmem:[%s19680_s3 + $0x100] sm:$0xff]  ;;  %v50_v22 = vld [vmem:[%s19680_s3 + $0x108] sm:$0xff]  ;;  %v36_v24 = vld [vmem:[%s19680_s3 + $0x98] sm:$0xff] }
  0x2f   :  { %8533 = vmatpush3.bf16.msra.mxu1 %v8532_v16  ;;  %8503 = vmatprep.subr.bf16.mxu0 %v8502_v17  ;;  %v8552_v16 = vpack.c.bf16 %v6570_v10, %v6569_v8  ;;  %v8554_v17 = vpack.c.bf16 %v34_v12, %v33_v11  ;;  %v67_v25 = vld [vmem:[%s19680_s3 + $0x190] sm:$0xff]  ;;  %v68_v26 = vld [vmem:[%s19680_s3 + $0x198] sm:$0xff]  ;;  %v37_v35 = vld [vmem:[%s19680_s3 + $0xa0] sm:$0xff] }
  0x30   :  { %8535 = vmatprep.subr.bf16.mxu1 %v8534_v21  ;;  %v8586_v21 = vpack.c.bf16 %v66_v14, %v65_v13  ;;  %v19_v30 = vld [vmem:[%s19680_s3 + $0x10] sm:$0xff]  ;;  %v20_v31 = vld [vmem:[%s19680_s3 + $0x18] sm:$0xff]  ;;  %v38_v36 = vld [vmem:[%s19680_s3 + $0xa8] sm:$0xff] }
  0x31   :  { %v51_v32 = vld [vmem:[%s19680_s3 + $0x110] sm:$0xff]  ;;  %v52_v34 = vld [vmem:[%s19680_s3 + $0x118] sm:$0xff]  ;;  %v69_v37 = vld [vmem:[%s19680_s3 + $0x1a0] sm:$0xff] }
  0x32   :  { %8505 = vmatpush3.bf16.msra.mxu0 %v8504_v27  ;;  %v8556_v27 = vpack.c.bf16 %v18_v19, %v17_v18  ;;  %v70_v38 = vld [vmem:[%s19680_s3 + $0x1a8] sm:$0xff]  ;;  %v21_v42 = vld [vmem:[%s19680_s3 + $0x20] sm:$0xff]  ;;  %v39_v47 = vld [vmem:[%s19680_s3 + $0xb0] sm:$0xff] }
  0x33   :  { %8537 = vmatpush3.bf16.msra.mxu1 %v8536_v28  ;;  %8507 = vmatprep.subr.bf16.mxu0 %v8506_v29  ;;  %v8588_v28 = vpack.c.bf16 %v50_v22, %v49_v20  ;;  %v8558_v29 = vpack.c.bf16 %v36_v24, %v35_v23  ;;  %v22_v43 = vld [vmem:[%s19680_s3 + $0x28] sm:$0xff]  ;;  %v53_v44 = vld [vmem:[%s19680_s3 + $0x120] sm:$0xff]  ;;  %v40_v48 = vld [vmem:[%s19680_s3 + $0xb8] sm:$0xff] }
  0x34   :  { %8539 = vmatprep.subr.bf16.mxu1 %v8538_v33  ;;  %v8590_v33 = vpack.c.bf16 %v68_v26, %v67_v25  ;;  %v54_v46 = vld [vmem:[%s19680_s3 + $0x128] sm:$0xff]  ;;  %v71_v49 = vld [vmem:[%s19680_s3 + $0x1b0] sm:$0xff]  ;;  %v72_v50 = vld [vmem:[%s19680_s3 + $0x1b8] sm:$0xff] }
  0x35   :  { %v23_v54 = vld [vmem:[%s19680_s3 + $0x30] sm:$0xff]  ;;  %v24_v55 = vld [vmem:[%s19680_s3 + $0x38] sm:$0xff]  ;;  %v41_v59 = vld [vmem:[%s19680_s3 + $0xc0] sm:$0xff] }
  0x36   :  { %8509 = vmatpush3.bf16.msra.mxu0 %v8508_v39  ;;  %v8560_v39 = vpack.c.bf16 %v20_v31, %v19_v30  ;;  %v55_v56 = vld [vmem:[%s19680_s3 + $0x130] sm:$0xff]  ;;  %v56_v58 = vld [vmem:[%s19680_s3 + $0x138] sm:$0xff]  ;;  %v42_v60 = vld [vmem:[%s19680_s3 + $0xc8] sm:$0xff] }
  0x37   :  { %8541 = vmatpush3.bf16.msra.mxu1 %v8540_v40  ;;  %8511 = vmatprep.subr.bf16.mxu0 %v8510_v41  ;;  %v8592_v40 = vpack.c.bf16 %v52_v34, %v51_v32  ;;  %v8562_v41 = vpack.c.bf16 %v38_v36, %v37_v35  ;;  %v73_v61 = vld [vmem:[%s19680_s3 + $0x1c0] sm:$0xff]  ;;  %v74_v62 = vld [vmem:[%s19680_s3 + $0x1c8] sm:$0xff]  ;;  %v43_v11 = vld [vmem:[%s19680_s3 + $0xd0] sm:$0xff] }
  0x38   :  { %8543 = vmatprep.subr.bf16.mxu1 %v8542_v45  ;;  %v8594_v45 = vpack.c.bf16 %v70_v38, %v69_v37  ;;  %v25_v6 = vld [vmem:[%s19680_s3 + $0x40] sm:$0xff]  ;;  %v26_v7 = vld [vmem:[%s19680_s3 + $0x48] sm:$0xff]  ;;  %v44_v12 = vld [vmem:[%s19680_s3 + $0xd8] sm:$0xff] }
  0x39   :  { %v57_v8 = vld [vmem:[%s19680_s3 + $0x140] sm:$0xff]  ;;  %v58_v10 = vld [vmem:[%s19680_s3 + $0x148] sm:$0xff]  ;;  %v75_v13 = vld [vmem:[%s19680_s3 + $0x1d0] sm:$0xff] }
  0x3a   :  { %8513 = vmatpush3.bf16.msra.mxu0 %v8512_v51  ;;  %v8564_v51 = vpack.c.bf16 %v22_v43, %v21_v42  ;;  %v76_v14 = vld [vmem:[%s19680_s3 + $0x1d8] sm:$0xff]  ;;  %v27_v18 = vld [vmem:[%s19680_s3 + $0x50] sm:$0xff]  ;;  %v45_v23 = vld [vmem:[%s19680_s3 + $0xe0] sm:$0xff] }
  0x3b   :  { %8545 = vmatpush3.bf16.msra.mxu1 %v8544_v52  ;;  %8515 = vmatprep.subr.bf16.mxu0 %v8514_v53  ;;  %v8596_v52 = vpack.c.bf16 %v54_v46, %v53_v44  ;;  %v8566_v53 = vpack.c.bf16 %v40_v48, %v39_v47  ;;  %v28_v19 = vld [vmem:[%s19680_s3 + $0x58] sm:$0xff]  ;;  %v59_v20 = vld [vmem:[%s19680_s3 + $0x150] sm:$0xff]  ;;  %v46_v24 = vld [vmem:[%s19680_s3 + $0xe8] sm:$0xff] }
  0x3c   :  { %8547 = vmatprep.subr.bf16.mxu1 %v8546_v57  ;;  %v8598_v57 = vpack.c.bf16 %v72_v50, %v71_v49  ;;  %v60_v22 = vld [vmem:[%s19680_s3 + $0x158] sm:$0xff]  ;;  %v77_v25 = vld [vmem:[%s19680_s3 + $0x1e0] sm:$0xff]  ;;  %v78_v26 = vld [vmem:[%s19680_s3 + $0x1e8] sm:$0xff] }
  0x3d   :  { %v29_v30 = vld [vmem:[%s19680_s3 + $0x60] sm:$0xff]  ;;  %v30_v31 = vld [vmem:[%s19680_s3 + $0x68] sm:$0xff]  ;;  %v47_v35 = vld [vmem:[%s19680_s3 + $0xf0] sm:$0xff] }
  0x3e   :  { %8517 = vmatpush3.bf16.msra.mxu0 %v8516_v63  ;;  %v8568_v63 = vpack.c.bf16 %v24_v55, %v23_v54  ;;  %v61_v32 = vld [vmem:[%s19680_s3 + $0x160] sm:$0xff]  ;;  %v62_v34 = vld [vmem:[%s19680_s3 + $0x168] sm:$0xff]  ;;  %v48_v36 = vld [vmem:[%s19680_s3 + $0xf8] sm:$0xff] }
  0x3f   :  { %8549 = vmatpush3.bf16.msra.mxu1 %v8548_v2  ;;  %8519 = vmatprep.subr.bf16.mxu0 %v8518_v4  ;;  %v8600_v2 = vpack.c.bf16 %v56_v58, %v55_v56  ;;  %v8570_v4 = vpack.c.bf16 %v42_v60, %v41_v59  ;;  %v79_v37 = vld [vmem:[%s19680_s3 + $0x1f0] sm:$0xff]  ;;  %v80_v38 = vld [vmem:[%s19680_s3 + $0x1f8] sm:$0xff]  ;;  %v97_v47 = vld [vmem:[%s19680_s3 + $0x280] sm:$0xff] }
  0x40   :  { %8551 = vmatprep.subr.bf16.mxu1 %v8550_v9  ;;  %v8602_v9 = vpack.c.bf16 %v74_v62, %v73_v61  ;;  %v31_v42 = vld [vmem:[%s19680_s3 + $0x70] sm:$0xff]  ;;  %v32_v43 = vld [vmem:[%s19680_s3 + $0x78] sm:$0xff]  ;;  %v98_v48 = vld [vmem:[%s19680_s3 + $0x288] sm:$0xff] }
  0x41   :  { %v63_v44 = vld [vmem:[%s19680_s3 + $0x170] sm:$0xff]  ;;  %v64_v46 = vld [vmem:[%s19680_s3 + $0x178] sm:$0xff]  ;;  %v129_v49 = vld [vmem:[%s19680_s3 + $0x380] sm:$0xff] }
  0x42   :  { %8521 = vmatpush3.bf16.msra.mxu0 %v8520_v15  ;;  %v8572_v15 = vpack.c.bf16 %v26_v7, %v25_v6  ;;  %v130_v50 = vld [vmem:[%s19680_s3 + $0x388] sm:$0xff]  ;;  %v81_v54 = vld [vmem:[%s19680_s3 + $0x200] sm:$0xff]  ;;  %v99_v59 = vld [vmem:[%s19680_s3 + $0x290] sm:$0xff] }
  0x43   :  { %8553 = vmatpush3.bf16.msra.mxu1 %v8552_v16  ;;  %8555 = vmatprep.subr.bf16.mxu0 %v8554_v17  ;;  %v8604_v16 = vpack.c.bf16 %v58_v10, %v57_v8  ;;  %v8574_v17 = vpack.c.bf16 %v44_v12, %v43_v11  ;;  %v82_v55 = vld [vmem:[%s19680_s3 + $0x208] sm:$0xff]  ;;  %v113_v56 = vld [vmem:[%s19680_s3 + $0x300] sm:$0xff]  ;;  %v100_v60 = vld [vmem:[%s19680_s3 + $0x298] sm:$0xff] }
  0x44   :  { %8587 = vmatprep.subr.bf16.mxu1 %v8586_v21  ;;  %v8606_v21 = vpack.c.bf16 %v76_v14, %v75_v13  ;;  %v114_v58 = vld [vmem:[%s19680_s3 + $0x308] sm:$0xff]  ;;  %v131_v61 = vld [vmem:[%s19680_s3 + $0x390] sm:$0xff]  ;;  %v132_v62 = vld [vmem:[%s19680_s3 + $0x398] sm:$0xff] }
  0x45   :  { %607 = vmatmul.mubr.f32.vlgmr.msra.gmra.mrb[2].mxu0 %v19685_v3  ;;  %v83_v6 = vld [vmem:[%s19680_s3 + $0x210] sm:$0xff]  ;;  %v84_v7 = vld [vmem:[%s19680_s3 + $0x218] sm:$0xff]  ;;  %v101_v11 = vld [vmem:[%s19680_s3 + $0x2a0] sm:$0xff] }
  0x46   :  { %677 = vmatmul.mubr.f32.vlgmr.msra.gmra.mrb[2].mxu1 %v19685_v3  ;;  %8557 = vmatpush3.bf16.msra.mxu0 %v8556_v27  ;;  %v8576_v27 = vpack.c.bf16 %v28_v19, %v27_v18  ;;  %v115_v8 = vld [vmem:[%s19680_s3 + $0x310] sm:$0xff]  ;;  %v116_v10 = vld [vmem:[%s19680_s3 + $0x318] sm:$0xff]  ;;  %v102_v12 = vld [vmem:[%s19680_s3 + $0x2a8] sm:$0xff] }
  0x47   :  { %8589 = vmatpush3.bf16.msra.mxu1 %v8588_v28  ;;  %8559 = vmatprep.subr.bf16.mxu0 %v8558_v29  ;;  %v8608_v28 = vpack.c.bf16 %v60_v22, %v59_v20  ;;  %v8578_v29 = vpack.c.bf16 %v46_v24, %v45_v23  ;;  %v133_v13 = vld [vmem:[%s19680_s3 + $0x3a0] sm:$0xff]  ;;  %v134_v14 = vld [vmem:[%s19680_s3 + $0x3a8] sm:$0xff]  ;;  %v103_v23 = vld [vmem:[%s19680_s3 + $0x2b0] sm:$0xff] }
  0x48   :  { %8591 = vmatprep.subr.bf16.mxu1 %v8590_v33  ;;  %746 = vmatprep.mubr.f32.mxu0 %v19685_v3  ;;  %v8610_v33 = vpack.c.bf16 %v78_v26, %v77_v25  ;;  %v85_v18 = vld [vmem:[%s19680_s3 + $0x220] sm:$0xff]  ;;  %v86_v19 = vld [vmem:[%s19680_s3 + $0x228] sm:$0xff]  ;;  %v104_v24 = vld [vmem:[%s19680_s3 + $0x2b8] sm:$0xff] }
  0x49   :  { %816 = vmatprep.mubr.f32.mxu1 %v19685_v3  ;;  %v117_v20 = vld [vmem:[%s19680_s3 + $0x320] sm:$0xff]  ;;  %v118_v22 = vld [vmem:[%s19680_s3 + $0x328] sm:$0xff]  ;;  %v135_v25 = vld [vmem:[%s19680_s3 + $0x3b0] sm:$0xff] }
  0x4a   :  { %8561 = vmatpush3.bf16.msra.mxu0 %v8560_v39  ;;  %v8580_v39 = vpack.c.bf16 %v30_v31, %v29_v30  ;;  %v136_v26 = vld [vmem:[%s19680_s3 + $0x3b8] sm:$0xff]  ;;  %v87_v30 = vld [vmem:[%s19680_s3 + $0x230] sm:$0xff] }
  0x4b   :  { %8593 = vmatpush3.bf16.msra.mxu1 %v8592_v40  ;;  %8563 = vmatprep.subr.bf16.mxu0 %v8562_v41  ;;  %v8612_v40 = vpack.c.bf16 %v62_v34, %v61_v32  ;;  %v8582_v41 = vpack.c.bf16 %v48_v36, %v47_v35  ;;  %v88_v31 = vld [vmem:[%s19680_s3 + $0x238] sm:$0xff]  ;;  %v119_v32 = vld [vmem:[%s19680_s3 + $0x330] sm:$0xff]  ;;  %v105_v35 = vld [vmem:[%s19680_s3 + $0x2c0] sm:$0xff] }
  0x4c   :  { %8595 = vmatprep.subr.bf16.mxu1 %v8594_v45  ;;  %v8614_v45 = vpack.c.bf16 %v80_v38, %v79_v37  ;;  %v120_v34 = vld [vmem:[%s19680_s3 + $0x338] sm:$0xff]  ;;  %v106_v36 = vld [vmem:[%s19680_s3 + $0x2c8] sm:$0xff]  ;;  %v137_v37 = vld [vmem:[%s19680_s3 + $0x3c0] sm:$0xff] }
  0x4d   :  { %v138_v38 = vld [vmem:[%s19680_s3 + $0x3c8] sm:$0xff] }
  0x4e   :  { %8565 = vmatpush3.bf16.msra.mxu0 %v8564_v51  ;;  %v8584_v51 = vpack.c.bf16 %v32_v43, %v31_v42  ;;  %v89_v42 = vld [vmem:[%s19680_s3 + $0x240] sm:$0xff]  ;;  %v90_v43 = vld [vmem:[%s19680_s3 + $0x248] sm:$0xff] }
  0x4f   :  { %8597 = vmatpush3.bf16.msra.mxu1 %v8596_v52  ;;  %8567 = vmatprep.subr.bf16.mxu0 %v8566_v53  ;;  %v8616_v52 = vpack.c.bf16 %v64_v46, %v63_v44  ;;  %v8618_v53 = vpack.c.bf16 %v98_v48, %v97_v47  ;;  %v121_v44 = vld [vmem:[%s19680_s3 + $0x340] sm:$0xff]  ;;  %v122_v46 = vld [vmem:[%s19680_s3 + $0x348] sm:$0xff]  ;;  %v107_v47 = vld [vmem:[%s19680_s3 + $0x2d0] sm:$0xff] }
  0x50   :  { %8599 = vmatprep.subr.bf16.mxu1 %v8598_v57  ;;  %v8650_v57 = vpack.c.bf16 %v130_v50, %v129_v49  ;;  %v108_v48 = vld [vmem:[%s19680_s3 + $0x2d8] sm:$0xff]  ;;  %v139_v49 = vld [vmem:[%s19680_s3 + $0x3d0] sm:$0xff] }
  0x51   :  { %v140_v50 = vld [vmem:[%s19680_s3 + $0x3d8] sm:$0xff] }
  0x52   :  { %8569 = vmatpush3.bf16.msra.mxu0 %v8568_v63  ;;  %v8620_v63 = vpack.c.bf16 %v82_v55, %v81_v54  ;;  %v91_v54 = vld [vmem:[%s19680_s3 + $0x250] sm:$0xff]  ;;  %v92_v55 = vld [vmem:[%s19680_s3 + $0x258] sm:$0xff] }
  0x53   :  { %8601 = vmatpush3.bf16.msra.mxu1 %v8600_v2  ;;  %8571 = vmatprep.subr.bf16.mxu0 %v8570_v4  ;;  %v8652_v2 = vpack.c.bf16 %v114_v58, %v113_v56  ;;  %v8622_v4 = vpack.c.bf16 %v100_v60, %v99_v59  ;;  %v123_v56 = vld [vmem:[%s19680_s3 + $0x350] sm:$0xff]  ;;  %v124_v58 = vld [vmem:[%s19680_s3 + $0x358] sm:$0xff]  ;;  %v109_v59 = vld [vmem:[%s19680_s3 + $0x2e0] sm:$0xff] }
  0x54   :  { %8603 = vmatprep.subr.bf16.mxu1 %v8602_v9  ;;  %v8654_v9 = vpack.c.bf16 %v132_v62, %v131_v61  ;;  %v110_v60 = vld [vmem:[%s19680_s3 + $0x2e8] sm:$0xff]  ;;  %v141_v61 = vld [vmem:[%s19680_s3 + $0x3e0] sm:$0xff] }
  0x55   :  { %v142_v62 = vld [vmem:[%s19680_s3 + $0x3e8] sm:$0xff] }
  0x56   :  { %8573 = vmatpush3.bf16.msra.mxu0 %v8572_v15  ;;  %v8624_v15 = vpack.c.bf16 %v84_v7, %v83_v6  ;;  %v93_v6 = vld [vmem:[%s19680_s3 + $0x260] sm:$0xff]  ;;  %v94_v7 = vld [vmem:[%s19680_s3 + $0x268] sm:$0xff] }
  0x57   :  { %8605 = vmatpush3.bf16.msra.mxu1 %v8604_v16  ;;  %8575 = vmatprep.subr.bf16.mxu0 %v8574_v17  ;;  %v8656_v16 = vpack.c.bf16 %v116_v10, %v115_v8  ;;  %v8626_v17 = vpack.c.bf16 %v102_v12, %v101_v11  ;;  %v125_v8 = vld [vmem:[%s19680_s3 + $0x360] sm:$0xff]  ;;  %v126_v10 = vld [vmem:[%s19680_s3 + $0x368] sm:$0xff]  ;;  %v111_v11 = vld [vmem:[%s19680_s3 + $0x2f0] sm:$0xff] }
  0x58   :  { %8607 = vmatprep.subr.bf16.mxu1 %v8606_v21  ;;  %v8658_v21 = vpack.c.bf16 %v134_v14, %v133_v13  ;;  %v112_v12 = vld [vmem:[%s19680_s3 + $0x2f8] sm:$0xff]  ;;  %v143_v13 = vld [vmem:[%s19680_s3 + $0x3f0] sm:$0xff] }
  0x59   :  { %v144_v14 = vld [vmem:[%s19680_s3 + $0x3f8] sm:$0xff] }
  0x5a   :  { %8577 = vmatpush3.bf16.msra.mxu0 %v8576_v27  ;;  %v8628_v27 = vpack.c.bf16 %v86_v19, %v85_v18  ;;  %v8676_v18 = vpack.c.bf16 %v126_v10, %v125_v8  ;;  %v8646_v19 = vpack.c.bf16 %v112_v12, %v111_v11  ;;  %v9487_v11 = vld [vmem:[%s19680_s3 + $0x528] sm:$0xff] }
  0x5b   :  { %8609 = vmatpush3.bf16.msra.mxu1 %v8608_v28  ;;  %8579 = vmatprep.subr.bf16.mxu0 %v8578_v29  ;;  %v8660_v28 = vpack.c.bf16 %v118_v22, %v117_v20  ;;  %v8630_v29 = vpack.c.bf16 %v104_v24, %v103_v23  ;;  %v95_v20 = vld [vmem:[%s19680_s3 + $0x270] sm:$0xff]  ;;  %v8678_v23 = vpack.c.bf16 %v144_v14, %v143_v13 }
  0x5c   :  { %8611 = vmatprep.subr.bf16.mxu1 %v8610_v33  ;;  %v8662_v33 = vpack.c.bf16 %v136_v26, %v135_v25  ;;  %v127_v24 = vld [vmem:[%s19680_s3 + $0x370] sm:$0xff]  ;;  %v128_v25 = vld [vmem:[%s19680_s3 + $0x378] sm:$0xff]  ;;  %v9468_v26 = vld [vmem:[%s19680_s3 + $0x400] sm:$0xff]  ;;  %v999_v12 = vmul.f32 %v9487_v11, %v9487_v11 }
  0x5e   :  { %8581 = vmatpush3.bf16.msra.mxu0 %v8580_v39  ;;  %v8632_v39 = vpack.c.bf16 %v88_v31, %v87_v30  ;;  %v9471_v31 = vld [vmem:[%s19680_s3 + $0x508] sm:$0xff] }
  0x5f   :  { %8613 = vmatpush3.bf16.msra.mxu1 %v8612_v40  ;;  %8583 = vmatprep.subr.bf16.mxu0 %v8582_v41  ;;  %v8664_v40 = vpack.c.bf16 %v120_v34, %v119_v32  ;;  %v8634_v41 = vpack.c.bf16 %v106_v36, %v105_v35  ;;  %v995_v32 = vmul.f32 %v9471_v31, %v9471_v31  ;;  %v9472_v36 = vld [vmem:[%s19680_s3 + $0x490] sm:$0xff] }
  0x60   :  { %8615 = vmatprep.subr.bf16.mxu1 %v8614_v45  ;;  %v8666_v45 = vpack.c.bf16 %v138_v38, %v137_v37  ;;  %v8680_v35 = vpack.c.bf16 %v128_v25, %v127_v24  ;;  %v980_v37 = vmul.f32 %v9472_v36, %v9472_v36  ;;  %v9473_v38 = vld [vmem:[%s19680_s3 + $0x498] sm:$0xff] }
  0x61   :  { %v9493_v25 = vld [vmem:[%s19680_s3 + $0x438] sm:$0xff] }
  0x62   :  { %8585 = vmatpush3.bf16.msra.mxu0 %v8584_v51  ;;  %v8636_v51 = vpack.c.bf16 %v90_v43, %v89_v42  ;;  %v9475_v43 = vld [vmem:[%s19680_s3 + $0x598] sm:$0xff] }
  0x63   :  { %8617 = vmatpush3.bf16.msra.mxu1 %v8616_v52  ;;  %8619 = vmatprep.subr.bf16.mxu0 %v8618_v53  ;;  %v8668_v52 = vpack.c.bf16 %v122_v46, %v121_v44  ;;  %v8638_v53 = vpack.c.bf16 %v108_v48, %v107_v47  ;;  %v1013_v44 = vmul.f32 %v9475_v43, %v9475_v43  ;;  %v9477_v47 = vld [vmem:[%s19680_s3 + $0x418] sm:$0xff] }
  0x64   :  { %8651 = vmatprep.subr.bf16.mxu1 %v8650_v57  ;;  %v8670_v57 = vpack.c.bf16 %v140_v50, %v139_v49  ;;  %v965_v48 = vmul.f32 %v9477_v47, %v9477_v47  ;;  %v9478_v49 = vld [vmem:[%s19680_s3 + $0x510] sm:$0xff] }
  0x65   :  { %747 = vmatmul.mubr.f32.vlgmr.msra.gmra.mrb[4].mxu0 %v19685_v3  ;;  %v996_v50 = vmul.f32 %v9478_v49, %v9478_v49 }
  0x66   :  { %817 = vmatmul.mubr.f32.vlgmr.msra.gmra.mrb[4].mxu1 %v19685_v3  ;;  %8621 = vmatpush3.bf16.msra.mxu0 %v8620_v63  ;;  %v8640_v63 = vpack.c.bf16 %v92_v55, %v91_v54 }
  0x67   :  { %8653 = vmatpush3.bf16.msra.mxu1 %v8652_v2  ;;  %8623 = vmatprep.subr.bf16.mxu0 %v8622_v4  ;;  %v8672_v2 = vpack.c.bf16 %v124_v58, %v123_v56  ;;  %v8642_v4 = vpack.c.bf16 %v110_v60, %v109_v59  ;;  %v9480_v56 = vld [vmem:[%s19680_s3 + $0x4a0] sm:$0xff]  ;;  %v9481_v58 = vld [vmem:[%s19680_s3 + $0x4a8] sm:$0xff] }
  0x68   :  { %8655 = vmatprep.subr.bf16.mxu1 %v8654_v9  ;;  %886 = vmatprep.mubr.f32.mxu0 %v19685_v3  ;;  %v8674_v9 = vpack.c.bf16 %v142_v62, %v141_v61  ;;  %v983_v59 = vmul.f32 %v9481_v58, %v9481_v58  ;;  %v9482_v61 = vld [vmem:[%s19680_s3 + $0x5a0] sm:$0xff]  ;;  %v9506_v58 = vld [vmem:[%s19680_s3 + $0x5d0] sm:$0xff] }
  0x69   :  { %956 = vmatprep.mubr.f32.mxu1 %v19685_v3  ;;  %v1014_v62 = vmul.f32 %v9482_v61, %v9482_v61 }
  0x6a   :  { %8625 = vmatpush3.bf16.msra.mxu0 %v8624_v15  ;;  %v978_v15 = vmul.f32 %v10261_v0, %v10261_v0  ;;  %v9467_v0 = vld [vmem:[%s19680_s3 + $0x580] sm:$0xff] }
  0x6b   :  { %8657 = vmatpush3.bf16.msra.mxu1 %v8656_v16  ;;  %8627 = vmatprep.subr.bf16.mxu0 %v8626_v17  ;;  %v979_v16 = vmul.f32 %v10266_v1, %v10266_v1  ;;  %v8644_v17 = vpack.c.bf16 %v94_v7, %v93_v6  ;;  %v1010_v22 = vmul.f32 %v9467_v0, %v9467_v0  ;;  %v9485_v7 = vld [vmem:[%s19680_s3 + $0x428] sm:$0xff] }
  0x6c   :  { %8659 = vmatprep.subr.bf16.mxu1 %v8658_v21  ;;  %v96_v21 = vld [vmem:[%s19680_s3 + $0x278] sm:$0xff]  ;;  %v1011_v1 = vmul.f32 %v10278_v5, %v10278_v5  ;;  %v967_v8 = vmul.f32 %v9485_v7, %v9485_v7 }
  0x6d   :  { %v8682_v34 = vpack.c.bf16 %v979_v16, %v978_v15  ;;  %v9488_v16 = vld [vmem:[%s19680_s3 + $0x4b0] sm:$0xff] }
  0x6e   :  { %8629 = vmatpush3.bf16.msra.mxu0 %v8628_v27  ;;  %v962_v27 = vmul.f32 %v9468_v26, %v9468_v26  ;;  %v969_v26 = vmul.f32 %v9493_v25, %v9493_v25 }
  0x6f   :  { %8661 = vmatpush3.bf16.msra.mxu1 %v8660_v28  ;;  %8631 = vmatprep.subr.bf16.mxu0 %v8630_v29  ;;  %v9469_v28 = vld [vmem:[%s19680_s3 + $0x408] sm:$0xff]  ;;  %v9470_v29 = vld [vmem:[%s19680_s3 + $0x500] sm:$0xff] }
  0x70   :  { %8663 = vmatprep.subr.bf16.mxu1 %v8662_v33  ;;  %v963_v5 = vmul.f32 %v9469_v28, %v9469_v28  ;;  %v994_v30 = vmul.f32 %v9470_v29, %v9470_v29  ;;  %v8648_v33 = vpack.c.bf16 %v96_v21, %v95_v20  ;;  %v9490_v21 = vld [vmem:[%s19680_s3 + $0x5b0] sm:$0xff] }
  0x71   :  { %v1016_v0 = vmul.f32 %v9490_v21, %v9490_v21 }
  0x72   :  { %8633 = vmatpush3.bf16.msra.mxu0 %v8632_v39  ;;  %v981_v39 = vmul.f32 %v9473_v38, %v9473_v38  ;;  %v8716_v54 = vpack.c.bf16 %v995_v32, %v994_v30  ;;  %v9498_v38 = vld [vmem:[%s19680_s3 + $0x5c0] sm:$0xff] }
  0x73   :  { %8665 = vmatpush3.bf16.msra.mxu1 %v8664_v40  ;;  %8635 = vmatprep.subr.bf16.mxu0 %v8634_v41  ;;  %v8714_v40 = vpack.c.bf16 %v1011_v1, %v1010_v22  ;;  %v9474_v41 = vld [vmem:[%s19680_s3 + $0x590] sm:$0xff]  ;;  %v9491_v22 = vld [vmem:[%s19680_s3 + $0x5b8] sm:$0xff] }
  0x74   :  { %8667 = vmatprep.subr.bf16.mxu1 %v8666_v45  ;;  %v1012_v42 = vmul.f32 %v9474_v41, %v9474_v41  ;;  %v9476_v45 = vld [vmem:[%s19680_s3 + $0x410] sm:$0xff]  ;;  %v8686_v55 = vpack.c.bf16 %v981_v39, %v980_v37  ;;  %v1017_v1 = vmul.f32 %v9491_v22, %v9491_v22  ;;  %v1018_v39 = vmul.f32 %v9498_v38, %v9498_v38 }
  0x75   :  { %v964_v46 = vmul.f32 %v9476_v45, %v9476_v45 }
  0x76   :  { %8637 = vmatpush3.bf16.msra.mxu0 %v8636_v51  ;;  %v9479_v51 = vld [vmem:[%s19680_s3 + $0x518] sm:$0xff]  ;;  %v8718_v60 = vpack.c.bf16 %v1013_v44, %v1012_v42  ;;  %v8726_v37 = vpack.c.bf16 %v1017_v1, %v1016_v0  ;;  %v9500_v42 = vld [vmem:[%s19680_s3 + $0x440] sm:$0xff]  ;;  %v9501_v44 = vld [vmem:[%s19680_s3 + $0x448] sm:$0xff] }
  0x77   :  { %8669 = vmatpush3.bf16.msra.mxu1 %v8668_v52  ;;  %8639 = vmatprep.subr.bf16.mxu0 %v8638_v53  ;;  %v997_v52 = vmul.f32 %v9479_v51, %v9479_v51  ;;  %v8684_v53 = vpack.c.bf16 %v963_v5, %v962_v27  ;;  %v8688_v13 = vpack.c.bf16 %v965_v48, %v964_v46  ;;  %v9494_v27 = vld [vmem:[%s19680_s3 + $0x530] sm:$0xff]  ;;  %v9495_v5 = vld [vmem:[%s19680_s3 + $0x538] sm:$0xff]  ;;  %v9502_v46 = vld [vmem:[%s19680_s3 + $0x540] sm:$0xff] }
  0x78   :  { %8671 = vmatprep.subr.bf16.mxu1 %v8670_v57  ;;  %v982_v57 = vmul.f32 %v9480_v56, %v9480_v56  ;;  %v1000_v28 = vmul.f32 %v9494_v27, %v9494_v27  ;;  %v1001_v29 = vmul.f32 %v9495_v5, %v9495_v5  ;;  %v970_v43 = vmul.f32 %v9500_v42, %v9500_v42  ;;  %v9503_v48 = vld [vmem:[%s19680_s3 + $0x548] sm:$0xff]  ;;  %v9516_v0 = vld [vmem:[%s19680_s3 + $0x460] sm:$0xff] }
  0x79   :  { %v8720_v14 = vpack.c.bf16 %v997_v52, %v996_v50  ;;  %v971_v45 = vmul.f32 %v9501_v44, %v9501_v44  ;;  %v1002_v47 = vmul.f32 %v9502_v46, %v9502_v46  ;;  %v1003_v49 = vmul.f32 %v9503_v48, %v9503_v48  ;;  %v9517_v1 = vld [vmem:[%s19680_s3 + $0x468] sm:$0xff] }
  0x7a   :  { %8641 = vmatpush3.bf16.msra.mxu0 %v8640_v63  ;;  %v9483_v63 = vld [vmem:[%s19680_s3 + $0x5a8] sm:$0xff]  ;;  %v8690_v15 = vpack.c.bf16 %v983_v59, %v982_v57  ;;  %v8728_v51 = vpack.c.bf16 %v1001_v29, %v1000_v28  ;;  %v1020_v59 = vmul.f32 %v9506_v58, %v9506_v58  ;;  %v974_v22 = vmul.f32 %v9516_v0, %v9516_v0 }
  0x7b   :  { %8673 = vmatpush3.bf16.msra.mxu1 %v8672_v2  ;;  %8643 = vmatprep.subr.bf16.mxu0 %v8642_v4  ;;  %v1015_v2 = vmul.f32 %v9483_v63, %v9483_v63  ;;  %v9484_v4 = vld [vmem:[%s19680_s3 + $0x420] sm:$0xff]  ;;  %v8732_v11 = vpack.c.bf16 %v1003_v49, %v1002_v47 }
  0x7c   :  { %8675 = vmatprep.subr.bf16.mxu1 %v8674_v9  ;;  %v966_v6 = vmul.f32 %v9484_v4, %v9484_v4  ;;  %v9486_v9 = vld [vmem:[%s19680_s3 + $0x520] sm:$0xff] }
  0x7d   :  { %v998_v10 = vmul.f32 %v9486_v9, %v9486_v9  ;;  %v8722_v20 = vpack.c.bf16 %v1015_v2, %v1014_v62  ;;  %v9508_v62 = vld [vmem:[%s19680_s3 + $0x450] sm:$0xff]  ;;  %v9509_v2 = vld [vmem:[%s19680_s3 + $0x458] sm:$0xff] }
  0x7e   :  { %8645 = vmatpush3.bf16.msra.mxu0 %v8644_v17  ;;  %v984_v17 = vmul.f32 %v9488_v16, %v9488_v16  ;;  %v8692_v30 = vpack.c.bf16 %v967_v8, %v966_v6  ;;  %v972_v63 = vmul.f32 %v9508_v62, %v9508_v62  ;;  %v973_v4 = vmul.f32 %v9509_v2, %v9509_v2  ;;  %v9510_v6 = vld [vmem:[%s19680_s3 + $0x550] sm:$0xff]  ;;  %v9511_v8 = vld [vmem:[%s19680_s3 + $0x558] sm:$0xff]  ;;  %v9533_v62 = vld [vmem:[%s19680_s3 + $0x608] sm:$0xff] }
  0x7f   :  { %8677 = vmatpush3.bf16.msra.mxu1 %v8676_v18  ;;  %8647 = vmatprep.subr.bf16.mxu0 %v8646_v19  ;;  %v9489_v18 = vld [vmem:[%s19680_s3 + $0x4b8] sm:$0xff]  ;;  %v8724_v31 = vpack.c.bf16 %v999_v12, %v998_v10  ;;  %v1004_v7 = vmul.f32 %v9510_v6, %v9510_v6  ;;  %v1005_v9 = vmul.f32 %v9511_v8, %v9511_v8  ;;  %v9534_v2 = vld [vmem:[%s19680_s3 + $0x700] sm:$0xff]  ;;  %v9535_v6 = vld [vmem:[%s19680_s3 + $0x708] sm:$0xff] }
  0x80   :  { %8679 = vmatprep.subr.bf16.mxu1 %v8678_v23  ;;  %v985_v19 = vmul.f32 %v9489_v18, %v9489_v18  ;;  %v9492_v23 = vld [vmem:[%s19680_s3 + $0x430] sm:$0xff]  ;;  %v8700_v10 = vpack.c.bf16 %v971_v45, %v970_v43  ;;  %v9514_v18 = vld [vmem:[%s19680_s3 + $0x5e0] sm:$0xff]  ;;  %v8704_v28 = vpack.c.bf16 %v973_v4, %v972_v63  ;;  %v9527_v45 = vld [vmem:[%s19680_s3 + $0x578] sm:$0xff]  ;;  %v1027_v63 = vmul.f32 %v9533_v62, %v9533_v62 }
  0x81   :  { %v968_v24 = vmul.f32 %v9492_v23, %v9492_v23  ;;  %v975_v23 = vmul.f32 %v9517_v1, %v9517_v1  ;;  %v8736_v5 = vpack.c.bf16 %v1005_v9, %v1004_v7  ;;  %v9526_v43 = vld [vmem:[%s19680_s3 + $0x570] sm:$0xff]  ;;  %v1009_v46 = vmul.f32 %v9527_v45, %v9527_v45 }
  0x82   :  { %8649 = vmatpush3.bf16.msra.mxu0 %v8648_v33  ;;  %v8694_v32 = vpack.c.bf16 %v985_v19, %v984_v17  ;;  %v9496_v33 = vld [vmem:[%s19680_s3 + $0x4c0] sm:$0xff]  ;;  %v1022_v19 = vmul.f32 %v9514_v18, %v9514_v18  ;;  %v1008_v44 = vmul.f32 %v9526_v43, %v9526_v43  ;;  %v1058_v4 = vmul.f32 %v9534_v2, %v9534_v2  ;;  %v9536_v8 = vld [vmem:[%s19680_s3 + $0x690] sm:$0xff]  ;;  %v9551_v43 = vld [vmem:[%s19680_s3 + $0x728] sm:$0xff] }
  0x83   :  { %8681 = vmatpush3.bf16.msra.mxu1 %v8680_v35  ;;  %8683 = vmatprep.subr.bf16.mxu0 %v8682_v34  ;;  %v986_v34 = vmul.f32 %v9496_v33, %v9496_v33  ;;  %v9497_v35 = vld [vmem:[%s19680_s3 + $0x4c8] sm:$0xff]  ;;  %v8696_v50 = vpack.c.bf16 %v969_v26, %v968_v24  ;;  %v9518_v24 = vld [vmem:[%s19680_s3 + $0x560] sm:$0xff]  ;;  %v8708_v47 = vpack.c.bf16 %v975_v23, %v974_v22  ;;  %v9552_v45 = vld [vmem:[%s19680_s3 + $0x6b0] sm:$0xff] }
  0x84   :  { %8715 = vmatprep.subr.bf16.mxu1 %v8714_v40  ;;  %v987_v36 = vmul.f32 %v9497_v35, %v9497_v35  ;;  %v9499_v40 = vld [vmem:[%s19680_s3 + $0x5c8] sm:$0xff]  ;;  %v1006_v25 = vmul.f32 %v9518_v24, %v9518_v24  ;;  %v9522_v35 = vld [vmem:[%s19680_s3 + $0x5f0] sm:$0xff]  ;;  %v1059_v7 = vmul.f32 %v9535_v6, %v9535_v6  ;;  %v1044_v9 = vmul.f32 %v9536_v8, %v9536_v8 }
  0x85   :  { %887 = vmatmul.mubr.f32.vlgmr.msra.gmra.mrb[6].mxu0 %v19685_v3  ;;  %v1019_v41 = vmul.f32 %v9499_v40, %v9499_v40  ;;  %v9519_v26 = vld [vmem:[%s19680_s3 + $0x568] sm:$0xff]  ;;  %v9542_v24 = vld [vmem:[%s19680_s3 + $0x710] sm:$0xff] }
  0x86   :  { %957 = vmatmul.mubr.f32.vlgmr.msra.gmra.mrb[6].mxu1 %v19685_v3  ;;  %8685 = vmatpush3.bf16.msra.mxu0 %v8684_v53  ;;  %v8698_v52 = vpack.c.bf16 %v987_v36, %v986_v34  ;;  %v9504_v53 = vld [vmem:[%s19680_s3 + $0x4d0] sm:$0xff]  ;;  %v1007_v27 = vmul.f32 %v9519_v26, %v9519_v26  ;;  %v1024_v36 = vmul.f32 %v9522_v35, %v9522_v35  ;;  %v9543_v26 = vld [vmem:[%s19680_s3 + $0x718] sm:$0xff] }
  0x87   :  { %8717 = vmatpush3.bf16.msra.mxu1 %v8716_v54  ;;  %8687 = vmatprep.subr.bf16.mxu0 %v8686_v55  ;;  %v988_v54 = vmul.f32 %v9504_v53, %v9504_v53  ;;  %v9505_v55 = vld [vmem:[%s19680_s3 + $0x4d8] sm:$0xff]  ;;  %v8730_v57 = vpack.c.bf16 %v1019_v41, %v1018_v39  ;;  %v9524_v39 = vld [vmem:[%s19680_s3 + $0x470] sm:$0xff]  ;;  %v8780_v1 = vpack.c.bf16 %v1059_v7, %v1058_v4  ;;  %v9560_v7 = vld [vmem:[%s19680_s3 + $0x6c0] sm:$0xff] }
  0x88   :  { %8719 = vmatprep.subr.bf16.mxu1 %v8718_v60  ;;  %1154 = vmatprep.mubr.f32.mxu0 %v19685_v3  ;;  %v989_v56 = vmul.f32 %v9505_v55, %v9505_v55  ;;  %v9507_v60 = vld [vmem:[%s19680_s3 + $0x5d8] sm:$0xff]  ;;  %v976_v40 = vmul.f32 %v9524_v39, %v9524_v39  ;;  %v8740_v48 = vpack.c.bf16 %v1007_v27, %v1006_v25  ;;  %v9530_v55 = vld [vmem:[%s19680_s3 + $0x780] sm:$0xff]  ;;  %v9549_v39 = vld [vmem:[%s19680_s3 + $0x628] sm:$0xff] }
  0x89   :  { %1224 = vmatprep.mubr.f32.mxu1 %v19685_v3  ;;  %v1021_v61 = vmul.f32 %v9507_v60, %v9507_v60  ;;  %v9525_v41 = vld [vmem:[%s19680_s3 + $0x478] sm:$0xff]  ;;  %v9532_v60 = vld [vmem:[%s19680_s3 + $0x600] sm:$0xff]  ;;  %v1060_v25 = vmul.f32 %v9542_v24, %v9542_v24  ;;  %v1061_v27 = vmul.f32 %v9543_v26, %v9543_v26  ;;  %v1050_v8 = vmul.f32 %v9560_v7, %v9560_v7 }
  0x8a   :  { %8689 = vmatpush3.bf16.msra.mxu0 %v8688_v13  ;;  %v8702_v12 = vpack.c.bf16 %v989_v56, %v988_v54  ;;  %v9512_v13 = vld [vmem:[%s19680_s3 + $0x4e0] sm:$0xff]  ;;  %v977_v42 = vmul.f32 %v9525_v41, %v9525_v41  ;;  %v1074_v56 = vmul.f32 %v9530_v55, %v9530_v55  ;;  %v9559_v4 = vld [vmem:[%s19680_s3 + $0x738] sm:$0xff] }
  0x8b   :  { %8721 = vmatpush3.bf16.msra.mxu1 %v8720_v14  ;;  %8691 = vmatprep.subr.bf16.mxu0 %v8690_v15  ;;  %v990_v14 = vmul.f32 %v9512_v13, %v9512_v13  ;;  %v9513_v15 = vld [vmem:[%s19680_s3 + $0x4e8] sm:$0xff]  ;;  %v8734_v17 = vpack.c.bf16 %v1021_v61, %v1020_v59  ;;  %v1026_v61 = vmul.f32 %v9532_v60, %v9532_v60  ;;  %v9550_v41 = vld [vmem:[%s19680_s3 + $0x720] sm:$0xff] }
  0x8c   :  { %8723 = vmatprep.subr.bf16.mxu1 %v8722_v20  ;;  %v991_v16 = vmul.f32 %v9513_v15, %v9513_v15  ;;  %v9515_v20 = vld [vmem:[%s19680_s3 + $0x5e8] sm:$0xff]  ;;  %v8712_v59 = vpack.c.bf16 %v977_v42, %v976_v40  ;;  %v9538_v15 = vld [vmem:[%s19680_s3 + $0x790] sm:$0xff]  ;;  %v1031_v40 = vmul.f32 %v9549_v39, %v9549_v39  ;;  %v1062_v42 = vmul.f32 %v9550_v41, %v9550_v41 }
  0x8d   :  { %v1023_v21 = vmul.f32 %v9515_v20, %v9515_v20  ;;  %v8748_v22 = vpack.c.bf16 %v1027_v63, %v1026_v61  ;;  %v9558_v63 = vld [vmem:[%s19680_s3 + $0x730] sm:$0xff]  ;;  %v1065_v6 = vmul.f32 %v9559_v4, %v9559_v4 }
  0x8e   :  { %8693 = vmatpush3.bf16.msra.mxu0 %v8692_v30  ;;  %v8706_v29 = vpack.c.bf16 %v991_v16, %v990_v14  ;;  %v9520_v30 = vld [vmem:[%s19680_s3 + $0x4f0] sm:$0xff]  ;;  %v1076_v16 = vmul.f32 %v9538_v15, %v9538_v15  ;;  %v1064_v2 = vmul.f32 %v9558_v63, %v9558_v63 }
  0x8f   :  { %8725 = vmatpush3.bf16.msra.mxu1 %v8724_v31  ;;  %8695 = vmatprep.subr.bf16.mxu0 %v8694_v32  ;;  %v992_v31 = vmul.f32 %v9520_v30, %v9520_v30  ;;  %v9521_v32 = vld [vmem:[%s19680_s3 + $0x4f8] sm:$0xff]  ;;  %v8738_v34 = vpack.c.bf16 %v1023_v21, %v1022_v19  ;;  %v9540_v19 = vld [vmem:[%s19680_s3 + $0x610] sm:$0xff] }
  0x90   :  { %8727 = vmatprep.subr.bf16.mxu1 %v8726_v37  ;;  %v993_v33 = vmul.f32 %v9521_v32, %v9521_v32  ;;  %v9523_v37 = vld [vmem:[%s19680_s3 + $0x5f8] sm:$0xff]  ;;  %v1028_v20 = vmul.f32 %v9540_v19, %v9540_v19  ;;  %v9546_v32 = vld [vmem:[%s19680_s3 + $0x7a0] sm:$0xff]  ;;  %v9565_v19 = vld [vmem:[%s19680_s3 + $0x648] sm:$0xff] }
  0x91   :  { %v1025_v38 = vmul.f32 %v9523_v37, %v9523_v37  ;;  %v9541_v21 = vld [vmem:[%s19680_s3 + $0x618] sm:$0xff]  ;;  %v9548_v37 = vld [vmem:[%s19680_s3 + $0x620] sm:$0xff] }
  0x92   :  { %8697 = vmatpush3.bf16.msra.mxu0 %v8696_v50  ;;  %v8710_v49 = vpack.c.bf16 %v993_v33, %v992_v31  ;;  %v9528_v50 = vld [vmem:[%s19680_s3 + $0x680] sm:$0xff]  ;;  %v1029_v0 = vmul.f32 %v9541_v21, %v9541_v21  ;;  %v1078_v33 = vmul.f32 %v9546_v32, %v9546_v32 }
  0x93   :  { %8729 = vmatpush3.bf16.msra.mxu1 %v8728_v51  ;;  %8699 = vmatprep.subr.bf16.mxu0 %v8698_v52  ;;  %v1042_v51 = vmul.f32 %v9528_v50, %v9528_v50  ;;  %v9529_v52 = vld [vmem:[%s19680_s3 + $0x688] sm:$0xff]  ;;  %v8742_v54 = vpack.c.bf16 %v1025_v38, %v1024_v36  ;;  %v1030_v38 = vmul.f32 %v9548_v37, %v9548_v37  ;;  %v9566_v21 = vld [vmem:[%s19680_s3 + $0x740] sm:$0xff] }
  0x94   :  { %8731 = vmatprep.subr.bf16.mxu1 %v8730_v57  ;;  %v1043_v53 = vmul.f32 %v9529_v52, %v9529_v52  ;;  %v9531_v57 = vld [vmem:[%s19680_s3 + $0x788] sm:$0xff]  ;;  %v8752_v36 = vpack.c.bf16 %v1029_v0, %v1028_v20  ;;  %v9554_v52 = vld [vmem:[%s19680_s3 + $0x7b0] sm:$0xff]  ;;  %v1035_v20 = vmul.f32 %v9565_v19, %v9565_v19  ;;  %v1066_v0 = vmul.f32 %v9566_v21, %v9566_v21 }
  0x95   :  { %v1075_v58 = vmul.f32 %v9531_v57, %v9531_v57  ;;  %v8756_v60 = vpack.c.bf16 %v1031_v40, %v1030_v38  ;;  %v9574_v40 = vld [vmem:[%s19680_s3 + $0x750] sm:$0xff] }
  0x96   :  { %8701 = vmatpush3.bf16.msra.mxu0 %v8700_v10  ;;  %v9537_v10 = vld [vmem:[%s19680_s3 + $0x698] sm:$0xff]  ;;  %v8746_v13 = vpack.c.bf16 %v1043_v53, %v1042_v51  ;;  %v1080_v53 = vmul.f32 %v9554_v52, %v9554_v52  ;;  %v1068_v41 = vmul.f32 %v9574_v40, %v9574_v40 }
  0x97   :  { %8733 = vmatpush3.bf16.msra.mxu1 %v8732_v11  ;;  %8703 = vmatprep.subr.bf16.mxu0 %v8702_v12  ;;  %v1045_v11 = vmul.f32 %v9537_v10, %v9537_v10  ;;  %v8744_v12 = vpack.c.bf16 %v1009_v46, %v1008_v44  ;;  %v8778_v14 = vpack.c.bf16 %v1075_v58, %v1074_v56  ;;  %v9556_v56 = vld [vmem:[%s19680_s3 + $0x630] sm:$0xff]  ;;  %v9557_v58 = vld [vmem:[%s19680_s3 + $0x638] sm:$0xff] }
  0x98   :  { %8735 = vmatprep.subr.bf16.mxu1 %v8734_v17  ;;  %v9539_v17 = vld [vmem:[%s19680_s3 + $0x798] sm:$0xff]  ;;  %v1063_v44 = vmul.f32 %v9551_v43, %v9551_v43  ;;  %v1048_v46 = vmul.f32 %v9552_v45, %v9552_v45  ;;  %v1032_v57 = vmul.f32 %v9556_v56, %v9556_v56  ;;  %v9581_v56 = vld [vmem:[%s19680_s3 + $0x668] sm:$0xff] }
  0x99   :  { %v1077_v18 = vmul.f32 %v9539_v17, %v9539_v17  ;;  %v8750_v23 = vpack.c.bf16 %v1045_v11, %v1044_v9  ;;  %v9561_v9 = vld [vmem:[%s19680_s3 + $0x6c8] sm:$0xff]  ;;  %v9564_v17 = vld [vmem:[%s19680_s3 + $0x640] sm:$0xff] }
  0x9a   :  { %8705 = vmatpush3.bf16.msra.mxu0 %v8704_v28  ;;  %v9544_v28 = vld [vmem:[%s19680_s3 + $0x6a0] sm:$0xff]  ;;  %v8788_v61 = vpack.c.bf16 %v1063_v44, %v1062_v42  ;;  %v1051_v10 = vmul.f32 %v9561_v9, %v9561_v9  ;;  %v9575_v42 = vld [vmem:[%s19680_s3 + $0x758] sm:$0xff]  ;;  %v9586_v9 = vld [vmem:[%s19680_s3 + $0x7f0] sm:$0xff] }
  0x9b   :  { %8737 = vmatpush3.bf16.msra.mxu1 %v8736_v5  ;;  %8707 = vmatprep.subr.bf16.mxu0 %v8706_v29  ;;  %v1046_v5 = vmul.f32 %v9544_v28, %v9544_v28  ;;  %v9545_v29 = vld [vmem:[%s19680_s3 + $0x6a8] sm:$0xff]  ;;  %v8782_v31 = vpack.c.bf16 %v1077_v18, %v1076_v16  ;;  %v1034_v18 = vmul.f32 %v9564_v17, %v9564_v17  ;;  %v9576_v44 = vld [vmem:[%s19680_s3 + $0x6e0] sm:$0xff] }
  0x9c   :  { %8739 = vmatprep.subr.bf16.mxu1 %v8738_v34  ;;  %v1047_v30 = vmul.f32 %v9545_v29, %v9545_v29  ;;  %v9547_v34 = vld [vmem:[%s19680_s3 + $0x7a8] sm:$0xff]  ;;  %v8762_v28 = vpack.c.bf16 %v1051_v10, %v1050_v8  ;;  %v9570_v29 = vld [vmem:[%s19680_s3 + $0x7d0] sm:$0xff]  ;;  %v1069_v43 = vmul.f32 %v9575_v42, %v9575_v42  ;;  %v1054_v45 = vmul.f32 %v9576_v44, %v9576_v44 }
  0x9d   :  { %v1079_v35 = vmul.f32 %v9547_v34, %v9547_v34  ;;  %v8764_v37 = vpack.c.bf16 %v1035_v20, %v1034_v18  ;;  %v1088_v10 = vmul.f32 %v9586_v9, %v9586_v9  ;;  %v9590_v20 = vld [vmem:[%s19680_s3 + $0x770] sm:$0xff] }
  0x9e   :  { %8709 = vmatpush3.bf16.msra.mxu0 %v8708_v47  ;;  %v9553_v47 = vld [vmem:[%s19680_s3 + $0x6b8] sm:$0xff]  ;;  %v8754_v50 = vpack.c.bf16 %v1047_v30, %v1046_v5  ;;  %v1084_v30 = vmul.f32 %v9570_v29, %v9570_v29  ;;  %v1072_v21 = vmul.f32 %v9590_v20, %v9590_v20 }
  0x9f   :  { %8741 = vmatpush3.bf16.msra.mxu1 %v8740_v48  ;;  %8711 = vmatprep.subr.bf16.mxu0 %v8710_v49  ;;  %v1049_v48 = vmul.f32 %v9553_v47, %v9553_v47  ;;  %v8784_v49 = vpack.c.bf16 %v1061_v27, %v1060_v25  ;;  %v8786_v51 = vpack.c.bf16 %v1079_v35, %v1078_v33  ;;  %v9569_v25 = vld [vmem:[%s19680_s3 + $0x6d8] sm:$0xff]  ;;  %v9572_v33 = vld [vmem:[%s19680_s3 + $0x650] sm:$0xff] }
  0xa0   :  { %8743 = vmatprep.subr.bf16.mxu1 %v8742_v54  ;;  %v9555_v54 = vld [vmem:[%s19680_s3 + $0x7b8] sm:$0xff]  ;;  %v1053_v26 = vmul.f32 %v9569_v25, %v9569_v25  ;;  %v8792_v27 = vpack.c.bf16 %v1065_v6, %v1064_v2  ;;  %v1036_v34 = vmul.f32 %v9572_v33, %v9572_v33  ;;  %v8800_v6 = vpack.c.bf16 %v1069_v43, %v1068_v41  ;;  %v9597_v33 = vld [vmem:[%s19680_s3 + $0x8] sm:$0xff] }
  0xa1   :  { %v1081_v55 = vmul.f32 %v9555_v54, %v9555_v54  ;;  %v8758_v62 = vpack.c.bf16 %v1049_v48, %v1048_v46  ;;  %v9573_v35 = vld [vmem:[%s19680_s3 + $0x658] sm:$0xff]  ;;  %v9577_v46 = vld [vmem:[%s19680_s3 + $0x6e8] sm:$0xff]  ;;  %v9580_v54 = vld [vmem:[%s19680_s3 + $0x660] sm:$0xff] }
  0xa2   :  { %8713 = vmatpush3.bf16.msra.mxu0 %v8712_v59  ;;  %v1033_v59 = vmul.f32 %v9557_v58, %v9557_v58  ;;  %v1055_v47 = vmul.f32 %v9577_v46, %v9577_v46  ;;  %v9582_v58 = vld [vmem:[%s19680_s3 + $0x760] sm:$0xff]  ;;  %v9585_v2 = vld [vmem:[%s19680_s3 + $0x6f8] sm:$0xff]  ;;  %v9602_v46 = vld [vmem:[%s19680_s3 + $0x190] sm:$0xff] }
  0xa3   :  { %8745 = vmatpush3.bf16.msra.mxu1 %v8744_v12  ;;  %8747 = vmatprep.subr.bf16.mxu0 %v8746_v13  ;;  %v8790_v11 = vpack.c.bf16 %v1081_v55, %v1080_v53  ;;  %v9562_v12 = vld [vmem:[%s19680_s3 + $0x7c0] sm:$0xff]  ;;  %v1038_v55 = vmul.f32 %v9580_v54, %v9580_v54  ;;  %v1057_v4 = vmul.f32 %v9585_v2, %v9585_v2  ;;  %v9601_v41 = vld [vmem:[%s19680_s3 + $0x98] sm:$0xff] }
  0xa4   :  { %8779 = vmatprep.subr.bf16.mxu1 %v8778_v14  ;;  %v1082_v13 = vmul.f32 %v9562_v12, %v9562_v12  ;;  %v9563_v14 = vld [vmem:[%s19680_s3 + $0x7c8] sm:$0xff]  ;;  %v8760_v16 = vpack.c.bf16 %v1033_v59, %v1032_v57  ;;  %v1039_v57 = vmul.f32 %v9581_v56, %v9581_v56  ;;  %v1070_v59 = vmul.f32 %v9582_v58, %v9582_v58 }
  0xa5   :  { %1155 = vmatmul.mubr.f32.vlgmr.msra.gmra.mrb[8].mxu0 %v19685_v3  ;;  %v1083_v15 = vmul.f32 %v9563_v14, %v9563_v14  ;;  %v8770_v7 = vpack.c.bf16 %v1055_v47, %v1054_v45  ;;  %v164_v42 = vmul.f32 %v9601_v41, %v9601_v41  ;;  %v195_v47 = vmul.f32 %v9602_v46, %v9602_v46 }
  0xa6   :  { %1225 = vmatmul.mubr.f32.vlgmr.msra.gmra.mrb[8].mxu1 %v19685_v3  ;;  %8749 = vmatpush3.bf16.msra.mxu0 %v8748_v22  ;;  %v9567_v22 = vld [vmem:[%s19680_s3 + $0x748] sm:$0xff]  ;;  %v8772_v17 = vpack.c.bf16 %v1039_v57, %v1038_v55  ;;  %v9606_v57 = vld [vmem:[%s19680_s3 + $0x110] sm:$0xff] }
  0xa7   :  { %8781 = vmatpush3.bf16.msra.mxu1 %v8780_v1  ;;  %8751 = vmatprep.subr.bf16.mxu0 %v8750_v23  ;;  %v1067_v1 = vmul.f32 %v9567_v22, %v9567_v22  ;;  %v9568_v23 = vld [vmem:[%s19680_s3 + $0x6d0] sm:$0xff]  ;;  %v8794_v5 = vpack.c.bf16 %v1083_v15, %v1082_v13  ;;  %v9589_v15 = vld [vmem:[%s19680_s3 + $0x678] sm:$0xff]  ;;  %v179_v58 = vmul.f32 %v9606_v57, %v9606_v57 }
  0xa8   :  { %8783 = vmatprep.subr.bf16.mxu1 %v8782_v31  ;;  %1294 = vmatprep.mubr.f32.mxu0 %v19685_v3  ;;  %v1052_v24 = vmul.f32 %v9568_v23, %v9568_v23  ;;  %v9571_v31 = vld [vmem:[%s19680_s3 + $0x7d8] sm:$0xff]  ;;  %v9588_v13 = vld [vmem:[%s19680_s3 + $0x670] sm:$0xff] }
  0xa9   :  { %1364 = vmatprep.mubr.f32.mxu1 %v19685_v3  ;;  %v1085_v32 = vmul.f32 %v9571_v31, %v9571_v31  ;;  %v8796_v38 = vpack.c.bf16 %v1067_v1, %v1066_v0  ;;  %v1040_v14 = vmul.f32 %v9588_v13, %v9588_v13  ;;  %v9591_v0 = vld [vmem:[%s19680_s3 + $0x778] sm:$0xff]  ;;  %v9592_v1 = vld [vmem:[%s19680_s3 + $0x80] sm:$0xff]  ;;  %v9613_v13 = vld [vmem:[%s19680_s3 + $0x28] sm:$0xff] }
  0xaa   :  { %8753 = vmatpush3.bf16.msra.mxu0 %v8752_v36  ;;  %v1037_v36 = vmul.f32 %v9573_v35, %v9573_v35  ;;  %v8766_v39 = vpack.c.bf16 %v1053_v26, %v1052_v24  ;;  %v1073_v22 = vmul.f32 %v9591_v0, %v9591_v0  ;;  %v161_v23 = vmul.f32 %v9592_v1, %v9592_v1  ;;  %v9593_v24 = vld [vmem:[%s19680_s3 + $0x88] sm:$0xff]  ;;  %v9596_v31 = vld [vmem:[%s19680_s3] sm:$0xff] }
  0xab   :  { %8785 = vmatpush3.bf16.msra.mxu1 %v8784_v49  ;;  %8755 = vmatprep.subr.bf16.mxu0 %v8754_v50  ;;  %v8798_v48 = vpack.c.bf16 %v1085_v32, %v1084_v30  ;;  %v9578_v49 = vld [vmem:[%s19680_s3 + $0x7e0] sm:$0xff]  ;;  %v162_v25 = vmul.f32 %v9593_v24, %v9593_v24  ;;  %v145_v32 = vmul.f32 %v9596_v31, %v9596_v31  ;;  %v9618_v24 = vld [vmem:[%s19680_s3 + $0x1b0] sm:$0xff] }
  0xac   :  { %8787 = vmatprep.subr.bf16.mxu1 %v8786_v51  ;;  %v1086_v50 = vmul.f32 %v9578_v49, %v9578_v49  ;;  %v9579_v51 = vld [vmem:[%s19680_s3 + $0x7e8] sm:$0xff]  ;;  %v8768_v53 = vpack.c.bf16 %v1037_v36, %v1036_v34  ;;  %v146_v34 = vmul.f32 %v9597_v33, %v9597_v33  ;;  %v9598_v35 = vld [vmem:[%s19680_s3 + $0x100] sm:$0xff]  ;;  %v8808_v43 = vpack.c.bf16 %v1073_v22, %v1072_v21  ;;  %v9617_v21 = vld [vmem:[%s19680_s3 + $0xb8] sm:$0xff] }
  0xad   :  { %v1087_v52 = vmul.f32 %v9579_v51, %v9579_v51  ;;  %v177_v36 = vmul.f32 %v9598_v35, %v9598_v35  ;;  %v8810_v44 = vpack.c.bf16 %v162_v25, %v161_v23  ;;  %v168_v0 = vmul.f32 %v9617_v21, %v9617_v21 }
  0xae   :  { %8757 = vmatpush3.bf16.msra.mxu0 %v8756_v60  ;;  %v9583_v60 = vld [vmem:[%s19680_s3 + $0x768] sm:$0xff]  ;;  %v8812_v54 = vpack.c.bf16 %v146_v34, %v145_v32  ;;  %v199_v25 = vmul.f32 %v9618_v24, %v9618_v24  ;;  %v9622_v34 = vld [vmem:[%s19680_s3 + $0x130] sm:$0xff] }
  0xaf   :  { %8789 = vmatpush3.bf16.msra.mxu1 %v8788_v61  ;;  %8759 = vmatprep.subr.bf16.mxu0 %v8758_v62  ;;  %v1071_v61 = vmul.f32 %v9583_v60, %v9583_v60  ;;  %v9584_v62 = vld [vmem:[%s19680_s3 + $0x6f0] sm:$0xff]  ;;  %v8802_v8 = vpack.c.bf16 %v1087_v52, %v1086_v50  ;;  %v9605_v52 = vld [vmem:[%s19680_s3 + $0x18] sm:$0xff]  ;;  %v183_v35 = vmul.f32 %v9622_v34, %v9622_v34 }
  0xb0   :  { %8791 = vmatprep.subr.bf16.mxu1 %v8790_v11  ;;  %v1056_v63 = vmul.f32 %v9584_v62, %v9584_v62  ;;  %v9587_v11 = vld [vmem:[%s19680_s3 + $0x7f8] sm:$0xff]  ;;  %v9604_v50 = vld [vmem:[%s19680_s3 + $0x10] sm:$0xff] }
  0xb1   :  { %v1089_v12 = vmul.f32 %v9587_v11, %v9587_v11  ;;  %v8804_v18 = vpack.c.bf16 %v1071_v61, %v1070_v59  ;;  %v147_v51 = vmul.f32 %v9604_v50, %v9604_v50  ;;  %v9607_v59 = vld [vmem:[%s19680_s3 + $0x118] sm:$0xff]  ;;  %v9608_v61 = vld [vmem:[%s19680_s3 + $0xa0] sm:$0xff]  ;;  %v9629_v50 = vld [vmem:[%s19680_s3 + $0x48] sm:$0xff] }
  0xb2   :  { %8761 = vmatpush3.bf16.msra.mxu0 %v8760_v16  ;;  %v1041_v16 = vmul.f32 %v9589_v15, %v9589_v15  ;;  %v8774_v19 = vpack.c.bf16 %v1057_v4, %v1056_v63  ;;  %v180_v60 = vmul.f32 %v9607_v59, %v9607_v59  ;;  %v165_v62 = vmul.f32 %v9608_v61, %v9608_v61  ;;  %v9609_v63 = vld [vmem:[%s19680_s3 + $0xa8] sm:$0xff]  ;;  %v9612_v11 = vld [vmem:[%s19680_s3 + $0x20] sm:$0xff] }
  0xb3   :  { %8793 = vmatpush3.bf16.msra.mxu1 %v8792_v27  ;;  %8763 = vmatprep.subr.bf16.mxu0 %v8762_v28  ;;  %v8806_v26 = vpack.c.bf16 %v1089_v12, %v1088_v10  ;;  %v9594_v27 = vld [vmem:[%s19680_s3 + $0x180] sm:$0xff]  ;;  %v166_v2 = vmul.f32 %v9609_v63, %v9609_v63  ;;  %v149_v12 = vmul.f32 %v9612_v11, %v9612_v11  ;;  %v9634_v63 = vld [vmem:[%s19680_s3 + $0x1d0] sm:$0xff] }
  0xb4   :  { %8795 = vmatprep.subr.bf16.mxu1 %v8794_v5  ;;  %v193_v28 = vmul.f32 %v9594_v27, %v9594_v27  ;;  %v9595_v5 = vld [vmem:[%s19680_s3 + $0x188] sm:$0xff]  ;;  %v8776_v30 = vpack.c.bf16 %v1041_v16, %v1040_v14  ;;  %v150_v14 = vmul.f32 %v9613_v13, %v9613_v13  ;;  %v9614_v15 = vld [vmem:[%s19680_s3 + $0x120] sm:$0xff]  ;;  %v8848_v22 = vpack.c.bf16 %v180_v60, %v179_v58  ;;  %v9633_v58 = vld [vmem:[%s19680_s3 + $0xd8] sm:$0xff] }
  0xb5   :  { %v194_v29 = vmul.f32 %v9595_v5, %v9595_v5  ;;  %v181_v16 = vmul.f32 %v9614_v15, %v9614_v15  ;;  %v8818_v1 = vpack.c.bf16 %v166_v2, %v165_v62  ;;  %v172_v59 = vmul.f32 %v9633_v58, %v9633_v58 }
  0xb6   :  { %8765 = vmatpush3.bf16.msra.mxu0 %v8764_v37  ;;  %v9599_v37 = vld [vmem:[%s19680_s3 + $0x108] sm:$0xff]  ;;  %v8820_v31 = vpack.c.bf16 %v150_v14, %v149_v12  ;;  %v203_v2 = vmul.f32 %v9634_v63, %v9634_v63  ;;  %v9637_v12 = vld [vmem:[%s19680_s3 + $0x58] sm:$0xff]  ;;  %v9638_v14 = vld [vmem:[%s19680_s3 + $0x150] sm:$0xff] }
  0xb7   :  { %8797 = vmatpush3.bf16.msra.mxu1 %v8796_v38  ;;  %8767 = vmatprep.subr.bf16.mxu0 %v8766_v39  ;;  %v178_v38 = vmul.f32 %v9599_v37, %v9599_v37  ;;  %v9600_v39 = vld [vmem:[%s19680_s3 + $0x90] sm:$0xff]  ;;  %v8842_v45 = vpack.c.bf16 %v194_v29, %v193_v28  ;;  %v9621_v29 = vld [vmem:[%s19680_s3 + $0x38] sm:$0xff]  ;;  %v156_v13 = vmul.f32 %v9637_v12, %v9637_v12 }
  0xb8   :  { %8799 = vmatprep.subr.bf16.mxu1 %v8798_v48  ;;  %v163_v40 = vmul.f32 %v9600_v39, %v9600_v39  ;;  %v9603_v48 = vld [vmem:[%s19680_s3 + $0x198] sm:$0xff]  ;;  %v9620_v28 = vld [vmem:[%s19680_s3 + $0x30] sm:$0xff]  ;;  %v187_v15 = vmul.f32 %v9638_v14, %v9638_v14 }
  0xb9   :  { %v196_v49 = vmul.f32 %v9603_v48, %v9603_v48  ;;  %v8844_v55 = vpack.c.bf16 %v178_v38, %v177_v36  ;;  %v151_v5 = vmul.f32 %v9620_v28, %v9620_v28  ;;  %v9623_v36 = vld [vmem:[%s19680_s3 + $0x138] sm:$0xff]  ;;  %v9624_v38 = vld [vmem:[%s19680_s3 + $0xc0] sm:$0xff] }
  0xba   :  { %8769 = vmatpush3.bf16.msra.mxu0 %v8768_v53  ;;  %v148_v53 = vmul.f32 %v9605_v52, %v9605_v52  ;;  %v8814_v56 = vpack.c.bf16 %v164_v42, %v163_v40  ;;  %v184_v37 = vmul.f32 %v9623_v36, %v9623_v36  ;;  %v169_v39 = vmul.f32 %v9624_v38, %v9624_v38  ;;  %v9625_v40 = vld [vmem:[%s19680_s3 + $0xc8] sm:$0xff]  ;;  %v9628_v48 = vld [vmem:[%s19680_s3 + $0x40] sm:$0xff] }
  0xbb   :  { %8801 = vmatpush3.bf16.msra.mxu1 %v8800_v6  ;;  %8771 = vmatprep.subr.bf16.mxu0 %v8770_v7  ;;  %v8846_v4 = vpack.c.bf16 %v196_v49, %v195_v47  ;;  %v9610_v6 = vld [vmem:[%s19680_s3 + $0x1a0] sm:$0xff]  ;;  %v170_v41 = vmul.f32 %v9625_v40, %v9625_v40  ;;  %v153_v49 = vmul.f32 %v9628_v48, %v9628_v48  ;;  %v9650_v40 = vld [vmem:[%s19680_s3 + $0x1f0] sm:$0xff] }
  0xbc   :  { %8803 = vmatprep.subr.bf16.mxu1 %v8802_v8  ;;  %v197_v7 = vmul.f32 %v9610_v6, %v9610_v6  ;;  %v9611_v8 = vld [vmem:[%s19680_s3 + $0x1a8] sm:$0xff]  ;;  %v8816_v10 = vpack.c.bf16 %v148_v53, %v147_v51  ;;  %v154_v51 = vmul.f32 %v9629_v50, %v9629_v50  ;;  %v9630_v52 = vld [vmem:[%s19680_s3 + $0x140] sm:$0xff]  ;;  %v8856_v60 = vpack.c.bf16 %v184_v37, %v183_v35  ;;  %v9649_v35 = vld [vmem:[%s19680_s3 + $0xf8] sm:$0xff] }
  0xbd   :  { %v198_v9 = vmul.f32 %v9611_v8, %v9611_v8  ;;  %v185_v53 = vmul.f32 %v9630_v52, %v9630_v52  ;;  %v8826_v61 = vpack.c.bf16 %v170_v41, %v169_v39  ;;  %v9636_v8 = vld [vmem:[%s19680_s3 + $0x50] sm:$0xff]  ;;  %v176_v36 = vmul.f32 %v9649_v35, %v9649_v35 }
  0xbe   :  { %8773 = vmatpush3.bf16.msra.mxu0 %v8772_v17  ;;  %v9615_v17 = vld [vmem:[%s19680_s3 + $0x128] sm:$0xff]  ;;  %v207_v41 = vmul.f32 %v9650_v40, %v9650_v40 }
  0xbf   :  { %8805 = vmatpush3.bf16.msra.mxu1 %v8804_v18  ;;  %8775 = vmatprep.subr.bf16.mxu0 %v8774_v19  ;;  %v182_v18 = vmul.f32 %v9615_v17, %v9615_v17  ;;  %v9616_v19 = vld [vmem:[%s19680_s3 + $0xb0] sm:$0xff]  ;;  %v8850_v23 = vpack.c.bf16 %v198_v9, %v197_v7  ;;  %v8828_v7 = vpack.c.bf16 %v154_v51, %v153_v49  ;;  %v9653_v49 = vld [vmem:[%s19680_s3 + $0x78] sm:$0xff] }
  0xc0   :  { %8807 = vmatprep.subr.bf16.mxu1 %v8806_v26  ;;  %v167_v20 = vmul.f32 %v9616_v19, %v9616_v19  ;;  %v9619_v26 = vld [vmem:[%s19680_s3 + $0x1b8] sm:$0xff]  ;;  %v155_v9 = vmul.f32 %v9636_v8, %v9636_v8  ;;  %v160_v50 = vmul.f32 %v9653_v49, %v9653_v49  ;;  %v9654_v51 = vld [vmem:[%s19680_s3 + $0x170] sm:$0xff]  ;;  %v9662_v8 = vld [vmem:[%s19680_s3 + $0x300] sm:$0xff] }
  0xc1   :  { %v200_v27 = vmul.f32 %v9619_v26, %v9619_v26  ;;  %v8852_v32 = vpack.c.bf16 %v182_v18, %v181_v16  ;;  %v9639_v16 = vld [vmem:[%s19680_s3 + $0x158] sm:$0xff]  ;;  %v9640_v18 = vld [vmem:[%s19680_s3 + $0xe0] sm:$0xff]  ;;  %v191_v52 = vmul.f32 %v9654_v51, %v9654_v51 }
  0xc2   :  { %8777 = vmatpush3.bf16.msra.mxu0 %v8776_v30  ;;  %v152_v30 = vmul.f32 %v9621_v29, %v9621_v29  ;;  %v8822_v33 = vpack.c.bf16 %v168_v0, %v167_v20  ;;  %v188_v17 = vmul.f32 %v9639_v16, %v9639_v16  ;;  %v173_v19 = vmul.f32 %v9640_v18, %v9640_v18  ;;  %v9641_v20 = vld [vmem:[%s19680_s3 + $0xe8] sm:$0xff] }
  0xc3   :  { %8809 = vmatpush3.bf16.msra.mxu1 %v8808_v43  ;;  %8811 = vmatprep.subr.bf16.mxu0 %v8810_v44  ;;  %v8854_v42 = vpack.c.bf16 %v200_v27, %v199_v25  ;;  %v9626_v43 = vld [vmem:[%s19680_s3 + $0x1c0] sm:$0xff]  ;;  %v174_v21 = vmul.f32 %v9641_v20, %v9641_v20  ;;  %v9645_v27 = vld [vmem:[%s19680_s3 + $0x68] sm:$0xff]  ;;  %v9666_v20 = vld [vmem:[%s19680_s3 + $0x390] sm:$0xff] }
  0xc4   :  { %8843 = vmatprep.subr.bf16.mxu1 %v8842_v45  ;;  %v201_v44 = vmul.f32 %v9626_v43, %v9626_v43  ;;  %v9627_v45 = vld [vmem:[%s19680_s3 + $0x1c8] sm:$0xff]  ;;  %v8824_v47 = vpack.c.bf16 %v152_v30, %v151_v5  ;;  %v9644_v25 = vld [vmem:[%s19680_s3 + $0x60] sm:$0xff]  ;;  %v158_v28 = vmul.f32 %v9645_v27, %v9645_v27  ;;  %v8864_v37 = vpack.c.bf16 %v188_v17, %v187_v15  ;;  %v9665_v15 = vld [vmem:[%s19680_s3 + $0x298] sm:$0xff] }
  0xc5   :  { %1295 = vmatmul.mubr.f32.vlgmr.msra.gmra.mrb[10].mxu0 %v19685_v3  ;;  %v202_v46 = vmul.f32 %v9627_v45, %v9627_v45  ;;  %v157_v26 = vmul.f32 %v9644_v25, %v9644_v25  ;;  %v9646_v5 = vld [vmem:[%s19680_s3 + $0x160] sm:$0xff]  ;;  %v9647_v30 = vld [vmem:[%s19680_s3 + $0x168] sm:$0xff]  ;;  %v8834_v38 = vpack.c.bf16 %v174_v21, %v173_v19  ;;  %v228_v16 = vmul.f32 %v9665_v15, %v9665_v15  ;;  %v9668_v25 = vld [vmem:[%s19680_s3 + $0x210] sm:$0xff] }
  0xc6   :  { %1365 = vmatmul.mubr.f32.vlgmr.msra.gmra.mrb[10].mxu1 %v19685_v3  ;;  %8813 = vmatpush3.bf16.msra.mxu0 %v8812_v54  ;;  %v9631_v54 = vld [vmem:[%s19680_s3 + $0x148] sm:$0xff]  ;;  %v189_v29 = vmul.f32 %v9646_v5, %v9646_v5  ;;  %v259_v21 = vmul.f32 %v9666_v20, %v9666_v20  ;;  %v9669_v27 = vld [vmem:[%s19680_s3 + $0x218] sm:$0xff]  ;;  %v9670_v5 = vld [vmem:[%s19680_s3 + $0x310] sm:$0xff] }
  0xc7   :  { %8845 = vmatpush3.bf16.msra.mxu1 %v8844_v55  ;;  %8815 = vmatprep.subr.bf16.mxu0 %v8814_v56  ;;  %v186_v55 = vmul.f32 %v9631_v54, %v9631_v54  ;;  %v9632_v56 = vld [vmem:[%s19680_s3 + $0xd0] sm:$0xff]  ;;  %v8858_v62 = vpack.c.bf16 %v202_v46, %v201_v44  ;;  %v8836_v44 = vpack.c.bf16 %v158_v28, %v157_v26 }
  0xc8   :  { %8847 = vmatprep.subr.bf16.mxu1 %v8846_v4  ;;  %1434 = vmatprep.mubr.f32.mxu0 %v19685_v3  ;;  %v171_v57 = vmul.f32 %v9632_v56, %v9632_v56  ;;  %v9635_v4 = vld [vmem:[%s19680_s3 + $0x1d8] sm:$0xff]  ;;  %v211_v26 = vmul.f32 %v9668_v25, %v9668_v25  ;;  %v212_v28 = vmul.f32 %v9669_v27, %v9669_v27  ;;  %v9695_v25 = vld [vmem:[%s19680_s3 + $0x348] sm:$0xff] }
  0xc9   :  { %1504 = vmatprep.mubr.f32.mxu1 %v19685_v3  ;;  %v204_v6 = vmul.f32 %v9635_v4, %v9635_v4 }
  0xca   :  { %8817 = vmatpush3.bf16.msra.mxu0 %v8816_v10  ;;  %v8860_v10 = vpack.c.bf16 %v186_v55, %v185_v53  ;;  %v8830_v11 = vpack.c.bf16 %v172_v59, %v171_v57  ;;  %v9655_v53 = vld [vmem:[%s19680_s3 + $0x178] sm:$0xff]  ;;  %v9656_v55 = vld [vmem:[%s19680_s3 + $0x280] sm:$0xff]  ;;  %v9657_v57 = vld [vmem:[%s19680_s3 + $0x288] sm:$0xff]  ;;  %v8880_v49 = vpack.c.bf16 %v212_v28, %v211_v26  ;;  %v250_v26 = vmul.f32 %v9695_v25, %v9695_v25 }
  0xcb   :  { %8849 = vmatpush3.bf16.msra.mxu1 %v8848_v22  ;;  %8819 = vmatprep.subr.bf16.mxu0 %v8818_v1  ;;  %v8862_v0 = vpack.c.bf16 %v204_v6, %v203_v2  ;;  %v9642_v22 = vld [vmem:[%s19680_s3 + $0x1e0] sm:$0xff]  ;;  %v192_v54 = vmul.f32 %v9655_v53, %v9655_v53  ;;  %v225_v56 = vmul.f32 %v9656_v55, %v9656_v55  ;;  %v9661_v6 = vld [vmem:[%s19680_s3 + $0x208] sm:$0xff]  ;;  %v9696_v28 = vld [vmem:[%s19680_s3 + $0x2d0] sm:$0xff] }
  0xcc   :  { %8851 = vmatprep.subr.bf16.mxu1 %v8850_v23  ;;  %v205_v1 = vmul.f32 %v9642_v22, %v9642_v22  ;;  %v9643_v23 = vld [vmem:[%s19680_s3 + $0x1e8] sm:$0xff]  ;;  %v226_v58 = vmul.f32 %v9657_v57, %v9657_v57  ;;  %v9660_v2 = vld [vmem:[%s19680_s3 + $0x200] sm:$0xff]  ;;  %v9682_v57 = vld [vmem:[%s19680_s3 + $0x3b0] sm:$0xff] }
  0xcd   :  { %v206_v24 = vmul.f32 %v9643_v23, %v9643_v23  ;;  %v209_v4 = vmul.f32 %v9660_v2, %v9660_v2  ;;  %v8872_v17 = vpack.c.bf16 %v192_v54, %v191_v52  ;;  %v9681_v52 = vld [vmem:[%s19680_s3 + $0x2b8] sm:$0xff]  ;;  %v9684_v2 = vld [vmem:[%s19680_s3 + $0x230] sm:$0xff] }
  0xce   :  { %8821 = vmatpush3.bf16.msra.mxu0 %v8820_v31  ;;  %v190_v31 = vmul.f32 %v9647_v30, %v9647_v30  ;;  %v8874_v18 = vpack.c.bf16 %v226_v58, %v225_v56  ;;  %v9671_v30 = vld [vmem:[%s19680_s3 + $0x318] sm:$0xff]  ;;  %v232_v53 = vmul.f32 %v9681_v52, %v9681_v52  ;;  %v263_v58 = vmul.f32 %v9682_v57, %v9682_v57 }
  0xcf   :  { %8853 = vmatpush3.bf16.msra.mxu1 %v8852_v32  ;;  %8823 = vmatprep.subr.bf16.mxu0 %v8822_v33  ;;  %v8832_v32 = vpack.c.bf16 %v156_v13, %v155_v9  ;;  %v9648_v33 = vld [vmem:[%s19680_s3 + $0xf0] sm:$0xff]  ;;  %v8866_v39 = vpack.c.bf16 %v206_v24, %v205_v1  ;;  %v241_v9 = vmul.f32 %v9662_v8, %v9662_v8 }
  0xd0   :  { %8855 = vmatprep.subr.bf16.mxu1 %v8854_v42  ;;  %v175_v34 = vmul.f32 %v9648_v33, %v9648_v33  ;;  %v9651_v42 = vld [vmem:[%s19680_s3 + $0x1f8] sm:$0xff]  ;;  %v8868_v45 = vpack.c.bf16 %v190_v31, %v189_v29  ;;  %v9664_v13 = vld [vmem:[%s19680_s3 + $0x290] sm:$0xff]  ;;  %v243_v29 = vmul.f32 %v9670_v5, %v9670_v5  ;;  %v244_v31 = vmul.f32 %v9671_v30, %v9671_v30 }
  0xd1   :  { %v208_v43 = vmul.f32 %v9651_v42, %v9651_v42  ;;  %v227_v14 = vmul.f32 %v9664_v13, %v9664_v13  ;;  %v9686_v8 = vld [vmem:[%s19680_s3 + $0x330] sm:$0xff]  ;;  %v235_v5 = vmul.f32 %v9696_v28, %v9696_v28 }
  0xd2   :  { %8825 = vmatpush3.bf16.msra.mxu0 %v8824_v47  ;;  %v8838_v46 = vpack.c.bf16 %v176_v36, %v175_v34  ;;  %v9652_v47 = vld [vmem:[%s19680_s3 + $0x70] sm:$0xff]  ;;  %v9673_v34 = vld [vmem:[%s19680_s3 + $0x2a8] sm:$0xff]  ;;  %v8912_v54 = vpack.c.bf16 %v244_v31, %v243_v29  ;;  %v9697_v29 = vld [vmem:[%s19680_s3 + $0x2d8] sm:$0xff] }
  0xd3   :  { %8857 = vmatpush3.bf16.msra.mxu1 %v8856_v60  ;;  %8827 = vmatprep.subr.bf16.mxu0 %v8826_v61  ;;  %v159_v48 = vmul.f32 %v9652_v47, %v9652_v47  ;;  %v8870_v59 = vpack.c.bf16 %v208_v43, %v207_v41  ;;  %v9658_v60 = vld [vmem:[%s19680_s3 + $0x380] sm:$0xff]  ;;  %v8878_v24 = vpack.c.bf16 %v228_v16, %v227_v14  ;;  %v9677_v43 = vld [vmem:[%s19680_s3 + $0x228] sm:$0xff] }
  0xd4   :  { %8859 = vmatprep.subr.bf16.mxu1 %v8858_v62  ;;  %v257_v61 = vmul.f32 %v9658_v60, %v9658_v60  ;;  %v9659_v62 = vld [vmem:[%s19680_s3 + $0x388] sm:$0xff]  ;;  %v230_v35 = vmul.f32 %v9673_v34, %v9673_v34  ;;  %v9676_v41 = vld [vmem:[%s19680_s3 + $0x220] sm:$0xff]  ;;  %v236_v30 = vmul.f32 %v9697_v29, %v9697_v29  ;;  %v9698_v34 = vld [vmem:[%s19680_s3 + $0x3d0] sm:$0xff] }
  0xd5   :  { %v258_v63 = vmul.f32 %v9659_v62, %v9659_v62  ;;  %v8840_v12 = vpack.c.bf16 %v160_v50, %v159_v48  ;;  %v213_v42 = vmul.f32 %v9676_v41, %v9676_v41  ;;  %v9679_v47 = vld [vmem:[%s19680_s3 + $0x328] sm:$0xff]  ;;  %v9680_v50 = vld [vmem:[%s19680_s3 + $0x2b0] sm:$0xff] }
  0xd6   :  { %8829 = vmatpush3.bf16.msra.mxu0 %v8828_v7  ;;  %v210_v7 = vmul.f32 %v9661_v6, %v9661_v6  ;;  %v246_v48 = vmul.f32 %v9679_v47, %v9679_v47  ;;  %v231_v51 = vmul.f32 %v9680_v50, %v9680_v50  ;;  %v9685_v6 = vld [vmem:[%s19680_s3 + $0x238] sm:$0xff]  ;;  %v9689_v14 = vld [vmem:[%s19680_s3 + $0x2c8] sm:$0xff]  ;;  %v9700_v41 = vld [vmem:[%s19680_s3 + $0x250] sm:$0xff] }
  0xd7   :  { %8861 = vmatpush3.bf16.msra.mxu1 %v8860_v10  ;;  %8831 = vmatprep.subr.bf16.mxu0 %v8830_v11  ;;  %v9663_v10 = vld [vmem:[%s19680_s3 + $0x308] sm:$0xff]  ;;  %v8906_v19 = vpack.c.bf16 %v258_v63, %v257_v61  ;;  %v234_v15 = vmul.f32 %v9689_v14, %v9689_v14  ;;  %v9703_v47 = vld [vmem:[%s19680_s3 + $0x358] sm:$0xff] }
  0xd8   :  { %8863 = vmatprep.subr.bf16.mxu1 %v8862_v0  ;;  %v242_v11 = vmul.f32 %v9663_v10, %v9663_v10  ;;  %v9667_v0 = vld [vmem:[%s19680_s3 + $0x398] sm:$0xff]  ;;  %v8876_v1 = vpack.c.bf16 %v210_v7, %v209_v4  ;;  %v8886_v63 = vpack.c.bf16 %v232_v53, %v231_v51  ;;  %v215_v4 = vmul.f32 %v9684_v2, %v9684_v2  ;;  %v9705_v51 = vld [vmem:[%s19680_s3 + $0x2e8] sm:$0xff] }
  0xd9   :  { %v260_v22 = vmul.f32 %v9667_v0, %v9667_v0  ;;  %v216_v7 = vmul.f32 %v9685_v6, %v9685_v6  ;;  %v9687_v10 = vld [vmem:[%s19680_s3 + $0x338] sm:$0xff]  ;;  %v238_v52 = vmul.f32 %v9705_v51, %v9705_v51  ;;  %v9711_v2 = vld [vmem:[%s19680_s3 + $0x368] sm:$0xff] }
  0xda   :  { %8833 = vmatpush3.bf16.msra.mxu0 %v8832_v32  ;;  %v8908_v23 = vpack.c.bf16 %v242_v11, %v241_v9  ;;  %v9672_v32 = vld [vmem:[%s19680_s3 + $0x2a0] sm:$0xff]  ;;  %v247_v9 = vmul.f32 %v9686_v8, %v9686_v8  ;;  %v248_v11 = vmul.f32 %v9687_v10, %v9687_v10 }
  0xdb   :  { %8865 = vmatpush3.bf16.msra.mxu1 %v8864_v37  ;;  %8835 = vmatprep.subr.bf16.mxu0 %v8834_v38  ;;  %v229_v33 = vmul.f32 %v9672_v32, %v9672_v32  ;;  %v8910_v36 = vpack.c.bf16 %v260_v22, %v259_v21  ;;  %v9674_v37 = vld [vmem:[%s19680_s3 + $0x3a0] sm:$0xff]  ;;  %v9693_v22 = vld [vmem:[%s19680_s3 + $0x248] sm:$0xff]  ;;  %v8888_v27 = vpack.c.bf16 %v216_v7, %v215_v4  ;;  %v9712_v7 = vld [vmem:[%s19680_s3 + $0x2f0] sm:$0xff] }
  0xdc   :  { %8867 = vmatprep.subr.bf16.mxu1 %v8866_v39  ;;  %v261_v38 = vmul.f32 %v9674_v37, %v9674_v37  ;;  %v9675_v39 = vld [vmem:[%s19680_s3 + $0x3a8] sm:$0xff]  ;;  %v9692_v21 = vld [vmem:[%s19680_s3 + $0x240] sm:$0xff]  ;;  %v8920_v31 = vpack.c.bf16 %v248_v11, %v247_v9  ;;  %v254_v4 = vmul.f32 %v9711_v2, %v9711_v2  ;;  %v239_v8 = vmul.f32 %v9712_v7, %v9712_v7  ;;  %v9713_v9 = vld [vmem:[%s19680_s3 + $0x2f8] sm:$0xff] }
  0xdd   :  { %v262_v40 = vmul.f32 %v9675_v39, %v9675_v39  ;;  %v8882_v55 = vpack.c.bf16 %v230_v35, %v229_v33  ;;  %v217_v0 = vmul.f32 %v9692_v21, %v9692_v21  ;;  %v267_v35 = vmul.f32 %v9698_v34, %v9698_v34  ;;  %v11838_v34 = vld [vmem:[%s19680_s3 + $0x888] sm:$0xff]  ;;  %v11965_v7 = vld [vmem:[%s19680_s3 + $0x920] sm:$0xff] }
  0xde   :  { %8837 = vmatpush3.bf16.msra.mxu0 %v8836_v44  ;;  %v214_v44 = vmul.f32 %v9677_v43, %v9677_v43  ;;  %v9701_v43 = vld [vmem:[%s19680_s3 + $0x258] sm:$0xff]  ;;  %v240_v10 = vmul.f32 %v9713_v9, %v9713_v9  ;;  %v11972_v9 = vld [vmem:[%s19680_s3 + $0x928] sm:$0xff] }
  0xdf   :  { %8869 = vmatpush3.bf16.msra.mxu1 %v8868_v45  ;;  %8839 = vmatprep.subr.bf16.mxu0 %v8838_v46  ;;  %v9678_v45 = vld [vmem:[%s19680_s3 + $0x320] sm:$0xff]  ;;  %v8914_v56 = vpack.c.bf16 %v262_v40, %v261_v38  ;;  %v8894_v40 = vpack.c.bf16 %v236_v30, %v235_v5  ;;  %v9718_v5 = vld [vmem:[%s19680_s3 + $0x370] sm:$0xff]  ;;  %v9719_v30 = vld [vmem:[%s19680_s3 + $0x378] sm:$0xff] }
  0xe0   :  { %8871 = vmatprep.subr.bf16.mxu1 %v8870_v59  ;;  %v245_v46 = vmul.f32 %v9678_v45, %v9678_v45  ;;  %v9683_v59 = vld [vmem:[%s19680_s3 + $0x3b8] sm:$0xff]  ;;  %v8884_v61 = vpack.c.bf16 %v214_v44, %v213_v42  ;;  %v219_v42 = vmul.f32 %v9700_v41, %v9700_v41  ;;  %v220_v44 = vmul.f32 %v9701_v43, %v9701_v43  ;;  %v9702_v45 = vld [vmem:[%s19680_s3 + $0x350] sm:$0xff]  ;;  %v11857_v41 = vld [vmem:[%s19680_s3 + $0x800] sm:$0xff] }
  0xe1   :  { %v264_v60 = vmul.f32 %v9683_v59, %v9683_v59  ;;  %v255_v29 = vmul.f32 %v9718_v5, %v9718_v5  ;;  %v11867_v43 = vld [vmem:[%s19680_s3 + $0x900] sm:$0xff] }
  0xe2   :  { %8841 = vmatpush3.bf16.msra.mxu0 %v8840_v12  ;;  %v8916_v62 = vpack.c.bf16 %v246_v48, %v245_v46  ;;  %v9688_v12 = vld [vmem:[%s19680_s3 + $0x2c0] sm:$0xff]  ;;  %v251_v46 = vmul.f32 %v9702_v45, %v9702_v45  ;;  %v252_v48 = vmul.f32 %v9703_v47, %v9703_v47  ;;  %v8896_v6 = vpack.c.bf16 %v220_v44, %v219_v42  ;;  %v11862_v42 = vld [vmem:[%s19680_s3 + $0x808] sm:$0xff]  ;;  %v11884_v47 = vld [vmem:[%s19680_s3 + $0x898] sm:$0xff] }
  0xe3   :  { %8873 = vmatpush3.bf16.msra.mxu1 %v8872_v17  ;;  %8875 = vmatprep.subr.bf16.mxu0 %v8874_v18  ;;  %v233_v13 = vmul.f32 %v9688_v12, %v9688_v12  ;;  %v8918_v16 = vpack.c.bf16 %v264_v60, %v263_v58  ;;  %v9690_v17 = vld [vmem:[%s19680_s3 + $0x3c0] sm:$0xff]  ;;  %v9709_v60 = vld [vmem:[%s19680_s3 + $0x268] sm:$0xff] }
  0xe4   :  { %8907 = vmatprep.subr.bf16.mxu1 %v8906_v19  ;;  %v265_v18 = vmul.f32 %v9690_v17, %v9690_v17  ;;  %v9691_v19 = vld [vmem:[%s19680_s3 + $0x3c8] sm:$0xff]  ;;  %v9708_v58 = vld [vmem:[%s19680_s3 + $0x260] sm:$0xff]  ;;  %v8928_v11 = vpack.c.bf16 %v252_v48, %v251_v46  ;;  %v9715_v17 = vld [vmem:[%s19680_s3 + $0x3f8] sm:$0xff] }
  0xe5   :  { %1435 = vmatmul.mubr.f32.vlgmr.msra.gmra.mrb[12].mxu0 %v19685_v3  ;;  %v266_v20 = vmul.f32 %v9691_v19, %v9691_v19  ;;  %v8890_v32 = vpack.c.bf16 %v234_v15, %v233_v13  ;;  %v221_v59 = vmul.f32 %v9708_v58, %v9708_v58  ;;  %v9714_v15 = vld [vmem:[%s19680_s3 + $0x3f0] sm:$0xff]  ;;  %v11874_v45 = vld [vmem:[%s19680_s3 + $0x908] sm:$0xff]  ;;  %v11927_v58 = vld [vmem:[%s19680_s3 + $0x8a0] sm:$0xff] }
  0xe6   :  { %1505 = vmatmul.mubr.f32.vlgmr.msra.gmra.mrb[12].mxu1 %v19685_v3  ;;  %8877 = vmatpush3.bf16.msra.mxu0 %v8876_v1  ;;  %v218_v1 = vmul.f32 %v9693_v22, %v9693_v22  ;;  %v11879_v46 = vld [vmem:[%s19680_s3 + $0x890] sm:$0xff]  ;;  %v8972_v51 = vpack.c.bf16 %v11874_v45, %v11867_v43  ;;  %v12063_v5 = vld [vmem:[%s19680_s3 + $0x940] sm:$0xff] }
  0xe7   :  { %8909 = vmatpush3.bf16.msra.mxu1 %v8908_v23  ;;  %8879 = vmatprep.subr.bf16.mxu0 %v8878_v24  ;;  %v9694_v23 = vld [vmem:[%s19680_s3 + $0x340] sm:$0xff]  ;;  %v8922_v33 = vpack.c.bf16 %v266_v20, %v265_v18  ;;  %v272_v18 = vmul.f32 %v9715_v17, %v9715_v17  ;;  %v11889_v48 = vld [vmem:[%s19680_s3 + $0x990] sm:$0xff] }
  0xe8   :  { %8911 = vmatprep.subr.bf16.mxu1 %v8910_v36  ;;  %1574 = vmatprep.mubr.f32.mxu0 %v19685_v3  ;;  %v249_v24 = vmul.f32 %v9694_v23, %v9694_v23  ;;  %v9699_v36 = vld [vmem:[%s19680_s3 + $0x3d8] sm:$0xff]  ;;  %v8892_v38 = vpack.c.bf16 %v218_v1, %v217_v0  ;;  %v8902_v23 = vpack.c.bf16 %v240_v10, %v239_v8  ;;  %v11977_v10 = vld [vmem:[%s19680_s3 + $0x8b0] sm:$0xff] }
  0xe9   :  { %1644 = vmatprep.mubr.f32.mxu1 %v19685_v3  ;;  %v268_v37 = vmul.f32 %v9699_v36, %v9699_v36  ;;  %v11845_v36 = vld [vmem:[%s19680_s3 + $0x980] sm:$0xff]  ;;  %v12005_v17 = vld [vmem:[%s19680_s3 + $0x830] sm:$0xff] }
  0xea   :  { %8881 = vmatpush3.bf16.msra.mxu0 %v8880_v49  ;;  %v8924_v39 = vpack.c.bf16 %v250_v26, %v249_v24  ;;  %v9704_v49 = vld [vmem:[%s19680_s3 + $0x2e0] sm:$0xff]  ;;  %v9716_v24 = vld [vmem:[%s19680_s3 + $0x270] sm:$0xff]  ;;  %v9717_v26 = vld [vmem:[%s19680_s3 + $0x278] sm:$0xff] }
  0xeb   :  { %8913 = vmatpush3.bf16.msra.mxu1 %v8912_v54  ;;  %8883 = vmatprep.subr.bf16.mxu0 %v8882_v55  ;;  %v237_v50 = vmul.f32 %v9704_v49, %v9704_v49  ;;  %v8926_v53 = vpack.c.bf16 %v268_v37, %v267_v35  ;;  %v9706_v54 = vld [vmem:[%s19680_s3 + $0x3e0] sm:$0xff]  ;;  %v223_v25 = vmul.f32 %v9716_v24, %v9716_v24  ;;  %v11850_v37 = vld [vmem:[%s19680_s3 + $0x988] sm:$0xff]  ;;  %v11894_v49 = vld [vmem:[%s19680_s3 + $0x998] sm:$0xff] }
  0xec   :  { %8915 = vmatprep.subr.bf16.mxu1 %v8914_v56  ;;  %v269_v55 = vmul.f32 %v9706_v54, %v9706_v54  ;;  %v9707_v56 = vld [vmem:[%s19680_s3 + $0x3e8] sm:$0xff]  ;;  %v8970_v44 = vpack.c.bf16 %v11850_v37, %v11845_v36  ;;  %v11910_v54 = vld [vmem:[%s19680_s3 + $0x818] sm:$0xff] }
  0xed   :  { %v270_v57 = vmul.f32 %v9707_v56, %v9707_v56  ;;  %v8898_v12 = vpack.c.bf16 %v238_v52, %v237_v50  ;;  %v8940_v50 = vpack.c.bf16 %v11862_v42, %v11857_v41  ;;  %v8942_v52 = vpack.c.bf16 %v11884_v47, %v11879_v46 }
  0xee   :  { %8885 = vmatpush3.bf16.msra.mxu0 %v8884_v61  ;;  %v222_v61 = vmul.f32 %v9709_v60, %v9709_v60  ;;  %v8974_v56 = vpack.c.bf16 %v11894_v49, %v11889_v48  ;;  %v11938_v60 = vld [vmem:[%s19680_s3 + $0x9a0] sm:$0xff] }
  0xef   :  { %8917 = vmatpush3.bf16.msra.mxu1 %v8916_v62  ;;  %8887 = vmatprep.subr.bf16.mxu0 %v8886_v63  ;;  %v9710_v62 = vld [vmem:[%s19680_s3 + $0x360] sm:$0xff]  ;;  %v8930_v14 = vpack.c.bf16 %v270_v57, %v269_v55  ;;  %v11915_v55 = vld [vmem:[%s19680_s3 + $0x910] sm:$0xff]  ;;  %v11922_v57 = vld [vmem:[%s19680_s3 + $0x918] sm:$0xff] }
  0xf0   :  { %8919 = vmatprep.subr.bf16.mxu1 %v8918_v16  ;;  %v253_v63 = vmul.f32 %v9710_v62, %v9710_v62  ;;  %v271_v16 = vmul.f32 %v9714_v15, %v9714_v15  ;;  %v8900_v21 = vpack.c.bf16 %v222_v61, %v221_v59  ;;  %v11932_v59 = vld [vmem:[%s19680_s3 + $0x8a8] sm:$0xff]  ;;  %v8980_v15 = vpack.c.bf16 %v11972_v9, %v11965_v7 }
  0xf1   :  { %v11943_v61 = vld [vmem:[%s19680_s3 + $0x9a8] sm:$0xff]  ;;  %v8946_v2 = vpack.c.bf16 %v11932_v59, %v11927_v58 }
  0xf2   :  { %8889 = vmatpush3.bf16.msra.mxu0 %v8888_v27  ;;  %v8932_v0 = vpack.c.bf16 %v254_v4, %v253_v63  ;;  %v224_v27 = vmul.f32 %v9717_v26, %v9717_v26  ;;  %v8976_v63 = vpack.c.bf16 %v11922_v57, %v11915_v55  ;;  %v11955_v4 = vld [vmem:[%s19680_s3 + $0x820] sm:$0xff]  ;;  %v8978_v8 = vpack.c.bf16 %v11943_v61, %v11938_v60 }
  0xf3   :  { %8921 = vmatpush3.bf16.msra.mxu1 %v8920_v31  ;;  %8891 = vmatprep.subr.bf16.mxu0 %v8890_v32  ;;  %v256_v31 = vmul.f32 %v9719_v30, %v9719_v30  ;;  %v8934_v32 = vpack.c.bf16 %v272_v18, %v271_v16  ;;  %v12010_v18 = vld [vmem:[%s19680_s3 + $0x838] sm:$0xff]  ;;  %v12070_v30 = vld [vmem:[%s19680_s3 + $0x948] sm:$0xff] }
  0xf4   :  { %8923 = vmatprep.subr.bf16.mxu1 %v8922_v33  ;;  %v11833_v33 = vld [vmem:[%s19680_s3 + $0x880] sm:$0xff]  ;;  %v8952_v24 = vpack.c.bf16 %v12010_v18, %v12005_v17 }
  0xf6   :  { %8893 = vmatpush3.bf16.msra.mxu0 %v8892_v38  ;;  %v8904_v38 = vpack.c.bf16 %v224_v27, %v223_v25  ;;  %v12053_v27 = vld [vmem:[%s19680_s3 + $0x840] sm:$0xff] }
  0xf7   :  { %8925 = vmatpush3.bf16.msra.mxu1 %v8924_v39  ;;  %8895 = vmatprep.subr.bf16.mxu0 %v8894_v40  ;;  %v8936_v39 = vpack.c.bf16 %v256_v31, %v255_v29  ;;  %v8938_v40 = vpack.c.bf16 %v11838_v34, %v11833_v33  ;;  %v12075_v31 = vld [vmem:[%s19680_s3 + $0x8d0] sm:$0xff] }
  0xf8   :  { %v7003_v13 = vpop.f32.mrb[0].mxu0  ;;  %8927 = vmatprep.subr.bf16.mxu1 %v8926_v53  ;;  %v11905_v53 = vld [vmem:[%s19680_s3 + $0x810] sm:$0xff]  ;;  %20042 = vst [vmem:[#allocation2_spill] sm:$0xff] %v12075_v31 }
  0xf9   :  { %v7038_v19 = vpop.f32.mrb[0].mxu1  ;;  %v7004_v20 = vpop.f32.mrb[1].mxu0  ;;  %v8944_v62 = vpack.c.bf16 %v11910_v54, %v11905_v53 }
  0xfa   :  { %v7005_v22 = vadd.f32 %v7004_v20, %v7003_v13  ;;  %v7039_v1 = vpop.f32.mrb[1].mxu1  ;;  %8897 = vmatpush3.bf16.msra.mxu0 %v8896_v6  ;;  %v11960_v6 = vld [vmem:[%s19680_s3 + $0x828] sm:$0xff]  ;;  %v11993_v13 = vld [vmem:[%s19680_s3 + $0x9b8] sm:$0xff] }
  0xfb   :  { %v7040_v28 = vadd.f32 %v7039_v1, %v7038_v19  ;;  %8929 = vmatpush3.bf16.msra.mxu1 %v8928_v11  ;;  %8899 = vmatprep.subr.bf16.mxu0 %v8898_v12  ;;  %v11982_v11 = vld [vmem:[%s19680_s3 + $0x8b8] sm:$0xff]  ;;  %v11988_v12 = vld [vmem:[%s19680_s3 + $0x9b0] sm:$0xff]  ;;  %v12037_v1 = vld [vmem:[%s19680_s3 + $0x9c0] sm:$0xff] }
  0xfc   :  { %8931 = vmatprep.subr.bf16.mxu1 %v8930_v14  ;;  %v8948_v14 = vpack.c.bf16 %v11960_v6, %v11955_v4  ;;  %v8950_v16 = vpack.c.bf16 %v11982_v11, %v11977_v10  ;;  %v12015_v19 = vld [vmem:[%s19680_s3 + $0x930] sm:$0xff]  ;;  %v8982_v20 = vpack.c.bf16 %v11993_v13, %v11988_v12 }
  0xfd   :  { %v11840_v35 = vadd.f32 %v7040_v28, %v7005_v22  ;;  %v12032_v22 = vld [vmem:[%s19680_s3 + $0x8c8] sm:$0xff] }
  0xfe   :  { %8901 = vmatpush3.bf16.msra.mxu0 %v8900_v21  ;;  %v12022_v21 = vld [vmem:[%s19680_s3 + $0x938] sm:$0xff]  ;;  %v12058_v28 = vld [vmem:[%s19680_s3 + $0x848] sm:$0xff] }
  0xff   :  { %8933 = vmatpush3.bf16.msra.mxu1 %v8932_v0  ;;  %8903 = vmatprep.subr.bf16.mxu0 %v8902_v23  ;;  %v12027_v0 = vld [vmem:[%s19680_s3 + $0x8c0] sm:$0xff]  ;;  %v12042_v23 = vld [vmem:[%s19680_s3 + $0x9c8] sm:$0xff]  ;;  %v8984_v25 = vpack.c.bf16 %v12022_v21, %v12015_v19 }
 0x100   :  { %8935 = vmatprep.subr.bf16.mxu1 %v8934_v32  ;;  %v8954_v26 = vpack.c.bf16 %v12032_v22, %v12027_v0  ;;  %v8986_v29 = vpack.c.bf16 %v12042_v23, %v12037_v1  ;;  %v12080_v32 = vld [vmem:[%s19680_s3 + $0x8d8] sm:$0xff] }
 0x101   :  { %20043 = vst [vmem:[#allocation3_spill] sm:$0xff] %v12080_v32 }
 0x102   :  { %8905 = vmatpush3.bf16.msra.mxu0 %v8904_v38  ;;  %v12085_v38 = vld [vmem:[%s19680_s3 + $0x9d0] sm:$0xff] }
 0x103   :  { %8937 = vmatpush3.bf16.msra.mxu1 %v8936_v39  ;;  %8939 = vmatprep.subr.bf16.mxu0 %v8938_v40  ;;  %20044 = vst [vmem:[#allocation4_spill] sm:$0xff] %v12085_v38  ;;  %v12090_v39 = vld [vmem:[%s19680_s3 + $0x9d8] sm:$0xff]  ;;  %v8956_v40 = vpack.c.bf16 %v12058_v28, %v12053_v27 }
 0x104   :  { %8971 = vmatprep.subr.bf16.mxu1 %v8970_v44  ;;  %20045 = vst [vmem:[#allocation5_spill] sm:$0xff] %v12090_v39  ;;  %v8988_v44 = vpack.c.bf16 %v12070_v30, %v12063_v5 }
 0x105   :  { %1575 = vmatmul.mubr.f32.vlgmr.msra.gmra.mrb[14].mxu0 %v19685_v3 }
 0x106   :  { %1645 = vmatmul.mubr.f32.vlgmr.msra.gmra.mrb[14].mxu1 %v19685_v3  ;;  %8941 = vmatpush3.bf16.msra.mxu0 %v8940_v50  ;;  %v8958_v50 = vpack.c.bf16 %v12080_v32, %v12075_v31  ;;  %v12197_v32 = vld [vmem:[%s19680_s3 + $0x870] sm:$0xff] }
 0x107   :  { %8973 = vmatpush3.bf16.msra.mxu1 %v8972_v51  ;;  %8943 = vmatprep.subr.bf16.mxu0 %v8942_v52  ;;  %v12101_v51 = vld [vmem:[%s19680_s3 + $0x850] sm:$0xff]  ;;  %v12106_v52 = vld [vmem:[%s19680_s3 + $0x858] sm:$0xff]  ;;  %20062 = vst [vmem:[#allocation22_spill] sm:$0xff] %v12197_v32 }
 0x108   :  { %8975 = vmatprep.subr.bf16.mxu1 %v8974_v56  ;;  %1843 = vmatprep.mubr.f32.mxu0 %v19685_v3  ;;  %20046 = vst [vmem:[#allocation6_spill] sm:$0xff] %v12101_v51  ;;  %20047 = vst [vmem:[#allocation7_spill] sm:$0xff] %v12106_v52  ;;  %v12111_v56 = vld [vmem:[%s19680_s3 + $0x950] sm:$0xff] }
 0x109   :  { %1913 = vmatprep.mubr.f32.mxu1 %v19685_v3  ;;  %20048 = vst [vmem:[#allocation8_spill] sm:$0xff] %v12111_v56  ;;  %v12171_v3 = vld [vmem:[%s19680_s3 + $0x8f0] sm:$0xff] }
 0x10a   :  { %8945 = vmatpush3.bf16.msra.mxu0 %v8944_v62  ;;  %v8990_v62 = vpack.c.bf16 %v12090_v39, %v12085_v38  ;;  %20058 = vst [vmem:[#allocation18_spill] sm:$0xff] %v12171_v3 }
 0x10b   :  { %8977 = vmatpush3.bf16.msra.mxu1 %v8976_v63  ;;  %8947 = vmatprep.subr.bf16.mxu0 %v8946_v2  ;;  %v12118_v63 = vld [vmem:[%s19680_s3 + $0x958] sm:$0xff]  ;;  %v12123_v2 = vld [vmem:[%s19680_s3 + $0x8e0] sm:$0xff] }
 0x10c   :  { %8979 = vmatprep.subr.bf16.mxu1 %v8978_v8  ;;  %20049 = vst [vmem:[#allocation9_spill] sm:$0xff] %v12118_v63  ;;  %20050 = vst [vmem:[#allocation10_spill] sm:$0xff] %v12123_v2  ;;  %v12128_v8 = vld [vmem:[%s19680_s3 + $0x8e8] sm:$0xff] }
 0x10d   :  { %20051 = vst [vmem:[#allocation11_spill] sm:$0xff] %v12128_v8 }
 0x10e   :  { %8949 = vmatpush3.bf16.msra.mxu0 %v8948_v14  ;;  %v12133_v14 = vld [vmem:[%s19680_s3 + $0x9e0] sm:$0xff] }
 0x10f   :  { %8981 = vmatpush3.bf16.msra.mxu1 %v8980_v15  ;;  %8951 = vmatprep.subr.bf16.mxu0 %v8950_v16  ;;  %20052 = vst [vmem:[#allocation12_spill] sm:$0xff] %v12133_v14  ;;  %v12138_v15 = vld [vmem:[%s19680_s3 + $0x9e8] sm:$0xff]  ;;  %v8960_v16 = vpack.c.bf16 %v12106_v52, %v12101_v51 }
 0x110   :  { %8983 = vmatprep.subr.bf16.mxu1 %v8982_v20  ;;  %20053 = vst [vmem:[#allocation13_spill] sm:$0xff] %v12138_v15  ;;  %v8992_v20 = vpack.c.bf16 %v12118_v63, %v12111_v56 }
 0x112   :  { %8953 = vmatpush3.bf16.msra.mxu0 %v8952_v24  ;;  %v8962_v24 = vpack.c.bf16 %v12128_v8, %v12123_v2  ;;  %v12176_v8 = vld [vmem:[%s19680_s3 + $0x8f8] sm:$0xff] }
 0x113   :  { %8985 = vmatpush3.bf16.msra.mxu1 %v8984_v25  ;;  %8955 = vmatprep.subr.bf16.mxu0 %v8954_v26  ;;  %v12149_v25 = vld [vmem:[%s19680_s3 + $0x860] sm:$0xff]  ;;  %v12154_v26 = vld [vmem:[%s19680_s3 + $0x868] sm:$0xff]  ;;  %20059 = vst [vmem:[#allocation19_spill] sm:$0xff] %v12176_v8  ;;  %v8966_v38 = vpack.c.bf16 %v12176_v8, %v12171_v3 }
 0x114   :  { %8987 = vmatprep.subr.bf16.mxu1 %v8986_v29  ;;  %20054 = vst [vmem:[#allocation14_spill] sm:$0xff] %v12149_v25  ;;  %20055 = vst [vmem:[#allocation15_spill] sm:$0xff] %v12154_v26  ;;  %v12159_v29 = vld [vmem:[%s19680_s3 + $0x960] sm:$0xff]  ;;  %v8964_v52 = vpack.c.bf16 %v12154_v26, %v12149_v25  ;;  %v12588_v25 = vld [vmem:[%s19680_s3 + $0xa70] sm:$0xff] }
 0x115   :  { %20056 = vst [vmem:[#allocation16_spill] sm:$0xff] %v12159_v29  ;;  %v12248_v3 = vld [vmem:[%s19680_s3 + $0xa00] sm:$0xff] }
 0x116   :  { %8957 = vmatpush3.bf16.msra.mxu0 %v8956_v40  ;;  %20070 = vst [vmem:[#allocation30_spill] sm:$0xff] %v12248_v3 }
 0x117   :  { %8989 = vmatpush3.bf16.msra.mxu1 %v8988_v44  ;;  %8959 = vmatprep.subr.bf16.mxu0 %v8958_v50  ;;  %v8994_v44 = vpack.c.bf16 %v12138_v15, %v12133_v14  ;;  %v12166_v50 = vld [vmem:[%s19680_s3 + $0x968] sm:$0xff]  ;;  %v12181_v15 = vld [vmem:[%s19680_s3 + $0x9f0] sm:$0xff]  ;;  %v12186_v14 = vld [vmem:[%s19680_s3 + $0x9f8] sm:$0xff] }
 0x118   :  { %v7073_v40 = vpop.f32.mrb[2].mxu0  ;;  %8991 = vmatprep.subr.bf16.mxu1 %v8990_v62  ;;  %20057 = vst [vmem:[#allocation17_spill] sm:$0xff] %v12166_v50  ;;  %20060 = vst [vmem:[#allocation20_spill] sm:$0xff] %v12181_v15  ;;  %v8996_v39 = vpack.c.bf16 %v12166_v50, %v12159_v29  ;;  %v12577_v50 = vld [vmem:[%s19680_s3 + $0xbf8] sm:$0xff] }
 0x119   :  { %v7074_v2 = vpop.f32.mrb[3].mxu0  ;;  %v7108_v62 = vpop.f32.mrb[2].mxu1  ;;  %20061 = vst [vmem:[#allocation21_spill] sm:$0xff] %v12186_v14 }
 0x11a   :  { %v7075_v63 = vadd.f32 %v7074_v2, %v7073_v40  ;;  %8961 = vmatpush3.bf16.msra.mxu0 %v8960_v16  ;;  %v7109_v56 = vpop.f32.mrb[3].mxu1  ;;  %v12202_v2 = vld [vmem:[%s19680_s3 + $0x878] sm:$0xff]  ;;  %v12220_v40 = vld [vmem:[%s19680_s3 + $0xa80] sm:$0xff] }
 0x11b   :  { %8993 = vmatpush3.bf16.msra.mxu1 %v8992_v20  ;;  %v7110_v51 = vadd.f32 %v7109_v56, %v7108_v62  ;;  %8963 = vmatprep.subr.bf16.mxu0 %v8962_v24  ;;  %20063 = vst [vmem:[#allocation23_spill] sm:$0xff] %v12202_v2  ;;  %v12207_v56 = vld [vmem:[%s19680_s3 + $0x970] sm:$0xff]  ;;  %v8998_v20 = vpack.c.bf16 %v12186_v14, %v12181_v15  ;;  %v12215_v24 = vld [vmem:[%s19680_s3 + $0x978] sm:$0xff]  ;;  %20066 = vst [vmem:[#allocation26_spill] sm:$0xff] %v12220_v40 }
 0x11c   :  { %20064 = vst [vmem:[#allocation24_spill] sm:$0xff] %v12207_v56  ;;  %v609_v16 = vadd.f32 %v7075_v63, %v11840_v35  ;;  %8995 = vmatprep.subr.bf16.mxu1 %v8994_v44  ;;  %20065 = vst [vmem:[#allocation25_spill] sm:$0xff] %v12215_v24  ;;  %v12225_v62 = vld [vmem:[%s19680_s3 + $0xa88] sm:$0xff]  ;;  %v12230_v35 = vld [vmem:[%s19680_s3 + $0xb80] sm:$0xff]  ;;  %v8968_v14 = vpack.c.bf16 %v12202_v2, %v12197_v32  ;;  %v9000_v15 = vpack.c.bf16 %v12215_v24, %v12207_v56 }
 0x11d   :  { %20067 = vst [vmem:[#allocation27_spill] sm:$0xff] %v12225_v62  ;;  %20068 = vst [vmem:[#allocation28_spill] sm:$0xff] %v12230_v35  ;;  %v12235_v63 = vld [vmem:[%s19680_s3 + $0xb88] sm:$0xff]  ;;  %v9002_v8 = vpack.c.bf16 %v12225_v62, %v12220_v40  ;;  %v12275_v62 = vld [vmem:[%s19680_s3 + $0xa98] sm:$0xff] }
 0x11e   :  { %20069 = vst [vmem:[#allocation29_spill] sm:$0xff] %v12235_v63  ;;  %v12237_v44 = vadd.f32 %v7110_v51, %v609_v16  ;;  %8965 = vmatpush3.bf16.msra.mxu0 %v8964_v52  ;;  %v12253_v51 = vld [vmem:[%s19680_s3 + $0xa08] sm:$0xff]  ;;  %v12270_v16 = vld [vmem:[%s19680_s3 + $0xa90] sm:$0xff]  ;;  %20075 = vst [vmem:[#allocation35_spill] sm:$0xff] %v12275_v62 }
 0x11f   :  { %8997 = vmatpush3.bf16.msra.mxu1 %v8996_v39  ;;  %8967 = vmatprep.subr.bf16.mxu0 %v8966_v38  ;;  %20071 = vst [vmem:[#allocation31_spill] sm:$0xff] %v12253_v51  ;;  %v12258_v38 = vld [vmem:[%s19680_s3 + $0xb00] sm:$0xff]  ;;  %v9034_v39 = vpack.c.bf16 %v12235_v63, %v12230_v35  ;;  %v12265_v52 = vld [vmem:[%s19680_s3 + $0xb08] sm:$0xff]  ;;  %20074 = vst [vmem:[#allocation34_spill] sm:$0xff] %v12270_v16  ;;  %v9004_v35 = vpack.c.bf16 %v12253_v51, %v12248_v3 }
 0x120   :  { %20072 = vst [vmem:[#allocation32_spill] sm:$0xff] %v12258_v38  ;;  %8999 = vmatprep.subr.bf16.mxu1 %v8998_v20  ;;  %20073 = vst [vmem:[#allocation33_spill] sm:$0xff] %v12265_v52  ;;  %v12280_v20 = vld [vmem:[%s19680_s3 + $0xb90] sm:$0xff]  ;;  %v12285_v63 = vld [vmem:[%s19680_s3 + $0xb98] sm:$0xff]  ;;  %v9036_v40 = vpack.c.bf16 %v12265_v52, %v12258_v38  ;;  %v9006_v24 = vpack.c.bf16 %v12275_v62, %v12270_v16  ;;  %v20084_v38 = vmov 1.0  }
 0x121   :  { %20076 = vst [vmem:[#allocation36_spill] sm:$0xff] %v12280_v20  ;;  %20077 = vst [vmem:[#allocation37_spill] sm:$0xff] %v12285_v63  ;;  %v12296_v56 = vld [vmem:[%s19680_s3 + $0xa10] sm:$0xff]  ;;  %v12313_v62 = vld [vmem:[%s19680_s3 + $0xb18] sm:$0xff] }
 0x122   :  { %8969 = vmatpush3.bf16.msra.mxu0 %v8968_v14  ;;  %20078 = vst [vmem:[#allocation38_spill] sm:$0xff] %v12296_v56  ;;  %v12301_v14 = vld [vmem:[%s19680_s3 + $0xa18] sm:$0xff]  ;;  %20081 = vst [vmem:[#allocation41_spill] sm:$0xff] %v12313_v62  ;;  %v12318_v16 = vld [vmem:[%s19680_s3 + $0xaa0] sm:$0xff] }
 0x123   :  { %9001 = vmatpush3.bf16.msra.mxu1 %v9000_v15  ;;  %9003 = vmatprep.subr.bf16.mxu0 %v9002_v8  ;;  %20079 = vst [vmem:[#allocation39_spill] sm:$0xff] %v12301_v14  ;;  %v12306_v8 = vld [vmem:[%s19680_s3 + $0xb10] sm:$0xff]  ;;  %v9038_v15 = vpack.c.bf16 %v12285_v63, %v12280_v20  ;;  %20082 = vst [vmem:[#allocation42_spill] sm:$0xff] %v12318_v16  ;;  %v12323_v52 = vld [vmem:[%s19680_s3 + $0xaa8] sm:$0xff]  ;;  %v9008_v20 = vpack.c.bf16 %v12301_v14, %v12296_v56 }
 0x124   :  { %20080 = vst [vmem:[#allocation40_spill] sm:$0xff] %v12306_v8  ;;  %9035 = vmatprep.subr.bf16.mxu1 %v9034_v39  ;;  %20083 = vst [vmem:[#allocation43_spill] sm:$0xff] %v12323_v52  ;;  %v12329_v39 = vld [vmem:[%s19680_s3 + $0xba0] sm:$0xff]  ;;  %v12334_v63 = vld [vmem:[%s19680_s3 + $0xba8] sm:$0xff]  ;;  %v9040_v51 = vpack.c.bf16 %v12313_v62, %v12306_v8  ;;  %v9010_v3 = vpack.c.bf16 %v12323_v52, %v12318_v16 }
 0x125   :  { %1844 = vmatmul.mubr.f32.vlgmr.msra.gmra.mrb[16].mxu0 %v20084_v38  ;;  %20085 = vst [vmem:[#allocation44_spill] sm:$0xff] %v12329_v39  ;;  %20086 = vst [vmem:[#allocation45_spill] sm:$0xff] %v12334_v63  ;;  %v12346_v2 = vld [vmem:[%s19680_s3 + $0xa20] sm:$0xff]  ;;  %v12363_v52 = vld [vmem:[%s19680_s3 + $0xb28] sm:$0xff] }
 0x126   :  { %1914 = vmatmul.mubr.f32.vlgmr.msra.gmra.mrb[16].mxu1 %v20084_v38  ;;  %9005 = vmatpush3.bf16.msra.mxu0 %v9004_v35  ;;  %20087 = vst [vmem:[#allocation46_spill] sm:$0xff] %v12346_v2  ;;  %v12351_v35 = vld [vmem:[%s19680_s3 + $0xa28] sm:$0xff]  ;;  %20090 = vst [vmem:[#allocation49_spill] sm:$0xff] %v12363_v52  ;;  %v12368_v16 = vld [vmem:[%s19680_s3 + $0xab0] sm:$0xff] }
 0x127   :  { %9037 = vmatpush3.bf16.msra.mxu1 %v9036_v40  ;;  %9007 = vmatprep.subr.bf16.mxu0 %v9006_v24  ;;  %20088 = vst [vmem:[#allocation47_spill] sm:$0xff] %v12351_v35  ;;  %v12356_v24 = vld [vmem:[%s19680_s3 + $0xb20] sm:$0xff]  ;;  %v9042_v40 = vpack.c.bf16 %v12334_v63, %v12329_v39  ;;  %20091 = vst [vmem:[#allocation50_spill] sm:$0xff] %v12368_v16  ;;  %v12373_v62 = vld [vmem:[%s19680_s3 + $0xab8] sm:$0xff]  ;;  %v9012_v39 = vpack.c.bf16 %v12351_v35, %v12346_v2 }
 0x128   :  { %20089 = vst [vmem:[#allocation48_spill] sm:$0xff] %v12356_v24  ;;  %9039 = vmatprep.subr.bf16.mxu1 %v9038_v15  ;;  %20092 = vst [vmem:[#allocation51_spill] sm:$0xff] %v12373_v62  ;;  %1983 = vmatprep.mubr.f32.mxu0 %v20084_v38  ;;  %v12379_v15 = vld [vmem:[%s19680_s3 + $0xbb0] sm:$0xff]  ;;  %v12384_v63 = vld [vmem:[%s19680_s3 + $0xbb8] sm:$0xff]  ;;  %v9044_v8 = vpack.c.bf16 %v12363_v52, %v12356_v24  ;;  %v9014_v14 = vpack.c.bf16 %v12373_v62, %v12368_v16 }
 0x129   :  { %20093 = vst [vmem:[#allocation52_spill] sm:$0xff] %v12379_v15  ;;  %20094 = vst [vmem:[#allocation53_spill] sm:$0xff] %v12384_v63  ;;  %2053 = vmatprep.mubr.f32.mxu1 %v20084_v38  ;;  %v12396_v56 = vld [vmem:[%s19680_s3 + $0xa30] sm:$0xff]  ;;  %v12413_v62 = vld [vmem:[%s19680_s3 + $0xb38] sm:$0xff] }
 0x12a   :  { %9009 = vmatpush3.bf16.msra.mxu0 %v9008_v20  ;;  %20095 = vst [vmem:[#allocation54_spill] sm:$0xff] %v12396_v56  ;;  %v12401_v20 = vld [vmem:[%s19680_s3 + $0xa38] sm:$0xff]  ;;  %20098 = vst [vmem:[#allocation57_spill] sm:$0xff] %v12413_v62  ;;  %v12418_v16 = vld [vmem:[%s19680_s3 + $0xac0] sm:$0xff] }
 0x12b   :  { %9041 = vmatpush3.bf16.msra.mxu1 %v9040_v51  ;;  %9011 = vmatprep.subr.bf16.mxu0 %v9010_v3  ;;  %20096 = vst [vmem:[#allocation55_spill] sm:$0xff] %v12401_v20  ;;  %v12406_v3 = vld [vmem:[%s19680_s3 + $0xb30] sm:$0xff]  ;;  %v9046_v51 = vpack.c.bf16 %v12384_v63, %v12379_v15  ;;  %20099 = vst [vmem:[#allocation58_spill] sm:$0xff] %v12418_v16  ;;  %v12423_v52 = vld [vmem:[%s19680_s3 + $0xac8] sm:$0xff]  ;;  %v9016_v15 = vpack.c.bf16 %v12401_v20, %v12396_v56 }
 0x12c   :  { %20097 = vst [vmem:[#allocation56_spill] sm:$0xff] %v12406_v3  ;;  %9043 = vmatprep.subr.bf16.mxu1 %v9042_v40  ;;  %20100 = vst [vmem:[#allocation59_spill] sm:$0xff] %v12423_v52  ;;  %v12428_v40 = vld [vmem:[%s19680_s3 + $0xbc0] sm:$0xff]  ;;  %v12433_v63 = vld [vmem:[%s19680_s3 + $0xbc8] sm:$0xff]  ;;  %v9048_v24 = vpack.c.bf16 %v12413_v62, %v12406_v3  ;;  %v9018_v35 = vpack.c.bf16 %v12423_v52, %v12418_v16 }
 0x12d   :  { %20101 = vst [vmem:[#allocation60_spill] sm:$0xff] %v12428_v40  ;;  %20102 = vst [vmem:[#allocation61_spill] sm:$0xff] %v12433_v63  ;;  %v12444_v2 = vld [vmem:[%s19680_s3 + $0xa40] sm:$0xff]  ;;  %v12461_v52 = vld [vmem:[%s19680_s3 + $0xb48] sm:$0xff] }
 0x12e   :  { %9013 = vmatpush3.bf16.msra.mxu0 %v9012_v39  ;;  %20103 = vst [vmem:[#allocation62_spill] sm:$0xff] %v12444_v2  ;;  %v12449_v39 = vld [vmem:[%s19680_s3 + $0xa48] sm:$0xff]  ;;  %20106 = vst [vmem:[#allocation65_spill] sm:$0xff] %v12461_v52  ;;  %v12466_v16 = vld [vmem:[%s19680_s3 + $0xad0] sm:$0xff] }
 0x12f   :  { %9045 = vmatpush3.bf16.msra.mxu1 %v9044_v8  ;;  %9015 = vmatprep.subr.bf16.mxu0 %v9014_v14  ;;  %20104 = vst [vmem:[#allocation63_spill] sm:$0xff] %v12449_v39  ;;  %v12454_v14 = vld [vmem:[%s19680_s3 + $0xb40] sm:$0xff]  ;;  %v9050_v8 = vpack.c.bf16 %v12433_v63, %v12428_v40  ;;  %20107 = vst [vmem:[#allocation66_spill] sm:$0xff] %v12466_v16  ;;  %v12471_v62 = vld [vmem:[%s19680_s3 + $0xad8] sm:$0xff]  ;;  %v9020_v40 = vpack.c.bf16 %v12449_v39, %v12444_v2 }
 0x130   :  { %20105 = vst [vmem:[#allocation64_spill] sm:$0xff] %v12454_v14  ;;  %9047 = vmatprep.subr.bf16.mxu1 %v9046_v51  ;;  %20108 = vst [vmem:[#allocation67_spill] sm:$0xff] %v12471_v62  ;;  %v12476_v51 = vld [vmem:[%s19680_s3 + $0xbd0] sm:$0xff]  ;;  %v12481_v63 = vld [vmem:[%s19680_s3 + $0xbd8] sm:$0xff]  ;;  %v9052_v3 = vpack.c.bf16 %v12461_v52, %v12454_v14  ;;  %v9022_v20 = vpack.c.bf16 %v12471_v62, %v12466_v16 }
 0x131   :  { %20109 = vst [vmem:[#allocation68_spill] sm:$0xff] %v12476_v51  ;;  %20110 = vst [vmem:[#allocation69_spill] sm:$0xff] %v12481_v63  ;;  %v12492_v56 = vld [vmem:[%s19680_s3 + $0xa50] sm:$0xff]  ;;  %v12509_v62 = vld [vmem:[%s19680_s3 + $0xb58] sm:$0xff] }
 0x132   :  { %9017 = vmatpush3.bf16.msra.mxu0 %v9016_v15  ;;  %20111 = vst [vmem:[#allocation70_spill] sm:$0xff] %v12492_v56  ;;  %v12497_v15 = vld [vmem:[%s19680_s3 + $0xa58] sm:$0xff]  ;;  %20114 = vst [vmem:[#allocation73_spill] sm:$0xff] %v12509_v62  ;;  %v12514_v16 = vld [vmem:[%s19680_s3 + $0xae0] sm:$0xff] }
 0x133   :  { %9049 = vmatpush3.bf16.msra.mxu1 %v9048_v24  ;;  %9019 = vmatprep.subr.bf16.mxu0 %v9018_v35  ;;  %20112 = vst [vmem:[#allocation71_spill] sm:$0xff] %v12497_v15  ;;  %v12502_v35 = vld [vmem:[%s19680_s3 + $0xb50] sm:$0xff]  ;;  %v9054_v24 = vpack.c.bf16 %v12481_v63, %v12476_v51  ;;  %20115 = vst [vmem:[#allocation74_spill] sm:$0xff] %v12514_v16  ;;  %v12519_v52 = vld [vmem:[%s19680_s3 + $0xae8] sm:$0xff]  ;;  %v9024_v51 = vpack.c.bf16 %v12497_v15, %v12492_v56 }
 0x134   :  { %20113 = vst [vmem:[#allocation72_spill] sm:$0xff] %v12502_v35  ;;  %9051 = vmatprep.subr.bf16.mxu1 %v9050_v8  ;;  %20116 = vst [vmem:[#allocation75_spill] sm:$0xff] %v12519_v52  ;;  %v12524_v8 = vld [vmem:[%s19680_s3 + $0xbe0] sm:$0xff]  ;;  %v12529_v63 = vld [vmem:[%s19680_s3 + $0xbe8] sm:$0xff]  ;;  %v9026_v15 = vpack.c.bf16 %v12519_v52, %v12514_v16 }
 0x135   :  { %20117 = vst [vmem:[#allocation76_spill] sm:$0xff] %v12524_v8  ;;  %20118 = vst [vmem:[#allocation77_spill] sm:$0xff] %v12529_v63  ;;  %v12536_v14 = vld [vmem:[%s19680_s3 + $0xa60] sm:$0xff]  ;;  %v12541_v39 = vld [vmem:[%s19680_s3 + $0xa68] sm:$0xff]  ;;  %v9058_v52 = vpack.c.bf16 %v12529_v63, %v12524_v8 }
 0x136   :  { %9021 = vmatpush3.bf16.msra.mxu0 %v9020_v40  ;;  %v12546_v2 = vld [vmem:[%s19680_s3 + $0xb60] sm:$0xff]  ;;  %v9056_v40 = vpack.c.bf16 %v12509_v62, %v12502_v35  ;;  %v12555_v56 = vld [vmem:[%s19680_s3 + $0xb68] sm:$0xff]  ;;  %v12560_v32 = vld [vmem:[%s19680_s3 + $0xaf0] sm:$0xff] }
 0x137   :  { %9053 = vmatpush3.bf16.msra.mxu1 %v9052_v3  ;;  %9023 = vmatprep.subr.bf16.mxu0 %v9022_v20  ;;  %20119 = vst [vmem:[#allocation78_spill] sm:$0xff] %v12555_v56  ;;  %20120 = vst [vmem:[#allocation79_spill] sm:$0xff] %v12560_v32  ;;  %v12565_v20 = vld [vmem:[%s19680_s3 + $0xaf8] sm:$0xff]  ;;  %v12572_v35 = vld [vmem:[%s19680_s3 + $0xbf0] sm:$0xff]  ;;  %v9060_v63 = vpack.c.bf16 %v12555_v56, %v12546_v2  ;;  %v2060_v56 = vmul.f32 %v11857_v41, %v11857_v41 }
 0x138   :  { %20121 = vst [vmem:[#allocation80_spill] sm:$0xff] %v12565_v20  ;;  %v7143_v3 = vpop.f32.mrb[4].mxu0  ;;  %9055 = vmatprep.subr.bf16.mxu1 %v9054_v24  ;;  %v9028_v24 = vpack.c.bf16 %v12541_v39, %v12536_v14  ;;  %v9030_v8 = vpack.c.bf16 %v12565_v20, %v12560_v32  ;;  %v2108_v20 = vmul.f32 %v11845_v36, %v11845_v36 }
 0x139   :  { %v7144_v16 = vpop.f32.mrb[5].mxu0  ;;  %v7178_v62 = vpop.f32.mrb[4].mxu1  ;;  %v2109_v32 = vmul.f32 %v11850_v37, %v11850_v37 }
 0x13a   :  { %v7145_v29 = vadd.f32 %v7144_v16, %v7143_v3  ;;  %9025 = vmatpush3.bf16.msra.mxu0 %v9024_v51  ;;  %v7179_v26 = vpop.f32.mrb[5].mxu1  ;;  %v12593_v16 = vld [vmem:[%s19680_s3 + $0xa78] sm:$0xff]  ;;  %v12598_v51 = vld [vmem:[%s19680_s3 + $0xb70] sm:$0xff] }
 0x13b   :  { %9057 = vmatpush3.bf16.msra.mxu1 %v9056_v40  ;;  %v7180_v31 = vadd.f32 %v7179_v26, %v7178_v62  ;;  %9027 = vmatprep.subr.bf16.mxu0 %v9026_v15  ;;  %v12603_v3 = vld [vmem:[%s19680_s3 + $0xb78] sm:$0xff]  ;;  %v2076_v40 = vmul.f32 %v11833_v33, %v11833_v33  ;;  %v2077_v26 = vmul.f32 %v11838_v34, %v11838_v34 }
 0x13c   :  { %v749_v62 = vadd.f32 %v7145_v29, %v12237_v44  ;;  %9059 = vmatprep.subr.bf16.mxu1 %v9058_v52  ;;  %v9062_v15 = vpack.c.bf16 %v12577_v50, %v12572_v35  ;;  %v2061_v33 = vmul.f32 %v11862_v42, %v11862_v42  ;;  %v2092_v34 = vmul.f32 %v11867_v43, %v11867_v43 }
 0x13d   :  { %v2093_v29 = vmul.f32 %v11874_v45, %v11874_v45  ;;  %v9032_v36 = vpack.c.bf16 %v12593_v16, %v12588_v25  ;;  %v9064_v37 = vpack.c.bf16 %v12603_v3, %v12598_v51  ;;  %v9066_v41 = vpack.c.bf16 %v2077_v26, %v2076_v40 }
 0x13e   :  { %v12624_v44 = vadd.f32 %v7180_v31, %v749_v62  ;;  %9029 = vmatpush3.bf16.msra.mxu0 %v9028_v24  ;;  %v2078_v42 = vmul.f32 %v11879_v46, %v11879_v46  ;;  %v2079_v43 = vmul.f32 %v11884_v47, %v11884_v47  ;;  %v9098_v45 = vpack.c.bf16 %v2109_v32, %v2108_v20 }
 0x13f   :  { %9061 = vmatpush3.bf16.msra.mxu1 %v9060_v63  ;;  %9031 = vmatprep.subr.bf16.mxu0 %v9030_v8  ;;  %v2110_v31 = vmul.f32 %v11889_v48, %v11889_v48  ;;  %v2111_v52 = vmul.f32 %v11894_v49, %v11894_v49  ;;  %v9068_v24 = vpack.c.bf16 %v2061_v33, %v2060_v56 }
 0x140   :  { %9063 = vmatprep.subr.bf16.mxu1 %v9062_v15  ;;  %v9100_v62 = vpack.c.bf16 %v2093_v29, %v2092_v34  ;;  %v2062_v63 = vmul.f32 %v11905_v53, %v11905_v53  ;;  %v2063_v46 = vmul.f32 %v11910_v54, %v11910_v54  ;;  %v2094_v47 = vmul.f32 %v11915_v55, %v11915_v55 }
 0x141   :  { %v2095_v32 = vmul.f32 %v11922_v57, %v11922_v57  ;;  %v9070_v48 = vpack.c.bf16 %v2079_v43, %v2078_v42  ;;  %v2080_v49 = vmul.f32 %v11927_v58, %v11927_v58  ;;  %v2081_v56 = vmul.f32 %v11932_v59, %v11932_v59  ;;  %v20122_v42 = vld [vmem:[#allocation2_spill] sm:$0xff]  ;;  %v20123_v43 = vld [vmem:[#allocation3_spill] sm:$0xff] }
 0x142   :  { %9033 = vmatpush3.bf16.msra.mxu0 %v9032_v36  ;;  %v9102_v53 = vpack.c.bf16 %v2111_v52, %v2110_v31  ;;  %v2112_v54 = vmul.f32 %v11938_v60, %v11938_v60  ;;  %v2113_v55 = vmul.f32 %v11943_v61, %v11943_v61  ;;  %v2064_v57 = vmul.f32 %v11955_v4, %v11955_v4  ;;  %v20125_v31 = vld [vmem:[#allocation5_spill] sm:$0xff] }
 0x143   :  { %9065 = vmatpush3.bf16.msra.mxu1 %v9064_v37  ;;  %9067 = vmatprep.subr.bf16.mxu0 %v9066_v41  ;;  %v2065_v8 = vmul.f32 %v11960_v6, %v11960_v6  ;;  %v2096_v58 = vmul.f32 %v11965_v7, %v11965_v7  ;;  %v2097_v59 = vmul.f32 %v11972_v9, %v11972_v9 }
 0x144   :  { %9099 = vmatprep.subr.bf16.mxu1 %v9098_v45  ;;  %v9072_v60 = vpack.c.bf16 %v2063_v46, %v2062_v63  ;;  %v9104_v20 = vpack.c.bf16 %v2095_v32, %v2094_v47  ;;  %v9074_v61 = vpack.c.bf16 %v2081_v56, %v2080_v49  ;;  %v2082_v4 = vmul.f32 %v11977_v10, %v11977_v10  ;;  %v20124_v45 = vld [vmem:[#allocation4_spill] sm:$0xff]  ;;  %v20127_v47 = vld [vmem:[#allocation7_spill] sm:$0xff]  ;;  %v20129_v56 = vld [vmem:[#allocation9_spill] sm:$0xff] }
 0x145   :  { %1984 = vmatmul.mubr.f32.vlgmr.msra.gmra.mrb[18].mxu0 %v20084_v38  ;;  %v2083_v6 = vmul.f32 %v11982_v11, %v11982_v11  ;;  %v9106_v40 = vpack.c.bf16 %v2113_v55, %v2112_v54  ;;  %v2114_v7 = vmul.f32 %v11988_v12, %v11988_v12  ;;  %v2115_v9 = vmul.f32 %v11993_v13, %v11993_v13  ;;  %v20130_v55 = vld [vmem:[#allocation10_spill] sm:$0xff] }
 0x146   :  { %2054 = vmatmul.mubr.f32.vlgmr.msra.gmra.mrb[18].mxu1 %v20084_v38  ;;  %9069 = vmatpush3.bf16.msra.mxu0 %v9068_v24  ;;  %v9076_v26 = vpack.c.bf16 %v2065_v8, %v2064_v57  ;;  %v9108_v15 = vpack.c.bf16 %v2097_v59, %v2096_v58  ;;  %v2066_v10 = vmul.f32 %v12005_v17, %v12005_v17  ;;  %v20131_v8 = vld [vmem:[#allocation11_spill] sm:$0xff]  ;;  %v20132_v59 = vld [vmem:[#allocation12_spill] sm:$0xff] }
 0x147   :  { %9101 = vmatpush3.bf16.msra.mxu1 %v9100_v62  ;;  %9071 = vmatprep.subr.bf16.mxu0 %v9070_v48  ;;  %v2067_v11 = vmul.f32 %v12010_v18, %v12010_v18  ;;  %v2098_v33 = vmul.f32 %v12015_v19, %v12015_v19  ;;  %v2099_v12 = vmul.f32 %v12022_v21, %v12022_v21  ;;  %v20126_v62 = vld [vmem:[#allocation6_spill] sm:$0xff]  ;;  %v20128_v48 = vld [vmem:[#allocation8_spill] sm:$0xff] }
 0x148   :  { %9103 = vmatprep.subr.bf16.mxu1 %v9102_v53  ;;  %2252 = vmatprep.mubr.f32.mxu0 %v20084_v38  ;;  %v9078_v13 = vpack.c.bf16 %v2083_v6, %v2082_v4  ;;  %v2084_v34 = vmul.f32 %v12027_v0, %v12027_v0  ;;  %v2085_v29 = vmul.f32 %v12032_v22, %v12032_v22  ;;  %v20134_v4 = vld [vmem:[#allocation14_spill] sm:$0xff] }
 0x149   :  { %2322 = vmatprep.mubr.f32.mxu1 %v20084_v38  ;;  %v9110_v17 = vpack.c.bf16 %v2115_v9, %v2114_v7  ;;  %v2116_v18 = vmul.f32 %v12037_v1, %v12037_v1  ;;  %v2117_v19 = vmul.f32 %v12042_v23, %v12042_v23  ;;  %v2068_v21 = vmul.f32 %v12053_v27, %v12053_v27  ;;  %v20136_v9 = vld [vmem:[#allocation16_spill] sm:$0xff] }
 0x14a   :  { %9073 = vmatpush3.bf16.msra.mxu0 %v9072_v60  ;;  %v2069_v36 = vmul.f32 %v12058_v28, %v12058_v28  ;;  %v2100_v0 = vmul.f32 %v12063_v5, %v12063_v5  ;;  %v2101_v22 = vmul.f32 %v12070_v30, %v12070_v30  ;;  %v9080_v37 = vpack.c.bf16 %v2067_v11, %v2066_v10  ;;  %v20138_v11 = vld [vmem:[#allocation18_spill] sm:$0xff] }
 0x14b   :  { %9105 = vmatpush3.bf16.msra.mxu1 %v9104_v20  ;;  %9075 = vmatprep.subr.bf16.mxu0 %v9074_v61  ;;  %v9112_v41 = vpack.c.bf16 %v2099_v12, %v2098_v33  ;;  %v2086_v1 = vmul.f32 %v20122_v42, %v20122_v42  ;;  %v2087_v23 = vmul.f32 %v20123_v43, %v20123_v43  ;;  %v20133_v20 = vld [vmem:[#allocation13_spill] sm:$0xff]  ;;  %v20139_v12 = vld [vmem:[#allocation19_spill] sm:$0xff] }
 0x14c   :  { %9107 = vmatprep.subr.bf16.mxu1 %v9106_v40  ;;  %v9082_v27 = vpack.c.bf16 %v2085_v29, %v2084_v34  ;;  %v2118_v28 = vmul.f32 %v20124_v45, %v20124_v45  ;;  %v2119_v5 = vmul.f32 %v20125_v31, %v20125_v31  ;;  %v9114_v30 = vpack.c.bf16 %v2117_v19, %v2116_v18  ;;  %v20135_v40 = vld [vmem:[#allocation15_spill] sm:$0xff] }
 0x14d   :  { %v9084_v52 = vpack.c.bf16 %v2069_v36, %v2068_v21  ;;  %v9116_v24 = vpack.c.bf16 %v2101_v22, %v2100_v0  ;;  %v2070_v63 = vmul.f32 %v20126_v62, %v20126_v62  ;;  %v9086_v46 = vpack.c.bf16 %v2087_v23, %v2086_v1  ;;  %v20140_v21 = vld [vmem:[#allocation20_spill] sm:$0xff]  ;;  %v20141_v0 = vld [vmem:[#allocation21_spill] sm:$0xff]  ;;  %v20142_v23 = vld [vmem:[#allocation22_spill] sm:$0xff] }
 0x14e   :  { %9077 = vmatpush3.bf16.msra.mxu0 %v9076_v26  ;;  %v2071_v32 = vmul.f32 %v20127_v47, %v20127_v47  ;;  %v2102_v49 = vmul.f32 %v20128_v48, %v20128_v48  ;;  %v2103_v53 = vmul.f32 %v20129_v56, %v20129_v56  ;;  %v9118_v54 = vpack.c.bf16 %v2119_v5, %v2118_v28  ;;  %v20143_v31 = vld [vmem:[#allocation23_spill] sm:$0xff] }
 0x14f   :  { %9109 = vmatpush3.bf16.msra.mxu1 %v9108_v15  ;;  %9079 = vmatprep.subr.bf16.mxu0 %v9078_v13  ;;  %v2088_v57 = vmul.f32 %v20130_v55, %v20130_v55  ;;  %v2089_v58 = vmul.f32 %v20131_v8, %v20131_v8  ;;  %v2120_v60 = vmul.f32 %v20132_v59, %v20132_v59  ;;  %v20137_v15 = vld [vmem:[#allocation17_spill] sm:$0xff]  ;;  %v20150_v8 = vld [vmem:[#allocation30_spill] sm:$0xff]  ;;  %v20151_v59 = vld [vmem:[#allocation31_spill] sm:$0xff] }
 0x150   :  { %9111 = vmatprep.subr.bf16.mxu1 %v9110_v17  ;;  %v2121_v61 = vmul.f32 %v20133_v20, %v20133_v20  ;;  %v2072_v6 = vmul.f32 %v20134_v4, %v20134_v4  ;;  %v2073_v7 = vmul.f32 %v20135_v40, %v20135_v40  ;;  %v2104_v26 = vmul.f32 %v20136_v9, %v20136_v9  ;;  %v20149_v55 = vld [vmem:[#allocation29_spill] sm:$0xff]  ;;  %v20152_v20 = vld [vmem:[#allocation32_spill] sm:$0xff] }
 0x151   :  { %v2105_v10 = vmul.f32 %v20137_v15, %v20137_v15  ;;  %v2090_v33 = vmul.f32 %v20138_v11, %v20138_v11  ;;  %v2091_v13 = vmul.f32 %v20139_v12, %v20139_v12  ;;  %v9088_v34 = vpack.c.bf16 %v2071_v32, %v2070_v63  ;;  %v20147_v32 = vld [vmem:[#allocation27_spill] sm:$0xff]  ;;  %v20153_v4 = vld [vmem:[#allocation33_spill] sm:$0xff]  ;;  %v20157_v12 = vld [vmem:[#allocation36_spill] sm:$0xff] }
 0x152   :  { %9081 = vmatpush3.bf16.msra.mxu0 %v9080_v37  ;;  %v9120_v29 = vpack.c.bf16 %v2103_v53, %v2102_v49  ;;  %v9090_v17 = vpack.c.bf16 %v2089_v58, %v2088_v57  ;;  %v9122_v19 = vpack.c.bf16 %v2121_v61, %v2120_v60  ;;  %v2122_v36 = vmul.f32 %v20140_v21, %v20140_v21  ;;  %v20148_v53 = vld [vmem:[#allocation28_spill] sm:$0xff]  ;;  %v20159_v21 = vld [vmem:[#allocation38_spill] sm:$0xff] }
 0x153   :  { %9113 = vmatpush3.bf16.msra.mxu1 %v9112_v41  ;;  %9083 = vmatprep.subr.bf16.mxu0 %v9082_v27  ;;  %v2123_v22 = vmul.f32 %v20141_v0, %v20141_v0  ;;  %v9092_v42 = vpack.c.bf16 %v2073_v7, %v2072_v6  ;;  %v9124_v1 = vpack.c.bf16 %v2105_v10, %v2104_v26  ;;  %v20155_v7 = vld [vmem:[#allocation34_spill] sm:$0xff]  ;;  %v20156_v26 = vld [vmem:[#allocation35_spill] sm:$0xff] }
 0x154   :  { %9115 = vmatprep.subr.bf16.mxu1 %v9114_v30  ;;  %v9094_v43 = vpack.c.bf16 %v2091_v13, %v2090_v33  ;;  %v2074_v27 = vmul.f32 %v20142_v23, %v20142_v23  ;;  %v2075_v5 = vmul.f32 %v20143_v31, %v20143_v31  ;;  %v20144_v30 = vld [vmem:[#allocation24_spill] sm:$0xff]  ;;  %v2141_v48 = vmul.f32 %v20147_v32, %v20147_v32  ;;  %v20160_v0 = vld [vmem:[#allocation39_spill] sm:$0xff] }
 0x155   :  { %v9126_v56 = vpack.c.bf16 %v2123_v22, %v2122_v36  ;;  %v2173_v57 = vmul.f32 %v20149_v55, %v20149_v55  ;;  %v2124_v58 = vmul.f32 %v20150_v8, %v20150_v8  ;;  %v2125_v60 = vmul.f32 %v20151_v59, %v20151_v59  ;;  %v20165_v31 = vld [vmem:[#allocation44_spill] sm:$0xff]  ;;  %v20172_v55 = vld [vmem:[#allocation51_spill] sm:$0xff] }
 0x156   :  { %9085 = vmatpush3.bf16.msra.mxu0 %v9084_v52  ;;  %v2106_v52 = vmul.f32 %v20144_v30, %v20144_v30  ;;  %v2156_v61 = vmul.f32 %v20152_v20, %v20152_v20  ;;  %v9096_v40 = vpack.c.bf16 %v2075_v5, %v2074_v27  ;;  %v2142_v9 = vmul.f32 %v20155_v7, %v20155_v7  ;;  %v20164_v27 = vld [vmem:[#allocation43_spill] sm:$0xff]  ;;  %v20166_v30 = vld [vmem:[#allocation45_spill] sm:$0xff] }
 0x157   :  { %9117 = vmatpush3.bf16.msra.mxu1 %v9116_v24  ;;  %9087 = vmatprep.subr.bf16.mxu0 %v9086_v46  ;;  %v20145_v24 = vld [vmem:[#allocation25_spill] sm:$0xff]  ;;  %v20146_v46 = vld [vmem:[#allocation26_spill] sm:$0xff]  ;;  %v2143_v15 = vmul.f32 %v20156_v26, %v20156_v26  ;;  %v2174_v13 = vmul.f32 %v20157_v12, %v20157_v12  ;;  %v2126_v36 = vmul.f32 %v20159_v21, %v20159_v21  ;;  %v20181_v21 = vld [vmem:[#allocation60_spill] sm:$0xff] }
 0x158   :  { %v7213_v18 = vpop.f32.mrb[6].mxu0  ;;  %9119 = vmatprep.subr.bf16.mxu1 %v9118_v54  ;;  %v2107_v62 = vmul.f32 %v20145_v24, %v20145_v24  ;;  %v2140_v47 = vmul.f32 %v20146_v46, %v20146_v46  ;;  %v2172_v54 = vmul.f32 %v20148_v53, %v20148_v53  ;;  %v2127_v22 = vmul.f32 %v20160_v0, %v20160_v0  ;;  %v20167_v24 = vld [vmem:[#allocation46_spill] sm:$0xff]  ;;  %v20178_v12 = vld [vmem:[#allocation57_spill] sm:$0xff] }
 0x159   :  { %v7214_v37 = vpop.f32.mrb[7].mxu0  ;;  %v7248_v41 = vpop.f32.mrb[6].mxu1  ;;  %v2176_v5 = vmul.f32 %v20165_v31, %v20165_v31  ;;  %v20171_v53 = vld [vmem:[#allocation50_spill] sm:$0xff]  ;;  %v20182_v0 = vld [vmem:[#allocation61_spill] sm:$0xff] }
 0x15a   :  { %v7215_v45 = vadd.f32 %v7214_v37, %v7213_v18  ;;  %9089 = vmatpush3.bf16.msra.mxu0 %v9088_v34  ;;  %v7249_v28 = vpop.f32.mrb[7].mxu1  ;;  %v9128_v10 = vpack.c.bf16 %v2107_v62, %v2106_v52  ;;  %v9130_v11 = vpack.c.bf16 %v2141_v48, %v2140_v47  ;;  %v9162_v33 = vpack.c.bf16 %v2173_v57, %v2172_v54  ;;  %v20158_v34 = vld [vmem:[#allocation37_spill] sm:$0xff]  ;;  %v20161_v37 = vld [vmem:[#allocation40_spill] sm:$0xff]  ;;  %v20187_v31 = vld [vmem:[#allocation66_spill] sm:$0xff] }
 0x15b   :  { %9121 = vmatpush3.bf16.msra.mxu1 %v9120_v29  ;;  %v7250_v63 = vadd.f32 %v7249_v28, %v7248_v41  ;;  %9091 = vmatprep.subr.bf16.mxu0 %v9090_v17  ;;  %v2175_v29 = vmul.f32 %v20158_v34, %v20158_v34  ;;  %v9132_v17 = vpack.c.bf16 %v2125_v60, %v2124_v58  ;;  %v20169_v47 = vld [vmem:[#allocation48_spill] sm:$0xff]  ;;  %v20170_v48 = vld [vmem:[#allocation49_spill] sm:$0xff]  ;;  %v20179_v34 = vld [vmem:[#allocation58_spill] sm:$0xff] }
 0x15c   :  { %v889_v49 = vadd.f32 %v7215_v45, %v12624_v44  ;;  %9123 = vmatprep.subr.bf16.mxu1 %v9122_v19  ;;  %v2157_v44 = vmul.f32 %v20153_v4, %v20153_v4  ;;  %v9134_v19 = vpack.c.bf16 %v2143_v15, %v2142_v9  ;;  %v2158_v41 = vmul.f32 %v20161_v37, %v20161_v37  ;;  %v20173_v60 = vld [vmem:[#allocation52_spill] sm:$0xff]  ;;  %v20175_v9 = vld [vmem:[#allocation54_spill] sm:$0xff]  ;;  %v20176_v15 = vld [vmem:[#allocation55_spill] sm:$0xff] }
 0x15d   :  { %v2145_v45 = vmul.f32 %v20164_v27, %v20164_v27  ;;  %v9166_v28 = vpack.c.bf16 %v2175_v29, %v2174_v13  ;;  %v2177_v52 = vmul.f32 %v20166_v30, %v20166_v30  ;;  %v2128_v62 = vmul.f32 %v20167_v24, %v20167_v24  ;;  %v20183_v37 = vld [vmem:[#allocation62_spill] sm:$0xff]  ;;  %v20186_v27 = vld [vmem:[#allocation65_spill] sm:$0xff]  ;;  %v20188_v30 = vld [vmem:[#allocation67_spill] sm:$0xff] }
 0x15e   :  { %v12763_v6 = vadd.f32 %v7250_v63, %v889_v49  ;;  %9093 = vmatpush3.bf16.msra.mxu0 %v9092_v42  ;;  %v9164_v18 = vpack.c.bf16 %v2157_v44, %v2156_v61  ;;  %v20162_v42 = vld [vmem:[#allocation41_spill] sm:$0xff]  ;;  %v20168_v63 = vld [vmem:[#allocation47_spill] sm:$0xff]  ;;  %v2160_v32 = vmul.f32 %v20169_v47, %v20169_v47  ;;  %v2161_v49 = vmul.f32 %v20170_v48, %v20170_v48 }
 0x15f   :  { %9125 = vmatpush3.bf16.msra.mxu1 %v9124_v1  ;;  %9095 = vmatprep.subr.bf16.mxu0 %v9094_v43  ;;  %v2159_v1 = vmul.f32 %v20162_v42, %v20162_v42  ;;  %v20163_v43 = vld [vmem:[#allocation42_spill] sm:$0xff]  ;;  %v2129_v46 = vmul.f32 %v20168_v63, %v20168_v63  ;;  %v2146_v54 = vmul.f32 %v20171_v53, %v20171_v53  ;;  %v20174_v61 = vld [vmem:[#allocation53_spill] sm:$0xff]  ;;  %v20184_v42 = vld [vmem:[#allocation63_spill] sm:$0xff] }
 0x160   :  { %20154 = vst [vmem:[#allocation2_spill] sm:$0xff] %v12763_v6  ;;  %9127 = vmatprep.subr.bf16.mxu1 %v9126_v56  ;;  %v2144_v23 = vmul.f32 %v20163_v43, %v20163_v43  ;;  %v9136_v56 = vpack.c.bf16 %v2127_v22, %v2126_v36  ;;  %v2147_v57 = vmul.f32 %v20172_v55, %v20172_v55  ;;  %v20185_v43 = vld [vmem:[#allocation64_spill] sm:$0xff]  ;;  %v13217_v6 = vld [vmem:[%s19680_s3 + $0xd68] sm:$0xff] }
 0x161   :  { %v9168_v8 = vpack.c.bf16 %v2159_v1, %v2158_v41  ;;  %v9170_v59 = vpack.c.bf16 %v2177_v52, %v2176_v5  ;;  %v2178_v20 = vmul.f32 %v20173_v60, %v20173_v60  ;;  %v2179_v4 = vmul.f32 %v20174_v61, %v20174_v61  ;;  %v20194_v60 = vld [vmem:[#allocation73_spill] sm:$0xff]  ;;  %v20195_v61 = vld [vmem:[#allocation74_spill] sm:$0xff]  ;;  %20217 = vst [vmem:[#allocation18_spill] sm:$0xff] %v13217_v6 }
 0x162   :  { %9097 = vmatpush3.bf16.msra.mxu0 %v9096_v40  ;;  %v9138_v58 = vpack.c.bf16 %v2145_v45, %v2144_v23  ;;  %v9140_v44 = vpack.c.bf16 %v2129_v46, %v2128_v62  ;;  %v9172_v40 = vpack.c.bf16 %v2161_v49, %v2160_v32  ;;  %v9142_v7 = vpack.c.bf16 %v2147_v57, %v2146_v54  ;;  %v20189_v46 = vld [vmem:[#allocation68_spill] sm:$0xff]  ;;  %v20190_v32 = vld [vmem:[#allocation69_spill] sm:$0xff]  ;;  %v20191_v54 = vld [vmem:[#allocation70_spill] sm:$0xff] }
 0x163   :  { %9129 = vmatpush3.bf16.msra.mxu1 %v9128_v10  ;;  %9131 = vmatprep.subr.bf16.mxu0 %v9130_v11  ;;  %v2130_v26 = vmul.f32 %v20175_v9, %v20175_v9  ;;  %v2131_v10 = vmul.f32 %v20176_v15, %v20176_v15  ;;  %v20177_v11 = vld [vmem:[#allocation56_spill] sm:$0xff]  ;;  %v2163_v13 = vmul.f32 %v20178_v12, %v20178_v12  ;;  %v20192_v57 = vld [vmem:[#allocation71_spill] sm:$0xff]  ;;  %v20198_v15 = vld [vmem:[#allocation77_spill] sm:$0xff] }
 0x164   :  { %9163 = vmatprep.subr.bf16.mxu1 %v9162_v33  ;;  %v2162_v33 = vmul.f32 %v20177_v11, %v20177_v11  ;;  %v2148_v29 = vmul.f32 %v20179_v34, %v20179_v34  ;;  %v2180_v36 = vmul.f32 %v20181_v21, %v20181_v21  ;;  %v2181_v22 = vmul.f32 %v20182_v0, %v20182_v0  ;;  %v20197_v9 = vld [vmem:[#allocation76_spill] sm:$0xff] }
 0x165   :  { %2253 = vmatmul.mubr.f32.vlgmr.msra.gmra.mrb[20].mxu0 %v20084_v38  ;;  %v2132_v41 = vmul.f32 %v20183_v37, %v20183_v37  ;;  %v2133_v1 = vmul.f32 %v20184_v42, %v20184_v42  ;;  %v2164_v23 = vmul.f32 %v20185_v43, %v20185_v43  ;;  %v2165_v45 = vmul.f32 %v20186_v27, %v20186_v27 }
 0x166   :  { %2323 = vmatmul.mubr.f32.vlgmr.msra.gmra.mrb[20].mxu1 %v20084_v38  ;;  %9133 = vmatpush3.bf16.msra.mxu0 %v9132_v17  ;;  %v20180_v17 = vld [vmem:[#allocation59_spill] sm:$0xff]  ;;  %v2150_v5 = vmul.f32 %v20187_v31, %v20187_v31  ;;  %v2151_v52 = vmul.f32 %v20188_v30, %v20188_v30  ;;  %v9176_v24 = vpack.c.bf16 %v2163_v13, %v2162_v33  ;;  %v20199_v13 = vld [vmem:[#allocation78_spill] sm:$0xff] }
 0x167   :  { %9165 = vmatpush3.bf16.msra.mxu1 %v9164_v18  ;;  %9135 = vmatprep.subr.bf16.mxu0 %v9134_v19  ;;  %v2149_v18 = vmul.f32 %v20180_v17, %v20180_v17  ;;  %v9174_v19 = vpack.c.bf16 %v2179_v4, %v2178_v20  ;;  %v9178_v63 = vpack.c.bf16 %v2181_v22, %v2180_v36  ;;  %v20200_v17 = vld [vmem:[#allocation79_spill] sm:$0xff]  ;;  %v12884_v30 = vld [vmem:[%s19680_s3 + $0xc80] sm:$0xff] }
 0x168   :  { %9167 = vmatprep.subr.bf16.mxu1 %v9166_v28  ;;  %2392 = vmatprep.mubr.f32.mxu0 %v20084_v38  ;;  %v9144_v28 = vpack.c.bf16 %v2131_v10, %v2130_v26  ;;  %v2182_v47 = vmul.f32 %v20189_v46, %v20189_v46  ;;  %v2183_v48 = vmul.f32 %v20190_v32, %v20190_v32  ;;  %v12913_v46 = vld [vmem:[%s19680_s3 + $0xc08] sm:$0xff] }
 0x169   :  { %2462 = vmatprep.mubr.f32.mxu1 %v20084_v38  ;;  %v9146_v62 = vpack.c.bf16 %v2149_v18, %v2148_v29  ;;  %v9148_v49 = vpack.c.bf16 %v2133_v1, %v2132_v41  ;;  %v9150_v53 = vpack.c.bf16 %v2151_v52, %v2150_v5  ;;  %v2134_v55 = vmul.f32 %v20191_v54, %v20191_v54  ;;  %v12945_v54 = vld [vmem:[%s19680_s3 + $0xd98] sm:$0xff] }
 0x16a   :  { %9137 = vmatpush3.bf16.msra.mxu0 %v9136_v56  ;;  %v9180_v56 = vpack.c.bf16 %v2165_v45, %v2164_v23  ;;  %v2167_v20 = vmul.f32 %v20194_v60, %v20194_v60  ;;  %v2152_v4 = vmul.f32 %v20195_v61, %v20195_v61  ;;  %v2184_v26 = vmul.f32 %v20197_v9, %v20197_v9  ;;  %v12966_v60 = vld [vmem:[%s19680_s3 + $0xd10] sm:$0xff]  ;;  %v12973_v61 = vld [vmem:[%s19680_s3 + $0xd18] sm:$0xff] }
 0x16b   :  { %9169 = vmatpush3.bf16.msra.mxu1 %v9168_v8  ;;  %9139 = vmatprep.subr.bf16.mxu0 %v9138_v58  ;;  %v2135_v8 = vmul.f32 %v20192_v57, %v20192_v57  ;;  %v20193_v58 = vld [vmem:[#allocation72_spill] sm:$0xff]  ;;  %v2185_v10 = vmul.f32 %v20198_v15, %v20198_v15  ;;  %v2136_v11 = vmul.f32 %v12536_v14, %v12536_v14 }
 0x16c   :  { %9171 = vmatprep.subr.bf16.mxu1 %v9170_v59  ;;  %v2166_v59 = vmul.f32 %v20193_v58, %v20193_v58  ;;  %v2137_v33 = vmul.f32 %v12541_v39, %v12541_v39  ;;  %v2168_v12 = vmul.f32 %v12546_v2, %v12546_v2  ;;  %v2169_v34 = vmul.f32 %v20199_v13, %v20199_v13  ;;  %v12956_v58 = vld [vmem:[%s19680_s3 + $0xc10] sm:$0xff]  ;;  %v13023_v13 = vld [vmem:[%s19680_s3 + $0xd28] sm:$0xff] }
 0x16d   :  { %v9152_v29 = vpack.c.bf16 %v2135_v8, %v2134_v55  ;;  %v2154_v18 = vmul.f32 %v20200_v17, %v20200_v17  ;;  %v9186_v39 = vpack.c.bf16 %v2185_v10, %v2184_v26  ;;  %v2186_v2 = vmul.f32 %v12572_v35, %v12572_v35  ;;  %v13006_v10 = vld [vmem:[%s19680_s3 + $0xc20] sm:$0xff]  ;;  %v13039_v17 = vld [vmem:[%s19680_s3 + $0xdb0] sm:$0xff] }
 0x16e   :  { %9141 = vmatpush3.bf16.msra.mxu0 %v9140_v44  ;;  %v20196_v44 = vld [vmem:[#allocation75_spill] sm:$0xff]  ;;  %v9184_v14 = vpack.c.bf16 %v2167_v20, %v2166_v59  ;;  %v2187_v22 = vmul.f32 %v12577_v50, %v12577_v50  ;;  %v9156_v42 = vpack.c.bf16 %v2137_v33, %v2136_v11  ;;  %v9188_v1 = vpack.c.bf16 %v2169_v34, %v2168_v12  ;;  %v12961_v59 = vld [vmem:[%s19680_s3 + $0xc18] sm:$0xff]  ;;  %v13016_v33 = vld [vmem:[%s19680_s3 + $0xd20] sm:$0xff] }
 0x16f   :  { %9173 = vmatpush3.bf16.msra.mxu1 %v9172_v40  ;;  %9143 = vmatprep.subr.bf16.mxu0 %v9142_v7  ;;  %v2153_v40 = vmul.f32 %v20196_v44, %v20196_v44  ;;  %v9182_v7 = vpack.c.bf16 %v2183_v48, %v2182_v47  ;;  %v2138_v45 = vmul.f32 %v12588_v25, %v12588_v25  ;;  %v12889_v25 = vld [vmem:[%s19680_s3 + $0xc88] sm:$0xff]  ;;  %v12918_v47 = vld [vmem:[%s19680_s3 + $0xd00] sm:$0xff]  ;;  %v13028_v34 = vld [vmem:[%s19680_s3 + $0xcb0] sm:$0xff] }
 0x170   :  { %9175 = vmatprep.subr.bf16.mxu1 %v9174_v19  ;;  %v20201_v19 = vld [vmem:[#allocation80_spill] sm:$0xff]  ;;  %v2170_v50 = vmul.f32 %v12598_v51, %v12598_v51  ;;  %v2171_v35 = vmul.f32 %v12603_v3, %v12603_v3  ;;  %v9190_v5 = vpack.c.bf16 %v2187_v22, %v2186_v2  ;;  %v12896_v51 = vld [vmem:[%s19680_s3 + $0xd80] sm:$0xff]  ;;  %v12901_v3 = vld [vmem:[%s19680_s3 + $0xd88] sm:$0xff]  ;;  %v9200_v9 = vpack.c.bf16 %v12961_v59, %v12956_v58 }
 0x171   :  { %v2155_v21 = vmul.f32 %v20201_v19, %v20201_v19  ;;  %v9154_v36 = vpack.c.bf16 %v2153_v40, %v2152_v4  ;;  %v9226_v32 = vpack.c.bf16 %v12901_v3, %v12896_v51  ;;  %v12925_v48 = vld [vmem:[%s19680_s3 + $0xd08] sm:$0xff]  ;;  %v12978_v4 = vld [vmem:[%s19680_s3 + $0xca0] sm:$0xff]  ;;  %v9232_v26 = vpack.c.bf16 %v12973_v61, %v12966_v60  ;;  %v13073_v22 = vld [vmem:[%s19680_s3 + $0xd38] sm:$0xff] }
 0x172   :  { %9145 = vmatpush3.bf16.msra.mxu0 %v9144_v28  ;;  %v2139_v28 = vmul.f32 %v12593_v16, %v12593_v16  ;;  %v9228_v57 = vpack.c.bf16 %v12925_v48, %v12918_v47  ;;  %v12983_v44 = vld [vmem:[%s19680_s3 + $0xca8] sm:$0xff]  ;;  %v12989_v40 = vld [vmem:[%s19680_s3 + $0xda0] sm:$0xff] }
 0x173   :  { %9177 = vmatpush3.bf16.msra.mxu1 %v9176_v24  ;;  %9147 = vmatprep.subr.bf16.mxu0 %v9146_v62  ;;  %v9158_v27 = vpack.c.bf16 %v2155_v21, %v2154_v18  ;;  %v9192_v24 = vpack.c.bf16 %v2171_v35, %v2170_v50  ;;  %v9194_v62 = vpack.c.bf16 %v12889_v25, %v12884_v30  ;;  %v13011_v11 = vld [vmem:[%s19680_s3 + $0xc28] sm:$0xff]  ;;  %v13044_v18 = vld [vmem:[%s19680_s3 + $0xdb8] sm:$0xff] }
 0x174   :  { %9179 = vmatprep.subr.bf16.mxu1 %v9178_v63  ;;  %v9160_v52 = vpack.c.bf16 %v2139_v28, %v2138_v45  ;;  %v12908_v63 = vld [vmem:[%s19680_s3 + $0xc00] sm:$0xff]  ;;  %v9202_v15 = vpack.c.bf16 %v12983_v44, %v12978_v4  ;;  %v9204_v19 = vpack.c.bf16 %v13011_v11, %v13006_v10  ;;  %v9236_v21 = vpack.c.bf16 %v13023_v13, %v13016_v33  ;;  %v13109_v28 = vld [vmem:[%s19680_s3 + $0xc48] sm:$0xff] }
 0x175   :  { %v9196_v55 = vpack.c.bf16 %v12913_v46, %v12908_v63  ;;  %v9238_v2 = vpack.c.bf16 %v13044_v18, %v13039_v17  ;;  %v13104_v45 = vld [vmem:[%s19680_s3 + $0xc40] sm:$0xff]  ;;  %v13121_v35 = vld [vmem:[%s19680_s3 + $0xd48] sm:$0xff] }
 0x176   :  { %9149 = vmatpush3.bf16.msra.mxu0 %v9148_v49  ;;  %v12930_v49 = vld [vmem:[%s19680_s3 + $0xc90] sm:$0xff] }
 0x177   :  { %9181 = vmatpush3.bf16.msra.mxu1 %v9180_v56  ;;  %9151 = vmatprep.subr.bf16.mxu0 %v9150_v53  ;;  %v12935_v56 = vld [vmem:[%s19680_s3 + $0xc98] sm:$0xff]  ;;  %v12940_v53 = vld [vmem:[%s19680_s3 + $0xd90] sm:$0xff] }
 0x178   :  { %v7283_v0 = vpop.f32.mrb[8].mxu0  ;;  %9183 = vmatprep.subr.bf16.mxu1 %v9182_v7  ;;  %v9198_v8 = vpack.c.bf16 %v12935_v56, %v12930_v49  ;;  %v9230_v20 = vpack.c.bf16 %v12945_v54, %v12940_v53  ;;  %v12994_v7 = vld [vmem:[%s19680_s3 + $0xda8] sm:$0xff] }
 0x179   :  { %v7318_v37 = vpop.f32.mrb[8].mxu1  ;;  %v7284_v41 = vpop.f32.mrb[9].mxu0  ;;  %v9234_v12 = vpack.c.bf16 %v12994_v7, %v12989_v40 }
 0x17a   :  { %v7285_v43 = vadd.f32 %v7284_v41, %v7283_v0  ;;  %v7319_v23 = vpop.f32.mrb[9].mxu1  ;;  %9153 = vmatpush3.bf16.msra.mxu0 %v9152_v29  ;;  %v13033_v29 = vld [vmem:[%s19680_s3 + $0xcb8] sm:$0xff]  ;;  %v13083_v41 = vld [vmem:[%s19680_s3 + $0xcc8] sm:$0xff] }
 0x17b   :  { %v7320_v31 = vadd.f32 %v7319_v23, %v7318_v37  ;;  %9185 = vmatpush3.bf16.msra.mxu1 %v9184_v14  ;;  %9155 = vmatprep.subr.bf16.mxu0 %v9154_v36  ;;  %v9206_v14 = vpack.c.bf16 %v13033_v29, %v13028_v34  ;;  %v13056_v36 = vld [vmem:[%s19680_s3 + $0xc30] sm:$0xff]  ;;  %v13061_v0 = vld [vmem:[%s19680_s3 + $0xc38] sm:$0xff]  ;;  %v13078_v37 = vld [vmem:[%s19680_s3 + $0xcc0] sm:$0xff] }
 0x17c   :  { %9187 = vmatprep.subr.bf16.mxu1 %v9186_v39  ;;  %v13066_v39 = vld [vmem:[%s19680_s3 + $0xd30] sm:$0xff] }
 0x17d   :  { %v12891_v16 = vadd.f32 %v7320_v31, %v7285_v43  ;;  %v9208_v43 = vpack.c.bf16 %v13061_v0, %v13056_v36  ;;  %v9240_v23 = vpack.c.bf16 %v13073_v22, %v13066_v39  ;;  %v13114_v31 = vld [vmem:[%s19680_s3 + $0xd40] sm:$0xff] }
 0x17e   :  { %9157 = vmatpush3.bf16.msra.mxu0 %v9156_v42  ;;  %v13088_v42 = vld [vmem:[%s19680_s3 + $0xdc0] sm:$0xff] }
 0x17f   :  { %9189 = vmatpush3.bf16.msra.mxu1 %v9188_v1  ;;  %9159 = vmatprep.subr.bf16.mxu0 %v9158_v27  ;;  %v13093_v1 = vld [vmem:[%s19680_s3 + $0xdc8] sm:$0xff]  ;;  %v9210_v27 = vpack.c.bf16 %v13083_v41, %v13078_v37 }
 0x180   :  { %9191 = vmatprep.subr.bf16.mxu1 %v9190_v5  ;;  %v9242_v50 = vpack.c.bf16 %v13093_v1, %v13088_v42  ;;  %v13126_v5 = vld [vmem:[%s19680_s3 + $0xcd0] sm:$0xff] }
 0x181   :  { %20202 = vst [vmem:[#allocation3_spill] sm:$0xff] %v13126_v5 }
 0x182   :  { %9161 = vmatpush3.bf16.msra.mxu0 %v9160_v52  ;;  %v13131_v52 = vld [vmem:[%s19680_s3 + $0xcd8] sm:$0xff] }
 0x183   :  { %9193 = vmatpush3.bf16.msra.mxu1 %v9192_v24  ;;  %9195 = vmatprep.subr.bf16.mxu0 %v9194_v62  ;;  %20203 = vst [vmem:[#allocation4_spill] sm:$0xff] %v13131_v52  ;;  %v13136_v24 = vld [vmem:[%s19680_s3 + $0xdd0] sm:$0xff]  ;;  %v13141_v62 = vld [vmem:[%s19680_s3 + $0xdd8] sm:$0xff] }
 0x184   :  { %9227 = vmatprep.subr.bf16.mxu1 %v9226_v32  ;;  %20204 = vst [vmem:[#allocation5_spill] sm:$0xff] %v13136_v24  ;;  %20205 = vst [vmem:[#allocation6_spill] sm:$0xff] %v13141_v62  ;;  %v9212_v32 = vpack.c.bf16 %v13109_v28, %v13104_v45 }
 0x185   :  { %2393 = vmatmul.mubr.f32.vlgmr.msra.gmra.mrb[22].mxu0 %v20084_v38 }
 0x186   :  { %2463 = vmatmul.mubr.f32.vlgmr.msra.gmra.mrb[22].mxu1 %v20084_v38  ;;  %9197 = vmatpush3.bf16.msra.mxu0 %v9196_v55  ;;  %v9244_v55 = vpack.c.bf16 %v13121_v35, %v13114_v31 }
 0x187   :  { %9229 = vmatpush3.bf16.msra.mxu1 %v9228_v57  ;;  %9199 = vmatprep.subr.bf16.mxu0 %v9198_v8  ;;  %v9214_v57 = vpack.c.bf16 %v13131_v52, %v13126_v5  ;;  %v13152_v8 = vld [vmem:[%s19680_s3 + $0xc50] sm:$0xff] }
 0x188   :  { %9231 = vmatprep.subr.bf16.mxu1 %v9230_v20  ;;  %2662 = vmatprep.mubr.f32.mxu0 %v20084_v38  ;;  %20206 = vst [vmem:[#allocation7_spill] sm:$0xff] %v13152_v8  ;;  %v13157_v20 = vld [vmem:[%s19680_s3 + $0xc58] sm:$0xff]  ;;  %v13248_v5 = vld [vmem:[%s19680_s3 + $0xc70] sm:$0xff] }
 0x189   :  { %2732 = vmatprep.mubr.f32.mxu1 %v20084_v38  ;;  %20207 = vst [vmem:[#allocation8_spill] sm:$0xff] %v13157_v20  ;;  %20222 = vst [vmem:[#allocation23_spill] sm:$0xff] %v13248_v5 }
 0x18a   :  { %9201 = vmatpush3.bf16.msra.mxu0 %v9200_v9  ;;  %v13162_v9 = vld [vmem:[%s19680_s3 + $0xd50] sm:$0xff] }
 0x18b   :  { %9233 = vmatpush3.bf16.msra.mxu1 %v9232_v26  ;;  %9203 = vmatprep.subr.bf16.mxu0 %v9202_v15  ;;  %20208 = vst [vmem:[#allocation9_spill] sm:$0xff] %v13162_v9  ;;  %v9246_v26 = vpack.c.bf16 %v13141_v62, %v13136_v24  ;;  %v13169_v15 = vld [vmem:[%s19680_s3 + $0xd58] sm:$0xff] }
 0x18c   :  { %9235 = vmatprep.subr.bf16.mxu1 %v9234_v12  ;;  %20209 = vst [vmem:[#allocation10_spill] sm:$0xff] %v13169_v15  ;;  %v13174_v12 = vld [vmem:[%s19680_s3 + $0xce0] sm:$0xff] }
 0x18d   :  { %20210 = vst [vmem:[#allocation11_spill] sm:$0xff] %v13174_v12 }
 0x18e   :  { %9205 = vmatpush3.bf16.msra.mxu0 %v9204_v19  ;;  %v13179_v19 = vld [vmem:[%s19680_s3 + $0xce8] sm:$0xff] }
 0x18f   :  { %9237 = vmatpush3.bf16.msra.mxu1 %v9236_v21  ;;  %9207 = vmatprep.subr.bf16.mxu0 %v9206_v14  ;;  %20211 = vst [vmem:[#allocation12_spill] sm:$0xff] %v13179_v19  ;;  %v13184_v21 = vld [vmem:[%s19680_s3 + $0xde0] sm:$0xff]  ;;  %v13189_v14 = vld [vmem:[%s19680_s3 + $0xde8] sm:$0xff] }
 0x190   :  { %9239 = vmatprep.subr.bf16.mxu1 %v9238_v2  ;;  %20212 = vst [vmem:[#allocation13_spill] sm:$0xff] %v13184_v21  ;;  %20213 = vst [vmem:[#allocation14_spill] sm:$0xff] %v13189_v14  ;;  %v9216_v2 = vpack.c.bf16 %v13157_v20, %v13152_v8 }
 0x192   :  { %9209 = vmatpush3.bf16.msra.mxu0 %v9208_v43  ;;  %v9248_v43 = vpack.c.bf16 %v13169_v15, %v13162_v9 }
 0x193   :  { %9241 = vmatpush3.bf16.msra.mxu1 %v9240_v23  ;;  %9211 = vmatprep.subr.bf16.mxu0 %v9210_v27  ;;  %v9218_v23 = vpack.c.bf16 %v13179_v19, %v13174_v12  ;;  %v13200_v27 = vld [vmem:[%s19680_s3 + $0xc60] sm:$0xff]  ;;  %v13222_v19 = vld [vmem:[%s19680_s3 + $0xcf0] sm:$0xff]  ;;  %v13227_v12 = vld [vmem:[%s19680_s3 + $0xcf8] sm:$0xff] }
 0x194   :  { %9243 = vmatprep.subr.bf16.mxu1 %v9242_v50  ;;  %20214 = vst [vmem:[#allocation15_spill] sm:$0xff] %v13200_v27  ;;  %v13205_v50 = vld [vmem:[%s19680_s3 + $0xc68] sm:$0xff]  ;;  %20218 = vst [vmem:[#allocation19_spill] sm:$0xff] %v13222_v19  ;;  %v9222_v52 = vpack.c.bf16 %v13227_v12, %v13222_v19  ;;  %v13299_v19 = vld [vmem:[%s19680_s3 + $0xe00] sm:$0xff] }
 0x195   :  { %20215 = vst [vmem:[#allocation16_spill] sm:$0xff] %v13205_v50  ;;  %20219 = vst [vmem:[#allocation20_spill] sm:$0xff] %v13227_v12  ;;  %v9220_v8 = vpack.c.bf16 %v13205_v50, %v13200_v27  ;;  %v13639_v27 = vld [vmem:[%s19680_s3 + $0xe70] sm:$0xff] }
 0x196   :  { %9213 = vmatpush3.bf16.msra.mxu0 %v9212_v32  ;;  %v13210_v32 = vld [vmem:[%s19680_s3 + $0xd60] sm:$0xff]  ;;  %20230 = vst [vmem:[#allocation31_spill] sm:$0xff] %v13299_v19 }
 0x197   :  { %9245 = vmatpush3.bf16.msra.mxu1 %v9244_v55  ;;  %9215 = vmatprep.subr.bf16.mxu0 %v9214_v57  ;;  %20216 = vst [vmem:[#allocation17_spill] sm:$0xff] %v13210_v32  ;;  %v9250_v57 = vpack.c.bf16 %v13189_v14, %v13184_v21  ;;  %v13232_v14 = vld [vmem:[%s19680_s3 + $0xdf0] sm:$0xff]  ;;  %v13237_v21 = vld [vmem:[%s19680_s3 + $0xdf8] sm:$0xff]  ;;  %v9252_v24 = vpack.c.bf16 %v13217_v6, %v13210_v32 }
 0x198   :  { %v7353_v55 = vpop.f32.mrb[10].mxu0  ;;  %9247 = vmatprep.subr.bf16.mxu1 %v9246_v26  ;;  %20220 = vst [vmem:[#allocation21_spill] sm:$0xff] %v13232_v14  ;;  %20221 = vst [vmem:[#allocation22_spill] sm:$0xff] %v13237_v21 }
 0x199   :  { %v7354_v15 = vpop.f32.mrb[11].mxu0  ;;  %v7388_v26 = vpop.f32.mrb[10].mxu1 }
 0x19a   :  { %v7355_v9 = vadd.f32 %v7354_v15, %v7353_v55  ;;  %9217 = vmatpush3.bf16.msra.mxu0 %v9216_v2  ;;  %v7389_v20 = vpop.f32.mrb[11].mxu1  ;;  %v13253_v15 = vld [vmem:[%s19680_s3 + $0xc78] sm:$0xff]  ;;  %v13271_v55 = vld [vmem:[%s19680_s3 + $0xe80] sm:$0xff] }
 0x19b   :  { %9249 = vmatpush3.bf16.msra.mxu1 %v9248_v43  ;;  %v7390_v62 = vadd.f32 %v7389_v20, %v7388_v26  ;;  %9219 = vmatprep.subr.bf16.mxu0 %v9218_v23  ;;  %20223 = vst [vmem:[#allocation24_spill] sm:$0xff] %v13253_v15  ;;  %v13258_v20 = vld [vmem:[%s19680_s3 + $0xd70] sm:$0xff]  ;;  %v9254_v43 = vpack.c.bf16 %v13237_v21, %v13232_v14  ;;  %v13266_v23 = vld [vmem:[%s19680_s3 + $0xd78] sm:$0xff]  ;;  %20226 = vst [vmem:[#allocation27_spill] sm:$0xff] %v13271_v55 }
 0x19c   :  { %20224 = vst [vmem:[#allocation25_spill] sm:$0xff] %v13258_v20  ;;  %v1297_v2 = vadd.f32 %v7355_v9, %v12891_v16  ;;  %9251 = vmatprep.subr.bf16.mxu1 %v9250_v57  ;;  %20225 = vst [vmem:[#allocation26_spill] sm:$0xff] %v13266_v23  ;;  %v13276_v26 = vld [vmem:[%s19680_s3 + $0xe88] sm:$0xff]  ;;  %v13281_v16 = vld [vmem:[%s19680_s3 + $0xf80] sm:$0xff]  ;;  %v9224_v21 = vpack.c.bf16 %v13253_v15, %v13248_v5  ;;  %v9256_v14 = vpack.c.bf16 %v13266_v23, %v13258_v20 }
 0x19d   :  { %20227 = vst [vmem:[#allocation28_spill] sm:$0xff] %v13276_v26  ;;  %20228 = vst [vmem:[#allocation29_spill] sm:$0xff] %v13281_v16  ;;  %v13286_v9 = vld [vmem:[%s19680_s3 + $0xf88] sm:$0xff]  ;;  %v9258_v12 = vpack.c.bf16 %v13276_v26, %v13271_v55  ;;  %v13326_v26 = vld [vmem:[%s19680_s3 + $0xe98] sm:$0xff] }
 0x19e   :  { %20229 = vst [vmem:[#allocation30_spill] sm:$0xff] %v13286_v9  ;;  %v13288_v57 = vadd.f32 %v7390_v62, %v1297_v2  ;;  %9221 = vmatpush3.bf16.msra.mxu0 %v9220_v8  ;;  %v13304_v62 = vld [vmem:[%s19680_s3 + $0xe08] sm:$0xff]  ;;  %v13321_v2 = vld [vmem:[%s19680_s3 + $0xe90] sm:$0xff]  ;;  %20235 = vst [vmem:[#allocation36_spill] sm:$0xff] %v13326_v26 }
 0x19f   :  { %9253 = vmatpush3.bf16.msra.mxu1 %v9252_v24  ;;  %9223 = vmatprep.subr.bf16.mxu0 %v9222_v52  ;;  %20231 = vst [vmem:[#allocation32_spill] sm:$0xff] %v13304_v62  ;;  %v13309_v52 = vld [vmem:[%s19680_s3 + $0xf00] sm:$0xff]  ;;  %v9290_v24 = vpack.c.bf16 %v13286_v9, %v13281_v16  ;;  %v13316_v8 = vld [vmem:[%s19680_s3 + $0xf08] sm:$0xff]  ;;  %20234 = vst [vmem:[#allocation35_spill] sm:$0xff] %v13321_v2  ;;  %v9260_v16 = vpack.c.bf16 %v13304_v62, %v13299_v19 }
 0x1a0   :  { %20232 = vst [vmem:[#allocation33_spill] sm:$0xff] %v13309_v52  ;;  %9255 = vmatprep.subr.bf16.mxu1 %v9254_v43  ;;  %20233 = vst [vmem:[#allocation34_spill] sm:$0xff] %v13316_v8  ;;  %v13331_v43 = vld [vmem:[%s19680_s3 + $0xf90] sm:$0xff]  ;;  %v13336_v9 = vld [vmem:[%s19680_s3 + $0xf98] sm:$0xff]  ;;  %v9292_v55 = vpack.c.bf16 %v13316_v8, %v13309_v52  ;;  %v9262_v23 = vpack.c.bf16 %v13326_v26, %v13321_v2 }
 0x1a1   :  { %20236 = vst [vmem:[#allocation37_spill] sm:$0xff] %v13331_v43  ;;  %20237 = vst [vmem:[#allocation38_spill] sm:$0xff] %v13336_v9  ;;  %v13347_v20 = vld [vmem:[%s19680_s3 + $0xe10] sm:$0xff]  ;;  %v13364_v26 = vld [vmem:[%s19680_s3 + $0xf18] sm:$0xff] }
 0x1a2   :  { %9225 = vmatpush3.bf16.msra.mxu0 %v9224_v21  ;;  %20238 = vst [vmem:[#allocation39_spill] sm:$0xff] %v13347_v20  ;;  %v13352_v21 = vld [vmem:[%s19680_s3 + $0xe18] sm:$0xff]  ;;  %20241 = vst [vmem:[#allocation42_spill] sm:$0xff] %v13364_v26  ;;  %v13369_v2 = vld [vmem:[%s19680_s3 + $0xea0] sm:$0xff] }
 0x1a3   :  { %9257 = vmatpush3.bf16.msra.mxu1 %v9256_v14  ;;  %9259 = vmatprep.subr.bf16.mxu0 %v9258_v12  ;;  %20239 = vst [vmem:[#allocation40_spill] sm:$0xff] %v13352_v21  ;;  %v13357_v12 = vld [vmem:[%s19680_s3 + $0xf10] sm:$0xff]  ;;  %v9294_v14 = vpack.c.bf16 %v13336_v9, %v13331_v43  ;;  %20242 = vst [vmem:[#allocation43_spill] sm:$0xff] %v13369_v2  ;;  %v13374_v8 = vld [vmem:[%s19680_s3 + $0xea8] sm:$0xff]  ;;  %v9264_v43 = vpack.c.bf16 %v13352_v21, %v13347_v20 }
 0x1a4   :  { %20240 = vst [vmem:[#allocation41_spill] sm:$0xff] %v13357_v12  ;;  %9291 = vmatprep.subr.bf16.mxu1 %v9290_v24  ;;  %20243 = vst [vmem:[#allocation44_spill] sm:$0xff] %v13374_v8  ;;  %v13380_v24 = vld [vmem:[%s19680_s3 + $0xfa0] sm:$0xff]  ;;  %v13385_v9 = vld [vmem:[%s19680_s3 + $0xfa8] sm:$0xff]  ;;  %v9296_v52 = vpack.c.bf16 %v13364_v26, %v13357_v12  ;;  %v9266_v62 = vpack.c.bf16 %v13374_v8, %v13369_v2 }
 0x1a5   :  { %2663 = vmatmul.mubr.f32.vlgmr.msra.gmra.mrb[24].mxu0 %v20084_v38  ;;  %20244 = vst [vmem:[#allocation45_spill] sm:$0xff] %v13380_v24  ;;  %20245 = vst [vmem:[#allocation46_spill] sm:$0xff] %v13385_v9  ;;  %v13397_v19 = vld [vmem:[%s19680_s3 + $0xe20] sm:$0xff]  ;;  %v13414_v8 = vld [vmem:[%s19680_s3 + $0xf28] sm:$0xff] }
 0x1a6   :  { %2733 = vmatmul.mubr.f32.vlgmr.msra.gmra.mrb[24].mxu1 %v20084_v38  ;;  %9261 = vmatpush3.bf16.msra.mxu0 %v9260_v16  ;;  %20246 = vst [vmem:[#allocation47_spill] sm:$0xff] %v13397_v19  ;;  %v13402_v16 = vld [vmem:[%s19680_s3 + $0xe28] sm:$0xff]  ;;  %20249 = vst [vmem:[#allocation50_spill] sm:$0xff] %v13414_v8  ;;  %v13419_v2 = vld [vmem:[%s19680_s3 + $0xeb0] sm:$0xff] }
 0x1a7   :  { %9293 = vmatpush3.bf16.msra.mxu1 %v9292_v55  ;;  %9263 = vmatprep.subr.bf16.mxu0 %v9262_v23  ;;  %20247 = vst [vmem:[#allocation48_spill] sm:$0xff] %v13402_v16  ;;  %v13407_v23 = vld [vmem:[%s19680_s3 + $0xf20] sm:$0xff]  ;;  %v9298_v55 = vpack.c.bf16 %v13385_v9, %v13380_v24  ;;  %20250 = vst [vmem:[#allocation51_spill] sm:$0xff] %v13419_v2  ;;  %v13424_v26 = vld [vmem:[%s19680_s3 + $0xeb8] sm:$0xff]  ;;  %v9268_v24 = vpack.c.bf16 %v13402_v16, %v13397_v19 }
 0x1a8   :  { %20248 = vst [vmem:[#allocation49_spill] sm:$0xff] %v13407_v23  ;;  %9295 = vmatprep.subr.bf16.mxu1 %v9294_v14  ;;  %20251 = vst [vmem:[#allocation52_spill] sm:$0xff] %v13424_v26  ;;  %2802 = vmatprep.mubr.f32.mxu0 %v20084_v38  ;;  %v13430_v14 = vld [vmem:[%s19680_s3 + $0xfb0] sm:$0xff]  ;;  %v13435_v9 = vld [vmem:[%s19680_s3 + $0xfb8] sm:$0xff]  ;;  %v9300_v12 = vpack.c.bf16 %v13414_v8, %v13407_v23  ;;  %v9270_v21 = vpack.c.bf16 %v13424_v26, %v13419_v2 }
 0x1a9   :  { %20252 = vst [vmem:[#allocation53_spill] sm:$0xff] %v13430_v14  ;;  %20253 = vst [vmem:[#allocation54_spill] sm:$0xff] %v13435_v9  ;;  %2872 = vmatprep.mubr.f32.mxu1 %v20084_v38  ;;  %v13447_v20 = vld [vmem:[%s19680_s3 + $0xe30] sm:$0xff]  ;;  %v13464_v26 = vld [vmem:[%s19680_s3 + $0xf38] sm:$0xff] }
 0x1aa   :  { %9265 = vmatpush3.bf16.msra.mxu0 %v9264_v43  ;;  %20254 = vst [vmem:[#allocation55_spill] sm:$0xff] %v13447_v20  ;;  %v13452_v43 = vld [vmem:[%s19680_s3 + $0xe38] sm:$0xff]  ;;  %20257 = vst [vmem:[#allocation58_spill] sm:$0xff] %v13464_v26  ;;  %v13469_v2 = vld [vmem:[%s19680_s3 + $0xec0] sm:$0xff] }
 0x1ab   :  { %9297 = vmatpush3.bf16.msra.mxu1 %v9296_v52  ;;  %9267 = vmatprep.subr.bf16.mxu0 %v9266_v62  ;;  %20255 = vst [vmem:[#allocation56_spill] sm:$0xff] %v13452_v43  ;;  %v13457_v62 = vld [vmem:[%s19680_s3 + $0xf30] sm:$0xff]  ;;  %v9302_v52 = vpack.c.bf16 %v13435_v9, %v13430_v14  ;;  %20258 = vst [vmem:[#allocation59_spill] sm:$0xff] %v13469_v2  ;;  %v13474_v8 = vld [vmem:[%s19680_s3 + $0xec8] sm:$0xff]  ;;  %v9272_v14 = vpack.c.bf16 %v13452_v43, %v13447_v20 }
 0x1ac   :  { %20256 = vst [vmem:[#allocation57_spill] sm:$0xff] %v13457_v62  ;;  %9299 = vmatprep.subr.bf16.mxu1 %v9298_v55  ;;  %20259 = vst [vmem:[#allocation60_spill] sm:$0xff] %v13474_v8  ;;  %v13479_v55 = vld [vmem:[%s19680_s3 + $0xfc0] sm:$0xff]  ;;  %v13484_v9 = vld [vmem:[%s19680_s3 + $0xfc8] sm:$0xff]  ;;  %v9304_v23 = vpack.c.bf16 %v13464_v26, %v13457_v62  ;;  %v9274_v16 = vpack.c.bf16 %v13474_v8, %v13469_v2 }
 0x1ad   :  { %20260 = vst [vmem:[#allocation61_spill] sm:$0xff] %v13479_v55  ;;  %20261 = vst [vmem:[#allocation62_spill] sm:$0xff] %v13484_v9  ;;  %v13495_v19 = vld [vmem:[%s19680_s3 + $0xe40] sm:$0xff]  ;;  %v13512_v8 = vld [vmem:[%s19680_s3 + $0xf48] sm:$0xff] }
 0x1ae   :  { %9269 = vmatpush3.bf16.msra.mxu0 %v9268_v24  ;;  %20262 = vst [vmem:[#allocation63_spill] sm:$0xff] %v13495_v19  ;;  %v13500_v24 = vld [vmem:[%s19680_s3 + $0xe48] sm:$0xff]  ;;  %20265 = vst [vmem:[#allocation66_spill] sm:$0xff] %v13512_v8  ;;  %v13517_v2 = vld [vmem:[%s19680_s3 + $0xed0] sm:$0xff] }
 0x1af   :  { %9301 = vmatpush3.bf16.msra.mxu1 %v9300_v12  ;;  %9271 = vmatprep.subr.bf16.mxu0 %v9270_v21  ;;  %20263 = vst [vmem:[#allocation64_spill] sm:$0xff] %v13500_v24  ;;  %v13505_v21 = vld [vmem:[%s19680_s3 + $0xf40] sm:$0xff]  ;;  %v9306_v12 = vpack.c.bf16 %v13484_v9, %v13479_v55  ;;  %20266 = vst [vmem:[#allocation67_spill] sm:$0xff] %v13517_v2  ;;  %v13522_v26 = vld [vmem:[%s19680_s3 + $0xed8] sm:$0xff]  ;;  %v9276_v55 = vpack.c.bf16 %v13500_v24, %v13495_v19 }
 0x1b0   :  { %20264 = vst [vmem:[#allocation65_spill] sm:$0xff] %v13505_v21  ;;  %9303 = vmatprep.subr.bf16.mxu1 %v9302_v52  ;;  %20267 = vst [vmem:[#allocation68_spill] sm:$0xff] %v13522_v26  ;;  %v13527_v52 = vld [vmem:[%s19680_s3 + $0xfd0] sm:$0xff]  ;;  %v13532_v9 = vld [vmem:[%s19680_s3 + $0xfd8] sm:$0xff]  ;;  %v9308_v62 = vpack.c.bf16 %v13512_v8, %v13505_v21  ;;  %v9278_v43 = vpack.c.bf16 %v13522_v26, %v13517_v2 }
 0x1b1   :  { %20268 = vst [vmem:[#allocation69_spill] sm:$0xff] %v13527_v52  ;;  %20269 = vst [vmem:[#allocation70_spill] sm:$0xff] %v13532_v9  ;;  %v13543_v20 = vld [vmem:[%s19680_s3 + $0xe50] sm:$0xff]  ;;  %v13560_v26 = vld [vmem:[%s19680_s3 + $0xf58] sm:$0xff] }
 0x1b2   :  { %9273 = vmatpush3.bf16.msra.mxu0 %v9272_v14  ;;  %20270 = vst [vmem:[#allocation71_spill] sm:$0xff] %v13543_v20  ;;  %v13548_v14 = vld [vmem:[%s19680_s3 + $0xe58] sm:$0xff]  ;;  %20273 = vst [vmem:[#allocation74_spill] sm:$0xff] %v13560_v26  ;;  %v13565_v2 = vld [vmem:[%s19680_s3 + $0xee0] sm:$0xff] }
 0x1b3   :  { %9305 = vmatpush3.bf16.msra.mxu1 %v9304_v23  ;;  %9275 = vmatprep.subr.bf16.mxu0 %v9274_v16  ;;  %20271 = vst [vmem:[#allocation72_spill] sm:$0xff] %v13548_v14  ;;  %v13553_v16 = vld [vmem:[%s19680_s3 + $0xf50] sm:$0xff]  ;;  %v9310_v23 = vpack.c.bf16 %v13532_v9, %v13527_v52  ;;  %20274 = vst [vmem:[#allocation75_spill] sm:$0xff] %v13565_v2  ;;  %v13570_v8 = vld [vmem:[%s19680_s3 + $0xee8] sm:$0xff]  ;;  %v9280_v52 = vpack.c.bf16 %v13548_v14, %v13543_v20 }
 0x1b4   :  { %20272 = vst [vmem:[#allocation73_spill] sm:$0xff] %v13553_v16  ;;  %9307 = vmatprep.subr.bf16.mxu1 %v9306_v12  ;;  %20275 = vst [vmem:[#allocation76_spill] sm:$0xff] %v13570_v8  ;;  %v13575_v12 = vld [vmem:[%s19680_s3 + $0xfe0] sm:$0xff]  ;;  %v13580_v9 = vld [vmem:[%s19680_s3 + $0xfe8] sm:$0xff]  ;;  %v9282_v14 = vpack.c.bf16 %v13570_v8, %v13565_v2 }
 0x1b5   :  { %20276 = vst [vmem:[#allocation77_spill] sm:$0xff] %v13575_v12  ;;  %20277 = vst [vmem:[#allocation78_spill] sm:$0xff] %v13580_v9  ;;  %v13587_v21 = vld [vmem:[%s19680_s3 + $0xe60] sm:$0xff]  ;;  %v13592_v24 = vld [vmem:[%s19680_s3 + $0xe68] sm:$0xff]  ;;  %v9314_v8 = vpack.c.bf16 %v13580_v9, %v13575_v12 }
 0x1b6   :  { %9277 = vmatpush3.bf16.msra.mxu0 %v9276_v55  ;;  %v13597_v19 = vld [vmem:[%s19680_s3 + $0xf60] sm:$0xff]  ;;  %v9312_v55 = vpack.c.bf16 %v13560_v26, %v13553_v16  ;;  %v13606_v20 = vld [vmem:[%s19680_s3 + $0xf68] sm:$0xff]  ;;  %v13611_v15 = vld [vmem:[%s19680_s3 + $0xef0] sm:$0xff] }
 0x1b7   :  { %9309 = vmatpush3.bf16.msra.mxu1 %v9308_v62  ;;  %9279 = vmatprep.subr.bf16.mxu0 %v9278_v43  ;;  %v13616_v43 = vld [vmem:[%s19680_s3 + $0xef8] sm:$0xff]  ;;  %v13623_v16 = vld [vmem:[%s19680_s3 + $0xff0] sm:$0xff]  ;;  %v9316_v9 = vpack.c.bf16 %v13606_v20, %v13597_v19 }
 0x1b8   :  { %v7423_v62 = vpop.f32.mrb[12].mxu0  ;;  %9311 = vmatprep.subr.bf16.mxu1 %v9310_v23  ;;  %20278 = vst [vmem:[#allocation79_spill] sm:$0xff] %v13623_v16  ;;  %v13628_v5 = vld [vmem:[%s19680_s3 + $0xff8] sm:$0xff]  ;;  %v9284_v23 = vpack.c.bf16 %v13592_v24, %v13587_v21  ;;  %v9286_v12 = vpack.c.bf16 %v13616_v43, %v13611_v15 }
 0x1b9   :  { %v7424_v2 = vpop.f32.mrb[13].mxu0  ;;  %v7458_v26 = vpop.f32.mrb[12].mxu1  ;;  %20279 = vst [vmem:[#allocation80_spill] sm:$0xff] %v13628_v5 }
 0x1ba   :  { %v7425_v6 = vadd.f32 %v7424_v2, %v7423_v62  ;;  %9281 = vmatpush3.bf16.msra.mxu0 %v9280_v52  ;;  %v7459_v32 = vpop.f32.mrb[13].mxu1  ;;  %v13644_v2 = vld [vmem:[%s19680_s3 + $0xe78] sm:$0xff]  ;;  %v2895_v52 = vmul.f32 %v12884_v30, %v12884_v30  ;;  %v2896_v62 = vmul.f32 %v12889_v25, %v12889_v25  ;;  %v2927_v30 = vmul.f32 %v12896_v51, %v12896_v51 }
 0x1bb   :  { %9313 = vmatpush3.bf16.msra.mxu1 %v9312_v55  ;;  %v7460_v50 = vadd.f32 %v7459_v32, %v7458_v26  ;;  %9283 = vmatprep.subr.bf16.mxu0 %v9282_v14  ;;  %20280 = vst [vmem:[#allocation81_spill] sm:$0xff] %v13644_v2  ;;  %v9318_v32 = vpack.c.bf16 %v13628_v5, %v13623_v16  ;;  %v13656_v26 = vld [vmem:[%s19680_s3 + $0xf70] sm:$0xff]  ;;  %v13661_v14 = vld [vmem:[%s19680_s3 + $0xf78] sm:$0xff] }
 0x1bc   :  { %v1437_v55 = vadd.f32 %v7425_v6, %v13288_v57  ;;  %9315 = vmatprep.subr.bf16.mxu1 %v9314_v8  ;;  %v2928_v6 = vmul.f32 %v12901_v3, %v12901_v3  ;;  %v2879_v25 = vmul.f32 %v12908_v63, %v12908_v63  ;;  %v2880_v57 = vmul.f32 %v12913_v46, %v12913_v46 }
 0x1bd   :  { %v2911_v8 = vmul.f32 %v12918_v47, %v12918_v47  ;;  %v2912_v5 = vmul.f32 %v12925_v48, %v12925_v48  ;;  %v9288_v51 = vpack.c.bf16 %v13644_v2, %v13639_v27  ;;  %v2897_v3 = vmul.f32 %v12930_v49, %v12930_v49 }
 0x1be   :  { %v13675_v16 = vadd.f32 %v7460_v50, %v1437_v55  ;;  %9285 = vmatpush3.bf16.msra.mxu0 %v9284_v23  ;;  %v2898_v63 = vmul.f32 %v12935_v56, %v12935_v56  ;;  %v9320_v46 = vpack.c.bf16 %v13661_v14, %v13656_v26  ;;  %v9322_v47 = vpack.c.bf16 %v2896_v62, %v2895_v52 }
 0x1bf   :  { %9317 = vmatpush3.bf16.msra.mxu1 %v9316_v9  ;;  %9287 = vmatprep.subr.bf16.mxu0 %v9286_v12  ;;  %v9354_v48 = vpack.c.bf16 %v2928_v6, %v2927_v30  ;;  %v2929_v50 = vmul.f32 %v12940_v53, %v12940_v53  ;;  %v2930_v23 = vmul.f32 %v12945_v54, %v12945_v54 }
 0x1c0   :  { %9319 = vmatprep.subr.bf16.mxu1 %v9318_v32  ;;  %v9324_v55 = vpack.c.bf16 %v2880_v57, %v2879_v25  ;;  %v9356_v2 = vpack.c.bf16 %v2912_v5, %v2911_v8  ;;  %v9326_v49 = vpack.c.bf16 %v2898_v63, %v2897_v3  ;;  %v2881_v56 = vmul.f32 %v12956_v58, %v12956_v58  ;;  %v20281_v3 = vld [vmem:[#allocation3_spill] sm:$0xff]  ;;  %v20282_v63 = vld [vmem:[#allocation4_spill] sm:$0xff] }
 0x1c1   :  { %v2882_v9 = vmul.f32 %v12961_v59, %v12961_v59  ;;  %v2913_v12 = vmul.f32 %v12966_v60, %v12966_v60  ;;  %v2914_v53 = vmul.f32 %v12973_v61, %v12973_v61  ;;  %v2899_v54 = vmul.f32 %v12978_v4, %v12978_v4 }
 0x1c2   :  { %9289 = vmatpush3.bf16.msra.mxu0 %v9288_v51  ;;  %v2900_v5 = vmul.f32 %v12983_v44, %v12983_v44  ;;  %v9358_v52 = vpack.c.bf16 %v2930_v23, %v2929_v50  ;;  %v2931_v58 = vmul.f32 %v12989_v40, %v12989_v40  ;;  %v2932_v59 = vmul.f32 %v12994_v7, %v12994_v7 }
 0x1c3   :  { %9321 = vmatpush3.bf16.msra.mxu1 %v9320_v46  ;;  %9323 = vmatprep.subr.bf16.mxu0 %v9322_v47  ;;  %v2883_v60 = vmul.f32 %v13006_v10, %v13006_v10  ;;  %v2884_v61 = vmul.f32 %v13011_v11, %v13011_v11  ;;  %v2915_v4 = vmul.f32 %v13016_v33, %v13016_v33  ;;  %v20283_v47 = vld [vmem:[#allocation5_spill] sm:$0xff] }
 0x1c4   :  { %9355 = vmatprep.subr.bf16.mxu1 %v9354_v48  ;;  %v2916_v44 = vmul.f32 %v13023_v13, %v13023_v13  ;;  %v9328_v40 = vpack.c.bf16 %v2882_v9, %v2881_v56  ;;  %v2901_v7 = vmul.f32 %v13028_v34, %v13028_v34  ;;  %v2902_v62 = vmul.f32 %v13033_v29, %v13033_v29  ;;  %v20284_v48 = vld [vmem:[#allocation6_spill] sm:$0xff]  ;;  %v20286_v9 = vld [vmem:[#allocation8_spill] sm:$0xff] }
 0x1c5   :  { %2803 = vmatmul.mubr.f32.vlgmr.msra.gmra.mrb[26].mxu0 %v20084_v38  ;;  %v9360_v10 = vpack.c.bf16 %v2914_v53, %v2913_v12  ;;  %v9330_v11 = vpack.c.bf16 %v2900_v5, %v2899_v54  ;;  %v9362_v32 = vpack.c.bf16 %v2932_v59, %v2931_v58  ;;  %v2933_v33 = vmul.f32 %v13039_v17, %v13039_v17  ;;  %v20287_v53 = vld [vmem:[#allocation9_spill] sm:$0xff]  ;;  %v20288_v5 = vld [vmem:[#allocation10_spill] sm:$0xff]  ;;  %v20289_v58 = vld [vmem:[#allocation11_spill] sm:$0xff] }
 0x1c6   :  { %2873 = vmatmul.mubr.f32.vlgmr.msra.gmra.mrb[26].mxu1 %v20084_v38  ;;  %9325 = vmatpush3.bf16.msra.mxu0 %v9324_v55  ;;  %v2934_v13 = vmul.f32 %v13044_v18, %v13044_v18  ;;  %v9332_v30 = vpack.c.bf16 %v2884_v61, %v2883_v60  ;;  %v9364_v6 = vpack.c.bf16 %v2916_v44, %v2915_v4  ;;  %v20290_v60 = vld [vmem:[#allocation12_spill] sm:$0xff]  ;;  %v20291_v44 = vld [vmem:[#allocation13_spill] sm:$0xff] }
 0x1c7   :  { %9357 = vmatpush3.bf16.msra.mxu1 %v9356_v2  ;;  %9327 = vmatprep.subr.bf16.mxu0 %v9326_v49  ;;  %v9334_v34 = vpack.c.bf16 %v2902_v62, %v2901_v7  ;;  %v2885_v29 = vmul.f32 %v13056_v36, %v13056_v36  ;;  %v2886_v2 = vmul.f32 %v13061_v0, %v13061_v0  ;;  %v20285_v49 = vld [vmem:[#allocation7_spill] sm:$0xff]  ;;  %v20292_v7 = vld [vmem:[#allocation14_spill] sm:$0xff] }
 0x1c8   :  { %9359 = vmatprep.subr.bf16.mxu1 %v9358_v52  ;;  %3071 = vmatprep.mubr.f32.mxu0 %v20084_v38  ;;  %v2917_v17 = vmul.f32 %v13066_v39, %v13066_v39  ;;  %v2918_v18 = vmul.f32 %v13073_v22, %v13073_v22  ;;  %v2903_v25 = vmul.f32 %v13078_v37, %v13078_v37 }
 0x1c9   :  { %3141 = vmatprep.mubr.f32.mxu1 %v20084_v38  ;;  %v2904_v57 = vmul.f32 %v13083_v41, %v13083_v41  ;;  %v9366_v8 = vpack.c.bf16 %v2934_v13, %v2933_v33  ;;  %v2935_v36 = vmul.f32 %v13088_v42, %v13088_v42  ;;  %v2936_v0 = vmul.f32 %v13093_v1, %v13093_v1  ;;  %v20295_v13 = vld [vmem:[#allocation17_spill] sm:$0xff] }
 0x1ca   :  { %9329 = vmatpush3.bf16.msra.mxu0 %v9328_v40  ;;  %v2887_v39 = vmul.f32 %v13104_v45, %v13104_v45  ;;  %v2888_v22 = vmul.f32 %v13109_v28, %v13109_v28  ;;  %v2919_v37 = vmul.f32 %v13114_v31, %v13114_v31  ;;  %v2920_v41 = vmul.f32 %v13121_v35, %v13121_v35 }
 0x1cb   :  { %9361 = vmatpush3.bf16.msra.mxu1 %v9360_v10  ;;  %9331 = vmatprep.subr.bf16.mxu0 %v9330_v11  ;;  %v9336_v51 = vpack.c.bf16 %v2886_v2, %v2885_v29  ;;  %v2905_v42 = vmul.f32 %v20281_v3, %v20281_v3  ;;  %v2906_v1 = vmul.f32 %v20282_v63, %v20282_v63  ;;  %v20293_v10 = vld [vmem:[#allocation15_spill] sm:$0xff] }
 0x1cc   :  { %9363 = vmatprep.subr.bf16.mxu1 %v9362_v32  ;;  %v9368_v45 = vpack.c.bf16 %v2918_v18, %v2917_v17  ;;  %v9338_v46 = vpack.c.bf16 %v2904_v57, %v2903_v25  ;;  %v9370_v28 = vpack.c.bf16 %v2936_v0, %v2935_v36  ;;  %v2937_v31 = vmul.f32 %v20283_v47, %v20283_v47  ;;  %v20294_v32 = vld [vmem:[#allocation16_spill] sm:$0xff]  ;;  %v20297_v2 = vld [vmem:[#allocation19_spill] sm:$0xff] }
 0x1cd   :  { %v2938_v35 = vmul.f32 %v20284_v48, %v20284_v48  ;;  %v9340_v50 = vpack.c.bf16 %v2888_v22, %v2887_v39  ;;  %v9372_v23 = vpack.c.bf16 %v2920_v41, %v2919_v37  ;;  %v9342_v55 = vpack.c.bf16 %v2906_v1, %v2905_v42  ;;  %v20298_v18 = vld [vmem:[#allocation20_spill] sm:$0xff]  ;;  %v20299_v39 = vld [vmem:[#allocation21_spill] sm:$0xff]  ;;  %v20300_v37 = vld [vmem:[#allocation22_spill] sm:$0xff] }
 0x1ce   :  { %9333 = vmatpush3.bf16.msra.mxu0 %v9332_v30  ;;  %v2889_v56 = vmul.f32 %v20285_v49, %v20285_v49  ;;  %v2890_v12 = vmul.f32 %v20286_v9, %v20286_v9  ;;  %v2921_v54 = vmul.f32 %v20287_v53, %v20287_v53  ;;  %v2922_v52 = vmul.f32 %v20288_v5, %v20288_v5  ;;  %v20301_v1 = vld [vmem:[#allocation23_spill] sm:$0xff] }
 0x1cf   :  { %9365 = vmatpush3.bf16.msra.mxu1 %v9364_v6  ;;  %9335 = vmatprep.subr.bf16.mxu0 %v9334_v34  ;;  %v2907_v59 = vmul.f32 %v20289_v58, %v20289_v58  ;;  %v2908_v61 = vmul.f32 %v20290_v60, %v20290_v60  ;;  %v9374_v4 = vpack.c.bf16 %v2938_v35, %v2937_v31  ;;  %v20296_v6 = vld [vmem:[#allocation18_spill] sm:$0xff]  ;;  %v20303_v35 = vld [vmem:[#allocation25_spill] sm:$0xff] }
 0x1d0   :  { %9367 = vmatprep.subr.bf16.mxu1 %v9366_v8  ;;  %v2939_v40 = vmul.f32 %v20291_v44, %v20291_v44  ;;  %v2940_v62 = vmul.f32 %v20292_v7, %v20292_v7  ;;  %v2891_v11 = vmul.f32 %v20293_v10, %v20293_v10  ;;  %v2892_v33 = vmul.f32 %v20294_v32, %v20294_v32  ;;  %v20310_v44 = vld [vmem:[#allocation32_spill] sm:$0xff]  ;;  %v20311_v7 = vld [vmem:[#allocation33_spill] sm:$0xff]  ;;  %v20312_v10 = vld [vmem:[#allocation34_spill] sm:$0xff] }
 0x1d1   :  { %v2923_v30 = vmul.f32 %v20295_v13, %v20295_v13  ;;  %v2924_v34 = vmul.f32 %v20296_v6, %v20296_v6  ;;  %v9344_v29 = vpack.c.bf16 %v2890_v12, %v2889_v56  ;;  %v2909_v17 = vmul.f32 %v20297_v2, %v20297_v2  ;;  %v20305_v56 = vld [vmem:[#allocation27_spill] sm:$0xff]  ;;  %v20306_v12 = vld [vmem:[#allocation28_spill] sm:$0xff] }
 0x1d2   :  { %9337 = vmatpush3.bf16.msra.mxu0 %v9336_v51  ;;  %v2910_v25 = vmul.f32 %v20298_v18, %v20298_v18  ;;  %v9376_v57 = vpack.c.bf16 %v2922_v52, %v2921_v54  ;;  %v9346_v8 = vpack.c.bf16 %v2908_v61, %v2907_v59  ;;  %v9378_v0 = vpack.c.bf16 %v2940_v62, %v2939_v40  ;;  %v20307_v52 = vld [vmem:[#allocation29_spill] sm:$0xff]  ;;  %v20308_v59 = vld [vmem:[#allocation30_spill] sm:$0xff]  ;;  %v20309_v61 = vld [vmem:[#allocation31_spill] sm:$0xff] }
 0x1d3   :  { %9369 = vmatpush3.bf16.msra.mxu1 %v9368_v45  ;;  %9339 = vmatprep.subr.bf16.mxu0 %v9338_v46  ;;  %v2941_v22 = vmul.f32 %v20299_v39, %v20299_v39  ;;  %v2942_v41 = vmul.f32 %v20300_v37, %v20300_v37  ;;  %v9348_v42 = vpack.c.bf16 %v2892_v33, %v2891_v11  ;;  %v20302_v46 = vld [vmem:[#allocation24_spill] sm:$0xff]  ;;  %v20313_v33 = vld [vmem:[#allocation35_spill] sm:$0xff] }
 0x1d4   :  { %9371 = vmatprep.subr.bf16.mxu1 %v9370_v28  ;;  %v9380_v63 = vpack.c.bf16 %v2924_v34, %v2923_v30  ;;  %v2893_v45 = vmul.f32 %v20301_v1, %v20301_v1  ;;  %v2894_v28 = vmul.f32 %v20302_v46, %v20302_v46  ;;  %v9350_v48 = vpack.c.bf16 %v2910_v25, %v2909_v17  ;;  %v20314_v30 = vld [vmem:[#allocation36_spill] sm:$0xff]  ;;  %v20315_v17 = vld [vmem:[#allocation37_spill] sm:$0xff]  ;;  %v20316_v25 = vld [vmem:[#allocation38_spill] sm:$0xff] }
 0x1d5   :  { %v2959_v9 = vmul.f32 %v20305_v56, %v20305_v56  ;;  %v2960_v53 = vmul.f32 %v20306_v12, %v20306_v12  ;;  %v9382_v5 = vpack.c.bf16 %v2942_v41, %v2941_v22  ;;  %v2991_v58 = vmul.f32 %v20307_v52, %v20307_v52  ;;  %v20317_v39 = vld [vmem:[#allocation39_spill] sm:$0xff]  ;;  %v20318_v37 = vld [vmem:[#allocation40_spill] sm:$0xff] }
 0x1d6   :  { %9341 = vmatpush3.bf16.msra.mxu0 %v9340_v50  ;;  %v2925_v50 = vmul.f32 %v20303_v35, %v20303_v35  ;;  %v2992_v60 = vmul.f32 %v20308_v59, %v20308_v59  ;;  %v2944_v40 = vmul.f32 %v20310_v44, %v20310_v44  ;;  %v2975_v62 = vmul.f32 %v20311_v7, %v20311_v7  ;;  %v20321_v1 = vld [vmem:[#allocation43_spill] sm:$0xff]  ;;  %v20322_v46 = vld [vmem:[#allocation44_spill] sm:$0xff]  ;;  %v20324_v35 = vld [vmem:[#allocation46_spill] sm:$0xff] }
 0x1d7   :  { %9373 = vmatpush3.bf16.msra.mxu1 %v9372_v23  ;;  %9343 = vmatprep.subr.bf16.mxu0 %v9342_v55  ;;  %v20304_v23 = vld [vmem:[#allocation26_spill] sm:$0xff]  ;;  %v9352_v32 = vpack.c.bf16 %v2894_v28, %v2893_v45  ;;  %v2961_v13 = vmul.f32 %v20313_v33, %v20313_v33  ;;  %v2962_v6 = vmul.f32 %v20314_v30, %v20314_v30  ;;  %v20329_v52 = vld [vmem:[#allocation51_spill] sm:$0xff]  ;;  %v20330_v59 = vld [vmem:[#allocation52_spill] sm:$0xff] }
 0x1d8   :  { %v7493_v36 = vpop.f32.mrb[14].mxu0  ;;  %9375 = vmatprep.subr.bf16.mxu1 %v9374_v4  ;;  %v2926_v55 = vmul.f32 %v20304_v23, %v20304_v23  ;;  %v2943_v4 = vmul.f32 %v20309_v61, %v20309_v61  ;;  %v9418_v2 = vpack.c.bf16 %v2992_v60, %v2991_v58  ;;  %v2993_v18 = vmul.f32 %v20315_v17, %v20315_v17  ;;  %v20325_v23 = vld [vmem:[#allocation47_spill] sm:$0xff]  ;;  %v20336_v17 = vld [vmem:[#allocation58_spill] sm:$0xff] }
 0x1d9   :  { %v7494_v51 = vpop.f32.mrb[15].mxu0  ;;  %v7528_v3 = vpop.f32.mrb[14].mxu1  ;;  %v2945_v22 = vmul.f32 %v20317_v39, %v20317_v39  ;;  %v2946_v41 = vmul.f32 %v20318_v37, %v20318_v37  ;;  %v2963_v45 = vmul.f32 %v20321_v1, %v20321_v1  ;;  %v2964_v28 = vmul.f32 %v20322_v46, %v20322_v46  ;;  %v20339_v39 = vld [vmem:[#allocation61_spill] sm:$0xff]  ;;  %v20340_v37 = vld [vmem:[#allocation62_spill] sm:$0xff] }
 0x1da   :  { %v7495_v47 = vadd.f32 %v7494_v51, %v7493_v36  ;;  %9345 = vmatpush3.bf16.msra.mxu0 %v9344_v29  ;;  %v7529_v31 = vpop.f32.mrb[15].mxu1  ;;  %v9384_v34 = vpack.c.bf16 %v2926_v55, %v2925_v50  ;;  %v9386_v29 = vpack.c.bf16 %v2960_v53, %v2959_v9  ;;  %v20319_v51 = vld [vmem:[#allocation41_spill] sm:$0xff]  ;;  %v2996_v50 = vmul.f32 %v20324_v35, %v20324_v35  ;;  %v20328_v53 = vld [vmem:[#allocation50_spill] sm:$0xff]  ;;  %v20346_v35 = vld [vmem:[#allocation68_spill] sm:$0xff] }
 0x1db   :  { %9377 = vmatpush3.bf16.msra.mxu1 %v9376_v57  ;;  %v7530_v49 = vadd.f32 %v7529_v31, %v7528_v3  ;;  %9347 = vmatprep.subr.bf16.mxu0 %v9346_v8  ;;  %v2994_v57 = vmul.f32 %v20316_v25, %v20316_v25  ;;  %v9388_v8 = vpack.c.bf16 %v2944_v40, %v2943_v4  ;;  %v20323_v31 = vld [vmem:[#allocation45_spill] sm:$0xff]  ;;  %v20337_v25 = vld [vmem:[#allocation59_spill] sm:$0xff]  ;;  %v20344_v46 = vld [vmem:[#allocation66_spill] sm:$0xff] }
 0x1dc   :  { %v1577_v54 = vadd.f32 %v7495_v47, %v13675_v16  ;;  %9379 = vmatprep.subr.bf16.mxu1 %v9378_v0  ;;  %v2976_v16 = vmul.f32 %v20312_v10, %v20312_v10  ;;  %v9390_v0 = vpack.c.bf16 %v2962_v6, %v2961_v13  ;;  %v2977_v3 = vmul.f32 %v20319_v51, %v20319_v51  ;;  %v20327_v9 = vld [vmem:[#allocation49_spill] sm:$0xff]  ;;  %v20333_v13 = vld [vmem:[#allocation55_spill] sm:$0xff]  ;;  %v20334_v6 = vld [vmem:[#allocation56_spill] sm:$0xff] }
 0x1dd   :  { %v9422_v47 = vpack.c.bf16 %v2994_v57, %v2993_v18  ;;  %v2947_v55 = vmul.f32 %v20325_v23, %v20325_v23  ;;  %v2979_v12 = vmul.f32 %v20327_v9, %v20327_v9  ;;  %v2965_v58 = vmul.f32 %v20329_v52, %v20329_v52  ;;  %v20331_v40 = vld [vmem:[#allocation53_spill] sm:$0xff]  ;;  %v20341_v51 = vld [vmem:[#allocation63_spill] sm:$0xff] }
 0x1de   :  { %v13814_v11 = vadd.f32 %v7530_v49, %v1577_v54  ;;  %9349 = vmatpush3.bf16.msra.mxu0 %v9348_v42  ;;  %v9420_v36 = vpack.c.bf16 %v2976_v16, %v2975_v62  ;;  %v20320_v42 = vld [vmem:[#allocation42_spill] sm:$0xff]  ;;  %v20326_v49 = vld [vmem:[#allocation48_spill] sm:$0xff]  ;;  %v2980_v54 = vmul.f32 %v20328_v53, %v20328_v53  ;;  %v2966_v60 = vmul.f32 %v20330_v59, %v20330_v59  ;;  %v20343_v1 = vld [vmem:[#allocation65_spill] sm:$0xff] }
 0x1df   :  { %9381 = vmatpush3.bf16.msra.mxu1 %v9380_v63  ;;  %9351 = vmatprep.subr.bf16.mxu0 %v9350_v48  ;;  %v2978_v63 = vmul.f32 %v20320_v42, %v20320_v42  ;;  %v2995_v48 = vmul.f32 %v20323_v31, %v20323_v31  ;;  %v2948_v56 = vmul.f32 %v20326_v49, %v20326_v49  ;;  %v20332_v62 = vld [vmem:[#allocation54_spill] sm:$0xff]  ;;  %v20342_v42 = vld [vmem:[#allocation64_spill] sm:$0xff]  ;;  %v20345_v31 = vld [vmem:[#allocation67_spill] sm:$0xff] }
 0x1e0   :  { %9383 = vmatprep.subr.bf16.mxu1 %v9382_v5  ;;  %v9392_v5 = vpack.c.bf16 %v2946_v41, %v2945_v22  ;;  %v9394_v4 = vpack.c.bf16 %v2964_v28, %v2963_v45  ;;  %v2997_v7 = vmul.f32 %v20331_v40, %v20331_v40  ;;  %v2998_v10 = vmul.f32 %v20332_v62, %v20332_v62  ;;  %v20352_v40 = vld [vmem:[#allocation74_spill] sm:$0xff]  ;;  %v20353_v62 = vld [vmem:[#allocation75_spill] sm:$0xff] }
 0x1e1   :  { %v9424_v61 = vpack.c.bf16 %v2978_v63, %v2977_v3  ;;  %v9426_v44 = vpack.c.bf16 %v2996_v50, %v2995_v48  ;;  %v9396_v16 = vpack.c.bf16 %v2948_v56, %v2947_v55  ;;  %v9398_v33 = vpack.c.bf16 %v2966_v60, %v2965_v58  ;;  %v20347_v56 = vld [vmem:[#allocation69_spill] sm:$0xff]  ;;  %v20349_v58 = vld [vmem:[#allocation71_spill] sm:$0xff]  ;;  %v20350_v60 = vld [vmem:[#allocation72_spill] sm:$0xff] }
 0x1e2   :  { %9353 = vmatpush3.bf16.msra.mxu0 %v9352_v32  ;;  %v9428_v32 = vpack.c.bf16 %v2980_v54, %v2979_v12  ;;  %v2949_v30 = vmul.f32 %v20333_v13, %v20333_v13  ;;  %v2982_v18 = vmul.f32 %v20336_v17, %v20336_v17  ;;  %v2967_v57 = vmul.f32 %v20337_v25, %v20337_v25  ;;  %v20348_v12 = vld [vmem:[#allocation70_spill] sm:$0xff]  ;;  %v20355_v13 = vld [vmem:[#allocation77_spill] sm:$0xff] }
 0x1e3   :  { %9385 = vmatpush3.bf16.msra.mxu1 %v9384_v34  ;;  %9387 = vmatprep.subr.bf16.mxu0 %v9386_v29  ;;  %v2950_v34 = vmul.f32 %v20334_v6, %v20334_v6  ;;  %v20335_v29 = vld [vmem:[#allocation57_spill] sm:$0xff]  ;;  %v2999_v22 = vmul.f32 %v20339_v39, %v20339_v39  ;;  %v3000_v41 = vmul.f32 %v20340_v37, %v20340_v37  ;;  %v20356_v6 = vld [vmem:[#allocation78_spill] sm:$0xff]  ;;  %v20357_v39 = vld [vmem:[#allocation79_spill] sm:$0xff] }
 0x1e4   :  { %9419 = vmatprep.subr.bf16.mxu1 %v9418_v2  ;;  %v2981_v2 = vmul.f32 %v20335_v29, %v20335_v29  ;;  %v2951_v3 = vmul.f32 %v20341_v51, %v20341_v51  ;;  %v2952_v63 = vmul.f32 %v20342_v42, %v20342_v42  ;;  %v2983_v45 = vmul.f32 %v20343_v1, %v20343_v1  ;;  %v20359_v1 = vld [vmem:[#allocation81_spill] sm:$0xff] }
 0x1e5   :  { %3072 = vmatmul.mubr.f32.vlgmr.msra.gmra.mrb[28].mxu0 %v20084_v38  ;;  %v2984_v28 = vmul.f32 %v20344_v46, %v20344_v46  ;;  %v2969_v48 = vmul.f32 %v20345_v31, %v20345_v31  ;;  %v2970_v50 = vmul.f32 %v20346_v35, %v20346_v35  ;;  %v9434_v49 = vpack.c.bf16 %v3000_v41, %v2999_v22  ;;  %v20358_v22 = vld [vmem:[#allocation80_spill] sm:$0xff] }
 0x1e6   :  { %3142 = vmatmul.mubr.f32.vlgmr.msra.gmra.mrb[28].mxu1 %v20084_v38  ;;  %9389 = vmatpush3.bf16.msra.mxu0 %v9388_v8  ;;  %v20338_v8 = vld [vmem:[#allocation60_spill] sm:$0xff]  ;;  %v9432_v23 = vpack.c.bf16 %v2982_v18, %v2981_v2  ;;  %v3001_v9 = vmul.f32 %v20347_v56, %v20347_v56  ;;  %v3002_v53 = vmul.f32 %v20348_v12, %v20348_v12  ;;  %v20360_v12 = vld [vmem:[#allocation2_spill] sm:$0xff] }
 0x1e7   :  { %9421 = vmatpush3.bf16.msra.mxu1 %v9420_v36  ;;  %9391 = vmatprep.subr.bf16.mxu0 %v9390_v0  ;;  %v2968_v36 = vmul.f32 %v20338_v8, %v20338_v8  ;;  %v9430_v0 = vpack.c.bf16 %v2998_v10, %v2997_v7  ;;  %v9404_v54 = vpack.c.bf16 %v2952_v63, %v2951_v3 }
 0x1e8   :  { %9423 = vmatprep.subr.bf16.mxu1 %v9422_v47  ;;  %3211 = vmatprep.mubr.f32.mxu0 %v20084_v38  ;;  %v9400_v47 = vpack.c.bf16 %v2950_v34, %v2949_v30  ;;  %v9406_v52 = vpack.c.bf16 %v2970_v50, %v2969_v48  ;;  %v2953_v59 = vmul.f32 %v20349_v58, %v20349_v58 }
 0x1e9   :  { %3281 = vmatprep.mubr.f32.mxu1 %v20084_v38  ;;  %v9402_v55 = vpack.c.bf16 %v2968_v36, %v2967_v57  ;;  %v2986_v7 = vmul.f32 %v20352_v40, %v20352_v40  ;;  %v2971_v10 = vmul.f32 %v20353_v62, %v20353_v62  ;;  %v3003_v30 = vmul.f32 %v20355_v13, %v20355_v13 }
 0x1ea   :  { %9393 = vmatpush3.bf16.msra.mxu0 %v9392_v5  ;;  %v9436_v5 = vpack.c.bf16 %v2984_v28, %v2983_v45  ;;  %v3004_v34 = vmul.f32 %v20356_v6, %v20356_v6  ;;  %v2955_v29 = vmul.f32 %v13587_v21, %v13587_v21  ;;  %v2956_v2 = vmul.f32 %v13592_v24, %v13592_v24 }
 0x1eb   :  { %9425 = vmatpush3.bf16.msra.mxu1 %v9424_v61  ;;  %9395 = vmatprep.subr.bf16.mxu0 %v9394_v4  ;;  %v2954_v61 = vmul.f32 %v20350_v60, %v20350_v60  ;;  %v20351_v4 = vld [vmem:[#allocation73_spill] sm:$0xff]  ;;  %v2987_v17 = vmul.f32 %v13597_v19, %v13597_v19  ;;  %v2988_v18 = vmul.f32 %v13606_v20, %v13606_v20 }
 0x1ec   :  { %9427 = vmatprep.subr.bf16.mxu1 %v9426_v44  ;;  %v2985_v44 = vmul.f32 %v20351_v4, %v20351_v4  ;;  %v2973_v57 = vmul.f32 %v13611_v15, %v13611_v15  ;;  %v2974_v8 = vmul.f32 %v13616_v43, %v13616_v43  ;;  %v9442_v24 = vpack.c.bf16 %v3004_v34, %v3003_v30 }
 0x1ed   :  { %v9408_v25 = vpack.c.bf16 %v2954_v61, %v2953_v59  ;;  %v3005_v19 = vmul.f32 %v20357_v39, %v20357_v39  ;;  %v3006_v20 = vmul.f32 %v20358_v22, %v20358_v22  ;;  %v9412_v51 = vpack.c.bf16 %v2956_v2, %v2955_v29 }
 0x1ee   :  { %9397 = vmatpush3.bf16.msra.mxu0 %v9396_v16  ;;  %v20354_v16 = vld [vmem:[#allocation76_spill] sm:$0xff]  ;;  %v9440_v21 = vpack.c.bf16 %v2986_v7, %v2985_v44  ;;  %v9444_v15 = vpack.c.bf16 %v2988_v18, %v2987_v17  ;;  %v9414_v43 = vpack.c.bf16 %v2974_v8, %v2973_v57  ;;  %v2957_v63 = vmul.f32 %v13639_v27, %v13639_v27 }
 0x1ef   :  { %9429 = vmatpush3.bf16.msra.mxu1 %v9428_v32  ;;  %9399 = vmatprep.subr.bf16.mxu0 %v9398_v33  ;;  %v2972_v32 = vmul.f32 %v20354_v16, %v20354_v16  ;;  %v9438_v33 = vpack.c.bf16 %v3002_v53, %v3001_v9  ;;  %v2958_v45 = vmul.f32 %v20359_v1, %v20359_v1 }
 0x1f0   :  { %9431 = vmatprep.subr.bf16.mxu1 %v9430_v0  ;;  %v2989_v28 = vmul.f32 %v13656_v26, %v13656_v26  ;;  %v9446_v31 = vpack.c.bf16 %v3006_v20, %v3005_v19 }
 0x1f1   :  { %v9410_v36 = vpack.c.bf16 %v2972_v32, %v2971_v10  ;;  %v9416_v35 = vpack.c.bf16 %v2958_v45, %v2957_v63 }
 0x1f2   :  { %9401 = vmatpush3.bf16.msra.mxu0 %v9400_v47  ;;  %v2990_v47 = vmul.f32 %v13661_v14, %v13661_v14 }
 0x1f3   :  { %9433 = vmatpush3.bf16.msra.mxu1 %v9432_v23  ;;  %9403 = vmatprep.subr.bf16.mxu0 %v9402_v55 }
 0x1f4   :  { %9435 = vmatprep.subr.bf16.mxu1 %v9434_v49  ;;  %v9448_v27 = vpack.c.bf16 %v2990_v47, %v2989_v28 }
 0x1f6   :  { %9405 = vmatpush3.bf16.msra.mxu0 %v9404_v54 }
 0x1f7   :  { %9437 = vmatpush3.bf16.msra.mxu1 %v9436_v5  ;;  %9407 = vmatprep.subr.bf16.mxu0 %v9406_v52 }
 0x1f8   :  { %v7563_v0 = vpop.f32.mrb[16].mxu0  ;;  %9439 = vmatprep.subr.bf16.mxu1 %v9438_v33 }
 0x1f9   :  { %v7598_v37 = vpop.f32.mrb[16].mxu1  ;;  %v7564_v41 = vpop.f32.mrb[17].mxu0 }
 0x1fa   :  { %v7565_v3 = vadd.f32 %v7564_v41, %v7563_v0  ;;  %v7599_v42 = vpop.f32.mrb[17].mxu1  ;;  %9409 = vmatpush3.bf16.msra.mxu0 %v9408_v25 }
 0x1fb   :  { %v7600_v46 = vadd.f32 %v7599_v42, %v7598_v37  ;;  %9441 = vmatpush3.bf16.msra.mxu1 %v9440_v21  ;;  %9411 = vmatprep.subr.bf16.mxu0 %v9410_v36 }
 0x1fc   :  { %9443 = vmatprep.subr.bf16.mxu1 %v9442_v24 }
 0x1fd   :  { %v1916_v48 = vadd.f32 %v7600_v46, %v7565_v3 }
 0x1fe   :  { %9413 = vmatpush3.bf16.msra.mxu0 %v9412_v51 }
 0x1ff   :  { %9445 = vmatpush3.bf16.msra.mxu1 %v9444_v15  ;;  %9415 = vmatprep.subr.bf16.mxu0 %v9414_v43 }
 0x200   :  { %9447 = vmatprep.subr.bf16.mxu1 %v9446_v31 }
 0x202   :  { %9417 = vmatpush3.bf16.msra.mxu0 %v9416_v35 }
 0x203   :  { %9449 = vmatpush3.bf16.msra.mxu1 %v9448_v27  ;;  %v3300_v27 = vlaneseq }
 0x205   :  { %3212 = vmatmul.mubr.f32.vlgmr.msra.gmra.mrb[30].mxu0 %v20084_v38 }
 0x206   :  { %3282 = vmatmul.mubr.f32.vlgmr.msra.gmra.mrb[30].mxu1 %v20084_v38 }
 0x218   :  { %v7633_v50 = vpop.f32.mrb[18].mxu0 }
 0x219   :  { %v7634_v26 = vpop.f32.mrb[19].mxu0  ;;  %v7668_v23 = vpop.f32.mrb[18].mxu1 }
 0x21a   :  { %v7635_v55 = vadd.f32 %v7634_v26, %v7633_v50  ;;  %v7669_v14 = vpop.f32.mrb[19].mxu1  ;;  %v3301_v50 = vshrl.u32 %v3300_v27, 7  ;;  %v3292_v26 = vld [vmem:[%s19681_s0] sm:$0x1] }
 0x21b   :  { %v7670_v49 = vadd.f32 %v7669_v14, %v7668_v23 }
 0x21c   :  { %v1986_v56 = vadd.f32 %v7635_v55, %v1916_v48  ;;  %v3302_v23 = vsub.s32 0, %v3301_v50  ;;  %v9747_v50 = vld [vmem:[%s19680_s3 + $0xd8] sm:$0xff] }
 0x21e   :  { %v2056_v9 = vadd.f32 %v7670_v49, %v1986_v56  ;;  %v3296_v49 = vld [vmem:[%s19682_s1] sm:$0x1] }
 0x220   :  { %v2059_v53 = vadd.f32 %v2056_v9, %v20360_v12 }
 0x238   :  { %v7703_v54 = vpop.f32.mrb[20].mxu0 }
 0x239   :  { %v7738_v5 = vpop.f32.mrb[20].mxu1  ;;  %v7704_v52 = vpop.f32.mrb[21].mxu0 }
 0x23a   :  { %v7705_v58 = vadd.f32 %v7704_v52, %v7703_v54  ;;  %v7739_v59 = vpop.f32.mrb[21].mxu1 }
 0x23b   :  { %v7740_v60 = vadd.f32 %v7739_v59, %v7738_v5  ;;  %v9721_v5 = vld [vmem:[%s19680_s3 + $0x8] sm:$0xff] }
 0x23d   :  { %v2325_v61 = vadd.f32 %v7740_v60, %v7705_v58  ;;  %v9722_v58 = vld [vmem:[%s19680_s3 + $0x10] sm:$0xff]  ;;  %v9723_v60 = vld [vmem:[%s19680_s3 + $0x18] sm:$0xff] }
 0x258   :  { %v7773_v4 = vpop.f32.mrb[22].mxu0 }
 0x259   :  { %v7774_v44 = vpop.f32.mrb[23].mxu0  ;;  %v7808_v38 = vpop.f32.mrb[22].mxu1 }
 0x25a   :  { %v7775_v40 = vadd.f32 %v7774_v44, %v7773_v4  ;;  %v7809_v7 = vpop.f32.mrb[23].mxu1  ;;  %v9724_v4 = vld [vmem:[%s19680_s3 + $0x20] sm:$0xff] }
 0x25b   :  { %v7810_v62 = vadd.f32 %v7809_v7, %v7808_v38  ;;  %v9725_v38 = vld [vmem:[%s19680_s3 + $0x28] sm:$0xff] }
 0x25c   :  { %v2395_v10 = vadd.f32 %v7775_v40, %v2325_v61 }
 0x25e   :  { %v2465_v16 = vadd.f32 %v7810_v62, %v2395_v10  ;;  %v9726_v62 = vld [vmem:[%s19680_s3 + $0x30] sm:$0xff] }
 0x260   :  { %v2468_v32 = vadd.f32 %v2465_v16, %v13814_v11  ;;  %v9727_v16 = vld [vmem:[%s19680_s3 + $0x38] sm:$0xff] }
 0x278   :  { %v7843_v33 = vpop.f32.mrb[24].mxu0 }
 0x279   :  { %v7878_v13 = vpop.f32.mrb[24].mxu1  ;;  %v7844_v30 = vpop.f32.mrb[25].mxu0 }
 0x27a   :  { %v7845_v6 = vadd.f32 %v7844_v30, %v7843_v33  ;;  %v7879_v34 = vpop.f32.mrb[25].mxu1  ;;  %v9728_v33 = vld [vmem:[%s19680_s3 + $0x40] sm:$0xff]  ;;  %v9729_v30 = vld [vmem:[%s19680_s3 + $0x48] sm:$0xff] }
 0x27b   :  { %v7880_v29 = vadd.f32 %v7879_v34, %v7878_v13  ;;  %v9730_v34 = vld [vmem:[%s19680_s3 + $0x50] sm:$0xff] }
 0x27d   :  { %v2735_v2 = vadd.f32 %v7880_v29, %v7845_v6 }
 0x298   :  { %v7913_v17 = vpop.f32.mrb[26].mxu0 }
 0x299   :  { %v7914_v18 = vpop.f32.mrb[27].mxu0  ;;  %v7948_v25 = vpop.f32.mrb[26].mxu1 }
 0x29a   :  { %v7915_v57 = vadd.f32 %v7914_v18, %v7913_v17  ;;  %v7949_v8 = vpop.f32.mrb[27].mxu1  ;;  %v9732_v18 = vld [vmem:[%s19680_s3 + $0x60] sm:$0xff] }
 0x29b   :  { %v7950_v21 = vadd.f32 %v7949_v8, %v7948_v25 }
 0x29c   :  { %v2805_v36 = vadd.f32 %v7915_v57, %v2735_v2  ;;  %v9731_v2 = vld [vmem:[%s19680_s3 + $0x58] sm:$0xff]  ;;  %v9733_v57 = vld [vmem:[%s19680_s3 + $0x68] sm:$0xff] }
 0x29e   :  { %v2875_v0 = vadd.f32 %v7950_v21, %v2805_v36  ;;  %v9734_v21 = vld [vmem:[%s19680_s3 + $0x70] sm:$0xff] }
 0x2a0   :  { %v2878_v24 = vadd.f32 %v2875_v0, %v2059_v53  ;;  %v9720_v53 = vld [vmem:[%s19680_s3] sm:$0xff]  ;;  %v9735_v0 = vld [vmem:[%s19680_s3 + $0x78] sm:$0xff] }
 0x2a2   :  { %v3288_v45 = vmul.f32 0.00024414063, %v2878_v24 }
 0x2a4   :  { %v3290_v47 = vmul.f32 %v3288_v45, %v3288_v45 }
 0x2b8   :  { %v7983_v39 = vpop.f32.mrb[28].mxu0 }
 0x2b9   :  { %v8018_v19 = vpop.f32.mrb[28].mxu1  ;;  %v7984_v22 = vpop.f32.mrb[29].mxu0 }
 0x2ba   :  { %v7985_v11 = vadd.f32 %v7984_v22, %v7983_v39  ;;  %v8019_v20 = vpop.f32.mrb[29].mxu1  ;;  %v9736_v39 = vld [vmem:[%s19680_s3 + $0x80] sm:$0xff]  ;;  %v9737_v22 = vld [vmem:[%s19680_s3 + $0x88] sm:$0xff] }
 0x2bb   :  { %v8020_v37 = vadd.f32 %v8019_v20, %v8018_v19  ;;  %v9738_v20 = vld [vmem:[%s19680_s3 + $0x90] sm:$0xff] }
 0x2bd   :  { %v3144_v41 = vadd.f32 %v8020_v37, %v7985_v11 }
 0x2d8   :  { %v8053_v51 = vpop.f32.mrb[30].mxu0 }
 0x2d9   :  { %v8054_v15 = vpop.f32.mrb[31].mxu0  ;;  %v8088_v3 = vpop.f32.mrb[30].mxu1 }
 0x2da   :  { %v8055_v42 = vadd.f32 %v8054_v15, %v8053_v51  ;;  %v8089_v43 = vpop.f32.mrb[31].mxu1  ;;  %v9740_v15 = vld [vmem:[%s19680_s3 + $0xa0] sm:$0xff] }
 0x2db   :  { %v8090_v63 = vadd.f32 %v8089_v43, %v8088_v3 }
 0x2dc   :  { %v3214_v1 = vadd.f32 %v8055_v42, %v3144_v41  ;;  %v9739_v41 = vld [vmem:[%s19680_s3 + $0x98] sm:$0xff]  ;;  %v9741_v42 = vld [vmem:[%s19680_s3 + $0xa8] sm:$0xff] }
 0x2de   :  { %v3284_v46 = vadd.f32 %v8090_v63, %v3214_v1  ;;  %v9742_v63 = vld [vmem:[%s19680_s3 + $0xb0] sm:$0xff] }
 0x2e0   :  { %v3287_v28 = vadd.f32 %v3284_v46, %v2468_v32 }
 0x2e2   :  { %v3289_v31 = vmul.f32 0.00024414063, %v3287_v28  ;;  %v9744_v28 = vld [vmem:[%s19680_s3 + $0xc0] sm:$0xff] }
 0x2e4   :  { %v3291_v48 = vsub.f32 %v3289_v31, %v3290_v47  ;;  %v9745_v31 = vld [vmem:[%s19680_s3 + $0xc8] sm:$0xff] }
 0x2e6   :  { %v3293_v35 = vadd.f32 1e-05, %v3291_v48 }
 0x2e8   :  { %9465 = vrsqrt.f32 %v3293_v35  ;;  %v9746_v35 = vld [vmem:[%s19680_s3 + $0xd0] sm:$0xff] }
 0x2f2   :  { %v9466_v55 = vpop.eup %9465 }
 0x2f3   :  { %v3295_v14 = vmul.f32 %v9466_v55, %v3292_v26 }
 0x2f5   :  { %v3297_v56 = vmul.f32 %v3295_v14, %v3288_v45  ;;  %v13942_v9 = vrot.slane %v3295_v14, %v3302_v23  ;;  %v9743_v45 = vld [vmem:[%s19680_s3 + $0xb8] sm:$0xff]  ;;  %v9749_v14 = vld [vmem:[%s19680_s3 + $0xe8] sm:$0xff] }
 0x2f7   :  { %20361 = vst [vmem:[#allocation3_spill] sm:$0xff] %v13942_v9  ;;  %v3298_v12 = vsub.f32 %v3296_v49, %v3297_v56  ;;  %v13948_v54 = vmul.f32 %v9720_v53, %v13942_v9  ;;  %v13954_v52 = vmul.f32 %v9721_v5, %v13942_v9  ;;  %v13960_v59 = vmul.f32 %v9722_v58, %v13942_v9  ;;  %v9750_v56 = vld [vmem:[%s19680_s3 + $0xf0] sm:$0xff]  ;;  %v9751_v53 = vld [vmem:[%s19680_s3 + $0xf8] sm:$0xff]  ;;  %v9752_v58 = vld [vmem:[%s19680_s3 + $0x100] sm:$0xff] }
 0x2f8   :  { %v13966_v61 = vmul.f32 %v9723_v60, %v13942_v9  ;;  %v13972_v44 = vmul.f32 %v9724_v4, %v13942_v9  ;;  %v13978_v40 = vmul.f32 %v9725_v38, %v13942_v9  ;;  %v13986_v10 = vmul.f32 %v9726_v62, %v13942_v9  ;;  %v9753_v4 = vld [vmem:[%s19680_s3 + $0x108] sm:$0xff]  ;;  %v9754_v62 = vld [vmem:[%s19680_s3 + $0x110] sm:$0xff] }
 0x2f9   :  { %20362 = vst [vmem:[#allocation4_spill] sm:$0xff] %v13948_v54  ;;  %20363 = vst [vmem:[#allocation5_spill] sm:$0xff] %v13960_v59  ;;  %v13980_v7 = vrot.slane %v3298_v12, %v3302_v23  ;;  %v13992_v32 = vmul.f32 %v9727_v16, %v13942_v9  ;;  %v13998_v13 = vmul.f32 %v9728_v33, %v13942_v9  ;;  %v9748_v23 = vld [vmem:[%s19680_s3 + $0xe0] sm:$0xff]  ;;  %v9755_v33 = vld [vmem:[%s19680_s3 + $0x118] sm:$0xff] }
 0x2fa   :  { %20364 = vst [vmem:[#allocation6_spill] sm:$0xff] %v13966_v61  ;;  %20365 = vst [vmem:[#allocation7_spill] sm:$0xff] %v13972_v44  ;;  %v14004_v6 = vmul.f32 %v9729_v30, %v13942_v9  ;;  %v14010_v29 = vmul.f32 %v9730_v34, %v13942_v9  ;;  %v14016_v17 = vmul.f32 %v9731_v2, %v13942_v9  ;;  %v9756_v34 = vld [vmem:[%s19680_s3 + $0x120] sm:$0xff]  ;;  %v9818_v44 = vld [vmem:[%s19680_s3 + $0x310] sm:$0xff] }
 0x2fb   :  { %20366 = vst [vmem:[#allocation8_spill] sm:$0xff] %v13978_v40  ;;  %20367 = vst [vmem:[#allocation9_spill] sm:$0xff] %v13986_v10  ;;  %v14022_v25 = vmul.f32 %v9732_v18, %v13942_v9  ;;  %v14028_v8 = vmul.f32 %v9733_v57, %v13942_v9  ;;  %v14034_v36 = vmul.f32 %v9734_v21, %v13942_v9  ;;  %v9757_v18 = vld [vmem:[%s19680_s3 + $0x128] sm:$0xff]  ;;  %v9758_v21 = vld [vmem:[%s19680_s3 + $0x130] sm:$0xff] }
 0x2fc   :  { %20368 = vst [vmem:[#allocation10_spill] sm:$0xff] %v13992_v32  ;;  %20369 = vst [vmem:[#allocation11_spill] sm:$0xff] %v13998_v13  ;;  %v14040_v24 = vmul.f32 %v9735_v0, %v13942_v9  ;;  %v14046_v19 = vmul.f32 %v9736_v39, %v13942_v9  ;;  %v14052_v11 = vmul.f32 %v9737_v22, %v13942_v9  ;;  %v9759_v39 = vld [vmem:[%s19680_s3 + $0x138] sm:$0xff]  ;;  %v9810_v13 = vld [vmem:[%s19680_s3 + $0x2d0] sm:$0xff] }
 0x2fd   :  { %20370 = vst [vmem:[#allocation12_spill] sm:$0xff] %v14004_v6  ;;  %20371 = vst [vmem:[#allocation13_spill] sm:$0xff] %v14010_v29  ;;  %v14058_v37 = vmul.f32 %v9738_v20, %v13942_v9  ;;  %v14064_v51 = vmul.f32 %v9739_v41, %v13942_v9  ;;  %v14070_v3 = vmul.f32 %v9740_v15, %v13942_v9  ;;  %v9760_v20 = vld [vmem:[%s19680_s3 + $0x140] sm:$0xff]  ;;  %v9761_v15 = vld [vmem:[%s19680_s3 + $0x148] sm:$0xff] }
 0x2fe   :  { %20372 = vst [vmem:[#allocation14_spill] sm:$0xff] %v14016_v17  ;;  %20373 = vst [vmem:[#allocation15_spill] sm:$0xff] %v14022_v25  ;;  %v14076_v43 = vmul.f32 %v9741_v42, %v13942_v9  ;;  %v14082_v1 = vmul.f32 %v9742_v63, %v13942_v9  ;;  %v14088_v46 = vmul.f32 %v9743_v45, %v13942_v9  ;;  %v9762_v63 = vld [vmem:[%s19680_s3 + $0x150] sm:$0xff]  ;;  %v9804_v17 = vld [vmem:[%s19680_s3 + $0x2a0] sm:$0xff] }
 0x2ff   :  { %20374 = vst [vmem:[#allocation16_spill] sm:$0xff] %v14028_v8  ;;  %20375 = vst [vmem:[#allocation17_spill] sm:$0xff] %v14034_v36  ;;  %v14094_v47 = vmul.f32 %v9744_v28, %v13942_v9  ;;  %v14100_v48 = vmul.f32 %v9745_v31, %v13942_v9  ;;  %v14106_v27 = vmul.f32 %v9746_v35, %v13942_v9  ;;  %v9763_v28 = vld [vmem:[%s19680_s3 + $0x158] sm:$0xff]  ;;  %v9764_v35 = vld [vmem:[%s19680_s3 + $0x160] sm:$0xff] }
 0x300   :  { %20376 = vst [vmem:[#allocation18_spill] sm:$0xff] %v14040_v24  ;;  %v14112_v26 = vmul.f32 %v9747_v50, %v13942_v9  ;;  %v14118_v55 = vmul.f32 %v9748_v23, %v13942_v9  ;;  %v14124_v49 = vmul.f32 %v9749_v14, %v13942_v9  ;;  %v14130_v12 = vmul.f32 %v9750_v56, %v13942_v9  ;;  %v9765_v23 = vld [vmem:[%s19680_s3 + $0x168] sm:$0xff]  ;;  %v9766_v56 = vld [vmem:[%s19680_s3 + $0x170] sm:$0xff]  ;;  %v9795_v24 = vld [vmem:[%s19680_s3 + $0x258] sm:$0xff] }
 0x301   :  { %v14136_v5 = vmul.f32 %v9751_v53, %v13942_v9  ;;  %v14142_v60 = vmul.f32 %v9752_v58, %v13942_v9  ;;  %v14148_v38 = vmul.f32 %v9753_v4, %v13942_v9  ;;  %v14154_v16 = vmul.f32 %v9754_v62, %v13942_v9  ;;  %v9767_v58 = vld [vmem:[%s19680_s3 + $0x178] sm:$0xff]  ;;  %v9768_v62 = vld [vmem:[%s19680_s3 + $0x180] sm:$0xff]  ;;  %v9797_v8 = vld [vmem:[%s19680_s3 + $0x268] sm:$0xff] }
 0x302   :  { %v14160_v30 = vmul.f32 %v9755_v33, %v13942_v9  ;;  %v14166_v2 = vmul.f32 %v9756_v34, %v13942_v9  ;;  %v14172_v57 = vmul.f32 %v9757_v18, %v13942_v9  ;;  %v14178_v0 = vmul.f32 %v9758_v21, %v13942_v9  ;;  %v9769_v34 = vld [vmem:[%s19680_s3 + $0x188] sm:$0xff]  ;;  %v9770_v21 = vld [vmem:[%s19680_s3 + $0x190] sm:$0xff]  ;;  %v9796_v36 = vld [vmem:[%s19680_s3 + $0x260] sm:$0xff] }
 0x303   :  { %20377 = vst [vmem:[#allocation19_spill] sm:$0xff] %v14142_v60  ;;  %20378 = vst [vmem:[#allocation20_spill] sm:$0xff] %v14148_v38  ;;  %v14184_v22 = vmul.f32 %v9759_v39, %v13942_v9  ;;  %v14190_v41 = vmul.f32 %v9760_v20, %v13942_v9  ;;  %v14196_v42 = vmul.f32 %v9761_v15, %v13942_v9  ;;  %v9771_v20 = vld [vmem:[%s19680_s3 + $0x198] sm:$0xff]  ;;  %v9793_v38 = vld [vmem:[%s19680_s3 + $0x248] sm:$0xff] }
 0x304   :  { %20379 = vst [vmem:[#allocation21_spill] sm:$0xff] %v14154_v16  ;;  %20380 = vst [vmem:[#allocation22_spill] sm:$0xff] %v14160_v30  ;;  %v14202_v45 = vmul.f32 %v9762_v63, %v13942_v9  ;;  %v14208_v31 = vmul.f32 %v9763_v28, %v13942_v9  ;;  %v14214_v50 = vmul.f32 %v9764_v35, %v13942_v9  ;;  %v9772_v63 = vld [vmem:[%s19680_s3 + $0x1a0] sm:$0xff]  ;;  %v9773_v35 = vld [vmem:[%s19680_s3 + $0x1a8] sm:$0xff] }
 0x305   :  { %20381 = vst [vmem:[#allocation23_spill] sm:$0xff] %v14166_v2  ;;  %20382 = vst [vmem:[#allocation24_spill] sm:$0xff] %v14172_v57  ;;  %v14220_v14 = vmul.f32 %v9765_v23, %v13942_v9  ;;  %v14226_v53 = vmul.f32 %v9766_v56, %v13942_v9  ;;  %v14232_v4 = vmul.f32 %v9767_v58, %v13942_v9  ;;  %v9774_v56 = vld [vmem:[%s19680_s3 + $0x1b0] sm:$0xff]  ;;  %v9789_v57 = vld [vmem:[%s19680_s3 + $0x228] sm:$0xff] }
 0x306   :  { %20383 = vst [vmem:[#allocation25_spill] sm:$0xff] %v14178_v0  ;;  %20384 = vst [vmem:[#allocation26_spill] sm:$0xff] %v14184_v22  ;;  %v14238_v33 = vmul.f32 %v9768_v62, %v13942_v9  ;;  %v14244_v18 = vmul.f32 %v9769_v34, %v13942_v9  ;;  %v14250_v39 = vmul.f32 %v9770_v21, %v13942_v9  ;;  %v9775_v62 = vld [vmem:[%s19680_s3 + $0x1b8] sm:$0xff]  ;;  %v9776_v21 = vld [vmem:[%s19680_s3 + $0x1c0] sm:$0xff] }
 0x307   :  { %20385 = vst [vmem:[#allocation27_spill] sm:$0xff] %v14190_v41  ;;  %20386 = vst [vmem:[#allocation28_spill] sm:$0xff] %v14196_v42  ;;  %v14256_v15 = vmul.f32 %v9771_v20, %v13942_v9  ;;  %v14262_v28 = vmul.f32 %v9772_v63, %v13942_v9  ;;  %v14268_v23 = vmul.f32 %v9773_v35, %v13942_v9  ;;  %v9777_v63 = vld [vmem:[%s19680_s3 + $0x1c8] sm:$0xff]  ;;  %v9786_v41 = vld [vmem:[%s19680_s3 + $0x210] sm:$0xff] }
 0x308   :  { %20387 = vst [vmem:[#allocation29_spill] sm:$0xff] %v14202_v45  ;;  %20388 = vst [vmem:[#allocation30_spill] sm:$0xff] %v14208_v31  ;;  %v14274_v58 = vmul.f32 %v9774_v56, %v13942_v9  ;;  %v14280_v34 = vmul.f32 %v9775_v62, %v13942_v9  ;;  %v14286_v20 = vmul.f32 %v9776_v21, %v13942_v9  ;;  %v9778_v56 = vld [vmem:[%s19680_s3 + $0x1d0] sm:$0xff]  ;;  %v9783_v31 = vld [vmem:[%s19680_s3 + $0x1f8] sm:$0xff] }
 0x309   :  { %20389 = vst [vmem:[#allocation31_spill] sm:$0xff] %v14214_v50  ;;  %20390 = vst [vmem:[#allocation32_spill] sm:$0xff] %v14220_v14  ;;  %v14292_v35 = vmul.f32 %v9777_v63, %v13942_v9  ;;  %v14298_v62 = vmul.f32 %v9778_v56, %v13942_v9  ;;  %v9781_v14 = vld [vmem:[%s19680_s3 + $0x1e8] sm:$0xff]  ;;  %v9782_v50 = vld [vmem:[%s19680_s3 + $0x1f0] sm:$0xff] }
 0x30a   :  { %20391 = vst [vmem:[#allocation33_spill] sm:$0xff] %v14226_v53  ;;  %20392 = vst [vmem:[#allocation34_spill] sm:$0xff] %v14232_v4  ;;  %v9779_v4 = vld [vmem:[%s19680_s3 + $0x1d8] sm:$0xff]  ;;  %v9780_v53 = vld [vmem:[%s19680_s3 + $0x1e0] sm:$0xff]  ;;  %v14316_v56 = vmul.f32 %v9781_v14, %v13942_v9 }
 0x30b   :  { %v14304_v21 = vmul.f32 %v9779_v4, %v13942_v9  ;;  %v14310_v63 = vmul.f32 %v9780_v53, %v13942_v9  ;;  %v14322_v4 = vmul.f32 %v9782_v50, %v13942_v9  ;;  %v14328_v53 = vmul.f32 %v9783_v31, %v13942_v9  ;;  %v9784_v45 = vld [vmem:[%s19680_s3 + $0x200] sm:$0xff]  ;;  %v9785_v42 = vld [vmem:[%s19680_s3 + $0x208] sm:$0xff]  ;;  %v9787_v22 = vld [vmem:[%s19680_s3 + $0x218] sm:$0xff] }
 0x30c   :  { %v14334_v14 = vmul.f32 %v9784_v45, %v13942_v9  ;;  %v14340_v50 = vmul.f32 %v9785_v42, %v13942_v9  ;;  %v14346_v31 = vmul.f32 %v9786_v41, %v13942_v9  ;;  %v14352_v45 = vmul.f32 %v9787_v22, %v13942_v9  ;;  %v9788_v0 = vld [vmem:[%s19680_s3 + $0x220] sm:$0xff]  ;;  %v9790_v2 = vld [vmem:[%s19680_s3 + $0x230] sm:$0xff]  ;;  %v9791_v30 = vld [vmem:[%s19680_s3 + $0x238] sm:$0xff] }
 0x30d   :  { %v14358_v42 = vmul.f32 %v9788_v0, %v13942_v9  ;;  %v14364_v41 = vmul.f32 %v9789_v57, %v13942_v9  ;;  %v14370_v22 = vmul.f32 %v9790_v2, %v13942_v9  ;;  %v14376_v0 = vmul.f32 %v9791_v30, %v13942_v9  ;;  %v9792_v16 = vld [vmem:[%s19680_s3 + $0x240] sm:$0xff]  ;;  %v9794_v60 = vld [vmem:[%s19680_s3 + $0x250] sm:$0xff] }
 0x30e   :  { %20393 = vst [vmem:[#allocation35_spill] sm:$0xff] %v14334_v14  ;;  %20394 = vst [vmem:[#allocation36_spill] sm:$0xff] %v14346_v31  ;;  %v14382_v57 = vmul.f32 %v9792_v16, %v13942_v9  ;;  %v14388_v2 = vmul.f32 %v9793_v38, %v13942_v9  ;;  %v14394_v30 = vmul.f32 %v9794_v60, %v13942_v9  ;;  %v9798_v25 = vld [vmem:[%s19680_s3 + $0x270] sm:$0xff]  ;;  %v9808_v6 = vld [vmem:[%s19680_s3 + $0x2c0] sm:$0xff] }
 0x30f   :  { %20395 = vst [vmem:[#allocation37_spill] sm:$0xff] %v14352_v45  ;;  %20396 = vst [vmem:[#allocation38_spill] sm:$0xff] %v14358_v42  ;;  %v14400_v16 = vmul.f32 %v9795_v24, %v13942_v9  ;;  %v14406_v38 = vmul.f32 %v9796_v36, %v13942_v9  ;;  %v14412_v60 = vmul.f32 %v9797_v8, %v13942_v9  ;;  %v9806_v29 = vld [vmem:[%s19680_s3 + $0x2b0] sm:$0xff]  ;;  %v9812_v32 = vld [vmem:[%s19680_s3 + $0x2e0] sm:$0xff] }
 0x310   :  { %20397 = vst [vmem:[#allocation39_spill] sm:$0xff] %v14364_v41  ;;  %20398 = vst [vmem:[#allocation40_spill] sm:$0xff] %v14370_v22  ;;  %v14418_v24 = vmul.f32 %v9798_v25, %v13942_v9  ;;  %v9813_v22 = vld [vmem:[%s19680_s3 + $0x2e8] sm:$0xff]  ;;  %v9814_v10 = vld [vmem:[%s19680_s3 + $0x2f0] sm:$0xff] }
 0x311   :  { %20399 = vst [vmem:[#allocation41_spill] sm:$0xff] %v14376_v0  ;;  %20400 = vst [vmem:[#allocation42_spill] sm:$0xff] %v14382_v57  ;;  %v9809_v57 = vld [vmem:[%s19680_s3 + $0x2c8] sm:$0xff]  ;;  %v9811_v0 = vld [vmem:[%s19680_s3 + $0x2d8] sm:$0xff] }
 0x312   :  { %20401 = vst [vmem:[#allocation43_spill] sm:$0xff] %v14388_v2  ;;  %20402 = vst [vmem:[#allocation44_spill] sm:$0xff] %v14394_v30  ;;  %v9805_v30 = vld [vmem:[%s19680_s3 + $0x2a8] sm:$0xff]  ;;  %v9807_v2 = vld [vmem:[%s19680_s3 + $0x2b8] sm:$0xff] }
 0x313   :  { %20403 = vst [vmem:[#allocation45_spill] sm:$0xff] %v14400_v16  ;;  %20404 = vst [vmem:[#allocation46_spill] sm:$0xff] %v14406_v38  ;;  %v9799_v16 = vld [vmem:[%s19680_s3 + $0x278] sm:$0xff]  ;;  %v9800_v38 = vld [vmem:[%s19680_s3 + $0x280] sm:$0xff] }
 0x314   :  { %20405 = vst [vmem:[#allocation47_spill] sm:$0xff] %v14412_v60  ;;  %20406 = vst [vmem:[#allocation48_spill] sm:$0xff] %v14418_v24  ;;  %v14424_v36 = vmul.f32 %v9799_v16, %v13942_v9  ;;  %v14430_v8 = vmul.f32 %v9800_v38, %v13942_v9  ;;  %v9801_v60 = vld [vmem:[%s19680_s3 + $0x288] sm:$0xff]  ;;  %v9802_v24 = vld [vmem:[%s19680_s3 + $0x290] sm:$0xff] }
 0x315   :  { %v14436_v25 = vmul.f32 %v9801_v60, %v13942_v9  ;;  %v14442_v16 = vmul.f32 %v9802_v24, %v13942_v9  ;;  %v14454_v60 = vmul.f32 %v9804_v17, %v13942_v9  ;;  %v14460_v24 = vmul.f32 %v9805_v30, %v13942_v9  ;;  %v9815_v41 = vld [vmem:[%s19680_s3 + $0x2f8] sm:$0xff]  ;;  %v9816_v40 = vld [vmem:[%s19680_s3 + $0x300] sm:$0xff]  ;;  %v9817_v42 = vld [vmem:[%s19680_s3 + $0x308] sm:$0xff] }
 0x316   :  { %20407 = vst [vmem:[#allocation49_spill] sm:$0xff] %v14424_v36  ;;  %v9803_v36 = vld [vmem:[%s19680_s3 + $0x298] sm:$0xff]  ;;  %v14472_v17 = vmul.f32 %v9807_v2, %v13942_v9  ;;  %v14478_v30 = vmul.f32 %v9808_v6, %v13942_v9  ;;  %v14490_v2 = vmul.f32 %v9810_v13, %v13942_v9  ;;  %v14496_v6 = vmul.f32 %v9811_v0, %v13942_v9  ;;  %v9836_v61 = vld [vmem:[%s19680_s3 + $0x3a0] sm:$0xff]  ;;  %v9837_v31 = vld [vmem:[%s19680_s3 + $0x3a8] sm:$0xff] }
 0x317   :  { %v14448_v38 = vmul.f32 %v9803_v36, %v13942_v9  ;;  %v14466_v36 = vmul.f32 %v9806_v29, %v13942_v9  ;;  %v14484_v29 = vmul.f32 %v9809_v57, %v13942_v9  ;;  %v14502_v57 = vmul.f32 %v9812_v32, %v13942_v9  ;;  %v9819_v45 = vld [vmem:[%s19680_s3 + $0x318] sm:$0xff]  ;;  %v9838_v59 = vld [vmem:[%s19680_s3 + $0x3b0] sm:$0xff]  ;;  %v9840_v54 = vld [vmem:[%s19680_s3 + $0x3c0] sm:$0xff] }
 0x318   :  { %v14508_v13 = vmul.f32 %v9813_v22, %v13942_v9  ;;  %v14514_v0 = vmul.f32 %v9814_v10, %v13942_v9  ;;  %v14520_v32 = vmul.f32 %v9815_v41, %v13942_v9  ;;  %v14526_v22 = vmul.f32 %v9816_v40, %v13942_v9  ;;  %v9839_v14 = vld [vmem:[%s19680_s3 + $0x3b8] sm:$0xff] }
 0x319   :  { %v14532_v10 = vmul.f32 %v9817_v42, %v13942_v9  ;;  %v14538_v41 = vmul.f32 %v9818_v44, %v13942_v9  ;;  %v14544_v40 = vmul.f32 %v9819_v45, %v13942_v9 }
 0x31a   :  { %20408 = vst [vmem:[#allocation50_spill] sm:$0xff] %v14526_v22  ;;  %v9820_v22 = vld [vmem:[%s19680_s3 + $0x320] sm:$0xff] }
 0x31b   :  { %20409 = vst [vmem:[#allocation51_spill] sm:$0xff] %v14532_v10  ;;  %20410 = vst [vmem:[#allocation52_spill] sm:$0xff] %v14538_v41  ;;  %v14550_v42 = vmul.f32 %v9820_v22, %v13942_v9  ;;  %v9821_v10 = vld [vmem:[%s19680_s3 + $0x328] sm:$0xff]  ;;  %v9822_v41 = vld [vmem:[%s19680_s3 + $0x330] sm:$0xff] }
 0x31c   :  { %20411 = vst [vmem:[#allocation53_spill] sm:$0xff] %v14544_v40  ;;  %v14556_v44 = vmul.f32 %v9821_v10, %v13942_v9  ;;  %v14562_v45 = vmul.f32 %v9822_v41, %v13942_v9  ;;  %v9823_v40 = vld [vmem:[%s19680_s3 + $0x338] sm:$0xff] }
 0x31d   :  { %20412 = vst [vmem:[#allocation54_spill] sm:$0xff] %v14550_v42  ;;  %v14568_v22 = vmul.f32 %v9823_v40, %v13942_v9  ;;  %v9824_v42 = vld [vmem:[%s19680_s3 + $0x340] sm:$0xff] }
 0x31e   :  { %20413 = vst [vmem:[#allocation55_spill] sm:$0xff] %v14556_v44  ;;  %20414 = vst [vmem:[#allocation56_spill] sm:$0xff] %v14562_v45  ;;  %v14574_v10 = vmul.f32 %v9824_v42, %v13942_v9  ;;  %v9825_v44 = vld [vmem:[%s19680_s3 + $0x348] sm:$0xff]  ;;  %v9826_v45 = vld [vmem:[%s19680_s3 + $0x350] sm:$0xff] }
 0x31f   :  { %20415 = vst [vmem:[#allocation57_spill] sm:$0xff] %v14568_v22  ;;  %v14580_v41 = vmul.f32 %v9825_v44, %v13942_v9  ;;  %v14586_v40 = vmul.f32 %v9826_v45, %v13942_v9  ;;  %v9827_v22 = vld [vmem:[%s19680_s3 + $0x358] sm:$0xff] }
 0x320   :  { %20416 = vst [vmem:[#allocation58_spill] sm:$0xff] %v14574_v10  ;;  %v14592_v42 = vmul.f32 %v9827_v22, %v13942_v9  ;;  %v9828_v10 = vld [vmem:[%s19680_s3 + $0x360] sm:$0xff] }
 0x321   :  { %20417 = vst [vmem:[#allocation59_spill] sm:$0xff] %v14580_v41  ;;  %20418 = vst [vmem:[#allocation60_spill] sm:$0xff] %v14586_v40  ;;  %v14598_v44 = vmul.f32 %v9828_v10, %v13942_v9  ;;  %v9829_v41 = vld [vmem:[%s19680_s3 + $0x368] sm:$0xff]  ;;  %v9830_v40 = vld [vmem:[%s19680_s3 + $0x370] sm:$0xff] }
 0x322   :  { %20419 = vst [vmem:[#allocation61_spill] sm:$0xff] %v14592_v42  ;;  %v14604_v45 = vmul.f32 %v9829_v41, %v13942_v9  ;;  %v14610_v22 = vmul.f32 %v9830_v40, %v13942_v9  ;;  %v9831_v42 = vld [vmem:[%s19680_s3 + $0x378] sm:$0xff] }
 0x323   :  { %20420 = vst [vmem:[#allocation62_spill] sm:$0xff] %v14598_v44  ;;  %v14616_v10 = vmul.f32 %v9831_v42, %v13942_v9  ;;  %v9832_v44 = vld [vmem:[%s19680_s3 + $0x380] sm:$0xff] }
 0x324   :  { %20421 = vst [vmem:[#allocation63_spill] sm:$0xff] %v14604_v45  ;;  %20422 = vst [vmem:[#allocation64_spill] sm:$0xff] %v14610_v22  ;;  %v14622_v41 = vmul.f32 %v9832_v44, %v13942_v9  ;;  %v9833_v45 = vld [vmem:[%s19680_s3 + $0x388] sm:$0xff]  ;;  %v9834_v22 = vld [vmem:[%s19680_s3 + $0x390] sm:$0xff] }
 0x325   :  { %20423 = vst [vmem:[#allocation65_spill] sm:$0xff] %v14616_v10  ;;  %v14628_v40 = vmul.f32 %v9833_v45, %v13942_v9  ;;  %v14634_v42 = vmul.f32 %v9834_v22, %v13942_v9  ;;  %v9835_v10 = vld [vmem:[%s19680_s3 + $0x398] sm:$0xff]  ;;  %v14646_v45 = vmul.f32 %v9836_v61, %v13942_v9  ;;  %v14652_v22 = vmul.f32 %v9837_v31, %v13942_v9 }
 0x326   :  { %v14640_v44 = vmul.f32 %v9835_v10, %v13942_v9  ;;  %v14658_v10 = vmul.f32 %v9838_v59, %v13942_v9  ;;  %v14664_v61 = vmul.f32 %v9839_v14, %v13942_v9  ;;  %v14670_v31 = vmul.f32 %v9840_v54, %v13942_v9 }
 0x327   :  { %20424 = vst [vmem:[#allocation66_spill] sm:$0xff] %v14652_v22  ;;  %v9841_v22 = vld [vmem:[%s19680_s3 + $0x3c8] sm:$0xff] }
 0x328   :  { %20425 = vst [vmem:[#allocation67_spill] sm:$0xff] %v14658_v10  ;;  %20426 = vst [vmem:[#allocation68_spill] sm:$0xff] %v14664_v61  ;;  %v14676_v59 = vmul.f32 %v9841_v22, %v13942_v9  ;;  %v9842_v10 = vld [vmem:[%s19680_s3 + $0x3d0] sm:$0xff]  ;;  %v9843_v61 = vld [vmem:[%s19680_s3 + $0x3d8] sm:$0xff] }
 0x329   :  { %20427 = vst [vmem:[#allocation69_spill] sm:$0xff] %v14670_v31  ;;  %v14682_v14 = vmul.f32 %v9842_v10, %v13942_v9  ;;  %v14688_v54 = vmul.f32 %v9843_v61, %v13942_v9  ;;  %v9844_v31 = vld [vmem:[%s19680_s3 + $0x3e0] sm:$0xff] }
 0x32a   :  { %20428 = vst [vmem:[#allocation70_spill] sm:$0xff] %v14676_v59  ;;  %v14694_v22 = vmul.f32 %v9844_v31, %v13942_v9  ;;  %v9845_v59 = vld [vmem:[%s19680_s3 + $0x3e8] sm:$0xff] }
 0x32b   :  { %20429 = vst [vmem:[#allocation71_spill] sm:$0xff] %v14682_v14  ;;  %20430 = vst [vmem:[#allocation72_spill] sm:$0xff] %v14688_v54  ;;  %v14700_v10 = vmul.f32 %v9845_v59, %v13942_v9  ;;  %v9846_v14 = vld [vmem:[%s19680_s3 + $0x3f0] sm:$0xff]  ;;  %v9847_v54 = vld [vmem:[%s19680_s3 + $0x3f8] sm:$0xff] }
 0x32c   :  { %20431 = vst [vmem:[#allocation73_spill] sm:$0xff] %v14694_v22  ;;  %v14706_v61 = vmul.f32 %v9846_v14, %v13942_v9  ;;  %v14712_v31 = vmul.f32 %v9847_v54, %v13942_v9  ;;  %v9848_v22 = vld [vmem:[%s19680_s3 + $0x400] sm:$0xff] }
 0x32d   :  { %20432 = vst [vmem:[#allocation74_spill] sm:$0xff] %v14700_v10  ;;  %v14718_v59 = vmul.f32 %v9848_v22, %v13942_v9  ;;  %v9849_v10 = vld [vmem:[%s19680_s3 + $0x408] sm:$0xff] }
 0x32e   :  { %20433 = vst [vmem:[#allocation75_spill] sm:$0xff] %v14706_v61  ;;  %20434 = vst [vmem:[#allocation76_spill] sm:$0xff] %v14712_v31  ;;  %v14724_v14 = vmul.f32 %v9849_v10, %v13942_v9  ;;  %v9850_v61 = vld [vmem:[%s19680_s3 + $0x410] sm:$0xff]  ;;  %v9851_v31 = vld [vmem:[%s19680_s3 + $0x418] sm:$0xff] }
 0x32f   :  { %20435 = vst [vmem:[#allocation77_spill] sm:$0xff] %v14718_v59  ;;  %v14730_v54 = vmul.f32 %v9850_v61, %v13942_v9  ;;  %v14736_v22 = vmul.f32 %v9851_v31, %v13942_v9  ;;  %v9852_v59 = vld [vmem:[%s19680_s3 + $0x420] sm:$0xff] }
 0x330   :  { %20436 = vst [vmem:[#allocation78_spill] sm:$0xff] %v14724_v14  ;;  %v14742_v10 = vmul.f32 %v9852_v59, %v13942_v9  ;;  %v9853_v14 = vld [vmem:[%s19680_s3 + $0x428] sm:$0xff] }
 0x331   :  { %20437 = vst [vmem:[#allocation79_spill] sm:$0xff] %v14730_v54  ;;  %20438 = vst [vmem:[#allocation80_spill] sm:$0xff] %v14736_v22  ;;  %v14748_v61 = vmul.f32 %v9853_v14, %v13942_v9  ;;  %v9854_v54 = vld [vmem:[%s19680_s3 + $0x430] sm:$0xff]  ;;  %v9855_v22 = vld [vmem:[%s19680_s3 + $0x438] sm:$0xff] }
 0x332   :  { %20439 = vst [vmem:[#allocation81_spill] sm:$0xff] %v14742_v10  ;;  %v14754_v31 = vmul.f32 %v9854_v54, %v13942_v9  ;;  %v14760_v59 = vmul.f32 %v9855_v22, %v13942_v9  ;;  %v9856_v10 = vld [vmem:[%s19680_s3 + $0x440] sm:$0xff] }
 0x333   :  { %20440 = vst [vmem:[#allocation2_spill] sm:$0xff] %v14748_v61  ;;  %v14766_v14 = vmul.f32 %v9856_v10, %v13942_v9  ;;  %v9857_v61 = vld [vmem:[%s19680_s3 + $0x448] sm:$0xff] }
 0x334   :  { %20441 = vst [vmem:[#allocation82_spill] sm:$0xff] %v14754_v31  ;;  %20442 = vst [vmem:[#allocation83_spill] sm:$0xff] %v14760_v59  ;;  %v14772_v54 = vmul.f32 %v9857_v61, %v13942_v9  ;;  %v9858_v31 = vld [vmem:[%s19680_s3 + $0x450] sm:$0xff]  ;;  %v9859_v59 = vld [vmem:[%s19680_s3 + $0x458] sm:$0xff] }
 0x335   :  { %20443 = vst [vmem:[#allocation84_spill] sm:$0xff] %v14766_v14  ;;  %v14778_v22 = vmul.f32 %v9858_v31, %v13942_v9  ;;  %v14784_v10 = vmul.f32 %v9859_v59, %v13942_v9  ;;  %v9860_v14 = vld [vmem:[%s19680_s3 + $0x460] sm:$0xff] }
 0x336   :  { %20444 = vst [vmem:[#allocation85_spill] sm:$0xff] %v14772_v54  ;;  %v14790_v61 = vmul.f32 %v9860_v14, %v13942_v9  ;;  %v9861_v54 = vld [vmem:[%s19680_s3 + $0x468] sm:$0xff] }
 0x337   :  { %20445 = vst [vmem:[#allocation86_spill] sm:$0xff] %v14778_v22  ;;  %20446 = vst [vmem:[#allocation87_spill] sm:$0xff] %v14784_v10  ;;  %v14796_v31 = vmul.f32 %v9861_v54, %v13942_v9  ;;  %v9862_v22 = vld [vmem:[%s19680_s3 + $0x470] sm:$0xff]  ;;  %v9863_v10 = vld [vmem:[%s19680_s3 + $0x478] sm:$0xff] }
 0x338   :  { %20447 = vst [vmem:[#allocation88_spill] sm:$0xff] %v14790_v61  ;;  %v14802_v59 = vmul.f32 %v9862_v22, %v13942_v9  ;;  %v14808_v14 = vmul.f32 %v9863_v10, %v13942_v9  ;;  %v9864_v61 = vld [vmem:[%s19680_s3 + $0x480] sm:$0xff] }
 0x339   :  { %20448 = vst [vmem:[#allocation89_spill] sm:$0xff] %v14796_v31  ;;  %v14814_v54 = vmul.f32 %v9864_v61, %v13942_v9  ;;  %v9865_v31 = vld [vmem:[%s19680_s3 + $0x488] sm:$0xff] }
 0x33a   :  { %20449 = vst [vmem:[#allocation90_spill] sm:$0xff] %v14802_v59  ;;  %20450 = vst [vmem:[#allocation91_spill] sm:$0xff] %v14808_v14  ;;  %v14820_v22 = vmul.f32 %v9865_v31, %v13942_v9  ;;  %v9866_v59 = vld [vmem:[%s19680_s3 + $0x490] sm:$0xff]  ;;  %v9867_v14 = vld [vmem:[%s19680_s3 + $0x498] sm:$0xff] }
 0x33b   :  { %20451 = vst [vmem:[#allocation92_spill] sm:$0xff] %v14814_v54  ;;  %v14826_v10 = vmul.f32 %v9866_v59, %v13942_v9  ;;  %v14832_v61 = vmul.f32 %v9867_v14, %v13942_v9  ;;  %v9868_v54 = vld [vmem:[%s19680_s3 + $0x4a0] sm:$0xff] }
 0x33c   :  { %20452 = vst [vmem:[#allocation93_spill] sm:$0xff] %v14820_v22  ;;  %v14838_v31 = vmul.f32 %v9868_v54, %v13942_v9  ;;  %v9869_v22 = vld [vmem:[%s19680_s3 + $0x4a8] sm:$0xff] }
 0x33d   :  { %20453 = vst [vmem:[#allocation94_spill] sm:$0xff] %v14826_v10  ;;  %20454 = vst [vmem:[#allocation95_spill] sm:$0xff] %v14832_v61  ;;  %v14844_v59 = vmul.f32 %v9869_v22, %v13942_v9  ;;  %v9870_v10 = vld [vmem:[%s19680_s3 + $0x4b0] sm:$0xff]  ;;  %v9871_v61 = vld [vmem:[%s19680_s3 + $0x4b8] sm:$0xff] }
 0x33e   :  { %20455 = vst [vmem:[#allocation96_spill] sm:$0xff] %v14838_v31  ;;  %v14850_v14 = vmul.f32 %v9870_v10, %v13942_v9  ;;  %v14856_v54 = vmul.f32 %v9871_v61, %v13942_v9  ;;  %v9872_v31 = vld [vmem:[%s19680_s3 + $0x4c0] sm:$0xff] }
 0x33f   :  { %20456 = vst [vmem:[#allocation97_spill] sm:$0xff] %v14844_v59  ;;  %v14862_v22 = vmul.f32 %v9872_v31, %v13942_v9  ;;  %v9873_v59 = vld [vmem:[%s19680_s3 + $0x4c8] sm:$0xff] }
 0x340   :  { %20457 = vst [vmem:[#allocation98_spill] sm:$0xff] %v14850_v14  ;;  %20458 = vst [vmem:[#allocation99_spill] sm:$0xff] %v14856_v54  ;;  %v14868_v10 = vmul.f32 %v9873_v59, %v13942_v9  ;;  %v9874_v14 = vld [vmem:[%s19680_s3 + $0x4d0] sm:$0xff]  ;;  %v9875_v54 = vld [vmem:[%s19680_s3 + $0x4d8] sm:$0xff] }
 0x341   :  { %20459 = vst [vmem:[#allocation100_spill] sm:$0xff] %v14862_v22  ;;  %v14874_v61 = vmul.f32 %v9874_v14, %v13942_v9  ;;  %v14880_v31 = vmul.f32 %v9875_v54, %v13942_v9  ;;  %v9876_v22 = vld [vmem:[%s19680_s3 + $0x4e0] sm:$0xff] }
 0x342   :  { %20460 = vst [vmem:[#allocation101_spill] sm:$0xff] %v14868_v10  ;;  %v14886_v59 = vmul.f32 %v9876_v22, %v13942_v9  ;;  %v9877_v10 = vld [vmem:[%s19680_s3 + $0x4e8] sm:$0xff] }
 0x343   :  { %20461 = vst [vmem:[#allocation102_spill] sm:$0xff] %v14874_v61  ;;  %20462 = vst [vmem:[#allocation103_spill] sm:$0xff] %v14880_v31  ;;  %v14892_v14 = vmul.f32 %v9877_v10, %v13942_v9  ;;  %v9878_v61 = vld [vmem:[%s19680_s3 + $0x4f0] sm:$0xff]  ;;  %v9879_v31 = vld [vmem:[%s19680_s3 + $0x4f8] sm:$0xff] }
 0x344   :  { %20463 = vst [vmem:[#allocation104_spill] sm:$0xff] %v14886_v59  ;;  %v14898_v54 = vmul.f32 %v9878_v61, %v13942_v9  ;;  %v14904_v22 = vmul.f32 %v9879_v31, %v13942_v9  ;;  %v9880_v59 = vld [vmem:[%s19680_s3 + $0x500] sm:$0xff] }
 0x345   :  { %20464 = vst [vmem:[#allocation105_spill] sm:$0xff] %v14892_v14  ;;  %v14910_v10 = vmul.f32 %v9880_v59, %v13942_v9  ;;  %v9881_v14 = vld [vmem:[%s19680_s3 + $0x508] sm:$0xff] }
 0x346   :  { %20465 = vst [vmem:[#allocation106_spill] sm:$0xff] %v14898_v54  ;;  %20466 = vst [vmem:[#allocation107_spill] sm:$0xff] %v14904_v22  ;;  %v14916_v61 = vmul.f32 %v9881_v14, %v13942_v9  ;;  %v9882_v54 = vld [vmem:[%s19680_s3 + $0x510] sm:$0xff]  ;;  %v9883_v22 = vld [vmem:[%s19680_s3 + $0x518] sm:$0xff] }
 0x347   :  { %20467 = vst [vmem:[#allocation108_spill] sm:$0xff] %v14910_v10  ;;  %v14922_v31 = vmul.f32 %v9882_v54, %v13942_v9  ;;  %v14928_v59 = vmul.f32 %v9883_v22, %v13942_v9  ;;  %v9884_v10 = vld [vmem:[%s19680_s3 + $0x520] sm:$0xff] }
 0x348   :  { %20468 = vst [vmem:[#allocation109_spill] sm:$0xff] %v14916_v61  ;;  %v14934_v14 = vmul.f32 %v9884_v10, %v13942_v9  ;;  %v9885_v61 = vld [vmem:[%s19680_s3 + $0x528] sm:$0xff] }
 0x349   :  { %20469 = vst [vmem:[#allocation110_spill] sm:$0xff] %v14922_v31  ;;  %20470 = vst [vmem:[#allocation111_spill] sm:$0xff] %v14928_v59  ;;  %v14940_v54 = vmul.f32 %v9885_v61, %v13942_v9  ;;  %v9886_v31 = vld [vmem:[%s19680_s3 + $0x530] sm:$0xff]  ;;  %v9887_v59 = vld [vmem:[%s19680_s3 + $0x538] sm:$0xff] }
 0x34a   :  { %20471 = vst [vmem:[#allocation112_spill] sm:$0xff] %v14934_v14  ;;  %v14946_v22 = vmul.f32 %v9886_v31, %v13942_v9  ;;  %v14952_v10 = vmul.f32 %v9887_v59, %v13942_v9  ;;  %v9888_v14 = vld [vmem:[%s19680_s3 + $0x540] sm:$0xff] }
 0x34b   :  { %20472 = vst [vmem:[#allocation113_spill] sm:$0xff] %v14940_v54  ;;  %v14958_v61 = vmul.f32 %v9888_v14, %v13942_v9  ;;  %v9889_v54 = vld [vmem:[%s19680_s3 + $0x548] sm:$0xff] }
 0x34c   :  { %20473 = vst [vmem:[#allocation114_spill] sm:$0xff] %v14946_v22  ;;  %20474 = vst [vmem:[#allocation115_spill] sm:$0xff] %v14952_v10  ;;  %v14964_v31 = vmul.f32 %v9889_v54, %v13942_v9  ;;  %v9890_v22 = vld [vmem:[%s19680_s3 + $0x550] sm:$0xff]  ;;  %v9891_v10 = vld [vmem:[%s19680_s3 + $0x558] sm:$0xff] }
 0x34d   :  { %20475 = vst [vmem:[#allocation116_spill] sm:$0xff] %v14958_v61  ;;  %v14970_v59 = vmul.f32 %v9890_v22, %v13942_v9  ;;  %v14976_v14 = vmul.f32 %v9891_v10, %v13942_v9  ;;  %v9892_v61 = vld [vmem:[%s19680_s3 + $0x560] sm:$0xff] }
 0x34e   :  { %20476 = vst [vmem:[#allocation117_spill] sm:$0xff] %v14964_v31  ;;  %v14982_v54 = vmul.f32 %v9892_v61, %v13942_v9  ;;  %v9893_v31 = vld [vmem:[%s19680_s3 + $0x568] sm:$0xff] }
 0x34f   :  { %20477 = vst [vmem:[#allocation118_spill] sm:$0xff] %v14970_v59  ;;  %20478 = vst [vmem:[#allocation119_spill] sm:$0xff] %v14976_v14  ;;  %v14988_v22 = vmul.f32 %v9893_v31, %v13942_v9  ;;  %v9894_v59 = vld [vmem:[%s19680_s3 + $0x570] sm:$0xff]  ;;  %v9895_v14 = vld [vmem:[%s19680_s3 + $0x578] sm:$0xff] }
 0x350   :  { %20479 = vst [vmem:[#allocation120_spill] sm:$0xff] %v14982_v54  ;;  %v14994_v10 = vmul.f32 %v9894_v59, %v13942_v9  ;;  %v15000_v61 = vmul.f32 %v9895_v14, %v13942_v9  ;;  %v9896_v54 = vld [vmem:[%s19680_s3 + $0x580] sm:$0xff] }
 0x351   :  { %20480 = vst [vmem:[#allocation121_spill] sm:$0xff] %v14988_v22  ;;  %v15006_v31 = vmul.f32 %v9896_v54, %v13942_v9  ;;  %v9897_v22 = vld [vmem:[%s19680_s3 + $0x588] sm:$0xff] }
 0x352   :  { %20481 = vst [vmem:[#allocation122_spill] sm:$0xff] %v14994_v10  ;;  %20482 = vst [vmem:[#allocation123_spill] sm:$0xff] %v15000_v61  ;;  %v15012_v59 = vmul.f32 %v9897_v22, %v13942_v9  ;;  %v9898_v10 = vld [vmem:[%s19680_s3 + $0x590] sm:$0xff]  ;;  %v9899_v61 = vld [vmem:[%s19680_s3 + $0x598] sm:$0xff] }
 0x353   :  { %20483 = vst [vmem:[#allocation124_spill] sm:$0xff] %v15006_v31  ;;  %v15018_v14 = vmul.f32 %v9898_v10, %v13942_v9  ;;  %v15024_v54 = vmul.f32 %v9899_v61, %v13942_v9  ;;  %v9900_v31 = vld [vmem:[%s19680_s3 + $0x5a0] sm:$0xff] }
 0x354   :  { %20484 = vst [vmem:[#allocation125_spill] sm:$0xff] %v15012_v59  ;;  %v15030_v22 = vmul.f32 %v9900_v31, %v13942_v9  ;;  %v9901_v59 = vld [vmem:[%s19680_s3 + $0x5a8] sm:$0xff] }
 0x355   :  { %20485 = vst [vmem:[#allocation126_spill] sm:$0xff] %v15018_v14  ;;  %20486 = vst [vmem:[#allocation127_spill] sm:$0xff] %v15024_v54  ;;  %v15036_v10 = vmul.f32 %v9901_v59, %v13942_v9  ;;  %v9902_v14 = vld [vmem:[%s19680_s3 + $0x5b0] sm:$0xff]  ;;  %v9903_v54 = vld [vmem:[%s19680_s3 + $0x5b8] sm:$0xff] }
 0x356   :  { %20487 = vst [vmem:[#allocation128_spill] sm:$0xff] %v15030_v22  ;;  %v15042_v61 = vmul.f32 %v9902_v14, %v13942_v9  ;;  %v15048_v31 = vmul.f32 %v9903_v54, %v13942_v9  ;;  %v9904_v22 = vld [vmem:[%s19680_s3 + $0x5c0] sm:$0xff] }
 0x357   :  { %20488 = vst [vmem:[#allocation129_spill] sm:$0xff] %v15036_v10  ;;  %v15054_v59 = vmul.f32 %v9904_v22, %v13942_v9  ;;  %v9905_v10 = vld [vmem:[%s19680_s3 + $0x5c8] sm:$0xff] }
 0x358   :  { %20489 = vst [vmem:[#allocation130_spill] sm:$0xff] %v15042_v61  ;;  %20490 = vst [vmem:[#allocation131_spill] sm:$0xff] %v15048_v31  ;;  %v15060_v14 = vmul.f32 %v9905_v10, %v13942_v9  ;;  %v9906_v61 = vld [vmem:[%s19680_s3 + $0x5d0] sm:$0xff]  ;;  %v9907_v31 = vld [vmem:[%s19680_s3 + $0x5d8] sm:$0xff] }
 0x359   :  { %20491 = vst [vmem:[#allocation132_spill] sm:$0xff] %v15054_v59  ;;  %v15066_v54 = vmul.f32 %v9906_v61, %v13942_v9  ;;  %v15072_v22 = vmul.f32 %v9907_v31, %v13942_v9  ;;  %v9908_v59 = vld [vmem:[%s19680_s3 + $0x5e0] sm:$0xff] }
 0x35a   :  { %20492 = vst [vmem:[#allocation133_spill] sm:$0xff] %v15060_v14  ;;  %v15078_v10 = vmul.f32 %v9908_v59, %v13942_v9  ;;  %v9909_v14 = vld [vmem:[%s19680_s3 + $0x5e8] sm:$0xff] }
 0x35b   :  { %20493 = vst [vmem:[#allocation134_spill] sm:$0xff] %v15066_v54  ;;  %20494 = vst [vmem:[#allocation135_spill] sm:$0xff] %v15072_v22  ;;  %v15084_v61 = vmul.f32 %v9909_v14, %v13942_v9  ;;  %v9910_v54 = vld [vmem:[%s19680_s3 + $0x5f0] sm:$0xff]  ;;  %v9911_v22 = vld [vmem:[%s19680_s3 + $0x5f8] sm:$0xff] }
 0x35c   :  { %20495 = vst [vmem:[#allocation136_spill] sm:$0xff] %v15078_v10  ;;  %v15090_v31 = vmul.f32 %v9910_v54, %v13942_v9  ;;  %v15096_v59 = vmul.f32 %v9911_v22, %v13942_v9  ;;  %v9912_v10 = vld [vmem:[%s19680_s3 + $0x600] sm:$0xff] }
 0x35d   :  { %20496 = vst [vmem:[#allocation137_spill] sm:$0xff] %v15084_v61  ;;  %v15102_v14 = vmul.f32 %v9912_v10, %v13942_v9  ;;  %v9913_v61 = vld [vmem:[%s19680_s3 + $0x608] sm:$0xff] }
 0x35e   :  { %20497 = vst [vmem:[#allocation138_spill] sm:$0xff] %v15090_v31  ;;  %20498 = vst [vmem:[#allocation139_spill] sm:$0xff] %v15096_v59  ;;  %v15108_v54 = vmul.f32 %v9913_v61, %v13942_v9  ;;  %v9914_v31 = vld [vmem:[%s19680_s3 + $0x610] sm:$0xff]  ;;  %v9915_v59 = vld [vmem:[%s19680_s3 + $0x618] sm:$0xff] }
 0x35f   :  { %20499 = vst [vmem:[#allocation140_spill] sm:$0xff] %v15102_v14  ;;  %v15114_v22 = vmul.f32 %v9914_v31, %v13942_v9  ;;  %v15120_v10 = vmul.f32 %v9915_v59, %v13942_v9  ;;  %v9916_v14 = vld [vmem:[%s19680_s3 + $0x620] sm:$0xff] }
 0x360   :  { %20500 = vst [vmem:[#allocation141_spill] sm:$0xff] %v15108_v54  ;;  %v15126_v61 = vmul.f32 %v9916_v14, %v13942_v9  ;;  %v9917_v54 = vld [vmem:[%s19680_s3 + $0x628] sm:$0xff] }
 0x361   :  { %20501 = vst [vmem:[#allocation142_spill] sm:$0xff] %v15114_v22  ;;  %20502 = vst [vmem:[#allocation143_spill] sm:$0xff] %v15120_v10  ;;  %v15132_v31 = vmul.f32 %v9917_v54, %v13942_v9  ;;  %v9918_v22 = vld [vmem:[%s19680_s3 + $0x630] sm:$0xff]  ;;  %v9919_v10 = vld [vmem:[%s19680_s3 + $0x638] sm:$0xff] }
 0x362   :  { %20503 = vst [vmem:[#allocation144_spill] sm:$0xff] %v15126_v61  ;;  %v15138_v59 = vmul.f32 %v9918_v22, %v13942_v9  ;;  %v15144_v14 = vmul.f32 %v9919_v10, %v13942_v9  ;;  %v9920_v61 = vld [vmem:[%s19680_s3 + $0x640] sm:$0xff] }
 0x363   :  { %20504 = vst [vmem:[#allocation145_spill] sm:$0xff] %v15132_v31  ;;  %v15150_v54 = vmul.f32 %v9920_v61, %v13942_v9  ;;  %v9921_v31 = vld [vmem:[%s19680_s3 + $0x648] sm:$0xff] }
 0x364   :  { %20505 = vst [vmem:[#allocation146_spill] sm:$0xff] %v15138_v59  ;;  %20506 = vst [vmem:[#allocation147_spill] sm:$0xff] %v15144_v14  ;;  %v15156_v22 = vmul.f32 %v9921_v31, %v13942_v9  ;;  %v9922_v59 = vld [vmem:[%s19680_s3 + $0x650] sm:$0xff]  ;;  %v9923_v14 = vld [vmem:[%s19680_s3 + $0x658] sm:$0xff] }
 0x365   :  { %20507 = vst [vmem:[#allocation148_spill] sm:$0xff] %v15150_v54  ;;  %v15162_v10 = vmul.f32 %v9922_v59, %v13942_v9  ;;  %v15168_v61 = vmul.f32 %v9923_v14, %v13942_v9  ;;  %v9924_v54 = vld [vmem:[%s19680_s3 + $0x660] sm:$0xff] }
 0x366   :  { %20508 = vst [vmem:[#allocation149_spill] sm:$0xff] %v15156_v22  ;;  %v15174_v31 = vmul.f32 %v9924_v54, %v13942_v9  ;;  %v9925_v22 = vld [vmem:[%s19680_s3 + $0x668] sm:$0xff] }
 0x367   :  { %20509 = vst [vmem:[#allocation150_spill] sm:$0xff] %v15162_v10  ;;  %20510 = vst [vmem:[#allocation151_spill] sm:$0xff] %v15168_v61  ;;  %v15180_v59 = vmul.f32 %v9925_v22, %v13942_v9  ;;  %v9926_v10 = vld [vmem:[%s19680_s3 + $0x670] sm:$0xff]  ;;  %v9927_v61 = vld [vmem:[%s19680_s3 + $0x678] sm:$0xff] }
 0x368   :  { %20511 = vst [vmem:[#allocation152_spill] sm:$0xff] %v15174_v31  ;;  %v15186_v14 = vmul.f32 %v9926_v10, %v13942_v9  ;;  %v15192_v54 = vmul.f32 %v9927_v61, %v13942_v9  ;;  %v9928_v31 = vld [vmem:[%s19680_s3 + $0x680] sm:$0xff] }
 0x369   :  { %20512 = vst [vmem:[#allocation153_spill] sm:$0xff] %v15180_v59  ;;  %v15198_v22 = vmul.f32 %v9928_v31, %v13942_v9  ;;  %v9929_v59 = vld [vmem:[%s19680_s3 + $0x688] sm:$0xff] }
 0x36a   :  { %20513 = vst [vmem:[#allocation154_spill] sm:$0xff] %v15186_v14  ;;  %20514 = vst [vmem:[#allocation155_spill] sm:$0xff] %v15192_v54  ;;  %v15204_v10 = vmul.f32 %v9929_v59, %v13942_v9  ;;  %v9930_v14 = vld [vmem:[%s19680_s3 + $0x690] sm:$0xff]  ;;  %v9931_v54 = vld [vmem:[%s19680_s3 + $0x698] sm:$0xff] }
 0x36b   :  { %20515 = vst [vmem:[#allocation156_spill] sm:$0xff] %v15198_v22  ;;  %v15210_v61 = vmul.f32 %v9930_v14, %v13942_v9  ;;  %v15216_v31 = vmul.f32 %v9931_v54, %v13942_v9  ;;  %v9932_v22 = vld [vmem:[%s19680_s3 + $0x6a0] sm:$0xff] }
 0x36c   :  { %20516 = vst [vmem:[#allocation157_spill] sm:$0xff] %v15204_v10  ;;  %v15222_v59 = vmul.f32 %v9932_v22, %v13942_v9  ;;  %v9933_v10 = vld [vmem:[%s19680_s3 + $0x6a8] sm:$0xff] }
 0x36d   :  { %20517 = vst [vmem:[#allocation158_spill] sm:$0xff] %v15210_v61  ;;  %20518 = vst [vmem:[#allocation159_spill] sm:$0xff] %v15216_v31  ;;  %v15228_v14 = vmul.f32 %v9933_v10, %v13942_v9  ;;  %v9934_v61 = vld [vmem:[%s19680_s3 + $0x6b0] sm:$0xff]  ;;  %v9935_v31 = vld [vmem:[%s19680_s3 + $0x6b8] sm:$0xff] }
 0x36e   :  { %20519 = vst [vmem:[#allocation160_spill] sm:$0xff] %v15222_v59  ;;  %v15234_v54 = vmul.f32 %v9934_v61, %v13942_v9  ;;  %v15240_v22 = vmul.f32 %v9935_v31, %v13942_v9  ;;  %v9936_v59 = vld [vmem:[%s19680_s3 + $0x6c0] sm:$0xff] }
 0x36f   :  { %20520 = vst [vmem:[#allocation161_spill] sm:$0xff] %v15228_v14  ;;  %v15246_v10 = vmul.f32 %v9936_v59, %v13942_v9  ;;  %v9937_v14 = vld [vmem:[%s19680_s3 + $0x6c8] sm:$0xff] }
 0x370   :  { %20521 = vst [vmem:[#allocation162_spill] sm:$0xff] %v15234_v54  ;;  %20522 = vst [vmem:[#allocation163_spill] sm:$0xff] %v15240_v22  ;;  %v15252_v61 = vmul.f32 %v9937_v14, %v13942_v9  ;;  %v9938_v54 = vld [vmem:[%s19680_s3 + $0x6d0] sm:$0xff]  ;;  %v9939_v22 = vld [vmem:[%s19680_s3 + $0x6d8] sm:$0xff] }
 0x371   :  { %20523 = vst [vmem:[#allocation164_spill] sm:$0xff] %v15246_v10  ;;  %v15258_v31 = vmul.f32 %v9938_v54, %v13942_v9  ;;  %v15264_v59 = vmul.f32 %v9939_v22, %v13942_v9  ;;  %v9940_v10 = vld [vmem:[%s19680_s3 + $0x6e0] sm:$0xff] }
 0x372   :  { %20524 = vst [vmem:[#allocation165_spill] sm:$0xff] %v15252_v61  ;;  %v15270_v14 = vmul.f32 %v9940_v10, %v13942_v9  ;;  %v9941_v61 = vld [vmem:[%s19680_s3 + $0x6e8] sm:$0xff] }
 0x373   :  { %20525 = vst [vmem:[#allocation166_spill] sm:$0xff] %v15258_v31  ;;  %20526 = vst [vmem:[#allocation167_spill] sm:$0xff] %v15264_v59  ;;  %v15276_v54 = vmul.f32 %v9941_v61, %v13942_v9  ;;  %v9942_v31 = vld [vmem:[%s19680_s3 + $0x6f0] sm:$0xff]  ;;  %v9943_v59 = vld [vmem:[%s19680_s3 + $0x6f8] sm:$0xff] }
 0x374   :  { %20527 = vst [vmem:[#allocation168_spill] sm:$0xff] %v15270_v14  ;;  %v15282_v22 = vmul.f32 %v9942_v31, %v13942_v9  ;;  %v15288_v10 = vmul.f32 %v9943_v59, %v13942_v9  ;;  %v9944_v14 = vld [vmem:[%s19680_s3 + $0x700] sm:$0xff] }
 0x375   :  { %20528 = vst [vmem:[#allocation169_spill] sm:$0xff] %v15276_v54  ;;  %v15294_v61 = vmul.f32 %v9944_v14, %v13942_v9  ;;  %v9945_v54 = vld [vmem:[%s19680_s3 + $0x708] sm:$0xff] }
 0x376   :  { %20529 = vst [vmem:[#allocation170_spill] sm:$0xff] %v15282_v22  ;;  %20530 = vst [vmem:[#allocation171_spill] sm:$0xff] %v15288_v10  ;;  %v15300_v31 = vmul.f32 %v9945_v54, %v13942_v9  ;;  %v9946_v22 = vld [vmem:[%s19680_s3 + $0x710] sm:$0xff]  ;;  %v9947_v10 = vld [vmem:[%s19680_s3 + $0x718] sm:$0xff] }
 0x377   :  { %20531 = vst [vmem:[#allocation172_spill] sm:$0xff] %v15294_v61  ;;  %v15306_v59 = vmul.f32 %v9946_v22, %v13942_v9  ;;  %v15312_v14 = vmul.f32 %v9947_v10, %v13942_v9  ;;  %v9948_v61 = vld [vmem:[%s19680_s3 + $0x720] sm:$0xff] }
 0x378   :  { %20532 = vst [vmem:[#allocation173_spill] sm:$0xff] %v15300_v31  ;;  %v15318_v54 = vmul.f32 %v9948_v61, %v13942_v9  ;;  %v9949_v31 = vld [vmem:[%s19680_s3 + $0x728] sm:$0xff] }
 0x379   :  { %20533 = vst [vmem:[#allocation174_spill] sm:$0xff] %v15306_v59  ;;  %20534 = vst [vmem:[#allocation175_spill] sm:$0xff] %v15312_v14  ;;  %v15324_v22 = vmul.f32 %v9949_v31, %v13942_v9  ;;  %v9950_v59 = vld [vmem:[%s19680_s3 + $0x730] sm:$0xff]  ;;  %v9951_v14 = vld [vmem:[%s19680_s3 + $0x738] sm:$0xff] }
 0x37a   :  { %20535 = vst [vmem:[#allocation176_spill] sm:$0xff] %v15318_v54  ;;  %v15330_v10 = vmul.f32 %v9950_v59, %v13942_v9  ;;  %v15336_v61 = vmul.f32 %v9951_v14, %v13942_v9  ;;  %v9952_v54 = vld [vmem:[%s19680_s3 + $0x740] sm:$0xff] }
 0x37b   :  { %20536 = vst [vmem:[#allocation177_spill] sm:$0xff] %v15324_v22  ;;  %v15342_v31 = vmul.f32 %v9952_v54, %v13942_v9  ;;  %v9953_v22 = vld [vmem:[%s19680_s3 + $0x748] sm:$0xff] }
 0x37c   :  { %20537 = vst [vmem:[#allocation178_spill] sm:$0xff] %v15330_v10  ;;  %20538 = vst [vmem:[#allocation179_spill] sm:$0xff] %v15336_v61  ;;  %v15348_v59 = vmul.f32 %v9953_v22, %v13942_v9  ;;  %v9954_v10 = vld [vmem:[%s19680_s3 + $0x750] sm:$0xff]  ;;  %v9955_v61 = vld [vmem:[%s19680_s3 + $0x758] sm:$0xff] }
 0x37d   :  { %20539 = vst [vmem:[#allocation180_spill] sm:$0xff] %v15342_v31  ;;  %v15354_v14 = vmul.f32 %v9954_v10, %v13942_v9  ;;  %v15360_v54 = vmul.f32 %v9955_v61, %v13942_v9  ;;  %v9956_v31 = vld [vmem:[%s19680_s3 + $0x760] sm:$0xff] }
 0x37e   :  { %20540 = vst [vmem:[#allocation181_spill] sm:$0xff] %v15348_v59  ;;  %v15366_v22 = vmul.f32 %v9956_v31, %v13942_v9  ;;  %v9957_v59 = vld [vmem:[%s19680_s3 + $0x768] sm:$0xff] }
 0x37f   :  { %20541 = vst [vmem:[#allocation182_spill] sm:$0xff] %v15354_v14  ;;  %20542 = vst [vmem:[#allocation183_spill] sm:$0xff] %v15360_v54  ;;  %v15372_v10 = vmul.f32 %v9957_v59, %v13942_v9  ;;  %v9958_v14 = vld [vmem:[%s19680_s3 + $0x770] sm:$0xff]  ;;  %v9959_v54 = vld [vmem:[%s19680_s3 + $0x778] sm:$0xff] }
 0x380   :  { %20543 = vst [vmem:[#allocation184_spill] sm:$0xff] %v15366_v22  ;;  %v15378_v61 = vmul.f32 %v9958_v14, %v13942_v9  ;;  %v15384_v31 = vmul.f32 %v9959_v54, %v13942_v9  ;;  %v9960_v22 = vld [vmem:[%s19680_s3 + $0x780] sm:$0xff] }
 0x381   :  { %20544 = vst [vmem:[#allocation185_spill] sm:$0xff] %v15372_v10  ;;  %v15390_v59 = vmul.f32 %v9960_v22, %v13942_v9  ;;  %v9961_v10 = vld [vmem:[%s19680_s3 + $0x788] sm:$0xff] }
 0x382   :  { %20545 = vst [vmem:[#allocation186_spill] sm:$0xff] %v15378_v61  ;;  %20546 = vst [vmem:[#allocation187_spill] sm:$0xff] %v15384_v31  ;;  %v15396_v14 = vmul.f32 %v9961_v10, %v13942_v9  ;;  %v9962_v61 = vld [vmem:[%s19680_s3 + $0x790] sm:$0xff]  ;;  %v9963_v31 = vld [vmem:[%s19680_s3 + $0x798] sm:$0xff] }
 0x383   :  { %20547 = vst [vmem:[#allocation188_spill] sm:$0xff] %v15390_v59  ;;  %v15402_v54 = vmul.f32 %v9962_v61, %v13942_v9  ;;  %v15408_v22 = vmul.f32 %v9963_v31, %v13942_v9  ;;  %v9964_v59 = vld [vmem:[%s19680_s3 + $0x7a0] sm:$0xff] }
 0x384   :  { %20548 = vst [vmem:[#allocation189_spill] sm:$0xff] %v15396_v14  ;;  %v15414_v10 = vmul.f32 %v9964_v59, %v13942_v9  ;;  %v9965_v14 = vld [vmem:[%s19680_s3 + $0x7a8] sm:$0xff] }
 0x385   :  { %20549 = vst [vmem:[#allocation190_spill] sm:$0xff] %v15402_v54  ;;  %20550 = vst [vmem:[#allocation191_spill] sm:$0xff] %v15408_v22  ;;  %v15420_v61 = vmul.f32 %v9965_v14, %v13942_v9  ;;  %v9966_v54 = vld [vmem:[%s19680_s3 + $0x7b0] sm:$0xff]  ;;  %v9967_v22 = vld [vmem:[%s19680_s3 + $0x7b8] sm:$0xff] }
 0x386   :  { %20551 = vst [vmem:[#allocation192_spill] sm:$0xff] %v15414_v10  ;;  %v15426_v31 = vmul.f32 %v9966_v54, %v13942_v9  ;;  %v15432_v59 = vmul.f32 %v9967_v22, %v13942_v9  ;;  %v9968_v10 = vld [vmem:[%s19680_s3 + $0x7c0] sm:$0xff] }
 0x387   :  { %20552 = vst [vmem:[#allocation193_spill] sm:$0xff] %v15420_v61  ;;  %v15438_v14 = vmul.f32 %v9968_v10, %v13942_v9  ;;  %v9969_v61 = vld [vmem:[%s19680_s3 + $0x7c8] sm:$0xff] }
 0x388   :  { %20553 = vst [vmem:[#allocation194_spill] sm:$0xff] %v15426_v31  ;;  %20554 = vst [vmem:[#allocation195_spill] sm:$0xff] %v15432_v59  ;;  %v15444_v54 = vmul.f32 %v9969_v61, %v13942_v9  ;;  %v9970_v31 = vld [vmem:[%s19680_s3 + $0x7d0] sm:$0xff]  ;;  %v9971_v59 = vld [vmem:[%s19680_s3 + $0x7d8] sm:$0xff] }
 0x389   :  { %20555 = vst [vmem:[#allocation196_spill] sm:$0xff] %v15438_v14  ;;  %v15450_v22 = vmul.f32 %v9970_v31, %v13942_v9  ;;  %v15456_v10 = vmul.f32 %v9971_v59, %v13942_v9  ;;  %v9972_v14 = vld [vmem:[%s19680_s3 + $0x7e0] sm:$0xff] }
 0x38a   :  { %20556 = vst [vmem:[#allocation197_spill] sm:$0xff] %v15444_v54  ;;  %v15462_v61 = vmul.f32 %v9972_v14, %v13942_v9  ;;  %v9973_v54 = vld [vmem:[%s19680_s3 + $0x7e8] sm:$0xff] }
 0x38b   :  { %20557 = vst [vmem:[#allocation198_spill] sm:$0xff] %v15450_v22  ;;  %20558 = vst [vmem:[#allocation199_spill] sm:$0xff] %v15456_v10  ;;  %v15468_v31 = vmul.f32 %v9973_v54, %v13942_v9  ;;  %v9974_v22 = vld [vmem:[%s19680_s3 + $0x7f0] sm:$0xff]  ;;  %v9975_v10 = vld [vmem:[%s19680_s3 + $0x7f8] sm:$0xff] }
 0x38c   :  { %20559 = vst [vmem:[#allocation200_spill] sm:$0xff] %v15462_v61  ;;  %v15474_v59 = vmul.f32 %v9974_v22, %v13942_v9  ;;  %v15480_v14 = vmul.f32 %v9975_v10, %v13942_v9  ;;  %v9976_v61 = vld [vmem:[%s19680_s3 + $0x800] sm:$0xff] }
 0x38d   :  { %20560 = vst [vmem:[#allocation201_spill] sm:$0xff] %v15468_v31  ;;  %v15486_v54 = vmul.f32 %v9976_v61, %v13942_v9  ;;  %v9977_v31 = vld [vmem:[%s19680_s3 + $0x808] sm:$0xff] }
 0x38e   :  { %20561 = vst [vmem:[#allocation202_spill] sm:$0xff] %v15474_v59  ;;  %20562 = vst [vmem:[#allocation203_spill] sm:$0xff] %v15480_v14  ;;  %v15492_v22 = vmul.f32 %v9977_v31, %v13942_v9  ;;  %v9978_v59 = vld [vmem:[%s19680_s3 + $0x810] sm:$0xff]  ;;  %v9979_v14 = vld [vmem:[%s19680_s3 + $0x818] sm:$0xff] }
 0x38f   :  { %20563 = vst [vmem:[#allocation204_spill] sm:$0xff] %v15486_v54  ;;  %v15498_v10 = vmul.f32 %v9978_v59, %v13942_v9  ;;  %v15504_v61 = vmul.f32 %v9979_v14, %v13942_v9  ;;  %v9980_v54 = vld [vmem:[%s19680_s3 + $0x820] sm:$0xff] }
 0x390   :  { %20564 = vst [vmem:[#allocation205_spill] sm:$0xff] %v15492_v22  ;;  %v15510_v31 = vmul.f32 %v9980_v54, %v13942_v9  ;;  %v9981_v22 = vld [vmem:[%s19680_s3 + $0x828] sm:$0xff] }
 0x391   :  { %20565 = vst [vmem:[#allocation206_spill] sm:$0xff] %v15498_v10  ;;  %20566 = vst [vmem:[#allocation207_spill] sm:$0xff] %v15504_v61  ;;  %v15516_v59 = vmul.f32 %v9981_v22, %v13942_v9  ;;  %v9982_v10 = vld [vmem:[%s19680_s3 + $0x830] sm:$0xff]  ;;  %v9983_v61 = vld [vmem:[%s19680_s3 + $0x838] sm:$0xff] }
 0x392   :  { %20567 = vst [vmem:[#allocation208_spill] sm:$0xff] %v15510_v31  ;;  %v15522_v14 = vmul.f32 %v9982_v10, %v13942_v9  ;;  %v15528_v54 = vmul.f32 %v9983_v61, %v13942_v9  ;;  %v9984_v31 = vld [vmem:[%s19680_s3 + $0x840] sm:$0xff] }
 0x393   :  { %20568 = vst [vmem:[#allocation209_spill] sm:$0xff] %v15516_v59  ;;  %v15534_v22 = vmul.f32 %v9984_v31, %v13942_v9  ;;  %v9985_v59 = vld [vmem:[%s19680_s3 + $0x848] sm:$0xff] }
 0x394   :  { %20569 = vst [vmem:[#allocation210_spill] sm:$0xff] %v15522_v14  ;;  %20570 = vst [vmem:[#allocation211_spill] sm:$0xff] %v15528_v54  ;;  %v15540_v10 = vmul.f32 %v9985_v59, %v13942_v9  ;;  %v9986_v14 = vld [vmem:[%s19680_s3 + $0x850] sm:$0xff]  ;;  %v9987_v54 = vld [vmem:[%s19680_s3 + $0x858] sm:$0xff] }
 0x395   :  { %20571 = vst [vmem:[#allocation212_spill] sm:$0xff] %v15534_v22  ;;  %v15546_v61 = vmul.f32 %v9986_v14, %v13942_v9  ;;  %v15552_v31 = vmul.f32 %v9987_v54, %v13942_v9  ;;  %v9988_v22 = vld [vmem:[%s19680_s3 + $0x860] sm:$0xff] }
 0x396   :  { %20572 = vst [vmem:[#allocation213_spill] sm:$0xff] %v15540_v10  ;;  %v15558_v59 = vmul.f32 %v9988_v22, %v13942_v9  ;;  %v9989_v10 = vld [vmem:[%s19680_s3 + $0x868] sm:$0xff] }
 0x397   :  { %20573 = vst [vmem:[#allocation214_spill] sm:$0xff] %v15546_v61  ;;  %20574 = vst [vmem:[#allocation215_spill] sm:$0xff] %v15552_v31  ;;  %v15564_v14 = vmul.f32 %v9989_v10, %v13942_v9  ;;  %v9990_v61 = vld [vmem:[%s19680_s3 + $0x870] sm:$0xff]  ;;  %v9991_v31 = vld [vmem:[%s19680_s3 + $0x878] sm:$0xff] }
 0x398   :  { %20575 = vst [vmem:[#allocation216_spill] sm:$0xff] %v15558_v59  ;;  %v15570_v54 = vmul.f32 %v9990_v61, %v13942_v9  ;;  %v15576_v22 = vmul.f32 %v9991_v31, %v13942_v9  ;;  %v9992_v59 = vld [vmem:[%s19680_s3 + $0x880] sm:$0xff] }
 0x399   :  { %20576 = vst [vmem:[#allocation217_spill] sm:$0xff] %v15564_v14  ;;  %v15582_v10 = vmul.f32 %v9992_v59, %v13942_v9  ;;  %v9993_v14 = vld [vmem:[%s19680_s3 + $0x888] sm:$0xff] }
 0x39a   :  { %20577 = vst [vmem:[#allocation218_spill] sm:$0xff] %v15570_v54  ;;  %20578 = vst [vmem:[#allocation219_spill] sm:$0xff] %v15576_v22  ;;  %v15588_v61 = vmul.f32 %v9993_v14, %v13942_v9  ;;  %v9994_v54 = vld [vmem:[%s19680_s3 + $0x890] sm:$0xff]  ;;  %v9995_v22 = vld [vmem:[%s19680_s3 + $0x898] sm:$0xff] }
 0x39b   :  { %20579 = vst [vmem:[#allocation220_spill] sm:$0xff] %v15582_v10  ;;  %v15594_v31 = vmul.f32 %v9994_v54, %v13942_v9  ;;  %v15600_v59 = vmul.f32 %v9995_v22, %v13942_v9  ;;  %v9996_v10 = vld [vmem:[%s19680_s3 + $0x8a0] sm:$0xff] }
 0x39c   :  { %20580 = vst [vmem:[#allocation221_spill] sm:$0xff] %v15588_v61  ;;  %v15606_v14 = vmul.f32 %v9996_v10, %v13942_v9  ;;  %v9997_v61 = vld [vmem:[%s19680_s3 + $0x8a8] sm:$0xff] }
 0x39d   :  { %20581 = vst [vmem:[#allocation222_spill] sm:$0xff] %v15594_v31  ;;  %20582 = vst [vmem:[#allocation223_spill] sm:$0xff] %v15600_v59  ;;  %v15612_v54 = vmul.f32 %v9997_v61, %v13942_v9  ;;  %v9998_v31 = vld [vmem:[%s19680_s3 + $0x8b0] sm:$0xff]  ;;  %v9999_v59 = vld [vmem:[%s19680_s3 + $0x8b8] sm:$0xff] }
 0x39e   :  { %20583 = vst [vmem:[#allocation224_spill] sm:$0xff] %v15606_v14  ;;  %v15618_v22 = vmul.f32 %v9998_v31, %v13942_v9  ;;  %v15624_v10 = vmul.f32 %v9999_v59, %v13942_v9  ;;  %v10000_v14 = vld [vmem:[%s19680_s3 + $0x8c0] sm:$0xff] }
 0x39f   :  { %20584 = vst [vmem:[#allocation225_spill] sm:$0xff] %v15612_v54  ;;  %v15630_v61 = vmul.f32 %v10000_v14, %v13942_v9  ;;  %v10001_v54 = vld [vmem:[%s19680_s3 + $0x8c8] sm:$0xff] }
 0x3a0   :  { %20585 = vst [vmem:[#allocation226_spill] sm:$0xff] %v15618_v22  ;;  %20586 = vst [vmem:[#allocation227_spill] sm:$0xff] %v15624_v10  ;;  %v15636_v31 = vmul.f32 %v10001_v54, %v13942_v9  ;;  %v10002_v22 = vld [vmem:[%s19680_s3 + $0x8d0] sm:$0xff]  ;;  %v10003_v10 = vld [vmem:[%s19680_s3 + $0x8d8] sm:$0xff] }
 0x3a1   :  { %20587 = vst [vmem:[#allocation228_spill] sm:$0xff] %v15630_v61  ;;  %v15642_v59 = vmul.f32 %v10002_v22, %v13942_v9  ;;  %v15648_v14 = vmul.f32 %v10003_v10, %v13942_v9  ;;  %v10004_v61 = vld [vmem:[%s19680_s3 + $0x8e0] sm:$0xff] }
 0x3a2   :  { %20588 = vst [vmem:[#allocation229_spill] sm:$0xff] %v15636_v31  ;;  %v15654_v54 = vmul.f32 %v10004_v61, %v13942_v9  ;;  %v10005_v31 = vld [vmem:[%s19680_s3 + $0x8e8] sm:$0xff] }
 0x3a3   :  { %20589 = vst [vmem:[#allocation230_spill] sm:$0xff] %v15642_v59  ;;  %20590 = vst [vmem:[#allocation231_spill] sm:$0xff] %v15648_v14  ;;  %v15660_v22 = vmul.f32 %v10005_v31, %v13942_v9  ;;  %v10006_v59 = vld [vmem:[%s19680_s3 + $0x8f0] sm:$0xff]  ;;  %v10007_v14 = vld [vmem:[%s19680_s3 + $0x8f8] sm:$0xff] }
 0x3a4   :  { %20591 = vst [vmem:[#allocation232_spill] sm:$0xff] %v15654_v54  ;;  %v15666_v10 = vmul.f32 %v10006_v59, %v13942_v9  ;;  %v15672_v61 = vmul.f32 %v10007_v14, %v13942_v9  ;;  %v10008_v54 = vld [vmem:[%s19680_s3 + $0x900] sm:$0xff] }
 0x3a5   :  { %20592 = vst [vmem:[#allocation233_spill] sm:$0xff] %v15660_v22  ;;  %v15678_v31 = vmul.f32 %v10008_v54, %v13942_v9  ;;  %v10009_v22 = vld [vmem:[%s19680_s3 + $0x908] sm:$0xff] }
 0x3a6   :  { %20593 = vst [vmem:[#allocation234_spill] sm:$0xff] %v15666_v10  ;;  %20594 = vst [vmem:[#allocation235_spill] sm:$0xff] %v15672_v61  ;;  %v15684_v59 = vmul.f32 %v10009_v22, %v13942_v9  ;;  %v10010_v10 = vld [vmem:[%s19680_s3 + $0x910] sm:$0xff]  ;;  %v10011_v61 = vld [vmem:[%s19680_s3 + $0x918] sm:$0xff] }
 0x3a7   :  { %20595 = vst [vmem:[#allocation236_spill] sm:$0xff] %v15678_v31  ;;  %v15690_v14 = vmul.f32 %v10010_v10, %v13942_v9  ;;  %v15696_v54 = vmul.f32 %v10011_v61, %v13942_v9  ;;  %v10012_v31 = vld [vmem:[%s19680_s3 + $0x920] sm:$0xff] }
 0x3a8   :  { %20596 = vst [vmem:[#allocation237_spill] sm:$0xff] %v15684_v59  ;;  %v15702_v22 = vmul.f32 %v10012_v31, %v13942_v9  ;;  %v10013_v59 = vld [vmem:[%s19680_s3 + $0x928] sm:$0xff] }
 0x3a9   :  { %20597 = vst [vmem:[#allocation238_spill] sm:$0xff] %v15690_v14  ;;  %20598 = vst [vmem:[#allocation239_spill] sm:$0xff] %v15696_v54  ;;  %v15708_v10 = vmul.f32 %v10013_v59, %v13942_v9  ;;  %v10014_v14 = vld [vmem:[%s19680_s3 + $0x930] sm:$0xff]  ;;  %v10015_v54 = vld [vmem:[%s19680_s3 + $0x938] sm:$0xff] }
 0x3aa   :  { %20599 = vst [vmem:[#allocation240_spill] sm:$0xff] %v15702_v22  ;;  %v15714_v61 = vmul.f32 %v10014_v14, %v13942_v9  ;;  %v15720_v31 = vmul.f32 %v10015_v54, %v13942_v9  ;;  %v10016_v22 = vld [vmem:[%s19680_s3 + $0x940] sm:$0xff] }
 0x3ab   :  { %20600 = vst [vmem:[#allocation241_spill] sm:$0xff] %v15708_v10  ;;  %v15726_v59 = vmul.f32 %v10016_v22, %v13942_v9  ;;  %v10017_v10 = vld [vmem:[%s19680_s3 + $0x948] sm:$0xff] }
 0x3ac   :  { %20601 = vst [vmem:[#allocation242_spill] sm:$0xff] %v15714_v61  ;;  %20602 = vst [vmem:[#allocation243_spill] sm:$0xff] %v15720_v31  ;;  %v15732_v14 = vmul.f32 %v10017_v10, %v13942_v9  ;;  %v10018_v61 = vld [vmem:[%s19680_s3 + $0x950] sm:$0xff]  ;;  %v10019_v31 = vld [vmem:[%s19680_s3 + $0x958] sm:$0xff] }
 0x3ad   :  { %20603 = vst [vmem:[#allocation244_spill] sm:$0xff] %v15726_v59  ;;  %v15738_v54 = vmul.f32 %v10018_v61, %v13942_v9  ;;  %v15744_v22 = vmul.f32 %v10019_v31, %v13942_v9  ;;  %v10020_v59 = vld [vmem:[%s19680_s3 + $0x960] sm:$0xff] }
 0x3ae   :  { %20604 = vst [vmem:[#allocation245_spill] sm:$0xff] %v15732_v14  ;;  %v15750_v10 = vmul.f32 %v10020_v59, %v13942_v9  ;;  %v10021_v14 = vld [vmem:[%s19680_s3 + $0x968] sm:$0xff] }
 0x3af   :  { %20605 = vst [vmem:[#allocation246_spill] sm:$0xff] %v15738_v54  ;;  %20606 = vst [vmem:[#allocation247_spill] sm:$0xff] %v15744_v22  ;;  %v15756_v61 = vmul.f32 %v10021_v14, %v13942_v9  ;;  %v10022_v54 = vld [vmem:[%s19680_s3 + $0x970] sm:$0xff]  ;;  %v10023_v22 = vld [vmem:[%s19680_s3 + $0x978] sm:$0xff] }
 0x3b0   :  { %20607 = vst [vmem:[#allocation248_spill] sm:$0xff] %v15750_v10  ;;  %v15762_v31 = vmul.f32 %v10022_v54, %v13942_v9  ;;  %v15768_v59 = vmul.f32 %v10023_v22, %v13942_v9  ;;  %v10024_v10 = vld [vmem:[%s19680_s3 + $0x980] sm:$0xff] }
 0x3b1   :  { %20608 = vst [vmem:[#allocation249_spill] sm:$0xff] %v15756_v61  ;;  %v15774_v14 = vmul.f32 %v10024_v10, %v13942_v9  ;;  %v10025_v61 = vld [vmem:[%s19680_s3 + $0x988] sm:$0xff] }
 0x3b2   :  { %20609 = vst [vmem:[#allocation250_spill] sm:$0xff] %v15762_v31  ;;  %20610 = vst [vmem:[#allocation251_spill] sm:$0xff] %v15768_v59  ;;  %v15780_v54 = vmul.f32 %v10025_v61, %v13942_v9  ;;  %v10026_v31 = vld [vmem:[%s19680_s3 + $0x990] sm:$0xff]  ;;  %v10027_v59 = vld [vmem:[%s19680_s3 + $0x998] sm:$0xff] }
 0x3b3   :  { %20611 = vst [vmem:[#allocation252_spill] sm:$0xff] %v15774_v14  ;;  %v15786_v22 = vmul.f32 %v10026_v31, %v13942_v9  ;;  %v15792_v10 = vmul.f32 %v10027_v59, %v13942_v9  ;;  %v10028_v14 = vld [vmem:[%s19680_s3 + $0x9a0] sm:$0xff] }
 0x3b4   :  { %20612 = vst [vmem:[#allocation253_spill] sm:$0xff] %v15780_v54  ;;  %v15798_v61 = vmul.f32 %v10028_v14, %v13942_v9  ;;  %v10029_v54 = vld [vmem:[%s19680_s3 + $0x9a8] sm:$0xff] }
 0x3b5   :  { %20613 = vst [vmem:[#allocation254_spill] sm:$0xff] %v15786_v22  ;;  %20614 = vst [vmem:[#allocation255_spill] sm:$0xff] %v15792_v10  ;;  %v15804_v31 = vmul.f32 %v10029_v54, %v13942_v9  ;;  %v10030_v22 = vld [vmem:[%s19680_s3 + $0x9b0] sm:$0xff]  ;;  %v10031_v10 = vld [vmem:[%s19680_s3 + $0x9b8] sm:$0xff] }
 0x3b6   :  { %20615 = vst [vmem:[#allocation256_spill] sm:$0xff] %v15798_v61  ;;  %v15810_v59 = vmul.f32 %v10030_v22, %v13942_v9  ;;  %v15816_v14 = vmul.f32 %v10031_v10, %v13942_v9  ;;  %v10032_v61 = vld [vmem:[%s19680_s3 + $0x9c0] sm:$0xff] }
 0x3b7   :  { %20616 = vst [vmem:[#allocation257_spill] sm:$0xff] %v15804_v31  ;;  %v15822_v54 = vmul.f32 %v10032_v61, %v13942_v9  ;;  %v10033_v31 = vld [vmem:[%s19680_s3 + $0x9c8] sm:$0xff] }
 0x3b8   :  { %20617 = vst [vmem:[#allocation258_spill] sm:$0xff] %v15810_v59  ;;  %20618 = vst [vmem:[#allocation259_spill] sm:$0xff] %v15816_v14  ;;  %v15828_v22 = vmul.f32 %v10033_v31, %v13942_v9  ;;  %v10034_v59 = vld [vmem:[%s19680_s3 + $0x9d0] sm:$0xff]  ;;  %v10035_v14 = vld [vmem:[%s19680_s3 + $0x9d8] sm:$0xff] }
 0x3b9   :  { %20619 = vst [vmem:[#allocation260_spill] sm:$0xff] %v15822_v54  ;;  %v15834_v10 = vmul.f32 %v10034_v59, %v13942_v9  ;;  %v15840_v61 = vmul.f32 %v10035_v14, %v13942_v9  ;;  %v10036_v54 = vld [vmem:[%s19680_s3 + $0x9e0] sm:$0xff] }
 0x3ba   :  { %20620 = vst [vmem:[#allocation261_spill] sm:$0xff] %v15828_v22  ;;  %v15846_v31 = vmul.f32 %v10036_v54, %v13942_v9  ;;  %v10037_v22 = vld [vmem:[%s19680_s3 + $0x9e8] sm:$0xff] }
 0x3bb   :  { %20621 = vst [vmem:[#allocation262_spill] sm:$0xff] %v15834_v10  ;;  %20622 = vst [vmem:[#allocation263_spill] sm:$0xff] %v15840_v61  ;;  %v15852_v59 = vmul.f32 %v10037_v22, %v13942_v9  ;;  %v10038_v10 = vld [vmem:[%s19680_s3 + $0x9f0] sm:$0xff]  ;;  %v10039_v61 = vld [vmem:[%s19680_s3 + $0x9f8] sm:$0xff] }
 0x3bc   :  { %20623 = vst [vmem:[#allocation264_spill] sm:$0xff] %v15846_v31  ;;  %v15858_v14 = vmul.f32 %v10038_v10, %v13942_v9  ;;  %v15864_v54 = vmul.f32 %v10039_v61, %v13942_v9  ;;  %v10040_v31 = vld [vmem:[%s19680_s3 + $0xa00] sm:$0xff] }
 0x3bd   :  { %20624 = vst [vmem:[#allocation265_spill] sm:$0xff] %v15852_v59  ;;  %v15870_v22 = vmul.f32 %v10040_v31, %v13942_v9  ;;  %v10041_v59 = vld [vmem:[%s19680_s3 + $0xa08] sm:$0xff] }
 0x3be   :  { %20625 = vst [vmem:[#allocation266_spill] sm:$0xff] %v15858_v14  ;;  %20626 = vst [vmem:[#allocation267_spill] sm:$0xff] %v15864_v54  ;;  %v15876_v10 = vmul.f32 %v10041_v59, %v13942_v9  ;;  %v10042_v14 = vld [vmem:[%s19680_s3 + $0xa10] sm:$0xff]  ;;  %v10043_v54 = vld [vmem:[%s19680_s3 + $0xa18] sm:$0xff] }
 0x3bf   :  { %20627 = vst [vmem:[#allocation268_spill] sm:$0xff] %v15870_v22  ;;  %v15882_v61 = vmul.f32 %v10042_v14, %v13942_v9  ;;  %v15888_v31 = vmul.f32 %v10043_v54, %v13942_v9  ;;  %v10044_v22 = vld [vmem:[%s19680_s3 + $0xa20] sm:$0xff] }
 0x3c0   :  { %20628 = vst [vmem:[#allocation269_spill] sm:$0xff] %v15876_v10  ;;  %v15894_v59 = vmul.f32 %v10044_v22, %v13942_v9  ;;  %v10045_v10 = vld [vmem:[%s19680_s3 + $0xa28] sm:$0xff] }
 0x3c1   :  { %20629 = vst [vmem:[#allocation270_spill] sm:$0xff] %v15882_v61  ;;  %20630 = vst [vmem:[#allocation271_spill] sm:$0xff] %v15888_v31  ;;  %v15900_v14 = vmul.f32 %v10045_v10, %v13942_v9  ;;  %v10046_v61 = vld [vmem:[%s19680_s3 + $0xa30] sm:$0xff]  ;;  %v10047_v31 = vld [vmem:[%s19680_s3 + $0xa38] sm:$0xff] }
 0x3c2   :  { %20631 = vst [vmem:[#allocation272_spill] sm:$0xff] %v15894_v59  ;;  %v15906_v54 = vmul.f32 %v10046_v61, %v13942_v9  ;;  %v15912_v22 = vmul.f32 %v10047_v31, %v13942_v9  ;;  %v10048_v59 = vld [vmem:[%s19680_s3 + $0xa40] sm:$0xff] }
 0x3c3   :  { %20632 = vst [vmem:[#allocation273_spill] sm:$0xff] %v15900_v14  ;;  %v15918_v10 = vmul.f32 %v10048_v59, %v13942_v9  ;;  %v10049_v14 = vld [vmem:[%s19680_s3 + $0xa48] sm:$0xff] }
 0x3c4   :  { %20633 = vst [vmem:[#allocation274_spill] sm:$0xff] %v15906_v54  ;;  %20634 = vst [vmem:[#allocation275_spill] sm:$0xff] %v15912_v22  ;;  %v15924_v61 = vmul.f32 %v10049_v14, %v13942_v9  ;;  %v10050_v54 = vld [vmem:[%s19680_s3 + $0xa50] sm:$0xff]  ;;  %v10051_v22 = vld [vmem:[%s19680_s3 + $0xa58] sm:$0xff] }
 0x3c5   :  { %20635 = vst [vmem:[#allocation276_spill] sm:$0xff] %v15918_v10  ;;  %v15930_v31 = vmul.f32 %v10050_v54, %v13942_v9  ;;  %v15936_v59 = vmul.f32 %v10051_v22, %v13942_v9  ;;  %v10052_v10 = vld [vmem:[%s19680_s3 + $0xa60] sm:$0xff] }
 0x3c6   :  { %20636 = vst [vmem:[#allocation277_spill] sm:$0xff] %v15924_v61  ;;  %v15942_v14 = vmul.f32 %v10052_v10, %v13942_v9  ;;  %v10053_v61 = vld [vmem:[%s19680_s3 + $0xa68] sm:$0xff] }
 0x3c7   :  { %20637 = vst [vmem:[#allocation278_spill] sm:$0xff] %v15930_v31  ;;  %20638 = vst [vmem:[#allocation279_spill] sm:$0xff] %v15936_v59  ;;  %v15948_v54 = vmul.f32 %v10053_v61, %v13942_v9  ;;  %v10054_v31 = vld [vmem:[%s19680_s3 + $0xa70] sm:$0xff]  ;;  %v10055_v59 = vld [vmem:[%s19680_s3 + $0xa78] sm:$0xff] }
 0x3c8   :  { %20639 = vst [vmem:[#allocation280_spill] sm:$0xff] %v15942_v14  ;;  %v15954_v22 = vmul.f32 %v10054_v31, %v13942_v9  ;;  %v15960_v10 = vmul.f32 %v10055_v59, %v13942_v9  ;;  %v10056_v14 = vld [vmem:[%s19680_s3 + $0xa80] sm:$0xff] }
 0x3c9   :  { %20640 = vst [vmem:[#allocation281_spill] sm:$0xff] %v15948_v54  ;;  %v15966_v61 = vmul.f32 %v10056_v14, %v13942_v9  ;;  %v10057_v54 = vld [vmem:[%s19680_s3 + $0xa88] sm:$0xff] }
 0x3ca   :  { %20641 = vst [vmem:[#allocation282_spill] sm:$0xff] %v15954_v22  ;;  %20642 = vst [vmem:[#allocation283_spill] sm:$0xff] %v15960_v10  ;;  %v15972_v31 = vmul.f32 %v10057_v54, %v13942_v9  ;;  %v10058_v22 = vld [vmem:[%s19680_s3 + $0xa90] sm:$0xff]  ;;  %v10059_v10 = vld [vmem:[%s19680_s3 + $0xa98] sm:$0xff] }
 0x3cb   :  { %20643 = vst [vmem:[#allocation284_spill] sm:$0xff] %v15966_v61  ;;  %v15978_v59 = vmul.f32 %v10058_v22, %v13942_v9  ;;  %v15984_v14 = vmul.f32 %v10059_v10, %v13942_v9  ;;  %v10060_v61 = vld [vmem:[%s19680_s3 + $0xaa0] sm:$0xff] }
 0x3cc   :  { %20644 = vst [vmem:[#allocation285_spill] sm:$0xff] %v15972_v31  ;;  %v15990_v54 = vmul.f32 %v10060_v61, %v13942_v9  ;;  %v10061_v31 = vld [vmem:[%s19680_s3 + $0xaa8] sm:$0xff] }
 0x3cd   :  { %20645 = vst [vmem:[#allocation286_spill] sm:$0xff] %v15978_v59  ;;  %20646 = vst [vmem:[#allocation287_spill] sm:$0xff] %v15984_v14  ;;  %v15996_v22 = vmul.f32 %v10061_v31, %v13942_v9  ;;  %v10062_v59 = vld [vmem:[%s19680_s3 + $0xab0] sm:$0xff]  ;;  %v10063_v14 = vld [vmem:[%s19680_s3 + $0xab8] sm:$0xff] }
 0x3ce   :  { %20647 = vst [vmem:[#allocation288_spill] sm:$0xff] %v15990_v54  ;;  %v16002_v10 = vmul.f32 %v10062_v59, %v13942_v9  ;;  %v16008_v61 = vmul.f32 %v10063_v14, %v13942_v9  ;;  %v10064_v54 = vld [vmem:[%s19680_s3 + $0xac0] sm:$0xff] }
 0x3cf   :  { %20648 = vst [vmem:[#allocation289_spill] sm:$0xff] %v15996_v22  ;;  %v16014_v31 = vmul.f32 %v10064_v54, %v13942_v9  ;;  %v10065_v22 = vld [vmem:[%s19680_s3 + $0xac8] sm:$0xff] }
 0x3d0   :  { %20649 = vst [vmem:[#allocation290_spill] sm:$0xff] %v16002_v10  ;;  %20650 = vst [vmem:[#allocation291_spill] sm:$0xff] %v16008_v61  ;;  %v16020_v59 = vmul.f32 %v10065_v22, %v13942_v9  ;;  %v10066_v10 = vld [vmem:[%s19680_s3 + $0xad0] sm:$0xff]  ;;  %v10067_v61 = vld [vmem:[%s19680_s3 + $0xad8] sm:$0xff] }
 0x3d1   :  { %20651 = vst [vmem:[#allocation292_spill] sm:$0xff] %v16014_v31  ;;  %v16026_v14 = vmul.f32 %v10066_v10, %v13942_v9  ;;  %v16032_v54 = vmul.f32 %v10067_v61, %v13942_v9  ;;  %v10068_v31 = vld [vmem:[%s19680_s3 + $0xae0] sm:$0xff] }
 0x3d2   :  { %20652 = vst [vmem:[#allocation293_spill] sm:$0xff] %v16020_v59  ;;  %v16038_v22 = vmul.f32 %v10068_v31, %v13942_v9  ;;  %v10069_v59 = vld [vmem:[%s19680_s3 + $0xae8] sm:$0xff] }
 0x3d3   :  { %20653 = vst [vmem:[#allocation294_spill] sm:$0xff] %v16026_v14  ;;  %20654 = vst [vmem:[#allocation295_spill] sm:$0xff] %v16032_v54  ;;  %v16044_v10 = vmul.f32 %v10069_v59, %v13942_v9  ;;  %v10070_v14 = vld [vmem:[%s19680_s3 + $0xaf0] sm:$0xff]  ;;  %v10071_v54 = vld [vmem:[%s19680_s3 + $0xaf8] sm:$0xff] }
 0x3d4   :  { %20655 = vst [vmem:[#allocation296_spill] sm:$0xff] %v16038_v22  ;;  %v16050_v61 = vmul.f32 %v10070_v14, %v13942_v9  ;;  %v16056_v31 = vmul.f32 %v10071_v54, %v13942_v9  ;;  %v10072_v22 = vld [vmem:[%s19680_s3 + $0xb00] sm:$0xff] }
 0x3d5   :  { %20656 = vst [vmem:[#allocation297_spill] sm:$0xff] %v16044_v10  ;;  %v16062_v59 = vmul.f32 %v10072_v22, %v13942_v9  ;;  %v10073_v10 = vld [vmem:[%s19680_s3 + $0xb08] sm:$0xff] }
 0x3d6   :  { %20657 = vst [vmem:[#allocation298_spill] sm:$0xff] %v16050_v61  ;;  %20658 = vst [vmem:[#allocation299_spill] sm:$0xff] %v16056_v31  ;;  %v16068_v14 = vmul.f32 %v10073_v10, %v13942_v9  ;;  %v10074_v61 = vld [vmem:[%s19680_s3 + $0xb10] sm:$0xff]  ;;  %v10075_v31 = vld [vmem:[%s19680_s3 + $0xb18] sm:$0xff] }
 0x3d7   :  { %20659 = vst [vmem:[#allocation300_spill] sm:$0xff] %v16062_v59  ;;  %v16074_v54 = vmul.f32 %v10074_v61, %v13942_v9  ;;  %v16080_v22 = vmul.f32 %v10075_v31, %v13942_v9  ;;  %v10076_v59 = vld [vmem:[%s19680_s3 + $0xb20] sm:$0xff] }
 0x3d8   :  { %20660 = vst [vmem:[#allocation301_spill] sm:$0xff] %v16068_v14  ;;  %v16086_v10 = vmul.f32 %v10076_v59, %v13942_v9  ;;  %v10077_v14 = vld [vmem:[%s19680_s3 + $0xb28] sm:$0xff] }
 0x3d9   :  { %20661 = vst [vmem:[#allocation302_spill] sm:$0xff] %v16074_v54  ;;  %20662 = vst [vmem:[#allocation303_spill] sm:$0xff] %v16080_v22  ;;  %v16092_v61 = vmul.f32 %v10077_v14, %v13942_v9  ;;  %v10078_v54 = vld [vmem:[%s19680_s3 + $0xb30] sm:$0xff]  ;;  %v10079_v22 = vld [vmem:[%s19680_s3 + $0xb38] sm:$0xff] }
 0x3da   :  { %20663 = vst [vmem:[#allocation304_spill] sm:$0xff] %v16086_v10  ;;  %v16098_v31 = vmul.f32 %v10078_v54, %v13942_v9  ;;  %v16104_v59 = vmul.f32 %v10079_v22, %v13942_v9  ;;  %v10080_v10 = vld [vmem:[%s19680_s3 + $0xb40] sm:$0xff] }
 0x3db   :  { %20664 = vst [vmem:[#allocation305_spill] sm:$0xff] %v16092_v61  ;;  %v16110_v14 = vmul.f32 %v10080_v10, %v13942_v9  ;;  %v10081_v61 = vld [vmem:[%s19680_s3 + $0xb48] sm:$0xff] }
 0x3dc   :  { %20665 = vst [vmem:[#allocation306_spill] sm:$0xff] %v16098_v31  ;;  %20666 = vst [vmem:[#allocation307_spill] sm:$0xff] %v16104_v59  ;;  %v16116_v54 = vmul.f32 %v10081_v61, %v13942_v9  ;;  %v10082_v31 = vld [vmem:[%s19680_s3 + $0xb50] sm:$0xff]  ;;  %v10083_v59 = vld [vmem:[%s19680_s3 + $0xb58] sm:$0xff] }
 0x3dd   :  { %20667 = vst [vmem:[#allocation308_spill] sm:$0xff] %v16110_v14  ;;  %v16122_v22 = vmul.f32 %v10082_v31, %v13942_v9  ;;  %v16128_v10 = vmul.f32 %v10083_v59, %v13942_v9  ;;  %v10084_v14 = vld [vmem:[%s19680_s3 + $0xb60] sm:$0xff] }
 0x3de   :  { %20668 = vst [vmem:[#allocation309_spill] sm:$0xff] %v16116_v54  ;;  %v16134_v61 = vmul.f32 %v10084_v14, %v13942_v9  ;;  %v10085_v54 = vld [vmem:[%s19680_s3 + $0xb68] sm:$0xff] }
 0x3df   :  { %20669 = vst [vmem:[#allocation310_spill] sm:$0xff] %v16122_v22  ;;  %20670 = vst [vmem:[#allocation311_spill] sm:$0xff] %v16128_v10  ;;  %v16140_v31 = vmul.f32 %v10085_v54, %v13942_v9  ;;  %v10086_v22 = vld [vmem:[%s19680_s3 + $0xb70] sm:$0xff]  ;;  %v10087_v10 = vld [vmem:[%s19680_s3 + $0xb78] sm:$0xff] }
 0x3e0   :  { %20671 = vst [vmem:[#allocation312_spill] sm:$0xff] %v16134_v61  ;;  %v16146_v59 = vmul.f32 %v10086_v22, %v13942_v9  ;;  %v16152_v14 = vmul.f32 %v10087_v10, %v13942_v9  ;;  %v10088_v61 = vld [vmem:[%s19680_s3 + $0xb80] sm:$0xff] }
 0x3e1   :  { %20672 = vst [vmem:[#allocation313_spill] sm:$0xff] %v16140_v31  ;;  %v16158_v54 = vmul.f32 %v10088_v61, %v13942_v9  ;;  %v10089_v31 = vld [vmem:[%s19680_s3 + $0xb88] sm:$0xff] }
 0x3e2   :  { %20673 = vst [vmem:[#allocation314_spill] sm:$0xff] %v16146_v59  ;;  %20674 = vst [vmem:[#allocation315_spill] sm:$0xff] %v16152_v14  ;;  %v16164_v22 = vmul.f32 %v10089_v31, %v13942_v9  ;;  %v10090_v59 = vld [vmem:[%s19680_s3 + $0xb90] sm:$0xff]  ;;  %v10091_v14 = vld [vmem:[%s19680_s3 + $0xb98] sm:$0xff] }
 0x3e3   :  { %20675 = vst [vmem:[#allocation316_spill] sm:$0xff] %v16158_v54  ;;  %v16170_v10 = vmul.f32 %v10090_v59, %v13942_v9  ;;  %v16176_v61 = vmul.f32 %v10091_v14, %v13942_v9  ;;  %v10092_v54 = vld [vmem:[%s19680_s3 + $0xba0] sm:$0xff] }
 0x3e4   :  { %20676 = vst [vmem:[#allocation317_spill] sm:$0xff] %v16164_v22  ;;  %v16182_v31 = vmul.f32 %v10092_v54, %v13942_v9  ;;  %v10093_v22 = vld [vmem:[%s19680_s3 + $0xba8] sm:$0xff] }
 0x3e5   :  { %20677 = vst [vmem:[#allocation318_spill] sm:$0xff] %v16170_v10  ;;  %20678 = vst [vmem:[#allocation319_spill] sm:$0xff] %v16176_v61  ;;  %v16188_v59 = vmul.f32 %v10093_v22, %v13942_v9  ;;  %v10094_v10 = vld [vmem:[%s19680_s3 + $0xbb0] sm:$0xff]  ;;  %v10095_v61 = vld [vmem:[%s19680_s3 + $0xbb8] sm:$0xff] }
 0x3e6   :  { %20679 = vst [vmem:[#allocation320_spill] sm:$0xff] %v16182_v31  ;;  %v16194_v14 = vmul.f32 %v10094_v10, %v13942_v9  ;;  %v16200_v54 = vmul.f32 %v10095_v61, %v13942_v9  ;;  %v10096_v31 = vld [vmem:[%s19680_s3 + $0xbc0] sm:$0xff] }
 0x3e7   :  { %20680 = vst [vmem:[#allocation321_spill] sm:$0xff] %v16188_v59  ;;  %v16206_v22 = vmul.f32 %v10096_v31, %v13942_v9  ;;  %v10097_v59 = vld [vmem:[%s19680_s3 + $0xbc8] sm:$0xff] }
 0x3e8   :  { %20681 = vst [vmem:[#allocation322_spill] sm:$0xff] %v16194_v14  ;;  %20682 = vst [vmem:[#allocation323_spill] sm:$0xff] %v16200_v54  ;;  %v16212_v10 = vmul.f32 %v10097_v59, %v13942_v9  ;;  %v10098_v14 = vld [vmem:[%s19680_s3 + $0xbd0] sm:$0xff]  ;;  %v10099_v54 = vld [vmem:[%s19680_s3 + $0xbd8] sm:$0xff] }
 0x3e9   :  { %20683 = vst [vmem:[#allocation324_spill] sm:$0xff] %v16206_v22  ;;  %v16218_v61 = vmul.f32 %v10098_v14, %v13942_v9  ;;  %v16224_v31 = vmul.f32 %v10099_v54, %v13942_v9  ;;  %v10100_v22 = vld [vmem:[%s19680_s3 + $0xbe0] sm:$0xff] }
 0x3ea   :  { %20684 = vst [vmem:[#allocation325_spill] sm:$0xff] %v16212_v10  ;;  %v16230_v59 = vmul.f32 %v10100_v22, %v13942_v9  ;;  %v10101_v10 = vld [vmem:[%s19680_s3 + $0xbe8] sm:$0xff] }
 0x3eb   :  { %20685 = vst [vmem:[#allocation326_spill] sm:$0xff] %v16218_v61  ;;  %20686 = vst [vmem:[#allocation327_spill] sm:$0xff] %v16224_v31  ;;  %v16236_v14 = vmul.f32 %v10101_v10, %v13942_v9  ;;  %v10102_v61 = vld [vmem:[%s19680_s3 + $0xbf0] sm:$0xff]  ;;  %v10103_v31 = vld [vmem:[%s19680_s3 + $0xbf8] sm:$0xff] }
 0x3ec   :  { %20687 = vst [vmem:[#allocation328_spill] sm:$0xff] %v16230_v59  ;;  %v16242_v54 = vmul.f32 %v10102_v61, %v13942_v9  ;;  %v16248_v22 = vmul.f32 %v10103_v31, %v13942_v9  ;;  %v10104_v59 = vld [vmem:[%s19680_s3 + $0xc08] sm:$0xff] }
 0x3ed   :  { %20688 = vst [vmem:[#allocation329_spill] sm:$0xff] %v16236_v14  ;;  %v16254_v10 = vmul.f32 %v10104_v59, %v13942_v9  ;;  %v10105_v14 = vld [vmem:[%s19680_s3 + $0xc80] sm:$0xff] }
 0x3ee   :  { %20689 = vst [vmem:[#allocation330_spill] sm:$0xff] %v16242_v54  ;;  %20690 = vst [vmem:[#allocation331_spill] sm:$0xff] %v16248_v22  ;;  %v16260_v61 = vmul.f32 %v10105_v14, %v13942_v9  ;;  %v10106_v54 = vld [vmem:[%s19680_s3 + $0xc88] sm:$0xff]  ;;  %v10107_v22 = vld [vmem:[%s19680_s3 + $0xc90] sm:$0xff] }
 0x3ef   :  { %20691 = vst [vmem:[#allocation332_spill] sm:$0xff] %v16254_v10  ;;  %v16266_v31 = vmul.f32 %v10106_v54, %v13942_v9  ;;  %v16272_v59 = vmul.f32 %v10107_v22, %v13942_v9  ;;  %v10108_v10 = vld [vmem:[%s19680_s3 + $0xc98] sm:$0xff] }
 0x3f0   :  { %20692 = vst [vmem:[#allocation333_spill] sm:$0xff] %v16260_v61  ;;  %v16278_v14 = vmul.f32 %v10108_v10, %v13942_v9  ;;  %v10109_v61 = vld [vmem:[%s19680_s3 + $0xca0] sm:$0xff] }
 0x3f1   :  { %20693 = vst [vmem:[#allocation334_spill] sm:$0xff] %v16266_v31  ;;  %20694 = vst [vmem:[#allocation335_spill] sm:$0xff] %v16272_v59  ;;  %v16284_v54 = vmul.f32 %v10109_v61, %v13942_v9  ;;  %v10110_v31 = vld [vmem:[%s19680_s3 + $0xca8] sm:$0xff]  ;;  %v10111_v59 = vld [vmem:[%s19680_s3 + $0xcb0] sm:$0xff] }
 0x3f2   :  { %20695 = vst [vmem:[#allocation336_spill] sm:$0xff] %v16278_v14  ;;  %v16290_v22 = vmul.f32 %v10110_v31, %v13942_v9  ;;  %v16296_v10 = vmul.f32 %v10111_v59, %v13942_v9  ;;  %v10112_v14 = vld [vmem:[%s19680_s3 + $0xcb8] sm:$0xff] }
 0x3f3   :  { %20696 = vst [vmem:[#allocation337_spill] sm:$0xff] %v16284_v54  ;;  %v16302_v61 = vmul.f32 %v10112_v14, %v13942_v9  ;;  %v10113_v54 = vld [vmem:[%s19680_s3 + $0xcc0] sm:$0xff] }
 0x3f4   :  { %20697 = vst [vmem:[#allocation338_spill] sm:$0xff] %v16290_v22  ;;  %20698 = vst [vmem:[#allocation339_spill] sm:$0xff] %v16296_v10  ;;  %v16308_v31 = vmul.f32 %v10113_v54, %v13942_v9  ;;  %v10114_v22 = vld [vmem:[%s19680_s3 + $0xcc8] sm:$0xff]  ;;  %v10115_v10 = vld [vmem:[%s19680_s3 + $0xcd0] sm:$0xff] }
 0x3f5   :  { %20699 = vst [vmem:[#allocation340_spill] sm:$0xff] %v16302_v61  ;;  %v16314_v59 = vmul.f32 %v10114_v22, %v13942_v9  ;;  %v16320_v14 = vmul.f32 %v10115_v10, %v13942_v9  ;;  %v10116_v61 = vld [vmem:[%s19680_s3 + $0xcd8] sm:$0xff] }
 0x3f6   :  { %20700 = vst [vmem:[#allocation341_spill] sm:$0xff] %v16308_v31  ;;  %v16326_v54 = vmul.f32 %v10116_v61, %v13942_v9  ;;  %v10117_v31 = vld [vmem:[%s19680_s3 + $0xce0] sm:$0xff] }
 0x3f7   :  { %20701 = vst [vmem:[#allocation342_spill] sm:$0xff] %v16314_v59  ;;  %20702 = vst [vmem:[#allocation343_spill] sm:$0xff] %v16320_v14  ;;  %v16332_v22 = vmul.f32 %v10117_v31, %v13942_v9  ;;  %v10118_v59 = vld [vmem:[%s19680_s3 + $0xce8] sm:$0xff]  ;;  %v10119_v14 = vld [vmem:[%s19680_s3 + $0xcf0] sm:$0xff] }
 0x3f8   :  { %20703 = vst [vmem:[#allocation344_spill] sm:$0xff] %v16326_v54  ;;  %v16338_v10 = vmul.f32 %v10118_v59, %v13942_v9  ;;  %v16344_v61 = vmul.f32 %v10119_v14, %v13942_v9  ;;  %v10120_v54 = vld [vmem:[%s19680_s3 + $0xcf8] sm:$0xff] }
 0x3f9   :  { %20704 = vst [vmem:[#allocation345_spill] sm:$0xff] %v16332_v22  ;;  %v16350_v31 = vmul.f32 %v10120_v54, %v13942_v9  ;;  %v10121_v22 = vld [vmem:[%s19680_s3 + $0xd80] sm:$0xff] }
 0x3fa   :  { %20705 = vst [vmem:[#allocation346_spill] sm:$0xff] %v16338_v10  ;;  %20706 = vst [vmem:[#allocation347_spill] sm:$0xff] %v16344_v61  ;;  %v16356_v59 = vmul.f32 %v10121_v22, %v13942_v9  ;;  %v10122_v10 = vld [vmem:[%s19680_s3 + $0xd88] sm:$0xff]  ;;  %v10123_v61 = vld [vmem:[%s19680_s3 + $0xd90] sm:$0xff] }
 0x3fb   :  { %20707 = vst [vmem:[#allocation348_spill] sm:$0xff] %v16350_v31  ;;  %v16362_v14 = vmul.f32 %v10122_v10, %v13942_v9  ;;  %v16368_v54 = vmul.f32 %v10123_v61, %v13942_v9  ;;  %v10124_v31 = vld [vmem:[%s19680_s3 + $0xd98] sm:$0xff] }
 0x3fc   :  { %20708 = vst [vmem:[#allocation349_spill] sm:$0xff] %v16356_v59  ;;  %v16374_v22 = vmul.f32 %v10124_v31, %v13942_v9  ;;  %v10125_v59 = vld [vmem:[%s19680_s3 + $0xda0] sm:$0xff] }
 0x3fd   :  { %20709 = vst [vmem:[#allocation350_spill] sm:$0xff] %v16362_v14  ;;  %20710 = vst [vmem:[#allocation351_spill] sm:$0xff] %v16368_v54  ;;  %v16380_v10 = vmul.f32 %v10125_v59, %v13942_v9  ;;  %v10126_v14 = vld [vmem:[%s19680_s3 + $0xda8] sm:$0xff]  ;;  %v10127_v54 = vld [vmem:[%s19680_s3 + $0xdb0] sm:$0xff] }
 0x3fe   :  { %20711 = vst [vmem:[#allocation352_spill] sm:$0xff] %v16374_v22  ;;  %v16386_v61 = vmul.f32 %v10126_v14, %v13942_v9  ;;  %v16392_v31 = vmul.f32 %v10127_v54, %v13942_v9  ;;  %v10128_v22 = vld [vmem:[%s19680_s3 + $0xdb8] sm:$0xff] }
 0x3ff   :  { %20712 = vst [vmem:[#allocation353_spill] sm:$0xff] %v16380_v10  ;;  %v16398_v59 = vmul.f32 %v10128_v22, %v13942_v9  ;;  %v10129_v10 = vld [vmem:[%s19680_s3 + $0xdc0] sm:$0xff] }
 0x400   :  { %20713 = vst [vmem:[#allocation354_spill] sm:$0xff] %v16386_v61  ;;  %20714 = vst [vmem:[#allocation355_spill] sm:$0xff] %v16392_v31  ;;  %v16404_v14 = vmul.f32 %v10129_v10, %v13942_v9  ;;  %v10130_v61 = vld [vmem:[%s19680_s3 + $0xdc8] sm:$0xff]  ;;  %v10131_v31 = vld [vmem:[%s19680_s3 + $0xdd0] sm:$0xff] }
 0x401   :  { %20715 = vst [vmem:[#allocation356_spill] sm:$0xff] %v16398_v59  ;;  %v16410_v54 = vmul.f32 %v10130_v61, %v13942_v9  ;;  %v16416_v22 = vmul.f32 %v10131_v31, %v13942_v9  ;;  %v10132_v59 = vld [vmem:[%s19680_s3 + $0xdd8] sm:$0xff] }
 0x402   :  { %20716 = vst [vmem:[#allocation357_spill] sm:$0xff] %v16404_v14  ;;  %v16422_v10 = vmul.f32 %v10132_v59, %v13942_v9  ;;  %v10133_v14 = vld [vmem:[%s19680_s3 + $0xde0] sm:$0xff] }
 0x403   :  { %20717 = vst [vmem:[#allocation358_spill] sm:$0xff] %v16410_v54  ;;  %20718 = vst [vmem:[#allocation359_spill] sm:$0xff] %v16416_v22  ;;  %v16428_v61 = vmul.f32 %v10133_v14, %v13942_v9  ;;  %v10134_v54 = vld [vmem:[%s19680_s3 + $0xde8] sm:$0xff]  ;;  %v10135_v22 = vld [vmem:[%s19680_s3 + $0xdf0] sm:$0xff] }
 0x404   :  { %20719 = vst [vmem:[#allocation360_spill] sm:$0xff] %v16422_v10  ;;  %v16434_v31 = vmul.f32 %v10134_v54, %v13942_v9  ;;  %v16440_v59 = vmul.f32 %v10135_v22, %v13942_v9  ;;  %v10136_v10 = vld [vmem:[%s19680_s3 + $0xdf8] sm:$0xff] }
 0x405   :  { %20720 = vst [vmem:[#allocation361_spill] sm:$0xff] %v16428_v61  ;;  %v16446_v14 = vmul.f32 %v10136_v10, %v13942_v9  ;;  %v10137_v61 = vld [vmem:[%s19680_s3 + $0xe08] sm:$0xff] }
 0x406   :  { %20721 = vst [vmem:[#allocation362_spill] sm:$0xff] %v16434_v31  ;;  %20722 = vst [vmem:[#allocation363_spill] sm:$0xff] %v16440_v59  ;;  %v16452_v54 = vmul.f32 %v10137_v61, %v13942_v9  ;;  %v10138_v31 = vld [vmem:[%s19680_s3 + $0xe80] sm:$0xff]  ;;  %v10139_v59 = vld [vmem:[%s19680_s3 + $0xe88] sm:$0xff] }
 0x407   :  { %20723 = vst [vmem:[#allocation364_spill] sm:$0xff] %v16446_v14  ;;  %v16458_v22 = vmul.f32 %v10138_v31, %v13942_v9  ;;  %v16464_v10 = vmul.f32 %v10139_v59, %v13942_v9  ;;  %v10140_v14 = vld [vmem:[%s19680_s3 + $0xe90] sm:$0xff] }
 0x408   :  { %20724 = vst [vmem:[#allocation365_spill] sm:$0xff] %v16452_v54  ;;  %v16470_v61 = vmul.f32 %v10140_v14, %v13942_v9  ;;  %v10141_v54 = vld [vmem:[%s19680_s3 + $0xe98] sm:$0xff] }
 0x409   :  { %20725 = vst [vmem:[#allocation366_spill] sm:$0xff] %v16458_v22  ;;  %20726 = vst [vmem:[#allocation367_spill] sm:$0xff] %v16464_v10  ;;  %v16476_v31 = vmul.f32 %v10141_v54, %v13942_v9  ;;  %v10142_v22 = vld [vmem:[%s19680_s3 + $0xea0] sm:$0xff]  ;;  %v10143_v10 = vld [vmem:[%s19680_s3 + $0xea8] sm:$0xff] }
 0x40a   :  { %20727 = vst [vmem:[#allocation368_spill] sm:$0xff] %v16470_v61  ;;  %v16482_v59 = vmul.f32 %v10142_v22, %v13942_v9  ;;  %v16488_v14 = vmul.f32 %v10143_v10, %v13942_v9  ;;  %v10144_v61 = vld [vmem:[%s19680_s3 + $0xeb0] sm:$0xff] }
 0x40b   :  { %20728 = vst [vmem:[#allocation369_spill] sm:$0xff] %v16476_v31  ;;  %v16494_v54 = vmul.f32 %v10144_v61, %v13942_v9  ;;  %v10145_v31 = vld [vmem:[%s19680_s3 + $0xeb8] sm:$0xff] }
 0x40c   :  { %20729 = vst [vmem:[#allocation370_spill] sm:$0xff] %v16482_v59  ;;  %20730 = vst [vmem:[#allocation371_spill] sm:$0xff] %v16488_v14  ;;  %v16500_v22 = vmul.f32 %v10145_v31, %v13942_v9  ;;  %v10146_v59 = vld [vmem:[%s19680_s3 + $0xec0] sm:$0xff]  ;;  %v10147_v14 = vld [vmem:[%s19680_s3 + $0xec8] sm:$0xff] }
 0x40d   :  { %20731 = vst [vmem:[#allocation372_spill] sm:$0xff] %v16494_v54  ;;  %v16506_v10 = vmul.f32 %v10146_v59, %v13942_v9  ;;  %v16512_v61 = vmul.f32 %v10147_v14, %v13942_v9  ;;  %v10148_v54 = vld [vmem:[%s19680_s3 + $0xed0] sm:$0xff] }
 0x40e   :  { %20732 = vst [vmem:[#allocation373_spill] sm:$0xff] %v16500_v22  ;;  %v16518_v31 = vmul.f32 %v10148_v54, %v13942_v9  ;;  %v10149_v22 = vld [vmem:[%s19680_s3 + $0xed8] sm:$0xff] }
 0x40f   :  { %20733 = vst [vmem:[#allocation374_spill] sm:$0xff] %v16506_v10  ;;  %20734 = vst [vmem:[#allocation375_spill] sm:$0xff] %v16512_v61  ;;  %v16524_v59 = vmul.f32 %v10149_v22, %v13942_v9  ;;  %v10150_v10 = vld [vmem:[%s19680_s3 + $0xee0] sm:$0xff]  ;;  %v10151_v61 = vld [vmem:[%s19680_s3 + $0xee8] sm:$0xff] }
 0x410   :  { %20735 = vst [vmem:[#allocation376_spill] sm:$0xff] %v16518_v31  ;;  %v16530_v14 = vmul.f32 %v10150_v10, %v13942_v9  ;;  %v16536_v54 = vmul.f32 %v10151_v61, %v13942_v9  ;;  %v10152_v31 = vld [vmem:[%s19680_s3 + $0xef0] sm:$0xff] }
 0x411   :  { %20736 = vst [vmem:[#allocation377_spill] sm:$0xff] %v16524_v59  ;;  %v16542_v22 = vmul.f32 %v10152_v31, %v13942_v9  ;;  %v10153_v59 = vld [vmem:[%s19680_s3 + $0xef8] sm:$0xff] }
 0x412   :  { %20737 = vst [vmem:[#allocation378_spill] sm:$0xff] %v16530_v14  ;;  %20738 = vst [vmem:[#allocation379_spill] sm:$0xff] %v16536_v54  ;;  %v16548_v10 = vmul.f32 %v10153_v59, %v13942_v9  ;;  %v10154_v14 = vld [vmem:[%s19680_s3 + $0xf80] sm:$0xff]  ;;  %v10155_v54 = vld [vmem:[%s19680_s3 + $0xf88] sm:$0xff] }
 0x413   :  { %20739 = vst [vmem:[#allocation380_spill] sm:$0xff] %v16542_v22  ;;  %v16554_v61 = vmul.f32 %v10154_v14, %v13942_v9  ;;  %v16560_v31 = vmul.f32 %v10155_v54, %v13942_v9  ;;  %v10156_v22 = vld [vmem:[%s19680_s3 + $0xf90] sm:$0xff] }
 0x414   :  { %20740 = vst [vmem:[#allocation381_spill] sm:$0xff] %v16548_v10  ;;  %v16566_v59 = vmul.f32 %v10156_v22, %v13942_v9  ;;  %v10157_v10 = vld [vmem:[%s19680_s3 + $0xf98] sm:$0xff] }
 0x415   :  { %20741 = vst [vmem:[#allocation382_spill] sm:$0xff] %v16554_v61  ;;  %20742 = vst [vmem:[#allocation383_spill] sm:$0xff] %v16560_v31  ;;  %v16572_v14 = vmul.f32 %v10157_v10, %v13942_v9  ;;  %v10158_v61 = vld [vmem:[%s19680_s3 + $0xfa0] sm:$0xff]  ;;  %v10159_v31 = vld [vmem:[%s19680_s3 + $0xfa8] sm:$0xff] }
 0x416   :  { %20743 = vst [vmem:[#allocation384_spill] sm:$0xff] %v16566_v59  ;;  %v16578_v54 = vmul.f32 %v10158_v61, %v13942_v9  ;;  %v16584_v22 = vmul.f32 %v10159_v31, %v13942_v9  ;;  %v10160_v59 = vld [vmem:[%s19680_s3 + $0xfb0] sm:$0xff] }
 0x417   :  { %20744 = vst [vmem:[#allocation385_spill] sm:$0xff] %v16572_v14  ;;  %v16590_v10 = vmul.f32 %v10160_v59, %v13942_v9  ;;  %v10161_v14 = vld [vmem:[%s19680_s3 + $0xfb8] sm:$0xff] }
 0x418   :  { %20745 = vst [vmem:[#allocation386_spill] sm:$0xff] %v16578_v54  ;;  %20746 = vst [vmem:[#allocation387_spill] sm:$0xff] %v16584_v22  ;;  %v16596_v61 = vmul.f32 %v10161_v14, %v13942_v9  ;;  %v10162_v54 = vld [vmem:[%s19680_s3 + $0xfc0] sm:$0xff]  ;;  %v10163_v22 = vld [vmem:[%s19680_s3 + $0xfc8] sm:$0xff] }
 0x419   :  { %20747 = vst [vmem:[#allocation388_spill] sm:$0xff] %v16590_v10  ;;  %v16602_v31 = vmul.f32 %v10162_v54, %v13942_v9  ;;  %v16608_v59 = vmul.f32 %v10163_v22, %v13942_v9  ;;  %v10164_v10 = vld [vmem:[%s19680_s3 + $0xfd0] sm:$0xff] }
 0x41a   :  { %20748 = vst [vmem:[#allocation389_spill] sm:$0xff] %v16596_v61  ;;  %v16614_v14 = vmul.f32 %v10164_v10, %v13942_v9  ;;  %v10165_v61 = vld [vmem:[%s19680_s3 + $0xfd8] sm:$0xff] }
 0x41b   :  { %20749 = vst [vmem:[#allocation390_spill] sm:$0xff] %v16602_v31  ;;  %20750 = vst [vmem:[#allocation391_spill] sm:$0xff] %v16608_v59  ;;  %v16620_v54 = vmul.f32 %v10165_v61, %v13942_v9  ;;  %v10166_v31 = vld [vmem:[%s19680_s3 + $0xfe0] sm:$0xff]  ;;  %v10167_v59 = vld [vmem:[%s19680_s3 + $0xfe8] sm:$0xff] }
 0x41c   :  { %20751 = vst [vmem:[#allocation392_spill] sm:$0xff] %v16614_v14  ;;  %v16626_v22 = vmul.f32 %v10166_v31, %v13942_v9  ;;  %v16632_v10 = vmul.f32 %v10167_v59, %v13942_v9  ;;  %v10168_v14 = vld [vmem:[%s19680_s3 + $0xff0] sm:$0xff]  ;;  %v16652_v59 = vadd.f32 %v13980_v7, %v14046_v19  ;;  %v16672_v19 = vadd.f32 %v13980_v7, %v14076_v43 }
 0x41d   :  { %20752 = vst [vmem:[#allocation393_spill] sm:$0xff] %v16620_v54  ;;  %v16638_v61 = vmul.f32 %v10168_v14, %v13942_v9  ;;  %v10169_v54 = vld [vmem:[%s19680_s3 + $0xff8] sm:$0xff]  ;;  %v16660_v14 = vadd.f32 %v13980_v7, %v14058_v37  ;;  %v16680_v37 = vadd.f32 %v13980_v7, %v14088_v46  ;;  %v16692_v43 = vadd.f32 %v13980_v7, %v14106_v27 }
 0x41e   :  { %20753 = vst [vmem:[#allocation394_spill] sm:$0xff] %v16626_v22  ;;  %20754 = vst [vmem:[#allocation395_spill] sm:$0xff] %v16632_v10  ;;  %v16644_v31 = vmul.f32 %v10169_v54, %v13942_v9  ;;  %v16648_v22 = vadd.f32 %v13980_v7, %v13954_v52  ;;  %v16656_v10 = vadd.f32 %v13980_v7, %v14052_v11  ;;  %v20816_v9 = vld [vmem:[#allocation68_spill] sm:$0xff] }
 0x41f   :  { %20755 = vst [vmem:[#allocation396_spill] sm:$0xff] %v16638_v61  ;;  %20758 = vst [vmem:[#allocation399_spill] sm:$0xff] %v16652_v59  ;;  %v16664_v54 = vadd.f32 %v13980_v7, %v14064_v51  ;;  %v16668_v52 = vadd.f32 %v13980_v7, %v14070_v3  ;;  %v16676_v11 = vadd.f32 %v13980_v7, %v14082_v1  ;;  %v20814_v61 = vld [vmem:[#allocation67_spill] sm:$0xff] }
 0x420   :  { %20756 = vst [vmem:[#allocation397_spill] sm:$0xff] %v16644_v31  ;;  %20757 = vst [vmem:[#allocation398_spill] sm:$0xff] %v16648_v22  ;;  %v16684_v51 = vadd.f32 %v13980_v7, %v14094_v47  ;;  %v16688_v3 = vadd.f32 %v13980_v7, %v14100_v48  ;;  %v16696_v1 = vadd.f32 %v13980_v7, %v14112_v26  ;;  %v20812_v31 = vld [vmem:[#allocation66_spill] sm:$0xff]  ;;  %v20957_v59 = vld [vmem:[#allocation131_spill] sm:$0xff] }
 0x421   :  { %20759 = vst [vmem:[#allocation400_spill] sm:$0xff] %v16656_v10  ;;  %20760 = vst [vmem:[#allocation401_spill] sm:$0xff] %v16660_v14  ;;  %v16700_v46 = vadd.f32 %v13980_v7, %v14118_v55  ;;  %v16704_v47 = vadd.f32 %v13980_v7, %v14124_v49  ;;  %v16708_v48 = vadd.f32 %v13980_v7, %v14130_v12  ;;  %v20949_v14 = vld [vmem:[#allocation127_spill] sm:$0xff]  ;;  %v20953_v10 = vld [vmem:[#allocation129_spill] sm:$0xff] }
 0x422   :  { %20761 = vst [vmem:[#allocation402_spill] sm:$0xff] %v16664_v54  ;;  %20762 = vst [vmem:[#allocation403_spill] sm:$0xff] %v16668_v52  ;;  %v16712_v27 = vadd.f32 %v13980_v7, %v14136_v5  ;;  %v16716_v26 = vadd.f32 %v13980_v7, %v14238_v33  ;;  %v16720_v55 = vadd.f32 %v13980_v7, %v14244_v18  ;;  %v20941_v52 = vld [vmem:[#allocation123_spill] sm:$0xff]  ;;  %v20945_v54 = vld [vmem:[#allocation125_spill] sm:$0xff] }
 0x423   :  { %20763 = vst [vmem:[#allocation404_spill] sm:$0xff] %v16672_v19  ;;  %20764 = vst [vmem:[#allocation405_spill] sm:$0xff] %v16676_v11  ;;  %v16724_v49 = vadd.f32 %v13980_v7, %v14250_v39  ;;  %v16728_v12 = vadd.f32 %v13980_v7, %v14256_v15  ;;  %v16732_v5 = vadd.f32 %v13980_v7, %v14262_v28  ;;  %v20933_v11 = vld [vmem:[#allocation119_spill] sm:$0xff]  ;;  %v20937_v19 = vld [vmem:[#allocation121_spill] sm:$0xff] }
 0x424   :  { %20765 = vst [vmem:[#allocation406_spill] sm:$0xff] %v16680_v37  ;;  %20766 = vst [vmem:[#allocation407_spill] sm:$0xff] %v16684_v51  ;;  %v16736_v33 = vadd.f32 %v13980_v7, %v14268_v23  ;;  %v16740_v18 = vadd.f32 %v13980_v7, %v14274_v58  ;;  %v16744_v39 = vadd.f32 %v13980_v7, %v14280_v34  ;;  %v20925_v51 = vld [vmem:[#allocation115_spill] sm:$0xff]  ;;  %v20929_v37 = vld [vmem:[#allocation117_spill] sm:$0xff] }
 0x425   :  { %20767 = vst [vmem:[#allocation408_spill] sm:$0xff] %v16688_v3  ;;  %20768 = vst [vmem:[#allocation409_spill] sm:$0xff] %v16692_v43  ;;  %v16748_v15 = vadd.f32 %v13980_v7, %v14286_v20  ;;  %v16752_v28 = vadd.f32 %v13980_v7, %v14292_v35  ;;  %v16756_v23 = vadd.f32 %v13980_v7, %v14298_v62  ;;  %v20917_v43 = vld [vmem:[#allocation111_spill] sm:$0xff]  ;;  %v20921_v3 = vld [vmem:[#allocation113_spill] sm:$0xff] }
 0x426   :  { %20769 = vst [vmem:[#allocation410_spill] sm:$0xff] %v16696_v1  ;;  %20770 = vst [vmem:[#allocation411_spill] sm:$0xff] %v16700_v46  ;;  %v16760_v58 = vadd.f32 %v13980_v7, %v14304_v21  ;;  %v16764_v34 = vadd.f32 %v13980_v7, %v14310_v63  ;;  %v16768_v20 = vadd.f32 %v13980_v7, %v14316_v56  ;;  %v20909_v46 = vld [vmem:[#allocation107_spill] sm:$0xff]  ;;  %v20913_v1 = vld [vmem:[#allocation109_spill] sm:$0xff] }
 0x427   :  { %20771 = vst [vmem:[#allocation412_spill] sm:$0xff] %v16704_v47  ;;  %20772 = vst [vmem:[#allocation413_spill] sm:$0xff] %v16708_v48  ;;  %v16772_v35 = vadd.f32 %v13980_v7, %v14322_v4  ;;  %v16776_v62 = vadd.f32 %v13980_v7, %v14328_v53  ;;  %v16780_v21 = vadd.f32 %v13980_v7, %v14340_v50  ;;  %v20901_v48 = vld [vmem:[#allocation103_spill] sm:$0xff]  ;;  %v20905_v47 = vld [vmem:[#allocation105_spill] sm:$0xff] }
 0x428   :  { %20773 = vst [vmem:[#allocation414_spill] sm:$0xff] %v16712_v27  ;;  %20774 = vst [vmem:[#allocation415_spill] sm:$0xff] %v16716_v26  ;;  %v16784_v63 = vadd.f32 %v13980_v7, %v14430_v8  ;;  %v16788_v56 = vadd.f32 %v13980_v7, %v14436_v25  ;;  %v16792_v4 = vadd.f32 %v13980_v7, %v14442_v16  ;;  %v20893_v26 = vld [vmem:[#allocation99_spill] sm:$0xff]  ;;  %v20897_v27 = vld [vmem:[#allocation101_spill] sm:$0xff] }
 0x429   :  { %20775 = vst [vmem:[#allocation416_spill] sm:$0xff] %v16720_v55  ;;  %20776 = vst [vmem:[#allocation417_spill] sm:$0xff] %v16724_v49  ;;  %v16796_v53 = vadd.f32 %v13980_v7, %v14448_v38  ;;  %v16800_v50 = vadd.f32 %v13980_v7, %v14454_v60  ;;  %v16804_v8 = vadd.f32 %v13980_v7, %v14460_v24  ;;  %v20885_v49 = vld [vmem:[#allocation95_spill] sm:$0xff]  ;;  %v20889_v55 = vld [vmem:[#allocation97_spill] sm:$0xff] }
 0x42a   :  { %20777 = vst [vmem:[#allocation418_spill] sm:$0xff] %v16728_v12  ;;  %20778 = vst [vmem:[#allocation419_spill] sm:$0xff] %v16732_v5  ;;  %v16808_v25 = vadd.f32 %v13980_v7, %v14466_v36  ;;  %v16812_v16 = vadd.f32 %v13980_v7, %v14472_v17  ;;  %v16816_v38 = vadd.f32 %v13980_v7, %v14478_v30  ;;  %v20863_v5 = vld [vmem:[#allocation84_spill] sm:$0xff]  ;;  %v20881_v12 = vld [vmem:[#allocation93_spill] sm:$0xff] }
 0x42b   :  { %20779 = vst [vmem:[#allocation420_spill] sm:$0xff] %v16736_v33  ;;  %20780 = vst [vmem:[#allocation421_spill] sm:$0xff] %v16740_v18  ;;  %v16820_v60 = vadd.f32 %v13980_v7, %v14484_v29  ;;  %v16824_v24 = vadd.f32 %v13980_v7, %v14490_v2  ;;  %v16828_v36 = vadd.f32 %v13980_v7, %v14496_v6  ;;  %v20865_v33 = vld [vmem:[#allocation85_spill] sm:$0xff]  ;;  %v20867_v18 = vld [vmem:[#allocation86_spill] sm:$0xff] }
 0x42c   :  { %20781 = vst [vmem:[#allocation422_spill] sm:$0xff] %v16744_v39  ;;  %20782 = vst [vmem:[#allocation423_spill] sm:$0xff] %v16748_v15  ;;  %v16832_v17 = vadd.f32 %v13980_v7, %v14502_v57  ;;  %v16836_v30 = vadd.f32 %v13980_v7, %v14508_v13  ;;  %v16840_v29 = vadd.f32 %v13980_v7, %v14514_v0  ;;  %v20869_v39 = vld [vmem:[#allocation87_spill] sm:$0xff]  ;;  %v20871_v15 = vld [vmem:[#allocation88_spill] sm:$0xff] }
 0x42d   :  { %20783 = vst [vmem:[#allocation424_spill] sm:$0xff] %v16752_v28  ;;  %20784 = vst [vmem:[#allocation425_spill] sm:$0xff] %v16756_v23  ;;  %v16844_v2 = vadd.f32 %v13980_v7, %v14520_v32  ;;  %v16848_v6 = vadd.f32 %v13980_v7, %v14622_v41  ;;  %v16852_v57 = vadd.f32 %v13980_v7, %v14628_v40  ;;  %v20873_v28 = vld [vmem:[#allocation89_spill] sm:$0xff]  ;;  %v20875_v23 = vld [vmem:[#allocation90_spill] sm:$0xff] }
 0x42e   :  { %20785 = vst [vmem:[#allocation426_spill] sm:$0xff] %v16760_v58  ;;  %20786 = vst [vmem:[#allocation427_spill] sm:$0xff] %v16764_v34  ;;  %v16856_v13 = vadd.f32 %v13980_v7, %v14634_v42  ;;  %v16860_v0 = vadd.f32 %v13980_v7, %v14640_v44  ;;  %v16864_v32 = vadd.f32 %v13980_v7, %v14646_v45  ;;  %v20877_v34 = vld [vmem:[#allocation91_spill] sm:$0xff]  ;;  %v20961_v22 = vld [vmem:[#allocation133_spill] sm:$0xff] }
 0x42f   :  { %20787 = vst [vmem:[#allocation428_spill] sm:$0xff] %v16768_v20  ;;  %20788 = vst [vmem:[#allocation429_spill] sm:$0xff] %v16772_v35  ;;  %v16868_v41 = vadd.f32 %v13980_v7, %v20812_v31  ;;  %v16872_v40 = vadd.f32 %v13980_v7, %v20814_v61  ;;  %v16876_v42 = vadd.f32 %v13980_v7, %v20816_v9  ;;  %v20861_v35 = vld [vmem:[#allocation83_spill] sm:$0xff]  ;;  %v20879_v20 = vld [vmem:[#allocation92_spill] sm:$0xff] }
 0x430   :  { %20789 = vst [vmem:[#allocation430_spill] sm:$0xff] %v16776_v62  ;;  %20790 = vst [vmem:[#allocation431_spill] sm:$0xff] %v16780_v21  ;;  %v20883_v62 = vld [vmem:[#allocation94_spill] sm:$0xff]  ;;  %v20959_v21 = vld [vmem:[#allocation132_spill] sm:$0xff] }
 0x431   :  { %20791 = vst [vmem:[#allocation432_spill] sm:$0xff] %v16784_v63  ;;  %20792 = vst [vmem:[#allocation433_spill] sm:$0xff] %v16788_v56  ;;  %v20951_v56 = vld [vmem:[#allocation128_spill] sm:$0xff]  ;;  %v20955_v63 = vld [vmem:[#allocation130_spill] sm:$0xff] }
 0x432   :  { %20793 = vst [vmem:[#allocation434_spill] sm:$0xff] %v16792_v4  ;;  %20794 = vst [vmem:[#allocation435_spill] sm:$0xff] %v16796_v53  ;;  %v20943_v53 = vld [vmem:[#allocation124_spill] sm:$0xff]  ;;  %v20947_v4 = vld [vmem:[#allocation126_spill] sm:$0xff] }
 0x433   :  { %20795 = vst [vmem:[#allocation436_spill] sm:$0xff] %v16800_v50  ;;  %20796 = vst [vmem:[#allocation437_spill] sm:$0xff] %v16804_v8  ;;  %v20935_v8 = vld [vmem:[#allocation120_spill] sm:$0xff]  ;;  %v20939_v50 = vld [vmem:[#allocation122_spill] sm:$0xff] }
 0x434   :  { %20797 = vst [vmem:[#allocation438_spill] sm:$0xff] %v16808_v25  ;;  %20798 = vst [vmem:[#allocation439_spill] sm:$0xff] %v16812_v16  ;;  %v20927_v16 = vld [vmem:[#allocation116_spill] sm:$0xff]  ;;  %v20931_v25 = vld [vmem:[#allocation118_spill] sm:$0xff] }
 0x435   :  { %20799 = vst [vmem:[#allocation440_spill] sm:$0xff] %v16816_v38  ;;  %20800 = vst [vmem:[#allocation441_spill] sm:$0xff] %v16820_v60  ;;  %v20919_v60 = vld [vmem:[#allocation112_spill] sm:$0xff]  ;;  %v20923_v38 = vld [vmem:[#allocation114_spill] sm:$0xff] }
 0x436   :  { %20801 = vst [vmem:[#allocation442_spill] sm:$0xff] %v16824_v24  ;;  %20802 = vst [vmem:[#allocation443_spill] sm:$0xff] %v16828_v36  ;;  %v20911_v36 = vld [vmem:[#allocation108_spill] sm:$0xff]  ;;  %v20915_v24 = vld [vmem:[#allocation110_spill] sm:$0xff] }
 0x437   :  { %20803 = vst [vmem:[#allocation444_spill] sm:$0xff] %v16832_v17  ;;  %20804 = vst [vmem:[#allocation445_spill] sm:$0xff] %v16836_v30  ;;  %v20903_v30 = vld [vmem:[#allocation104_spill] sm:$0xff]  ;;  %v20907_v17 = vld [vmem:[#allocation106_spill] sm:$0xff] }
 0x438   :  { %20805 = vst [vmem:[#allocation446_spill] sm:$0xff] %v16840_v29  ;;  %20806 = vst [vmem:[#allocation447_spill] sm:$0xff] %v16844_v2  ;;  %v20895_v2 = vld [vmem:[#allocation100_spill] sm:$0xff]  ;;  %v20899_v29 = vld [vmem:[#allocation102_spill] sm:$0xff] }
 0x439   :  { %20807 = vst [vmem:[#allocation448_spill] sm:$0xff] %v16848_v6  ;;  %20808 = vst [vmem:[#allocation449_spill] sm:$0xff] %v16852_v57  ;;  %v20887_v57 = vld [vmem:[#allocation96_spill] sm:$0xff]  ;;  %v20891_v6 = vld [vmem:[#allocation98_spill] sm:$0xff] }
 0x43a   :  { %20809 = vst [vmem:[#allocation450_spill] sm:$0xff] %v16856_v13  ;;  %20810 = vst [vmem:[#allocation451_spill] sm:$0xff] %v16860_v0  ;;  %v20818_v13 = vld [vmem:[#allocation69_spill] sm:$0xff]  ;;  %v20820_v0 = vld [vmem:[#allocation70_spill] sm:$0xff] }
 0x43b   :  { %20811 = vst [vmem:[#allocation452_spill] sm:$0xff] %v16864_v32  ;;  %20813 = vst [vmem:[#allocation66_spill] sm:$0xff] %v16868_v41  ;;  %v16880_v44 = vadd.f32 %v13980_v7, %v20818_v13  ;;  %v16884_v45 = vadd.f32 %v13980_v7, %v20820_v0  ;;  %v20822_v32 = vld [vmem:[#allocation71_spill] sm:$0xff]  ;;  %v20824_v41 = vld [vmem:[#allocation72_spill] sm:$0xff] }
 0x43c   :  { %20815 = vst [vmem:[#allocation67_spill] sm:$0xff] %v16872_v40  ;;  %20817 = vst [vmem:[#allocation68_spill] sm:$0xff] %v16876_v42  ;;  %v16888_v31 = vadd.f32 %v13980_v7, %v20822_v32  ;;  %v16892_v61 = vadd.f32 %v13980_v7, %v20824_v41  ;;  %v20826_v40 = vld [vmem:[#allocation73_spill] sm:$0xff]  ;;  %v20828_v42 = vld [vmem:[#allocation74_spill] sm:$0xff] }
 0x43d   :  { %20819 = vst [vmem:[#allocation69_spill] sm:$0xff] %v16880_v44  ;;  %20821 = vst [vmem:[#allocation70_spill] sm:$0xff] %v16884_v45  ;;  %v16896_v9 = vadd.f32 %v13980_v7, %v20826_v40  ;;  %v16900_v13 = vadd.f32 %v13980_v7, %v20828_v42  ;;  %v20830_v44 = vld [vmem:[#allocation75_spill] sm:$0xff]  ;;  %v20832_v45 = vld [vmem:[#allocation76_spill] sm:$0xff] }
 0x43e   :  { %20823 = vst [vmem:[#allocation71_spill] sm:$0xff] %v16888_v31  ;;  %20825 = vst [vmem:[#allocation72_spill] sm:$0xff] %v16892_v61  ;;  %v16904_v0 = vadd.f32 %v13980_v7, %v20830_v44  ;;  %v16908_v32 = vadd.f32 %v13980_v7, %v20832_v45  ;;  %v20851_v31 = vld [vmem:[#allocation79_spill] sm:$0xff]  ;;  %v20853_v61 = vld [vmem:[#allocation80_spill] sm:$0xff] }
 0x43f   :  { %20827 = vst [vmem:[#allocation73_spill] sm:$0xff] %v16896_v9  ;;  %20829 = vst [vmem:[#allocation74_spill] sm:$0xff] %v16900_v13  ;;  %v20847_v13 = vld [vmem:[#allocation77_spill] sm:$0xff]  ;;  %v16986_v45 = vadd.f32 %v20851_v31, %v13980_v7  ;;  %v16990_v41 = vadd.f32 %v20853_v61, %v13980_v7  ;;  %v20857_v42 = vld [vmem:[#allocation2_spill] sm:$0xff]  ;;  %v17006_v31 = vadd.f32 %v20861_v35, %v13980_v7 }
 0x440   :  { %20831 = vst [vmem:[#allocation75_spill] sm:$0xff] %v16904_v0  ;;  %20833 = vst [vmem:[#allocation76_spill] sm:$0xff] %v16908_v32  ;;  %v16978_v58 = vadd.f32 %v20847_v13, %v13980_v7  ;;  %v20849_v0 = vld [vmem:[#allocation78_spill] sm:$0xff]  ;;  %v20855_v9 = vld [vmem:[#allocation81_spill] sm:$0xff]  ;;  %v16998_v13 = vadd.f32 %v20857_v42, %v13980_v7  ;;  %v17010_v61 = vadd.f32 %v20863_v5, %v13980_v7 }
 0x441   :  { %v16982_v44 = vadd.f32 %v20849_v0, %v13980_v7  ;;  %20852 = vst [vmem:[#allocation79_spill] sm:$0xff] %v16986_v45  ;;  %20854 = vst [vmem:[#allocation80_spill] sm:$0xff] %v16990_v41  ;;  %v16994_v40 = vadd.f32 %v20855_v9, %v13980_v7  ;;  %v20859_v32 = vld [vmem:[#allocation82_spill] sm:$0xff]  ;;  %v17014_v9 = vadd.f32 %v20865_v33, %v13980_v7  ;;  %v21157_v41 = vld [vmem:[#allocation319_spill] sm:$0xff] }
 0x442   :  { %20848 = vst [vmem:[#allocation77_spill] sm:$0xff] %v16978_v58  ;;  %20858 = vst [vmem:[#allocation2_spill] sm:$0xff] %v16998_v13  ;;  %v17002_v0 = vadd.f32 %v20859_v32, %v13980_v7  ;;  %v17018_v42 = vadd.f32 %v20867_v18, %v13980_v7  ;;  %v17022_v32 = vadd.f32 %v20869_v39, %v13980_v7  ;;  %v21153_v13 = vld [vmem:[#allocation317_spill] sm:$0xff]  ;;  %v21159_v45 = vld [vmem:[#allocation320_spill] sm:$0xff] }
 0x443   :  { %20850 = vst [vmem:[#allocation78_spill] sm:$0xff] %v16982_v44  ;;  %20856 = vst [vmem:[#allocation81_spill] sm:$0xff] %v16994_v40  ;;  %v17026_v35 = vadd.f32 %v20871_v15, %v13980_v7  ;;  %v17030_v5 = vadd.f32 %v20873_v28, %v13980_v7  ;;  %v17034_v33 = vadd.f32 %v20875_v23, %v13980_v7  ;;  %v21155_v40 = vld [vmem:[#allocation318_spill] sm:$0xff]  ;;  %v21165_v44 = vld [vmem:[#allocation323_spill] sm:$0xff] }
 0x444   :  { %20860 = vst [vmem:[#allocation82_spill] sm:$0xff] %v17002_v0  ;;  %20862 = vst [vmem:[#allocation83_spill] sm:$0xff] %v17006_v31  ;;  %v17038_v18 = vadd.f32 %v20877_v34, %v13980_v7  ;;  %v17042_v39 = vadd.f32 %v20879_v20, %v13980_v7  ;;  %v17046_v15 = vadd.f32 %v20881_v12, %v13980_v7  ;;  %v21150_v31 = vld [vmem:[#allocation299_spill] sm:$0xff]  ;;  %v21151_v0 = vld [vmem:[#allocation316_spill] sm:$0xff] }
 0x445   :  { %20864 = vst [vmem:[#allocation84_spill] sm:$0xff] %v17010_v61  ;;  %20866 = vst [vmem:[#allocation85_spill] sm:$0xff] %v17014_v9  ;;  %v17050_v28 = vadd.f32 %v20883_v62, %v13980_v7  ;;  %v17054_v23 = vadd.f32 %v20885_v49, %v13980_v7  ;;  %v17058_v34 = vadd.f32 %v20887_v57, %v13980_v7  ;;  %v21148_v9 = vld [vmem:[#allocation297_spill] sm:$0xff]  ;;  %v21149_v61 = vld [vmem:[#allocation298_spill] sm:$0xff] }
 0x446   :  { %20868 = vst [vmem:[#allocation86_spill] sm:$0xff] %v17018_v42  ;;  %20870 = vst [vmem:[#allocation87_spill] sm:$0xff] %v17022_v32  ;;  %v17062_v20 = vadd.f32 %v20889_v55, %v13980_v7  ;;  %v17066_v12 = vadd.f32 %v20891_v6, %v13980_v7  ;;  %v17070_v62 = vadd.f32 %v20893_v26, %v13980_v7  ;;  %v21146_v32 = vld [vmem:[#allocation295_spill] sm:$0xff]  ;;  %v21147_v42 = vld [vmem:[#allocation296_spill] sm:$0xff] }
 0x447   :  { %20872 = vst [vmem:[#allocation88_spill] sm:$0xff] %v17026_v35  ;;  %20874 = vst [vmem:[#allocation89_spill] sm:$0xff] %v17030_v5  ;;  %v17074_v49 = vadd.f32 %v20895_v2, %v13980_v7  ;;  %v17078_v57 = vadd.f32 %v20897_v27, %v13980_v7  ;;  %v17082_v55 = vadd.f32 %v20899_v29, %v13980_v7  ;;  %v21144_v5 = vld [vmem:[#allocation293_spill] sm:$0xff]  ;;  %v21145_v35 = vld [vmem:[#allocation294_spill] sm:$0xff] }
 0x448   :  { %20876 = vst [vmem:[#allocation90_spill] sm:$0xff] %v17034_v33  ;;  %20878 = vst [vmem:[#allocation91_spill] sm:$0xff] %v17038_v18  ;;  %v17086_v6 = vadd.f32 %v20901_v48, %v13980_v7  ;;  %v17090_v26 = vadd.f32 %v20903_v30, %v13980_v7  ;;  %v17094_v2 = vadd.f32 %v20905_v47, %v13980_v7  ;;  %v21142_v18 = vld [vmem:[#allocation291_spill] sm:$0xff]  ;;  %v21143_v33 = vld [vmem:[#allocation292_spill] sm:$0xff] }
 0x449   :  { %20880 = vst [vmem:[#allocation92_spill] sm:$0xff] %v17042_v39  ;;  %20882 = vst [vmem:[#allocation93_spill] sm:$0xff] %v17046_v15  ;;  %v17098_v27 = vadd.f32 %v20907_v17, %v13980_v7  ;;  %v17102_v29 = vadd.f32 %v20909_v46, %v13980_v7  ;;  %v17106_v48 = vadd.f32 %v20911_v36, %v13980_v7  ;;  %v21139_v15 = vld [vmem:[#allocation288_spill] sm:$0xff]  ;;  %v21141_v39 = vld [vmem:[#allocation290_spill] sm:$0xff] }
 0x44a   :  { %20884 = vst [vmem:[#allocation94_spill] sm:$0xff] %v17050_v28  ;;  %20886 = vst [vmem:[#allocation95_spill] sm:$0xff] %v17054_v23  ;;  %v17110_v30 = vadd.f32 %v20913_v1, %v13980_v7  ;;  %v17114_v47 = vadd.f32 %v20915_v24, %v13980_v7  ;;  %v17118_v17 = vadd.f32 %v20917_v43, %v13980_v7  ;;  %v21135_v23 = vld [vmem:[#allocation284_spill] sm:$0xff]  ;;  %v21137_v28 = vld [vmem:[#allocation286_spill] sm:$0xff] }
 0x44b   :  { %20888 = vst [vmem:[#allocation96_spill] sm:$0xff] %v17058_v34  ;;  %20890 = vst [vmem:[#allocation97_spill] sm:$0xff] %v17062_v20  ;;  %v17122_v46 = vadd.f32 %v20919_v60, %v13980_v7  ;;  %v17126_v36 = vadd.f32 %v20921_v3, %v13980_v7  ;;  %v17130_v1 = vadd.f32 %v20923_v38, %v13980_v7  ;;  %v21128_v20 = vld [vmem:[#allocation265_spill] sm:$0xff]  ;;  %v21132_v34 = vld [vmem:[#allocation267_spill] sm:$0xff] }
 0x44c   :  { %20892 = vst [vmem:[#allocation98_spill] sm:$0xff] %v17066_v12  ;;  %20894 = vst [vmem:[#allocation99_spill] sm:$0xff] %v17070_v62  ;;  %v17134_v24 = vadd.f32 %v20925_v51, %v13980_v7  ;;  %v17138_v43 = vadd.f32 %v20927_v16, %v13980_v7  ;;  %v17142_v60 = vadd.f32 %v20929_v37, %v13980_v7  ;;  %v21120_v62 = vld [vmem:[#allocation261_spill] sm:$0xff]  ;;  %v21124_v12 = vld [vmem:[#allocation263_spill] sm:$0xff] }
 0x44d   :  { %20896 = vst [vmem:[#allocation100_spill] sm:$0xff] %v17074_v49  ;;  %20898 = vst [vmem:[#allocation101_spill] sm:$0xff] %v17078_v57  ;;  %v17146_v3 = vadd.f32 %v20931_v25, %v13980_v7  ;;  %v17150_v38 = vadd.f32 %v20933_v11, %v13980_v7  ;;  %v17154_v51 = vadd.f32 %v20935_v8, %v13980_v7  ;;  %v21112_v57 = vld [vmem:[#allocation257_spill] sm:$0xff]  ;;  %v21116_v49 = vld [vmem:[#allocation259_spill] sm:$0xff] }
 0x44e   :  { %20900 = vst [vmem:[#allocation102_spill] sm:$0xff] %v17082_v55  ;;  %20902 = vst [vmem:[#allocation103_spill] sm:$0xff] %v17086_v6  ;;  %v17158_v16 = vadd.f32 %v20937_v19, %v13980_v7  ;;  %v17162_v37 = vadd.f32 %v20939_v50, %v13980_v7  ;;  %v17166_v25 = vadd.f32 %v20941_v52, %v13980_v7  ;;  %v21104_v6 = vld [vmem:[#allocation253_spill] sm:$0xff]  ;;  %v21108_v55 = vld [vmem:[#allocation255_spill] sm:$0xff] }
 0x44f   :  { %20904 = vst [vmem:[#allocation104_spill] sm:$0xff] %v17090_v26  ;;  %20906 = vst [vmem:[#allocation105_spill] sm:$0xff] %v17094_v2  ;;  %v17170_v11 = vadd.f32 %v20943_v53, %v13980_v7  ;;  %v17174_v8 = vadd.f32 %v20945_v54, %v13980_v7  ;;  %v17178_v19 = vadd.f32 %v20947_v4, %v13980_v7  ;;  %v21100_v2 = vld [vmem:[#allocation234_spill] sm:$0xff] }
 0x450   :  { %20908 = vst [vmem:[#allocation106_spill] sm:$0xff] %v17098_v27  ;;  %20910 = vst [vmem:[#allocation107_spill] sm:$0xff] %v17102_v29  ;;  %v17182_v50 = vadd.f32 %v20949_v14, %v13980_v7  ;;  %v17186_v52 = vadd.f32 %v20951_v56, %v13980_v7  ;;  %v17190_v53 = vadd.f32 %v20953_v10, %v13980_v7  ;;  %v21092_v29 = vld [vmem:[#allocation226_spill] sm:$0xff]  ;;  %v21101_v27 = vld [vmem:[#allocation235_spill] sm:$0xff] }
 0x451   :  { %20912 = vst [vmem:[#allocation108_spill] sm:$0xff] %v17106_v48  ;;  %20914 = vst [vmem:[#allocation109_spill] sm:$0xff] %v17110_v30  ;;  %v17194_v54 = vadd.f32 %v20955_v63, %v13980_v7  ;;  %v17198_v4 = vadd.f32 %v20957_v59, %v13980_v7  ;;  %v17202_v14 = vadd.f32 %v20959_v21, %v13980_v7  ;;  %v21093_v48 = vld [vmem:[#allocation227_spill] sm:$0xff]  ;;  %v21094_v30 = vld [vmem:[#allocation228_spill] sm:$0xff] }
 0x452   :  { %20916 = vst [vmem:[#allocation110_spill] sm:$0xff] %v17114_v47  ;;  %20918 = vst [vmem:[#allocation111_spill] sm:$0xff] %v17118_v17  ;;  %v17206_v56 = vadd.f32 %v20961_v22, %v13980_v7  ;;  %v21095_v47 = vld [vmem:[#allocation229_spill] sm:$0xff]  ;;  %v21096_v17 = vld [vmem:[#allocation230_spill] sm:$0xff] }
 0x453   :  { %20920 = vst [vmem:[#allocation112_spill] sm:$0xff] %v17122_v46  ;;  %20922 = vst [vmem:[#allocation113_spill] sm:$0xff] %v17126_v36  ;;  %v21097_v46 = vld [vmem:[#allocation231_spill] sm:$0xff]  ;;  %v21098_v36 = vld [vmem:[#allocation232_spill] sm:$0xff] }
 0x454   :  { %20924 = vst [vmem:[#allocation114_spill] sm:$0xff] %v17130_v1  ;;  %20926 = vst [vmem:[#allocation115_spill] sm:$0xff] %v17134_v24  ;;  %v21099_v1 = vld [vmem:[#allocation233_spill] sm:$0xff]  ;;  %v21102_v24 = vld [vmem:[#allocation252_spill] sm:$0xff] }
 0x455   :  { %20928 = vst [vmem:[#allocation116_spill] sm:$0xff] %v17138_v43  ;;  %20930 = vst [vmem:[#allocation117_spill] sm:$0xff] %v17142_v60  ;;  %v21106_v43 = vld [vmem:[#allocation254_spill] sm:$0xff]  ;;  %v21110_v60 = vld [vmem:[#allocation256_spill] sm:$0xff] }
 0x456   :  { %20932 = vst [vmem:[#allocation118_spill] sm:$0xff] %v17146_v3  ;;  %20934 = vst [vmem:[#allocation119_spill] sm:$0xff] %v17150_v38  ;;  %v21140_v38 = vld [vmem:[#allocation289_spill] sm:$0xff]  ;;  %v21163_v58 = vld [vmem:[#allocation322_spill] sm:$0xff] }
 0x457   :  { %20936 = vst [vmem:[#allocation120_spill] sm:$0xff] %v17154_v51  ;;  %20938 = vst [vmem:[#allocation121_spill] sm:$0xff] %v17158_v16  ;;  %v21136_v16 = vld [vmem:[#allocation285_spill] sm:$0xff]  ;;  %v21138_v51 = vld [vmem:[#allocation287_spill] sm:$0xff] }
 0x458   :  { %20940 = vst [vmem:[#allocation122_spill] sm:$0xff] %v17162_v37  ;;  %20942 = vst [vmem:[#allocation123_spill] sm:$0xff] %v17166_v25  ;;  %v21130_v25 = vld [vmem:[#allocation266_spill] sm:$0xff]  ;;  %v21134_v37 = vld [vmem:[#allocation269_spill] sm:$0xff] }
 0x459   :  { %20944 = vst [vmem:[#allocation124_spill] sm:$0xff] %v17170_v11  ;;  %20946 = vst [vmem:[#allocation125_spill] sm:$0xff] %v17174_v8  ;;  %v21122_v8 = vld [vmem:[#allocation262_spill] sm:$0xff]  ;;  %v21126_v11 = vld [vmem:[#allocation264_spill] sm:$0xff] }
 0x45a   :  { %20948 = vst [vmem:[#allocation126_spill] sm:$0xff] %v17178_v19  ;;  %20950 = vst [vmem:[#allocation127_spill] sm:$0xff] %v17182_v50  ;;  %v21114_v50 = vld [vmem:[#allocation258_spill] sm:$0xff]  ;;  %v21118_v19 = vld [vmem:[#allocation260_spill] sm:$0xff] }
 0x45b   :  { %20952 = vst [vmem:[#allocation128_spill] sm:$0xff] %v17186_v52  ;;  %20954 = vst [vmem:[#allocation129_spill] sm:$0xff] %v17190_v53  ;;  %v20963_v52 = vld [vmem:[#allocation134_spill] sm:$0xff]  ;;  %v20965_v53 = vld [vmem:[#allocation135_spill] sm:$0xff] }
 0x45c   :  { %20956 = vst [vmem:[#allocation130_spill] sm:$0xff] %v17194_v54  ;;  %20958 = vst [vmem:[#allocation131_spill] sm:$0xff] %v17198_v4  ;;  %v17210_v10 = vadd.f32 %v20963_v52, %v13980_v7  ;;  %v17214_v63 = vadd.f32 %v20965_v53, %v13980_v7  ;;  %v20967_v54 = vld [vmem:[#allocation136_spill] sm:$0xff]  ;;  %v20969_v4 = vld [vmem:[#allocation137_spill] sm:$0xff] }
 0x45d   :  { %20960 = vst [vmem:[#allocation132_spill] sm:$0xff] %v17202_v14  ;;  %20962 = vst [vmem:[#allocation133_spill] sm:$0xff] %v17206_v56  ;;  %v17218_v59 = vadd.f32 %v20967_v54, %v13980_v7  ;;  %v17222_v21 = vadd.f32 %v20969_v4, %v13980_v7  ;;  %v20971_v14 = vld [vmem:[#allocation138_spill] sm:$0xff]  ;;  %v20973_v56 = vld [vmem:[#allocation139_spill] sm:$0xff] }
 0x45e   :  { %20964 = vst [vmem:[#allocation134_spill] sm:$0xff] %v17210_v10  ;;  %20966 = vst [vmem:[#allocation135_spill] sm:$0xff] %v17214_v63  ;;  %v17226_v22 = vadd.f32 %v20971_v14, %v13980_v7  ;;  %v17230_v52 = vadd.f32 %v20973_v56, %v13980_v7  ;;  %v20975_v10 = vld [vmem:[#allocation141_spill] sm:$0xff]  ;;  %v20977_v63 = vld [vmem:[#allocation156_spill] sm:$0xff] }
 0x45f   :  { %20968 = vst [vmem:[#allocation136_spill] sm:$0xff] %v17218_v59  ;;  %20970 = vst [vmem:[#allocation137_spill] sm:$0xff] %v17222_v21  ;;  %v17234_v53 = vadd.f32 %v20975_v10, %v13980_v7  ;;  %v17238_v54 = vadd.f32 %v20977_v63, %v13980_v7  ;;  %v20979_v59 = vld [vmem:[#allocation157_spill] sm:$0xff]  ;;  %v20981_v21 = vld [vmem:[#allocation158_spill] sm:$0xff] }
 0x460   :  { %20972 = vst [vmem:[#allocation138_spill] sm:$0xff] %v17226_v22  ;;  %20974 = vst [vmem:[#allocation139_spill] sm:$0xff] %v17230_v52  ;;  %v17242_v4 = vadd.f32 %v20979_v59, %v13980_v7  ;;  %v17246_v14 = vadd.f32 %v20981_v21, %v13980_v7  ;;  %v20983_v22 = vld [vmem:[#allocation159_spill] sm:$0xff]  ;;  %v20985_v52 = vld [vmem:[#allocation160_spill] sm:$0xff] }
 0x461   :  { %20976 = vst [vmem:[#allocation141_spill] sm:$0xff] %v17234_v53  ;;  %20978 = vst [vmem:[#allocation156_spill] sm:$0xff] %v17238_v54  ;;  %v17250_v56 = vadd.f32 %v20983_v22, %v13980_v7  ;;  %v17254_v10 = vadd.f32 %v20985_v52, %v13980_v7  ;;  %v20987_v53 = vld [vmem:[#allocation161_spill] sm:$0xff]  ;;  %v20989_v54 = vld [vmem:[#allocation162_spill] sm:$0xff] }
 0x462   :  { %20980 = vst [vmem:[#allocation157_spill] sm:$0xff] %v17242_v4  ;;  %20982 = vst [vmem:[#allocation158_spill] sm:$0xff] %v17246_v14  ;;  %v17258_v63 = vadd.f32 %v20987_v53, %v13980_v7  ;;  %v17262_v59 = vadd.f32 %v20989_v54, %v13980_v7  ;;  %v20991_v4 = vld [vmem:[#allocation163_spill] sm:$0xff]  ;;  %v20993_v14 = vld [vmem:[#allocation164_spill] sm:$0xff] }
 0x463   :  { %20984 = vst [vmem:[#allocation159_spill] sm:$0xff] %v17250_v56  ;;  %20986 = vst [vmem:[#allocation160_spill] sm:$0xff] %v17254_v10  ;;  %v17266_v21 = vadd.f32 %v20991_v4, %v13980_v7  ;;  %v17270_v22 = vadd.f32 %v20993_v14, %v13980_v7  ;;  %v20995_v56 = vld [vmem:[#allocation165_spill] sm:$0xff]  ;;  %v20997_v10 = vld [vmem:[#allocation166_spill] sm:$0xff] }
 0x464   :  { %20988 = vst [vmem:[#allocation161_spill] sm:$0xff] %v17258_v63  ;;  %20990 = vst [vmem:[#allocation162_spill] sm:$0xff] %v17262_v59  ;;  %v17274_v52 = vadd.f32 %v20995_v56, %v13980_v7  ;;  %v17278_v53 = vadd.f32 %v20997_v10, %v13980_v7  ;;  %v20999_v63 = vld [vmem:[#allocation167_spill] sm:$0xff]  ;;  %v21001_v59 = vld [vmem:[#allocation168_spill] sm:$0xff] }
 0x465   :  { %20992 = vst [vmem:[#allocation163_spill] sm:$0xff] %v17266_v21  ;;  %20994 = vst [vmem:[#allocation164_spill] sm:$0xff] %v17270_v22  ;;  %v17282_v54 = vadd.f32 %v20999_v63, %v13980_v7  ;;  %v17286_v4 = vadd.f32 %v21001_v59, %v13980_v7  ;;  %v21003_v21 = vld [vmem:[#allocation169_spill] sm:$0xff]  ;;  %v21005_v22 = vld [vmem:[#allocation170_spill] sm:$0xff] }
 0x466   :  { %20996 = vst [vmem:[#allocation165_spill] sm:$0xff] %v17274_v52  ;;  %20998 = vst [vmem:[#allocation166_spill] sm:$0xff] %v17278_v53  ;;  %v17290_v14 = vadd.f32 %v21003_v21, %v13980_v7  ;;  %v17294_v56 = vadd.f32 %v21005_v22, %v13980_v7  ;;  %v21007_v52 = vld [vmem:[#allocation171_spill] sm:$0xff]  ;;  %v21009_v53 = vld [vmem:[#allocation188_spill] sm:$0xff] }
 0x467   :  { %21000 = vst [vmem:[#allocation167_spill] sm:$0xff] %v17282_v54  ;;  %21002 = vst [vmem:[#allocation168_spill] sm:$0xff] %v17286_v4  ;;  %v17298_v10 = vadd.f32 %v21007_v52, %v13980_v7  ;;  %v17302_v63 = vadd.f32 %v21009_v53, %v13980_v7  ;;  %v21011_v54 = vld [vmem:[#allocation189_spill] sm:$0xff]  ;;  %v21013_v4 = vld [vmem:[#allocation190_spill] sm:$0xff] }
 0x468   :  { %21004 = vst [vmem:[#allocation169_spill] sm:$0xff] %v17290_v14  ;;  %21006 = vst [vmem:[#allocation170_spill] sm:$0xff] %v17294_v56  ;;  %v17306_v59 = vadd.f32 %v21011_v54, %v13980_v7  ;;  %v17310_v21 = vadd.f32 %v21013_v4, %v13980_v7  ;;  %v21015_v14 = vld [vmem:[#allocation191_spill] sm:$0xff]  ;;  %v21017_v56 = vld [vmem:[#allocation192_spill] sm:$0xff] }
 0x469   :  { %21008 = vst [vmem:[#allocation171_spill] sm:$0xff] %v17298_v10  ;;  %21010 = vst [vmem:[#allocation188_spill] sm:$0xff] %v17302_v63  ;;  %v17314_v22 = vadd.f32 %v21015_v14, %v13980_v7  ;;  %v17318_v52 = vadd.f32 %v21017_v56, %v13980_v7  ;;  %v21019_v10 = vld [vmem:[#allocation193_spill] sm:$0xff]  ;;  %v21021_v63 = vld [vmem:[#allocation194_spill] sm:$0xff] }
 0x46a   :  { %21012 = vst [vmem:[#allocation189_spill] sm:$0xff] %v17306_v59  ;;  %21014 = vst [vmem:[#allocation190_spill] sm:$0xff] %v17310_v21  ;;  %v17322_v53 = vadd.f32 %v21019_v10, %v13980_v7  ;;  %v17326_v54 = vadd.f32 %v21021_v63, %v13980_v7  ;;  %v21023_v59 = vld [vmem:[#allocation195_spill] sm:$0xff]  ;;  %v21025_v21 = vld [vmem:[#allocation196_spill] sm:$0xff] }
 0x46b   :  { %21016 = vst [vmem:[#allocation191_spill] sm:$0xff] %v17314_v22  ;;  %21018 = vst [vmem:[#allocation192_spill] sm:$0xff] %v17318_v52  ;;  %v17330_v4 = vadd.f32 %v21023_v59, %v13980_v7  ;;  %v17334_v14 = vadd.f32 %v21025_v21, %v13980_v7  ;;  %v21027_v22 = vld [vmem:[#allocation197_spill] sm:$0xff]  ;;  %v21029_v52 = vld [vmem:[#allocation198_spill] sm:$0xff] }
 0x46c   :  { %21020 = vst [vmem:[#allocation193_spill] sm:$0xff] %v17322_v53  ;;  %21022 = vst [vmem:[#allocation194_spill] sm:$0xff] %v17326_v54  ;;  %v17338_v56 = vadd.f32 %v21027_v22, %v13980_v7  ;;  %v17342_v10 = vadd.f32 %v21029_v52, %v13980_v7  ;;  %v21031_v53 = vld [vmem:[#allocation199_spill] sm:$0xff]  ;;  %v21033_v54 = vld [vmem:[#allocation200_spill] sm:$0xff] }
 0x46d   :  { %21024 = vst [vmem:[#allocation195_spill] sm:$0xff] %v17330_v4  ;;  %21026 = vst [vmem:[#allocation196_spill] sm:$0xff] %v17334_v14  ;;  %v17346_v63 = vadd.f32 %v21031_v53, %v13980_v7  ;;  %v17350_v59 = vadd.f32 %v21033_v54, %v13980_v7  ;;  %v21035_v4 = vld [vmem:[#allocation201_spill] sm:$0xff]  ;;  %v21037_v14 = vld [vmem:[#allocation202_spill] sm:$0xff] }
 0x46e   :  { %21028 = vst [vmem:[#allocation197_spill] sm:$0xff] %v17338_v56  ;;  %21030 = vst [vmem:[#allocation198_spill] sm:$0xff] %v17342_v10  ;;  %v17354_v21 = vadd.f32 %v21035_v4, %v13980_v7  ;;  %v17358_v22 = vadd.f32 %v21037_v14, %v13980_v7  ;;  %v21039_v56 = vld [vmem:[#allocation203_spill] sm:$0xff]  ;;  %v21085_v14 = vld [vmem:[#allocation205_spill] sm:$0xff] }
 0x46f   :  { %21032 = vst [vmem:[#allocation199_spill] sm:$0xff] %v17346_v63  ;;  %21034 = vst [vmem:[#allocation200_spill] sm:$0xff] %v17350_v59  ;;  %v17362_v52 = vadd.f32 %v21039_v56, %v13980_v7  ;;  %v17463_v26 = vadd.f32 %v21085_v14, %v13980_v7  ;;  %v21086_v56 = vld [vmem:[#allocation220_spill] sm:$0xff]  ;;  %v21087_v53 = vld [vmem:[#allocation221_spill] sm:$0xff] }
 0x470   :  { %21036 = vst [vmem:[#allocation201_spill] sm:$0xff] %v17354_v21  ;;  %21038 = vst [vmem:[#allocation202_spill] sm:$0xff] %v17358_v22  ;;  %v17467_v22 = vadd.f32 %v21086_v56, %v13980_v7  ;;  %v17471_v10 = vadd.f32 %v21087_v53, %v13980_v7  ;;  %v21088_v54 = vld [vmem:[#allocation222_spill] sm:$0xff]  ;;  %v21089_v4 = vld [vmem:[#allocation223_spill] sm:$0xff]  ;;  %v17491_v53 = vadd.f32 %v21092_v29, %v13980_v7 }
 0x471   :  { %21040 = vst [vmem:[#allocation203_spill] sm:$0xff] %v17362_v52  ;;  %v17475_v63 = vadd.f32 %v21088_v54, %v13980_v7  ;;  %v17479_v59 = vadd.f32 %v21089_v4, %v13980_v7  ;;  %v21090_v21 = vld [vmem:[#allocation224_spill] sm:$0xff]  ;;  %v21091_v52 = vld [vmem:[#allocation225_spill] sm:$0xff]  ;;  %v17495_v54 = vadd.f32 %v21093_v48, %v13980_v7  ;;  %v17499_v4 = vadd.f32 %v21094_v30, %v13980_v7 }
 0x472   :  { %v17483_v14 = vadd.f32 %v21090_v21, %v13980_v7  ;;  %v17487_v56 = vadd.f32 %v21091_v52, %v13980_v7  ;;  %v17503_v21 = vadd.f32 %v21095_v47, %v13980_v7  ;;  %v17507_v52 = vadd.f32 %v21096_v17, %v13980_v7  ;;  %v21161_v3 = vld [vmem:[#allocation321_spill] sm:$0xff] }
 0x473   :  { %v17511_v29 = vadd.f32 %v21097_v46, %v13980_v7  ;;  %v17515_v48 = vadd.f32 %v21098_v36, %v13980_v7  ;;  %v17519_v30 = vadd.f32 %v21099_v1, %v13980_v7  ;;  %v17523_v47 = vadd.f32 %v21100_v2, %v13980_v7 }
 0x474   :  { %v17527_v17 = vadd.f32 %v21101_v27, %v13980_v7  ;;  %v17531_v46 = vadd.f32 %v21102_v24, %v13980_v7  ;;  %v17535_v36 = vadd.f32 %v21104_v6, %v13980_v7  ;;  %v17539_v1 = vadd.f32 %v21106_v43, %v13980_v7 }
 0x475   :  { %v17543_v2 = vadd.f32 %v21108_v55, %v13980_v7  ;;  %v17547_v27 = vadd.f32 %v21110_v60, %v13980_v7  ;;  %v17551_v24 = vadd.f32 %v21112_v57, %v13980_v7  ;;  %v17555_v6 = vadd.f32 %v21114_v50, %v13980_v7 }
 0x476   :  { %21103 = vst [vmem:[#allocation205_spill] sm:$0xff] %v17531_v46  ;;  %21105 = vst [vmem:[#allocation220_spill] sm:$0xff] %v17535_v36  ;;  %v17559_v43 = vadd.f32 %v21116_v49, %v13980_v7  ;;  %v17563_v55 = vadd.f32 %v21118_v19, %v13980_v7  ;;  %v17567_v60 = vadd.f32 %v21120_v62, %v13980_v7 }
 0x477   :  { %21107 = vst [vmem:[#allocation221_spill] sm:$0xff] %v17539_v1  ;;  %21109 = vst [vmem:[#allocation222_spill] sm:$0xff] %v17543_v2  ;;  %v17571_v57 = vadd.f32 %v21122_v8, %v13980_v7  ;;  %v17575_v50 = vadd.f32 %v21124_v12, %v13980_v7  ;;  %v17579_v49 = vadd.f32 %v21126_v11, %v13980_v7  ;;  %v21197_v2 = vld [vmem:[#allocation4_spill] sm:$0xff] }
 0x478   :  { %21111 = vst [vmem:[#allocation223_spill] sm:$0xff] %v17547_v27  ;;  %21113 = vst [vmem:[#allocation224_spill] sm:$0xff] %v17551_v24  ;;  %v17583_v19 = vadd.f32 %v21128_v20, %v13980_v7  ;;  %v17587_v62 = vadd.f32 %v21130_v25, %v13980_v7  ;;  %v17591_v8 = vadd.f32 %v21132_v34, %v13980_v7  ;;  %v21196_v24 = vld [vmem:[#allocation332_spill] sm:$0xff] }
 0x479   :  { %21115 = vst [vmem:[#allocation225_spill] sm:$0xff] %v17555_v6  ;;  %21117 = vst [vmem:[#allocation226_spill] sm:$0xff] %v17559_v43  ;;  %v17595_v12 = vadd.f32 %v21134_v37, %v13980_v7  ;;  %v17599_v11 = vadd.f32 %v21135_v23, %v13980_v7  ;;  %v17603_v20 = vadd.f32 %v21136_v16, %v13980_v7  ;;  %v21198_v43 = vld [vmem:[#allocation204_spill] sm:$0xff] }
 0x47a   :  { %21119 = vst [vmem:[#allocation227_spill] sm:$0xff] %v17563_v55  ;;  %21121 = vst [vmem:[#allocation228_spill] sm:$0xff] %v17567_v60  ;;  %v17607_v25 = vadd.f32 %v21137_v28, %v13980_v7  ;;  %v17611_v34 = vadd.f32 %v21138_v51, %v13980_v7  ;;  %v17615_v37 = vadd.f32 %v21139_v15, %v13980_v7 }
 0x47b   :  { %21123 = vst [vmem:[#allocation229_spill] sm:$0xff] %v17571_v57  ;;  %21125 = vst [vmem:[#allocation230_spill] sm:$0xff] %v17575_v50  ;;  %v17619_v23 = vadd.f32 %v21140_v38, %v13980_v7  ;;  %v17623_v16 = vadd.f32 %v21141_v39, %v13980_v7  ;;  %v17627_v28 = vadd.f32 %v21142_v18, %v13980_v7 }
 0x47c   :  { %21127 = vst [vmem:[#allocation231_spill] sm:$0xff] %v17579_v49  ;;  %21129 = vst [vmem:[#allocation232_spill] sm:$0xff] %v17583_v19  ;;  %v17631_v51 = vadd.f32 %v21143_v33, %v13980_v7  ;;  %v17635_v15 = vadd.f32 %v21144_v5, %v13980_v7  ;;  %v17639_v38 = vadd.f32 %v21145_v35, %v13980_v7 }
 0x47d   :  { %21131 = vst [vmem:[#allocation233_spill] sm:$0xff] %v17587_v62  ;;  %21133 = vst [vmem:[#allocation234_spill] sm:$0xff] %v17591_v8  ;;  %v17643_v39 = vadd.f32 %v21146_v32, %v13980_v7  ;;  %v17647_v18 = vadd.f32 %v21147_v42, %v13980_v7  ;;  %v17651_v33 = vadd.f32 %v21148_v9, %v13980_v7 }
 0x47e   :  { %v17655_v5 = vadd.f32 %v21149_v61, %v13980_v7  ;;  %v17659_v35 = vadd.f32 %v21150_v31, %v13980_v7  ;;  %v17663_v32 = vadd.f32 %v21151_v0, %v13980_v7  ;;  %v17667_v42 = vadd.f32 %v21153_v13, %v13980_v7 }
 0x47f   :  { %v17671_v9 = vadd.f32 %v21155_v40, %v13980_v7  ;;  %v17675_v61 = vadd.f32 %v21157_v41, %v13980_v7  ;;  %v17679_v31 = vadd.f32 %v21159_v45, %v13980_v7  ;;  %v17683_v0 = vadd.f32 %v21161_v3, %v13980_v7 }
 0x480   :  { %21152 = vst [vmem:[#allocation235_spill] sm:$0xff] %v17663_v32  ;;  %21154 = vst [vmem:[#allocation252_spill] sm:$0xff] %v17667_v42  ;;  %v17687_v13 = vadd.f32 %v21163_v58, %v13980_v7  ;;  %v17691_v40 = vadd.f32 %v21165_v44, %v13980_v7  ;;  %v4848_v19 = vadd.f32 %v21196_v24, %v13980_v7 }
 0x481   :  { %21156 = vst [vmem:[#allocation253_spill] sm:$0xff] %v17671_v9  ;;  %21158 = vst [vmem:[#allocation254_spill] sm:$0xff] %v17675_v61  ;;  %v21167_v9 = vld [vmem:[#allocation324_spill] sm:$0xff]  ;;  %v21169_v61 = vld [vmem:[#allocation325_spill] sm:$0xff]  ;;  %v3439_v60 = vadd.f32 %v13980_v7, %v21197_v2  ;;  %v4335_v55 = vadd.f32 %v21198_v43, %v13980_v7 }
 0x482   :  { %21160 = vst [vmem:[#allocation255_spill] sm:$0xff] %v17679_v31  ;;  %21162 = vst [vmem:[#allocation256_spill] sm:$0xff] %v17683_v0  ;;  %v17695_v41 = vadd.f32 %v21167_v9, %v13980_v7  ;;  %v17699_v45 = vadd.f32 %v21169_v61, %v13980_v7  ;;  %v21171_v31 = vld [vmem:[#allocation326_spill] sm:$0xff]  ;;  %v21173_v0 = vld [vmem:[#allocation327_spill] sm:$0xff] }
 0x483   :  { %21164 = vst [vmem:[#allocation257_spill] sm:$0xff] %v17687_v13  ;;  %21166 = vst [vmem:[#allocation258_spill] sm:$0xff] %v17691_v40  ;;  %v17703_v3 = vadd.f32 %v21171_v31, %v13980_v7  ;;  %v17707_v58 = vadd.f32 %v21173_v0, %v13980_v7  ;;  %v21175_v13 = vld [vmem:[#allocation328_spill] sm:$0xff]  ;;  %v21177_v40 = vld [vmem:[#allocation329_spill] sm:$0xff]  ;;  %v3567_v2 = vmax.f32 %v3439_v60, 0.0  ;;  %v4463_v1 = vmax.f32 %v4335_v55, 0.0 }
 0x484   :  { %21168 = vst [vmem:[#allocation259_spill] sm:$0xff] %v17695_v41  ;;  %21170 = vst [vmem:[#allocation260_spill] sm:$0xff] %v17699_v45  ;;  %v17711_v44 = vadd.f32 %v21175_v13, %v13980_v7  ;;  %v17715_v9 = vadd.f32 %v21177_v40, %v13980_v7  ;;  %v21179_v41 = vld [vmem:[#allocation330_spill] sm:$0xff]  ;;  %v21181_v45 = vld [vmem:[#allocation331_spill] sm:$0xff] }
 0x485   :  { %21172 = vst [vmem:[#allocation261_spill] sm:$0xff] %v17703_v3  ;;  %21174 = vst [vmem:[#allocation262_spill] sm:$0xff] %v17707_v58  ;;  %v17719_v61 = vadd.f32 %v21179_v41, %v13980_v7  ;;  %v17723_v31 = vadd.f32 %v21181_v45, %v13980_v7  ;;  %v5234_v13 = vld [vmem:[%s19683_s2 + $0x18] sm:$0xff]  ;;  %v10170_v58 = vld [vmem:[%s19680_s3 + $0xc00] sm:$0xff] }
 0x486   :  { %21176 = vst [vmem:[#allocation263_spill] sm:$0xff] %v17711_v44  ;;  %21178 = vst [vmem:[#allocation264_spill] sm:$0xff] %v17715_v9  ;;  %v5231_v9 = vld [vmem:[%s19683_s2] sm:$0xff]  ;;  %v5233_v44 = vld [vmem:[%s19683_s2 + $0x10] sm:$0xff] }
 0x487   :  { %21180 = vst [vmem:[#allocation265_spill] sm:$0xff] %v17719_v61  ;;  %21182 = vst [vmem:[#allocation266_spill] sm:$0xff] %v17723_v31  ;;  %v5232_v61 = vld [vmem:[%s19683_s2 + $0x8] sm:$0xff]  ;;  %v9454_v62 = vpack.c.bf16 %v5234_v13, %v5233_v44  ;;  %v21199_v45 = vld [vmem:[#allocation365_spill] sm:$0xff] }
 0x488   :  { %v9450_v27 = vpack.c.bf16 %v5232_v61, %v5231_v9  ;;  %v4912_v3 = vadd.f32 %v21199_v45, %v13980_v7  ;;  %v21200_v0 = vld [vmem:[#allocation3_spill] sm:$0xff]  ;;  %v21202_v44 = vld [vmem:[#allocation140_spill] sm:$0xff]  ;;  %v10171_v13 = vld [vmem:[%s19680_s3 + $0xe00] sm:$0xff] }
 0x489   :  { %v4719_v50 = vmul.f32 %v10170_v58, %v21200_v0  ;;  %v21201_v31 = vld [vmem:[#allocation35_spill] sm:$0xff]  ;;  %v3887_v9 = vadd.f32 %v21202_v44, %v13980_v7  ;;  %v21203_v43 = vld [vmem:[#allocation268_spill] sm:$0xff]  ;;  %v4783_v45 = vmul.f32 %v10171_v13, %v21200_v0  ;;  %v21204_v44 = vld [vmem:[#allocation398_spill] sm:$0xff] }
 0x48a   :  { %v3503_v24 = vadd.f32 %v13980_v7, %v21201_v31  ;;  %9451 = vmatprep.subr.bf16.mxu0 %v9450_v27  ;;  %9458 = vmatprep.subr.bf16.mxu1 %v9450_v27  ;;  %v4399_v61 = vadd.f32 %v21203_v43, %v13980_v7  ;;  %v21205_v40 = vmax.f32 %v21204_v44, 0.0  ;;  %v21206_v41 = vld [vmem:[#allocation78_spill] sm:$0xff]  ;;  %v21208_v43 = vld [vmem:[#allocation77_spill] sm:$0xff]  ;;  %v4976_v44 = vmax.f32 %v4848_v19, 0.0 }
 0x48b   :  { %9453 = vmatpush3.bf16.msra.mxu0 %v9450_v27  ;;  %9461 = vmatpush3.bf16.msra.mxu1 %v9450_v27  ;;  %v4847_v58 = vadd.f32 %v4719_v50, %v13980_v7  ;;  %v4015_v49 = vmax.f32 %v3887_v9, 0.0  ;;  %v21207_v60 = vmax.f32 %v21206_v41, 0.0  ;;  %v21209_v57 = vmax.f32 %v21208_v43, 0.0  ;;  %v5235_v27 = vld [vmem:[%s19683_s2 + $0x20] sm:$0xff]  ;;  %v21211_v41 = vld [vmem:[#allocation431_spill] sm:$0xff] }
 0x48c   :  { %v3631_v31 = vmax.f32 %v3503_v24, 0.0  ;;  %9455 = vmatprep.subr.bf16.mxu0 %v9454_v62  ;;  %9459 = vmatprep.subr.bf16.mxu1 %v9454_v62  ;;  %v4527_v42 = vmax.f32 %v4399_v61, 0.0  ;;  %v4911_v13 = vadd.f32 %v4783_v45, %v13980_v7  ;;  %v21210_v24 = vmax.f32 %v17463_v26, 0.0 }
 0x48d   :  { %v4080_v6 = vadd.f32 %v21207_v60, %v21205_v40  ;;  %v4079_v8 = vadd.f32 %v21209_v57, %v3567_v2  ;;  %v21212_v40 = vmax.f32 %v21211_v41, 0.0  ;;  %v21213_v60 = vld [vmem:[#allocation141_spill] sm:$0xff]  ;;  %v4975_v57 = vmax.f32 %v4847_v58, 0.0 }
 0x48e   :  { %v4143_v50 = vadd.f32 %v4015_v49, %v3631_v31  ;;  %v21214_v36 = vmax.f32 %v21213_v60, 0.0  ;;  %v5039_v55 = vmax.f32 %v4911_v13, 0.0  ;;  %v21215_v2 = vld [vmem:[#allocation5_spill] sm:$0xff]  ;;  %v21216_v49 = vmax.f32 %v17595_v12, 0.0  ;;  %v21218_v13 = vld [vmem:[#allocation36_spill] sm:$0xff] }
 0x48f   :  { %v4592_v9 = vadd.f32 %v21210_v24, %v4080_v6  ;;  %v4591_v43 = vadd.f32 %v4463_v1, %v4079_v8  ;;  %v3441_v61 = vadd.f32 %v13980_v7, %v21215_v2  ;;  %9457 = vmatpush3.bf16.msra.mxu0 %v9454_v62  ;;  %9462 = vmatpush3.bf16.msra.mxu1 %v9454_v62  ;;  %v5040_v6 = vmax.f32 %v4912_v3, 0.0  ;;  %v10172_v8 = vld [vmem:[%s19680_s3 + $0xc10] sm:$0xff] }
 0x490   :  { %v4144_v32 = vadd.f32 %v21214_v36, %v21212_v40  ;;  %v4655_v45 = vadd.f32 %v4527_v42, %v4143_v50  ;;  %8232 = vmatprep.subr.mxu0 %v5235_v27  ;;  %9460 = vmatprep.subr.mxu1 %v5235_v27  ;;  %v21217_v36 = vld [vmem:[#allocation206_spill] sm:$0xff]  ;;  %v4721_v58 = vmul.f32 %v10172_v8, %v21200_v0  ;;  %v21220_v50 = vld [vmem:[#allocation79_spill] sm:$0xff]  ;;  %v10174_v8 = vld [vmem:[%s19680_s3 + $0xc18] sm:$0xff] }
 0x491   :  { %v5104_v46 = vadd.f32 %v4976_v44, %v4592_v9  ;;  %v5103_v19 = vadd.f32 %v4975_v57, %v4591_v43  ;;  %v3569_v31 = vmax.f32 %v3441_v61, 0.0  ;;  %v4337_v1 = vadd.f32 %v21217_v36, %v13980_v7  ;;  %v21222_v40 = vld [vmem:[#allocation270_spill] sm:$0xff] }
 0x492   :  { %v4656_v26 = vadd.f32 %v21216_v49, %v4144_v32  ;;  %v5167_v62 = vadd.f32 %v5039_v55, %v4655_v45  ;;  %v3505_v12 = vadd.f32 %v13980_v7, %v21218_v13  ;;  %v21219_v32 = vld [vmem:[#allocation142_spill] sm:$0xff]  ;;  %v21221_v24 = vmax.f32 %v21220_v50, 0.0  ;;  %v10173_v55 = vld [vmem:[%s19680_s3 + $0xe10] sm:$0xff]  ;;  %v21225_v13 = vld [vmem:[#allocation37_spill] sm:$0xff] }
 0x493   :  { %v3889_v3 = vadd.f32 %v21219_v32, %v13980_v7  ;;  %8234 = vmatprep.mubr.msk.f32.mxu0 %vm5236_vm0, %v5103_v19  ;;  %v4465_v44 = vmax.f32 %v4337_v1, 0.0  ;;  %v4849_v41 = vadd.f32 %v4721_v58, %v13980_v7  ;;  %v4401_v60 = vadd.f32 %v21222_v40, %v13980_v7  ;;  %8233 = vmatpush3.msra.mxu0 %v5235_v27  ;;  %v21223_v61 = vld [vmem:[#allocation6_spill] sm:$0xff]  ;;  %v21226_v32 = vld [vmem:[#allocation143_spill] sm:$0xff] }
 0x494   :  { %v5168_v42 = vadd.f32 %v5040_v6, %v4656_v26  ;;  %v4081_v9 = vadd.f32 %v21221_v24, %v3569_v31  ;;  %9463 = vmatpush3.msra.mxu1 %v5235_v27  ;;  %v3633_v43 = vmax.f32 %v3505_v12, 0.0  ;;  %v4785_v2 = vmul.f32 %v10173_v55, %v21200_v0  ;;  %8330 = vmatprep.mubr.msk.f32.mxu1 %vm5236_vm0, %v5167_v62  ;;  %v21224_v27 = vld [vmem:[#allocation207_spill] sm:$0xff]  ;;  %v21227_v24 = vld [vmem:[#allocation80_spill] sm:$0xff]  ;;  %v10175_v55 = vld [vmem:[%s19680_s3 + $0xe18] sm:$0xff] }
 0x495   :  { %v4017_v57 = vmax.f32 %v3889_v3, 0.0  ;;  %v3442_v45 = vadd.f32 %v13980_v7, %v21223_v61  ;;  %8235 = vmatmul.mubr.msk.f32.vlgmr.msra.gmra.mrb[32].mxu0 %vm5236_vm0, %v5104_v46  ;;  %v4977_v26 = vmax.f32 %v4849_v41, 0.0  ;;  %v4529_v6 = vmax.f32 %v4401_v60, 0.0 }
 0x496   :  { %v4593_v49 = vadd.f32 %v4465_v44, %v4081_v9  ;;  %v4338_v19 = vadd.f32 %v21224_v27, %v13980_v7  ;;  %8331 = vmatmul.mubr.msk.f32.vlgmr.msra.gmra.mrb[32].mxu1 %vm5236_vm0, %v5168_v42  ;;  %v4913_v36 = vadd.f32 %v4785_v2, %v13980_v7  ;;  %v4722_v58 = vmul.f32 %v10174_v8, %v21200_v0 }
 0x497   :  { %v4145_v31 = vadd.f32 %v4017_v57, %v3633_v43  ;;  %v3570_v1 = vmax.f32 %v3442_v45, 0.0  ;;  %v3506_v12 = vadd.f32 %v13980_v7, %v21225_v13  ;;  %v3890_v3 = vadd.f32 %v21226_v32, %v13980_v7  ;;  %v21229_v43 = vld [vmem:[#allocation271_spill] sm:$0xff]  ;;  %v21232_v13 = vld [vmem:[#allocation38_spill] sm:$0xff] }
 0x498   :  { %v5105_v62 = vadd.f32 %v4977_v26, %v4593_v49  ;;  %v4466_v46 = vmax.f32 %v4338_v19, 0.0  ;;  %v5041_v42 = vmax.f32 %v4913_v36, 0.0  ;;  %v21228_v9 = vmax.f32 %v21227_v24, 0.0  ;;  %v21230_v26 = vld [vmem:[#allocation7_spill] sm:$0xff]  ;;  %v21231_v36 = vld [vmem:[#allocation208_spill] sm:$0xff] }
 0x499   :  { %v4657_v50 = vadd.f32 %v4529_v6, %v4145_v31  ;;  %v4850_v41 = vadd.f32 %v4722_v58, %v13980_v7  ;;  %v3634_v40 = vmax.f32 %v3506_v12, 0.0  ;;  %v4018_v60 = vmax.f32 %v3890_v3, 0.0 }
 0x49a   :  { %v4082_v44 = vadd.f32 %v21228_v9, %v3570_v1  ;;  %8237 = vmatprep.mubr.msk.f32.mxu0 %vm5236_vm0, %v5105_v62  ;;  %v4402_v57 = vadd.f32 %v21229_v43, %v13980_v7  ;;  %v4786_v2 = vmul.f32 %v10175_v55, %v21200_v0  ;;  %v3443_v6 = vadd.f32 %v13980_v7, %v21230_v26  ;;  %v10176_v62 = vld [vmem:[%s19680_s3 + $0xc20] sm:$0xff]  ;;  %v21234_v9 = vld [vmem:[#allocation81_spill] sm:$0xff]  ;;  %v21236_v43 = vld [vmem:[#allocation272_spill] sm:$0xff] }
 0x49b   :  { %v5169_v61 = vadd.f32 %v5041_v42, %v4657_v50  ;;  %v4978_v49 = vmax.f32 %v4850_v41, 0.0  ;;  %v4146_v27 = vadd.f32 %v4018_v60, %v3634_v40  ;;  %v4339_v1 = vadd.f32 %v21231_v36, %v13980_v7  ;;  %v21233_v42 = vld [vmem:[#allocation144_spill] sm:$0xff] }
 0x49c   :  { %v4594_v45 = vadd.f32 %v4466_v46, %v4082_v44  ;;  %v4530_v19 = vmax.f32 %v4402_v57, 0.0  ;;  %v4914_v31 = vadd.f32 %v4786_v2, %v13980_v7  ;;  %v3571_v58 = vmax.f32 %v3443_v6, 0.0 }
 0x49d   :  { %8333 = vmatprep.mubr.msk.f32.mxu1 %vm5236_vm0, %v5169_v61  ;;  %v4723_v46 = vmul.f32 %v10176_v62, %v21200_v0  ;;  %v3507_v12 = vadd.f32 %v13980_v7, %v21232_v13  ;;  %v4467_v50 = vmax.f32 %v4339_v1, 0.0  ;;  %v3891_v24 = vadd.f32 %v21233_v42, %v13980_v7  ;;  %v10177_v61 = vld [vmem:[%s19680_s3 + $0xe20] sm:$0xff]  ;;  %v10178_v62 = vld [vmem:[%s19680_s3 + $0xc28] sm:$0xff] }
 0x49e   :  { %v5106_v8 = vadd.f32 %v4978_v49, %v4594_v45  ;;  %v4658_v32 = vadd.f32 %v4530_v19, %v4146_v27  ;;  %v5042_v3 = vmax.f32 %v4914_v31, 0.0  ;;  %v21235_v44 = vmax.f32 %v21234_v9, 0.0  ;;  %v21237_v49 = vld [vmem:[#allocation8_spill] sm:$0xff]  ;;  %v21238_v31 = vld [vmem:[#allocation209_spill] sm:$0xff] }
 0x49f   :  { %v4851_v40 = vadd.f32 %v4723_v46, %v13980_v7  ;;  %v3635_v60 = vmax.f32 %v3507_v12, 0.0  ;;  %v4403_v57 = vadd.f32 %v21236_v43, %v13980_v7  ;;  %v4019_v2 = vmax.f32 %v3891_v24, 0.0 }
 0x4a0   :  { %8238 = vmatmul.mubr.msk.f32.gmra.mrb[34].mxu0 %vm5236_vm0, %v5106_v8  ;;  %v4083_v41 = vadd.f32 %v21235_v44, %v3571_v58  ;;  %v5170_v55 = vadd.f32 %v5042_v3, %v4658_v32  ;;  %v4787_v45 = vmul.f32 %v10177_v61, %v21200_v0  ;;  %v3444_v26 = vadd.f32 %v13980_v7, %v21237_v49  ;;  %v21239_v32 = vld [vmem:[#allocation39_spill] sm:$0xff]  ;;  %v21241_v44 = vld [vmem:[#allocation2_spill] sm:$0xff] }
 0x4a1   :  { %v4979_v27 = vmax.f32 %v4851_v40, 0.0  ;;  %v4531_v19 = vmax.f32 %v4403_v57, 0.0  ;;  %v4340_v36 = vadd.f32 %v21238_v31, %v13980_v7  ;;  %v4147_v1 = vadd.f32 %v4019_v2, %v3635_v60  ;;  %v10179_v61 = vld [vmem:[%s19680_s3 + $0xe28] sm:$0xff] }
 0x4a2   :  { %v4595_v6 = vadd.f32 %v4467_v50, %v4083_v41  ;;  %8334 = vmatmul.mubr.msk.f32.gmra.mrb[34].mxu1 %vm5236_vm0, %v5170_v55  ;;  %v4915_v8 = vadd.f32 %v4787_v45, %v13980_v7  ;;  %v3572_v58 = vmax.f32 %v3444_v26, 0.0  ;;  %v4724_v46 = vmul.f32 %v10178_v62, %v21200_v0  ;;  %v21240_v50 = vld [vmem:[#allocation145_spill] sm:$0xff] }
 0x4a3   :  { %v4468_v12 = vmax.f32 %v4340_v36, 0.0  ;;  %v3508_v3 = vadd.f32 %v13980_v7, %v21239_v32  ;;  %v3892_v42 = vadd.f32 %v21240_v50, %v13980_v7  ;;  %v4659_v24 = vadd.f32 %v4531_v19, %v4147_v1  ;;  %v21243_v55 = vld [vmem:[#allocation273_spill] sm:$0xff]  ;;  %v21246_v32 = vld [vmem:[#allocation40_spill] sm:$0xff] }
 0x4a4   :  { %v5107_v13 = vadd.f32 %v4979_v27, %v4595_v6  ;;  %v5043_v9 = vmax.f32 %v4915_v8, 0.0  ;;  %v21242_v41 = vmax.f32 %v21241_v44, 0.0  ;;  %v4852_v60 = vadd.f32 %v4724_v46, %v13980_v7  ;;  %v21244_v27 = vld [vmem:[#allocation9_spill] sm:$0xff]  ;;  %v21245_v8 = vld [vmem:[#allocation210_spill] sm:$0xff] }
 0x4a5   :  { %v3636_v43 = vmax.f32 %v3508_v3, 0.0  ;;  %v4020_v57 = vmax.f32 %v3892_v42, 0.0  ;;  %v4404_v2 = vadd.f32 %v21243_v55, %v13980_v7  ;;  %v4788_v45 = vmul.f32 %v10179_v61, %v21200_v0  ;;  %v21250_v55 = vld [vmem:[#allocation274_spill] sm:$0xff] }
 0x4a6   :  { %v4084_v40 = vadd.f32 %v21242_v41, %v3572_v58  ;;  %8240 = vmatprep.mubr.msk.f32.mxu0 %vm5236_vm0, %v5107_v13  ;;  %v5171_v49 = vadd.f32 %v5043_v9, %v4659_v24  ;;  %v4980_v6 = vmax.f32 %v4852_v60, 0.0  ;;  %v3445_v19 = vadd.f32 %v13980_v7, %v21244_v27  ;;  %v10180_v13 = vld [vmem:[%s19680_s3 + $0xc30] sm:$0xff]  ;;  %v21247_v9 = vld [vmem:[#allocation146_spill] sm:$0xff] }
 0x4a7   :  { %v4148_v31 = vadd.f32 %v4020_v57, %v3636_v43  ;;  %v4532_v36 = vmax.f32 %v4404_v2, 0.0  ;;  %v4916_v1 = vadd.f32 %v4788_v45, %v13980_v7  ;;  %v4341_v58 = vadd.f32 %v21245_v8, %v13980_v7  ;;  %v21248_v41 = vld [vmem:[#allocation82_spill] sm:$0xff] }
 0x4a8   :  { %v4596_v26 = vadd.f32 %v4468_v12, %v4084_v40  ;;  %8336 = vmatprep.mubr.msk.f32.mxu1 %vm5236_vm0, %v5171_v49  ;;  %v3573_v46 = vmax.f32 %v3445_v19, 0.0  ;;  %v4725_v12 = vmul.f32 %v10180_v13, %v21200_v0  ;;  %v3509_v3 = vadd.f32 %v13980_v7, %v21246_v32  ;;  %v10181_v49 = vld [vmem:[%s19680_s3 + $0xe30] sm:$0xff]  ;;  %v10182_v13 = vld [vmem:[%s19680_s3 + $0xc38] sm:$0xff] }
 0x4a9   :  { %v4660_v50 = vadd.f32 %v4532_v36, %v4148_v31  ;;  %v5044_v42 = vmax.f32 %v4916_v1, 0.0  ;;  %v4469_v24 = vmax.f32 %v4341_v58, 0.0  ;;  %v3893_v44 = vadd.f32 %v21247_v9, %v13980_v7  ;;  %v21252_v1 = vld [vmem:[#allocation211_spill] sm:$0xff] }
 0x4aa   :  { %v5108_v62 = vadd.f32 %v4980_v6, %v4596_v26  ;;  %v21249_v40 = vmax.f32 %v21248_v41, 0.0  ;;  %v4853_v43 = vadd.f32 %v4725_v12, %v13980_v7  ;;  %v3637_v57 = vmax.f32 %v3509_v3, 0.0  ;;  %v21251_v6 = vld [vmem:[#allocation10_spill] sm:$0xff] }
 0x4ab   :  { %v4405_v2 = vadd.f32 %v21250_v55, %v13980_v7  ;;  %v5172_v61 = vadd.f32 %v5044_v42, %v4660_v50  ;;  %v4021_v45 = vmax.f32 %v3893_v44, 0.0  ;;  %v4789_v26 = vmul.f32 %v10181_v49, %v21200_v0  ;;  %v21253_v50 = vld [vmem:[#allocation41_spill] sm:$0xff] }
 0x4ac   :  { %8241 = vmatmul.mubr.msk.f32.gmra.mrb[36].mxu0 %vm5236_vm0, %v5108_v62  ;;  %v4085_v60 = vadd.f32 %v21249_v40, %v3573_v46  ;;  %v3446_v27 = vadd.f32 %v13980_v7, %v21251_v6  ;;  %v4981_v31 = vmax.f32 %v4853_v43, 0.0  ;;  %v4342_v8 = vadd.f32 %v21252_v1, %v13980_v7  ;;  %v21255_v40 = vld [vmem:[#allocation83_spill] sm:$0xff]  ;;  %v10183_v49 = vld [vmem:[%s19680_s3 + $0xe38] sm:$0xff] }
 0x4ad   :  { %v4533_v36 = vmax.f32 %v4405_v2, 0.0  ;;  %8337 = vmatmul.mubr.msk.f32.gmra.mrb[36].mxu1 %vm5236_vm0, %v5172_v61  ;;  %v4149_v58 = vadd.f32 %v4021_v45, %v3637_v57  ;;  %v4917_v62 = vadd.f32 %v4789_v26, %v13980_v7  ;;  %v4726_v12 = vmul.f32 %v10182_v13, %v21200_v0  ;;  %v21257_v61 = vld [vmem:[#allocation275_spill] sm:$0xff] }
 0x4ae   :  { %v4597_v19 = vadd.f32 %v4469_v24, %v4085_v60  ;;  %v3574_v46 = vmax.f32 %v3446_v27, 0.0  ;;  %v4470_v3 = vmax.f32 %v4342_v8, 0.0  ;;  %v3510_v42 = vadd.f32 %v13980_v7, %v21253_v50  ;;  %v21254_v24 = vld [vmem:[#allocation147_spill] sm:$0xff]  ;;  %v21260_v50 = vld [vmem:[#allocation42_spill] sm:$0xff] }
 0x4af   :  { %v3894_v9 = vadd.f32 %v21254_v24, %v13980_v7  ;;  %v4661_v44 = vadd.f32 %v4533_v36, %v4149_v58  ;;  %v5045_v41 = vmax.f32 %v4917_v62, 0.0  ;;  %v21256_v60 = vmax.f32 %v21255_v40, 0.0  ;;  %v21259_v62 = vld [vmem:[#allocation212_spill] sm:$0xff] }
 0x4b0   :  { %v5109_v32 = vadd.f32 %v4981_v31, %v4597_v19  ;;  %v4854_v57 = vadd.f32 %v4726_v12, %v13980_v7  ;;  %v3638_v55 = vmax.f32 %v3510_v42, 0.0  ;;  %v4406_v45 = vadd.f32 %v21257_v61, %v13980_v7  ;;  %v21258_v31 = vld [vmem:[#allocation11_spill] sm:$0xff]  ;;  %v21264_v61 = vld [vmem:[#allocation276_spill] sm:$0xff] }
 0x4b1   :  { %v4086_v43 = vadd.f32 %v21256_v60, %v3574_v46  ;;  %v4022_v2 = vmax.f32 %v3894_v9, 0.0  ;;  %v4790_v26 = vmul.f32 %v10183_v49, %v21200_v0  ;;  %v5173_v6 = vadd.f32 %v5045_v41, %v4661_v44  ;;  %v21261_v41 = vld [vmem:[#allocation148_spill] sm:$0xff] }
 0x4b2   :  { %8243 = vmatprep.mubr.msk.f32.mxu0 %vm5236_vm0, %v5109_v32  ;;  %v4982_v19 = vmax.f32 %v4854_v57, 0.0  ;;  %v3447_v36 = vadd.f32 %v13980_v7, %v21258_v31  ;;  %v4534_v8 = vmax.f32 %v4406_v45, 0.0  ;;  %v4343_v46 = vadd.f32 %v21259_v62, %v13980_v7  ;;  %v10184_v32 = vld [vmem:[%s19680_s3 + $0xc40] sm:$0xff]  ;;  %v21262_v60 = vld [vmem:[#allocation84_spill] sm:$0xff] }
 0x4b3   :  { %v4598_v27 = vadd.f32 %v4470_v3, %v4086_v43  ;;  %v4150_v1 = vadd.f32 %v4022_v2, %v3638_v55  ;;  %v4918_v58 = vadd.f32 %v4790_v26, %v13980_v7  ;;  %8339 = vmatprep.mubr.msk.f32.mxu1 %vm5236_vm0, %v5173_v6  ;;  %v4727_v3 = vmul.f32 %v10184_v32, %v21200_v0  ;;  %v10185_v6 = vld [vmem:[%s19680_s3 + $0xe40] sm:$0xff]  ;;  %v10186_v32 = vld [vmem:[%s19680_s3 + $0xc48] sm:$0xff] }
 0x4b4   :  { %v3575_v12 = vmax.f32 %v3447_v36, 0.0  ;;  %v3511_v42 = vadd.f32 %v13980_v7, %v21260_v50  ;;  %v4471_v44 = vmax.f32 %v4343_v46, 0.0  ;;  %v3895_v40 = vadd.f32 %v21261_v41, %v13980_v7 }
 0x4b5   :  { %v5110_v13 = vadd.f32 %v4982_v19, %v4598_v27  ;;  %v4662_v24 = vadd.f32 %v4534_v8, %v4150_v1  ;;  %v5046_v9 = vmax.f32 %v4918_v58, 0.0  ;;  %v21263_v43 = vmax.f32 %v21262_v60, 0.0  ;;  %v21265_v19 = vld [vmem:[#allocation12_spill] sm:$0xff]  ;;  %v21266_v58 = vld [vmem:[#allocation213_spill] sm:$0xff] }
 0x4b6   :  { %v4855_v55 = vadd.f32 %v4727_v3, %v13980_v7  ;;  %v3639_v2 = vmax.f32 %v3511_v42, 0.0  ;;  %v4407_v45 = vadd.f32 %v21264_v61, %v13980_v7  ;;  %v4023_v26 = vmax.f32 %v3895_v40, 0.0 }
 0x4b7   :  { %8244 = vmatmul.mubr.msk.f32.gmra.mrb[38].mxu0 %vm5236_vm0, %v5110_v13  ;;  %v4087_v57 = vadd.f32 %v21263_v43, %v3575_v12  ;;  %v5174_v49 = vadd.f32 %v5046_v9, %v4662_v24  ;;  %v4791_v27 = vmul.f32 %v10185_v6, %v21200_v0  ;;  %v3448_v31 = vadd.f32 %v13980_v7, %v21265_v19  ;;  %v21267_v24 = vld [vmem:[#allocation43_spill] sm:$0xff]  ;;  %v21269_v43 = vld [vmem:[#allocation85_spill] sm:$0xff] }
 0x4b8   :  { %v4983_v1 = vmax.f32 %v4855_v55, 0.0  ;;  %v4535_v8 = vmax.f32 %v4407_v45, 0.0  ;;  %v4344_v62 = vadd.f32 %v21266_v58, %v13980_v7  ;;  %v4151_v46 = vadd.f32 %v4023_v26, %v3639_v2  ;;  %v10187_v6 = vld [vmem:[%s19680_s3 + $0xe48] sm:$0xff] }
 0x4b9   :  { %v4599_v36 = vadd.f32 %v4471_v44, %v4087_v57  ;;  %8340 = vmatmul.mubr.msk.f32.gmra.mrb[38].mxu1 %vm5236_vm0, %v5174_v49  ;;  %v4919_v13 = vadd.f32 %v4791_v27, %v13980_v7  ;;  %v3576_v12 = vmax.f32 %v3448_v31, 0.0  ;;  %v4728_v3 = vmul.f32 %v10186_v32, %v21200_v0  ;;  %v21268_v44 = vld [vmem:[#allocation149_spill] sm:$0xff] }
 0x4ba   :  { %v4472_v42 = vmax.f32 %v4344_v62, 0.0  ;;  %v3512_v9 = vadd.f32 %v13980_v7, %v21267_v24  ;;  %v3896_v41 = vadd.f32 %v21268_v44, %v13980_v7  ;;  %v4663_v40 = vadd.f32 %v4535_v8, %v4151_v46  ;;  %v21271_v49 = vld [vmem:[#allocation277_spill] sm:$0xff]  ;;  %v21274_v24 = vld [vmem:[#allocation44_spill] sm:$0xff] }
 0x4bb   :  { %v5111_v50 = vadd.f32 %v4983_v1, %v4599_v36  ;;  %v5047_v60 = vmax.f32 %v4919_v13, 0.0  ;;  %v21270_v57 = vmax.f32 %v21269_v43, 0.0  ;;  %v4856_v2 = vadd.f32 %v4728_v3, %v13980_v7  ;;  %v21272_v1 = vld [vmem:[#allocation13_spill] sm:$0xff]  ;;  %v21273_v13 = vld [vmem:[#allocation214_spill] sm:$0xff] }
 0x4bc   :  { %v3640_v61 = vmax.f32 %v3512_v9, 0.0  ;;  %v4024_v45 = vmax.f32 %v3896_v41, 0.0  ;;  %v4408_v26 = vadd.f32 %v21271_v49, %v13980_v7  ;;  %v4792_v27 = vmul.f32 %v10187_v6, %v21200_v0  ;;  %v21278_v49 = vld [vmem:[#allocation278_spill] sm:$0xff] }
 0x4bd   :  { %v4088_v55 = vadd.f32 %v21270_v57, %v3576_v12  ;;  %8246 = vmatprep.mubr.msk.f32.mxu0 %vm5236_vm0, %v5111_v50  ;;  %v5175_v19 = vadd.f32 %v5047_v60, %v4663_v40  ;;  %v4984_v36 = vmax.f32 %v4856_v2, 0.0  ;;  %v3449_v8 = vadd.f32 %v13980_v7, %v21272_v1  ;;  %v10188_v50 = vld [vmem:[%s19680_s3 + $0xc50] sm:$0xff]  ;;  %v21275_v60 = vld [vmem:[#allocation150_spill] sm:$0xff] }
 0x4be   :  { %v4152_v58 = vadd.f32 %v4024_v45, %v3640_v61  ;;  %v4536_v62 = vmax.f32 %v4408_v26, 0.0  ;;  %v4920_v46 = vadd.f32 %v4792_v27, %v13980_v7  ;;  %v4345_v12 = vadd.f32 %v21273_v13, %v13980_v7  ;;  %v21276_v57 = vld [vmem:[#allocation86_spill] sm:$0xff] }
 0x4bf   :  { %v4600_v31 = vadd.f32 %v4472_v42, %v4088_v55  ;;  %8342 = vmatprep.mubr.msk.f32.mxu1 %vm5236_vm0, %v5175_v19  ;;  %v3577_v3 = vmax.f32 %v3449_v8, 0.0  ;;  %v4729_v42 = vmul.f32 %v10188_v50, %v21200_v0  ;;  %v3513_v9 = vadd.f32 %v13980_v7, %v21274_v24  ;;  %v10189_v19 = vld [vmem:[%s19680_s3 + $0xe50] sm:$0xff]  ;;  %v10190_v50 = vld [vmem:[%s19680_s3 + $0xc58] sm:$0xff] }
 0x4c0   :  { %v4664_v44 = vadd.f32 %v4536_v62, %v4152_v58  ;;  %v5048_v41 = vmax.f32 %v4920_v46, 0.0  ;;  %v4473_v40 = vmax.f32 %v4345_v12, 0.0  ;;  %v3897_v43 = vadd.f32 %v21275_v60, %v13980_v7  ;;  %v21280_v46 = vld [vmem:[#allocation215_spill] sm:$0xff] }
 0x4c1   :  { %v5112_v32 = vadd.f32 %v4984_v36, %v4600_v31  ;;  %v21277_v55 = vmax.f32 %v21276_v57, 0.0  ;;  %v4857_v61 = vadd.f32 %v4729_v42, %v13980_v7  ;;  %v3641_v45 = vmax.f32 %v3513_v9, 0.0  ;;  %v21279_v36 = vld [vmem:[#allocation14_spill] sm:$0xff] }
 0x4c2   :  { %v4409_v26 = vadd.f32 %v21278_v49, %v13980_v7  ;;  %v5176_v6 = vadd.f32 %v5048_v41, %v4664_v44  ;;  %v4025_v27 = vmax.f32 %v3897_v43, 0.0  ;;  %v4793_v31 = vmul.f32 %v10189_v19, %v21200_v0  ;;  %v21281_v44 = vld [vmem:[#allocation45_spill] sm:$0xff] }
 0x4c3   :  { %8247 = vmatmul.mubr.msk.f32.gmra.mrb[40].mxu0 %vm5236_vm0, %v5112_v32  ;;  %v4089_v2 = vadd.f32 %v21277_v55, %v3577_v3  ;;  %v3450_v1 = vadd.f32 %v13980_v7, %v21279_v36  ;;  %v4985_v58 = vmax.f32 %v4857_v61, 0.0  ;;  %v4346_v13 = vadd.f32 %v21280_v46, %v13980_v7  ;;  %v21283_v55 = vld [vmem:[#allocation87_spill] sm:$0xff]  ;;  %v10191_v19 = vld [vmem:[%s19680_s3 + $0xe58] sm:$0xff] }
 0x4c4   :  { %v4537_v62 = vmax.f32 %v4409_v26, 0.0  ;;  %8343 = vmatmul.mubr.msk.f32.gmra.mrb[40].mxu1 %vm5236_vm0, %v5176_v6  ;;  %v4153_v12 = vadd.f32 %v4025_v27, %v3641_v45  ;;  %v4921_v32 = vadd.f32 %v4793_v31, %v13980_v7  ;;  %v4730_v42 = vmul.f32 %v10190_v50, %v21200_v0  ;;  %v21285_v6 = vld [vmem:[#allocation279_spill] sm:$0xff] }
 0x4c5   :  { %v4601_v8 = vadd.f32 %v4473_v40, %v4089_v2  ;;  %v3578_v3 = vmax.f32 %v3450_v1, 0.0  ;;  %v4474_v9 = vmax.f32 %v4346_v13, 0.0  ;;  %v3514_v41 = vadd.f32 %v13980_v7, %v21281_v44  ;;  %v21282_v40 = vld [vmem:[#allocation151_spill] sm:$0xff]  ;;  %v21288_v44 = vld [vmem:[#allocation46_spill] sm:$0xff] }
 0x4c6   :  { %v3898_v60 = vadd.f32 %v21282_v40, %v13980_v7  ;;  %v4665_v43 = vadd.f32 %v4537_v62, %v4153_v12  ;;  %v5049_v57 = vmax.f32 %v4921_v32, 0.0  ;;  %v21284_v2 = vmax.f32 %v21283_v55, 0.0  ;;  %v21287_v32 = vld [vmem:[#allocation216_spill] sm:$0xff] }
 0x4c7   :  { %v5113_v24 = vadd.f32 %v4985_v58, %v4601_v8  ;;  %v4858_v45 = vadd.f32 %v4730_v42, %v13980_v7  ;;  %v3642_v49 = vmax.f32 %v3514_v41, 0.0  ;;  %v4410_v27 = vadd.f32 %v21285_v6, %v13980_v7  ;;  %v21286_v58 = vld [vmem:[#allocation15_spill] sm:$0xff]  ;;  %v21292_v6 = vld [vmem:[#allocation280_spill] sm:$0xff] }
 0x4c8   :  { %v4090_v61 = vadd.f32 %v21284_v2, %v3578_v3  ;;  %v4026_v26 = vmax.f32 %v3898_v60, 0.0  ;;  %v4794_v31 = vmul.f32 %v10191_v19, %v21200_v0  ;;  %v5177_v36 = vadd.f32 %v5049_v57, %v4665_v43  ;;  %v21289_v57 = vld [vmem:[#allocation152_spill] sm:$0xff] }
 0x4c9   :  { %8249 = vmatprep.mubr.msk.f32.mxu0 %vm5236_vm0, %v5113_v24  ;;  %v4986_v8 = vmax.f32 %v4858_v45, 0.0  ;;  %v3451_v62 = vadd.f32 %v13980_v7, %v21286_v58  ;;  %v4538_v13 = vmax.f32 %v4410_v27, 0.0  ;;  %v4347_v3 = vadd.f32 %v21287_v32, %v13980_v7  ;;  %v10192_v24 = vld [vmem:[%s19680_s3 + $0xc60] sm:$0xff]  ;;  %v21290_v2 = vld [vmem:[#allocation88_spill] sm:$0xff] }
 0x4ca   :  { %v4602_v1 = vadd.f32 %v4474_v9, %v4090_v61  ;;  %v4154_v46 = vadd.f32 %v4026_v26, %v3642_v49  ;;  %v4922_v12 = vadd.f32 %v4794_v31, %v13980_v7  ;;  %8345 = vmatprep.mubr.msk.f32.mxu1 %vm5236_vm0, %v5177_v36  ;;  %v4731_v9 = vmul.f32 %v10192_v24, %v21200_v0  ;;  %v10193_v36 = vld [vmem:[%s19680_s3 + $0xe60] sm:$0xff]  ;;  %v10194_v24 = vld [vmem:[%s19680_s3 + $0xc68] sm:$0xff] }
 0x4cb   :  { %v3579_v42 = vmax.f32 %v3451_v62, 0.0  ;;  %v3515_v41 = vadd.f32 %v13980_v7, %v21288_v44  ;;  %v4475_v43 = vmax.f32 %v4347_v3, 0.0  ;;  %v3899_v55 = vadd.f32 %v21289_v57, %v13980_v7 }
 0x4cc   :  { %v5114_v50 = vadd.f32 %v4986_v8, %v4602_v1  ;;  %v4666_v40 = vadd.f32 %v4538_v13, %v4154_v46  ;;  %v5050_v60 = vmax.f32 %v4922_v12, 0.0  ;;  %v21291_v61 = vmax.f32 %v21290_v2, 0.0  ;;  %v21293_v8 = vld [vmem:[#allocation16_spill] sm:$0xff]  ;;  %v21294_v12 = vld [vmem:[#allocation217_spill] sm:$0xff] }
 0x4cd   :  { %v4859_v49 = vadd.f32 %v4731_v9, %v13980_v7  ;;  %v3643_v26 = vmax.f32 %v3515_v41, 0.0  ;;  %v4411_v27 = vadd.f32 %v21292_v6, %v13980_v7  ;;  %v4027_v31 = vmax.f32 %v3899_v55, 0.0 }
 0x4ce   :  { %8250 = vmatmul.mubr.msk.f32.gmra.mrb[42].mxu0 %vm5236_vm0, %v5114_v50  ;;  %v4091_v45 = vadd.f32 %v21291_v61, %v3579_v42  ;;  %v5178_v19 = vadd.f32 %v5050_v60, %v4666_v40  ;;  %v4795_v1 = vmul.f32 %v10193_v36, %v21200_v0  ;;  %v3452_v58 = vadd.f32 %v13980_v7, %v21293_v8  ;;  %v21295_v40 = vld [vmem:[#allocation47_spill] sm:$0xff]  ;;  %v21297_v61 = vld [vmem:[#allocation89_spill] sm:$0xff] }
 0x4cf   :  { %v4987_v46 = vmax.f32 %v4859_v49, 0.0  ;;  %v4539_v13 = vmax.f32 %v4411_v27, 0.0  ;;  %v4348_v32 = vadd.f32 %v21294_v12, %v13980_v7  ;;  %v4155_v3 = vadd.f32 %v4027_v31, %v3643_v26  ;;  %v10195_v36 = vld [vmem:[%s19680_s3 + $0xe68] sm:$0xff] }
 0x4d0   :  { %v4603_v62 = vadd.f32 %v4475_v43, %v4091_v45  ;;  %8346 = vmatmul.mubr.msk.f32.gmra.mrb[42].mxu1 %vm5236_vm0, %v5178_v19  ;;  %v4923_v50 = vadd.f32 %v4795_v1, %v13980_v7  ;;  %v3580_v42 = vmax.f32 %v3452_v58, 0.0  ;;  %v4732_v9 = vmul.f32 %v10194_v24, %v21200_v0  ;;  %v21296_v43 = vld [vmem:[#allocation153_spill] sm:$0xff] }
 0x4d1   :  { %v4476_v41 = vmax.f32 %v4348_v32, 0.0  ;;  %v3516_v60 = vadd.f32 %v13980_v7, %v21295_v40  ;;  %v3900_v57 = vadd.f32 %v21296_v43, %v13980_v7  ;;  %v4667_v55 = vadd.f32 %v4539_v13, %v4155_v3  ;;  %v21299_v19 = vld [vmem:[#allocation281_spill] sm:$0xff]  ;;  %v21302_v40 = vld [vmem:[#allocation48_spill] sm:$0xff] }
 0x4d2   :  { %v5115_v44 = vadd.f32 %v4987_v46, %v4603_v62  ;;  %v5051_v2 = vmax.f32 %v4923_v50, 0.0  ;;  %v21298_v45 = vmax.f32 %v21297_v61, 0.0  ;;  %v4860_v26 = vadd.f32 %v4732_v9, %v13980_v7  ;;  %v21300_v46 = vld [vmem:[#allocation17_spill] sm:$0xff]  ;;  %v21301_v50 = vld [vmem:[#allocation218_spill] sm:$0xff] }
 0x4d3   :  { %v3644_v6 = vmax.f32 %v3516_v60, 0.0  ;;  %v4028_v27 = vmax.f32 %v3900_v57, 0.0  ;;  %v4412_v31 = vadd.f32 %v21299_v19, %v13980_v7  ;;  %v4796_v1 = vmul.f32 %v10195_v36, %v21200_v0  ;;  %v21306_v19 = vld [vmem:[#allocation282_spill] sm:$0xff] }
 0x4d4   :  { %v4092_v49 = vadd.f32 %v21298_v45, %v3580_v42  ;;  %8252 = vmatprep.mubr.msk.f32.mxu0 %vm5236_vm0, %v5115_v44  ;;  %v5179_v8 = vadd.f32 %v5051_v2, %v4667_v55  ;;  %v4988_v62 = vmax.f32 %v4860_v26, 0.0  ;;  %v3453_v13 = vadd.f32 %v13980_v7, %v21300_v46  ;;  %v10196_v44 = vld [vmem:[%s19680_s3 + $0xc70] sm:$0xff]  ;;  %v21303_v2 = vld [vmem:[#allocation154_spill] sm:$0xff] }
 0x4d5   :  { %v4156_v12 = vadd.f32 %v4028_v27, %v3644_v6  ;;  %v4540_v32 = vmax.f32 %v4412_v31, 0.0  ;;  %v4924_v3 = vadd.f32 %v4796_v1, %v13980_v7  ;;  %v4349_v42 = vadd.f32 %v21301_v50, %v13980_v7  ;;  %v21304_v45 = vld [vmem:[#allocation90_spill] sm:$0xff] }
 0x4d6   :  { %v4604_v58 = vadd.f32 %v4476_v41, %v4092_v49  ;;  %8348 = vmatprep.mubr.msk.f32.mxu1 %vm5236_vm0, %v5179_v8  ;;  %v3581_v9 = vmax.f32 %v3453_v13, 0.0  ;;  %v4733_v41 = vmul.f32 %v10196_v44, %v21200_v0  ;;  %v3517_v60 = vadd.f32 %v13980_v7, %v21302_v40  ;;  %v10197_v8 = vld [vmem:[%s19680_s3 + $0xe70] sm:$0xff]  ;;  %v10198_v44 = vld [vmem:[%s19680_s3 + $0xc78] sm:$0xff] }
 0x4d7   :  { %v4668_v43 = vadd.f32 %v4540_v32, %v4156_v12  ;;  %v5052_v57 = vmax.f32 %v4924_v3, 0.0  ;;  %v4477_v55 = vmax.f32 %v4349_v42, 0.0  ;;  %v3901_v61 = vadd.f32 %v21303_v2, %v13980_v7  ;;  %v21308_v3 = vld [vmem:[#allocation219_spill] sm:$0xff] }
 0x4d8   :  { %v5116_v24 = vadd.f32 %v4988_v62, %v4604_v58  ;;  %v21305_v49 = vmax.f32 %v21304_v45, 0.0  ;;  %v4861_v6 = vadd.f32 %v4733_v41, %v13980_v7  ;;  %v3645_v27 = vmax.f32 %v3517_v60, 0.0  ;;  %v21307_v62 = vld [vmem:[#allocation18_spill] sm:$0xff] }
 0x4d9   :  { %v4413_v31 = vadd.f32 %v21306_v19, %v13980_v7  ;;  %v5180_v36 = vadd.f32 %v5052_v57, %v4668_v43  ;;  %v4029_v1 = vmax.f32 %v3901_v61, 0.0  ;;  %v4797_v58 = vmul.f32 %v10197_v8, %v21200_v0  ;;  %v21309_v43 = vld [vmem:[#allocation49_spill] sm:$0xff] }
 0x4da   :  { %8253 = vmatmul.mubr.msk.f32.gmra.mrb[44].mxu0 %vm5236_vm0, %v5116_v24  ;;  %v4093_v26 = vadd.f32 %v21305_v49, %v3581_v9  ;;  %v3454_v46 = vadd.f32 %v13980_v7, %v21307_v62  ;;  %v4989_v12 = vmax.f32 %v4861_v6, 0.0  ;;  %v4350_v50 = vadd.f32 %v21308_v3, %v13980_v7  ;;  %v21311_v49 = vld [vmem:[#allocation91_spill] sm:$0xff]  ;;  %v10199_v8 = vld [vmem:[%s19680_s3 + $0xe78] sm:$0xff]  ;;  %v21316_v3 = vld [vmem:[#allocation92_spill] sm:$0xff] }
 0x4db   :  { %v4541_v32 = vmax.f32 %v4413_v31, 0.0  ;;  %8349 = vmatmul.mubr.msk.f32.gmra.mrb[44].mxu1 %vm5236_vm0, %v5180_v36  ;;  %v4157_v42 = vadd.f32 %v4029_v1, %v3645_v27  ;;  %v4925_v24 = vadd.f32 %v4797_v58, %v13980_v7  ;;  %v4734_v41 = vmul.f32 %v10198_v44, %v21200_v0  ;;  %v21313_v36 = vld [vmem:[#allocation283_spill] sm:$0xff] }
 0x4dc   :  { %v4605_v13 = vadd.f32 %v4477_v55, %v4093_v26  ;;  %v3582_v9 = vmax.f32 %v3454_v46, 0.0  ;;  %v4478_v60 = vmax.f32 %v4350_v50, 0.0  ;;  %v3518_v57 = vadd.f32 %v13980_v7, %v21309_v43  ;;  %v21310_v55 = vld [vmem:[#allocation155_spill] sm:$0xff] }
 0x4dd   :  { %v3902_v2 = vadd.f32 %v21310_v55, %v13980_v7  ;;  %v4669_v61 = vadd.f32 %v4541_v32, %v4157_v42  ;;  %v5053_v45 = vmax.f32 %v4925_v24, 0.0  ;;  %v21312_v26 = vmax.f32 %v21311_v49, 0.0 }
 0x4de   :  { %v5117_v40 = vadd.f32 %v4989_v12, %v4605_v13  ;;  %v4862_v27 = vadd.f32 %v4734_v41, %v13980_v7  ;;  %v3646_v19 = vmax.f32 %v3518_v57, 0.0  ;;  %v4414_v1 = vadd.f32 %v21313_v36, %v13980_v7  ;;  %v21314_v12 = vld [vmem:[#allocation399_spill] sm:$0xff]  ;;  %v21318_v41 = vld [vmem:[#allocation333_spill] sm:$0xff]  ;;  %v21325_v36 = vld [vmem:[#allocation400_spill] sm:$0xff] }
 0x4df   :  { %v4094_v6 = vadd.f32 %v21312_v26, %v3582_v9  ;;  %v4030_v31 = vmax.f32 %v3902_v2, 0.0  ;;  %v4798_v58 = vmul.f32 %v10199_v8, %v21200_v0  ;;  %v5181_v62 = vadd.f32 %v5053_v45, %v4669_v61  ;;  %v21322_v61 = vld [vmem:[#allocation156_spill] sm:$0xff]  ;;  %v21324_v26 = vld [vmem:[#allocation366_spill] sm:$0xff]  ;;  %v21327_v8 = vld [vmem:[#allocation93_spill] sm:$0xff] }
 0x4e0   :  { %8255 = vmatprep.mubr.msk.f32.mxu0 %vm5236_vm0, %v5117_v40  ;;  %v4990_v13 = vmax.f32 %v4862_v27, 0.0  ;;  %v21315_v32 = vmax.f32 %v21314_v12, 0.0  ;;  %v21317_v50 = vmax.f32 %v21316_v3, 0.0  ;;  %v4542_v9 = vmax.f32 %v4414_v1, 0.0  ;;  %v21330_v12 = vld [vmem:[#allocation334_spill] sm:$0xff]  ;;  %v21331_v3 = vld [vmem:[#allocation433_spill] sm:$0xff] }
 0x4e1   :  { %v4606_v46 = vadd.f32 %v4478_v60, %v4094_v6  ;;  %v4158_v24 = vadd.f32 %v4030_v31, %v3646_v19  ;;  %v4926_v44 = vadd.f32 %v4798_v58, %v13980_v7  ;;  %v4863_v40 = vadd.f32 %v21318_v41, %v13980_v7  ;;  %8351 = vmatprep.mubr.msk.f32.mxu1 %vm5236_vm0, %v5181_v62  ;;  %v21320_v60 = vld [vmem:[#allocation432_spill] sm:$0xff] }
 0x4e2   :  { %v4095_v42 = vadd.f32 %v21317_v50, %v21315_v32  ;;  %v21319_v57 = vmax.f32 %v17467_v22, 0.0  ;;  %v21321_v2 = vmax.f32 %v21320_v60, 0.0  ;;  %v21323_v45 = vmax.f32 %v21322_v61, 0.0  ;;  %v21336_v60 = vld [vmem:[#allocation367_spill] sm:$0xff] }
 0x4e3   :  { %v5118_v43 = vadd.f32 %v4990_v13, %v4606_v46  ;;  %v4927_v6 = vadd.f32 %v21324_v26, %v13980_v7  ;;  %v4670_v27 = vadd.f32 %v4542_v9, %v4158_v24  ;;  %v5054_v19 = vmax.f32 %v4926_v44, 0.0 }
 0x4e4   :  { %v4607_v55 = vadd.f32 %v21319_v57, %v4095_v42  ;;  %v4159_v49 = vadd.f32 %v21323_v45, %v21321_v2  ;;  %v4991_v31 = vmax.f32 %v4863_v40, 0.0  ;;  %v21326_v1 = vmax.f32 %v21325_v36, 0.0  ;;  %v21333_v42 = vld [vmem:[#allocation157_spill] sm:$0xff] }
 0x4e5   :  { %v21328_v58 = vmax.f32 %v21327_v8, 0.0  ;;  %8256 = vmatmul.mubr.msk.f32.gmra.mrb[46].mxu0 %vm5236_vm0, %v5118_v43  ;;  %v21329_v22 = vmax.f32 %v17599_v11, 0.0  ;;  %v5055_v13 = vmax.f32 %v4927_v6, 0.0  ;;  %v4864_v32 = vadd.f32 %v21330_v12, %v13980_v7  ;;  %v21340_v6 = vld [vmem:[#allocation94_spill] sm:$0xff] }
 0x4e6   :  { %v21332_v50 = vmax.f32 %v21331_v3, 0.0  ;;  %v21334_v24 = vmax.f32 %v21333_v42, 0.0  ;;  %v5182_v44 = vadd.f32 %v5054_v19, %v4670_v27  ;;  %v5119_v41 = vadd.f32 %v4991_v31, %v4607_v55  ;;  %v21343_v19 = vld [vmem:[#allocation434_spill] sm:$0xff] }
 0x4e7   :  { %v4096_v62 = vadd.f32 %v21328_v58, %v21326_v1  ;;  %v4671_v46 = vadd.f32 %v21329_v22, %v4159_v49  ;;  %v21335_v40 = vmax.f32 %v17471_v10, 0.0  ;;  %v4928_v43 = vadd.f32 %v21336_v60, %v13980_v7  ;;  %v21338_v49 = vld [vmem:[#allocation401_spill] sm:$0xff]  ;;  %v21342_v10 = vld [vmem:[#allocation335_spill] sm:$0xff]  ;;  %v21345_v8 = vld [vmem:[#allocation158_spill] sm:$0xff] }
 0x4e8   :  { %v4160_v9 = vadd.f32 %v21334_v24, %v21332_v50  ;;  %v4992_v11 = vmax.f32 %v4864_v32, 0.0  ;;  %v21337_v61 = vmax.f32 %v17603_v20, 0.0  ;;  %v21339_v26 = vmax.f32 %v21338_v49, 0.0  ;;  %8352 = vmatmul.mubr.msk.f32.gmra.mrb[46].mxu1 %vm5236_vm0, %v5182_v44  ;;  %8258 = vmatprep.mubr.msk.f32.mxu0 %vm5236_vm0, %v5119_v41  ;;  %v21347_v20 = vld [vmem:[#allocation368_spill] sm:$0xff]  ;;  %v21349_v32 = vld [vmem:[#allocation402_spill] sm:$0xff]  ;;  %v21351_v50 = vld [vmem:[#allocation95_spill] sm:$0xff] }
 0x4e9   :  { %v4608_v57 = vadd.f32 %v21335_v40, %v4096_v62  ;;  %v5183_v2 = vadd.f32 %v5055_v13, %v4671_v46  ;;  %v21341_v36 = vmax.f32 %v21340_v6, 0.0  ;;  %v5056_v55 = vmax.f32 %v4928_v43, 0.0 }
 0x4ea   :  { %v4672_v45 = vadd.f32 %v21337_v61, %v4160_v9  ;;  %v4865_v27 = vadd.f32 %v21342_v10, %v13980_v7  ;;  %v21344_v31 = vmax.f32 %v21343_v19, 0.0  ;;  %v21346_v58 = vmax.f32 %v21345_v8, 0.0  ;;  %v21353_v9 = vld [vmem:[#allocation336_spill] sm:$0xff] }
 0x4eb   :  { %v4097_v1 = vadd.f32 %v21341_v36, %v21339_v26  ;;  %v4929_v22 = vadd.f32 %v21347_v20, %v13980_v7  ;;  %8354 = vmatprep.mubr.msk.f32.mxu1 %vm5236_vm0, %v5183_v2  ;;  %v5120_v46 = vadd.f32 %v4992_v11, %v4608_v57  ;;  %v21348_v13 = vmax.f32 %v17475_v63, 0.0  ;;  %v21356_v11 = vld [vmem:[#allocation435_spill] sm:$0xff]  ;;  %v21363_v19 = vld [vmem:[#allocation96_spill] sm:$0xff] }
 0x4ec   :  { %v4161_v62 = vadd.f32 %v21346_v58, %v21344_v31  ;;  %v21350_v3 = vmax.f32 %v21349_v32, 0.0  ;;  %v21352_v42 = vmax.f32 %v21351_v50, 0.0  ;;  %v4866_v44 = vadd.f32 %v21353_v9, %v13980_v7  ;;  %v21358_v26 = vld [vmem:[#allocation159_spill] sm:$0xff] }
 0x4ed   :  { %v4609_v12 = vadd.f32 %v21348_v13, %v4097_v1  ;;  %v5184_v41 = vadd.f32 %v5056_v55, %v4672_v45  ;;  %v4993_v40 = vmax.f32 %v4865_v27, 0.0  ;;  %v21354_v60 = vmax.f32 %v17607_v25, 0.0  ;;  %8259 = vmatmul.mubr.msk.f32.gmra.mrb[48].mxu0 %vm5236_vm0, %v5120_v46  ;;  %v21360_v1 = vld [vmem:[#allocation369_spill] sm:$0xff]  ;;  %v21361_v55 = vld [vmem:[#allocation403_spill] sm:$0xff]  ;;  %v21367_v13 = vld [vmem:[#allocation436_spill] sm:$0xff] }
 0x4ee   :  { %v4098_v24 = vadd.f32 %v21352_v42, %v21350_v3  ;;  %v5057_v61 = vmax.f32 %v4929_v22, 0.0  ;;  %v21355_v57 = vmax.f32 %v17479_v59, 0.0  ;;  %v4994_v2 = vmax.f32 %v4866_v44, 0.0  ;;  %v21365_v59 = vld [vmem:[#allocation337_spill] sm:$0xff]  ;;  %v21369_v3 = vld [vmem:[#allocation160_spill] sm:$0xff]  ;;  %v21372_v44 = vld [vmem:[#allocation370_spill] sm:$0xff] }
 0x4ef   :  { %v4673_v43 = vadd.f32 %v21354_v60, %v4161_v62  ;;  %v21357_v49 = vmax.f32 %v21356_v11, 0.0  ;;  %v21359_v6 = vmax.f32 %v21358_v26, 0.0  ;;  %v4930_v10 = vadd.f32 %v21360_v1, %v13980_v7  ;;  %8355 = vmatmul.mubr.msk.f32.gmra.mrb[48].mxu1 %vm5236_vm0, %v5184_v41  ;;  %v21375_v60 = vld [vmem:[#allocation97_spill] sm:$0xff]  ;;  %v21378_v11 = vld [vmem:[#allocation338_spill] sm:$0xff] }
 0x4f0   :  { %v4610_v63 = vadd.f32 %v21355_v57, %v4098_v24  ;;  %v5121_v45 = vadd.f32 %v4993_v40, %v4609_v12  ;;  %v21362_v27 = vmax.f32 %v21361_v55, 0.0  ;;  %v21364_v31 = vmax.f32 %v21363_v19, 0.0  ;;  %v21373_v40 = vld [vmem:[#allocation404_spill] sm:$0xff] }
 0x4f1   :  { %v4162_v36 = vadd.f32 %v21359_v6, %v21357_v49  ;;  %v5185_v25 = vadd.f32 %v5057_v61, %v4673_v43  ;;  %v4867_v58 = vadd.f32 %v21365_v59, %v13980_v7  ;;  %v21366_v20 = vmax.f32 %v17611_v34, 0.0  ;;  %v21381_v6 = vld [vmem:[#allocation161_spill] sm:$0xff] }
 0x4f2   :  { %v4099_v8 = vadd.f32 %v21364_v31, %v21362_v27  ;;  %v5122_v62 = vadd.f32 %v4994_v2, %v4610_v63  ;;  %v5058_v46 = vmax.f32 %v4930_v10, 0.0  ;;  %v21368_v32 = vmax.f32 %v21367_v13, 0.0  ;;  %8261 = vmatprep.mubr.msk.f32.mxu0 %vm5236_vm0, %v5121_v45  ;;  %v21384_v27 = vld [vmem:[#allocation371_spill] sm:$0xff]  ;;  %v21386_v59 = vld [vmem:[#allocation405_spill] sm:$0xff] }
 0x4f3   :  { %v4674_v22 = vadd.f32 %v21366_v20, %v4162_v36  ;;  %v21370_v50 = vmax.f32 %v21369_v3, 0.0  ;;  %8357 = vmatprep.mubr.msk.f32.mxu1 %vm5236_vm0, %v5185_v25  ;;  %v21371_v12 = vmax.f32 %v17483_v14, 0.0  ;;  %v4995_v9 = vmax.f32 %v4867_v58, 0.0  ;;  %v21379_v14 = vld [vmem:[#allocation437_spill] sm:$0xff]  ;;  %v21391_v3 = vld [vmem:[#allocation438_spill] sm:$0xff] }
 0x4f4   :  { %v4931_v41 = vadd.f32 %v21372_v44, %v13980_v7  ;;  %v21374_v34 = vmax.f32 %v21373_v40, 0.0  ;;  %v21376_v43 = vmax.f32 %v21375_v60, 0.0  ;;  %8262 = vmatmul.mubr.msk.f32.gmra.mrb[50].mxu0 %vm5236_vm0, %v5122_v62  ;;  %v21377_v63 = vmax.f32 %v17615_v37, 0.0  ;;  %v21388_v62 = vld [vmem:[#allocation98_spill] sm:$0xff] }
 0x4f5   :  { %v4163_v42 = vadd.f32 %v21370_v50, %v21368_v32  ;;  %v4611_v24 = vadd.f32 %v21371_v12, %v4099_v8  ;;  %v5186_v57 = vadd.f32 %v5058_v46, %v4674_v22  ;;  %v4868_v49 = vadd.f32 %v21378_v11, %v13980_v7  ;;  %v21390_v46 = vld [vmem:[#allocation339_spill] sm:$0xff]  ;;  %v21397_v60 = vld [vmem:[#allocation406_spill] sm:$0xff] }
 0x4f6   :  { %v4100_v61 = vadd.f32 %v21376_v43, %v21374_v34  ;;  %v21380_v26 = vmax.f32 %v21379_v14, 0.0  ;;  %v21382_v36 = vmax.f32 %v21381_v6, 0.0  ;;  %v5059_v45 = vmax.f32 %v4931_v41, 0.0 }
 0x4f7   :  { %v4675_v2 = vadd.f32 %v21377_v63, %v4163_v42  ;;  %v5123_v10 = vadd.f32 %v4995_v9, %v4611_v24  ;;  %v21383_v25 = vmax.f32 %v17487_v56, 0.0  ;;  %v4932_v19 = vadd.f32 %v21384_v27, %v13980_v7  ;;  %8358 = vmatmul.mubr.msk.f32.gmra.mrb[50].mxu1 %vm5236_vm0, %v5186_v57  ;;  %v21393_v42 = vld [vmem:[#allocation162_spill] sm:$0xff] }
 0x4f8   :  { %v4164_v1 = vadd.f32 %v21382_v36, %v21380_v26  ;;  %v4996_v37 = vmax.f32 %v4868_v49, 0.0  ;;  %v21385_v31 = vmax.f32 %v17619_v23, 0.0  ;;  %v21387_v58 = vmax.f32 %v21386_v59, 0.0  ;;  %v21395_v23 = vld [vmem:[#allocation372_spill] sm:$0xff] }
 0x4f9   :  { %v4612_v55 = vadd.f32 %v21383_v25, %v4100_v61  ;;  %v21389_v20 = vmax.f32 %v21388_v62, 0.0  ;;  %v4869_v13 = vadd.f32 %v21390_v46, %v13980_v7  ;;  %8264 = vmatprep.mubr.msk.f32.mxu0 %vm5236_vm0, %v5123_v10  ;;  %v5187_v56 = vadd.f32 %v5059_v45, %v4675_v2  ;;  %v21399_v61 = vld [vmem:[#allocation99_spill] sm:$0xff]  ;;  %v21402_v26 = vld [vmem:[#allocation340_spill] sm:$0xff] }
 0x4fa   :  { %v4676_v8 = vadd.f32 %v21385_v31, %v4164_v1  ;;  %v5060_v32 = vmax.f32 %v4932_v19, 0.0  ;;  %v21392_v50 = vmax.f32 %v21391_v3, 0.0  ;;  %v21394_v12 = vmax.f32 %v21393_v42, 0.0  ;;  %v21404_v10 = vld [vmem:[#allocation439_spill] sm:$0xff]  ;;  %v21408_v19 = vld [vmem:[#allocation373_spill] sm:$0xff] }
 0x4fb   :  { %v4101_v22 = vadd.f32 %v21389_v20, %v21387_v58  ;;  %v4933_v9 = vadd.f32 %v21395_v23, %v13980_v7  ;;  %v5124_v44 = vadd.f32 %v4996_v37, %v4612_v55  ;;  %v21396_v41 = vmax.f32 %v17491_v53, 0.0  ;;  %8360 = vmatprep.mubr.msk.f32.mxu1 %vm5236_vm0, %v5187_v56  ;;  %v21406_v25 = vld [vmem:[#allocation163_spill] sm:$0xff]  ;;  %v21411_v58 = vld [vmem:[#allocation100_spill] sm:$0xff] }
 0x4fc   :  { %v4165_v24 = vadd.f32 %v21394_v12, %v21392_v50  ;;  %v4997_v34 = vmax.f32 %v4869_v13, 0.0  ;;  %v21398_v43 = vmax.f32 %v21397_v60, 0.0  ;;  %v21400_v57 = vmax.f32 %v21399_v61, 0.0  ;;  %v21417_v50 = vld [vmem:[#allocation164_spill] sm:$0xff] }
 0x4fd   :  { %v4613_v40 = vadd.f32 %v21396_v41, %v4101_v22  ;;  %v5188_v2 = vadd.f32 %v5060_v32, %v4676_v8  ;;  %v21401_v11 = vmax.f32 %v17623_v16, 0.0  ;;  %v5061_v14 = vmax.f32 %v4933_v9, 0.0  ;;  %8265 = vmatmul.mubr.msk.f32.gmra.mrb[52].mxu0 %vm5236_vm0, %v5124_v44  ;;  %v21409_v8 = vld [vmem:[#allocation407_spill] sm:$0xff]  ;;  %v21415_v32 = vld [vmem:[#allocation440_spill] sm:$0xff] }
 0x4fe   :  { %v4102_v63 = vadd.f32 %v21400_v57, %v21398_v43  ;;  %v4870_v6 = vadd.f32 %v21402_v26, %v13980_v7  ;;  %v21403_v36 = vmax.f32 %v17495_v54, 0.0  ;;  %v21405_v45 = vmax.f32 %v21404_v10, 0.0  ;;  %v21413_v54 = vld [vmem:[#allocation341_spill] sm:$0xff] }
 0x4ff   :  { %v4677_v49 = vadd.f32 %v21401_v11, %v4165_v24  ;;  %v5125_v53 = vadd.f32 %v4997_v34, %v4613_v40  ;;  %v21407_v55 = vmax.f32 %v21406_v25, 0.0  ;;  %v4934_v37 = vadd.f32 %v21408_v19, %v13980_v7  ;;  %8361 = vmatmul.mubr.msk.f32.gmra.mrb[52].mxu1 %vm5236_vm0, %v5188_v2  ;;  %v21419_v24 = vld [vmem:[#allocation374_spill] sm:$0xff]  ;;  %v21421_v34 = vld [vmem:[#allocation408_spill] sm:$0xff]  ;;  %v21432_v25 = vld [vmem:[#allocation375_spill] sm:$0xff] }
 0x500   :  { %v4614_v1 = vadd.f32 %v21403_v36, %v4102_v63  ;;  %v4998_v31 = vmax.f32 %v4870_v6, 0.0  ;;  %v21410_v59 = vmax.f32 %v21409_v8, 0.0  ;;  %v21412_v62 = vmax.f32 %v21411_v58, 0.0  ;;  %v21433_v19 = vld [vmem:[#allocation409_spill] sm:$0xff] }
 0x501   :  { %v4166_v27 = vadd.f32 %v21407_v55, %v21405_v45  ;;  %v5189_v16 = vadd.f32 %v5061_v14, %v4677_v49  ;;  %v4871_v22 = vadd.f32 %v21413_v54, %v13980_v7  ;;  %8267 = vmatprep.mubr.msk.f32.mxu0 %vm5236_vm0, %v5125_v53  ;;  %v21414_v46 = vmax.f32 %v17627_v28, 0.0  ;;  %v21423_v28 = vld [vmem:[#allocation101_spill] sm:$0xff]  ;;  %v21426_v49 = vld [vmem:[#allocation342_spill] sm:$0xff] }
 0x502   :  { %v4103_v20 = vadd.f32 %v21412_v62, %v21410_v59  ;;  %v5062_v56 = vmax.f32 %v4934_v37, 0.0  ;;  %v21416_v3 = vmax.f32 %v21415_v32, 0.0  ;;  %v21418_v42 = vmax.f32 %v21417_v50, 0.0  ;;  %v21428_v53 = vld [vmem:[#allocation441_spill] sm:$0xff]  ;;  %v21439_v54 = vld [vmem:[#allocation442_spill] sm:$0xff]  ;;  %v21443_v32 = vld [vmem:[#allocation376_spill] sm:$0xff] }
 0x503   :  { %v4678_v13 = vadd.f32 %v21414_v46, %v4166_v27  ;;  %v4935_v23 = vadd.f32 %v21419_v24, %v13980_v7  ;;  %8363 = vmatprep.mubr.msk.f32.mxu1 %vm5236_vm0, %v5189_v16  ;;  %v5126_v9 = vadd.f32 %v4998_v31, %v4614_v1  ;;  %v21420_v44 = vmax.f32 %v17499_v4, 0.0  ;;  %v21430_v1 = vld [vmem:[#allocation165_spill] sm:$0xff]  ;;  %v21435_v16 = vld [vmem:[#allocation102_spill] sm:$0xff] }
 0x504   :  { %v4167_v12 = vadd.f32 %v21418_v42, %v21416_v3  ;;  %v4999_v40 = vmax.f32 %v4871_v22, 0.0  ;;  %v21422_v60 = vmax.f32 %v21421_v34, 0.0  ;;  %v21424_v43 = vmax.f32 %v21423_v28, 0.0  ;;  %v21441_v46 = vld [vmem:[#allocation166_spill] sm:$0xff] }
 0x505   :  { %v4615_v41 = vadd.f32 %v21420_v44, %v4103_v20  ;;  %v5190_v57 = vadd.f32 %v5062_v56, %v4678_v13  ;;  %v21425_v63 = vmax.f32 %v17631_v51, 0.0  ;;  %v5063_v11 = vmax.f32 %v4935_v23, 0.0  ;;  %8268 = vmatmul.mubr.msk.f32.gmra.mrb[54].mxu0 %vm5236_vm0, %v5126_v9  ;;  %v21445_v23 = vld [vmem:[#allocation410_spill] sm:$0xff] }
 0x506   :  { %v4104_v61 = vadd.f32 %v21424_v43, %v21422_v60  ;;  %v4872_v14 = vadd.f32 %v21426_v49, %v13980_v7  ;;  %v21427_v4 = vmax.f32 %v17503_v21, 0.0  ;;  %v21429_v36 = vmax.f32 %v21428_v53, 0.0  ;;  %v21437_v21 = vld [vmem:[#allocation343_spill] sm:$0xff]  ;;  %v21450_v43 = vld [vmem:[#allocation344_spill] sm:$0xff] }
 0x507   :  { %v4679_v2 = vadd.f32 %v21425_v63, %v4167_v12  ;;  %v5127_v26 = vadd.f32 %v4999_v40, %v4615_v41  ;;  %v21431_v10 = vmax.f32 %v21430_v1, 0.0  ;;  %v4936_v55 = vadd.f32 %v21432_v25, %v13980_v7  ;;  %8364 = vmatmul.mubr.msk.f32.gmra.mrb[54].mxu1 %vm5236_vm0, %v5190_v57  ;;  %v21454_v49 = vld [vmem:[#allocation167_spill] sm:$0xff] }
 0x508   :  { %v4616_v6 = vadd.f32 %v21427_v4, %v4104_v61  ;;  %v5000_v27 = vmax.f32 %v4872_v14, 0.0  ;;  %v21434_v37 = vmax.f32 %v21433_v19, 0.0  ;;  %v21436_v31 = vmax.f32 %v21435_v16, 0.0  ;;  %v21456_v4 = vld [vmem:[#allocation377_spill] sm:$0xff] }
 0x509   :  { %v4168_v45 = vadd.f32 %v21431_v10, %v21429_v36  ;;  %v5191_v51 = vadd.f32 %v5063_v11, %v4679_v2  ;;  %v4873_v59 = vadd.f32 %v21437_v21, %v13980_v7  ;;  %8270 = vmatprep.mubr.msk.f32.mxu0 %vm5236_vm0, %v5127_v26  ;;  %v21438_v58 = vmax.f32 %v17635_v15, 0.0  ;;  %v21447_v15 = vld [vmem:[#allocation103_spill] sm:$0xff]  ;;  %v21459_v10 = vld [vmem:[#allocation104_spill] sm:$0xff] }
 0x50a   :  { %v4105_v8 = vadd.f32 %v21436_v31, %v21434_v37  ;;  %v5064_v20 = vmax.f32 %v4936_v55, 0.0  ;;  %v21440_v22 = vmax.f32 %v21439_v54, 0.0  ;;  %v21442_v13 = vmax.f32 %v21441_v46, 0.0  ;;  %v21452_v2 = vld [vmem:[#allocation443_spill] sm:$0xff]  ;;  %v21463_v37 = vld [vmem:[#allocation444_spill] sm:$0xff] }
 0x50b   :  { %v4680_v62 = vadd.f32 %v21438_v58, %v4168_v45  ;;  %v4937_v3 = vadd.f32 %v21443_v32, %v13980_v7  ;;  %8366 = vmatprep.mubr.msk.f32.mxu1 %vm5236_vm0, %v5191_v51  ;;  %v5128_v50 = vadd.f32 %v5000_v27, %v4616_v6  ;;  %v21444_v42 = vmax.f32 %v17507_v52, 0.0  ;;  %v21457_v36 = vld [vmem:[#allocation411_spill] sm:$0xff]  ;;  %v21465_v31 = vld [vmem:[#allocation168_spill] sm:$0xff] }
 0x50c   :  { %v4169_v56 = vadd.f32 %v21442_v13, %v21440_v22  ;;  %v5001_v24 = vmax.f32 %v4873_v59, 0.0  ;;  %v21446_v9 = vmax.f32 %v21445_v23, 0.0  ;;  %v21448_v44 = vmax.f32 %v21447_v15, 0.0  ;;  %v21467_v59 = vld [vmem:[#allocation378_spill] sm:$0xff]  ;;  %v21469_v46 = vld [vmem:[#allocation412_spill] sm:$0xff] }
 0x50d   :  { %v4617_v12 = vadd.f32 %v21444_v42, %v4105_v8  ;;  %v5192_v40 = vadd.f32 %v5064_v20, %v4680_v62  ;;  %v21449_v34 = vmax.f32 %v17639_v38, 0.0  ;;  %v5065_v28 = vmax.f32 %v4937_v3, 0.0  ;;  %8271 = vmatmul.mubr.msk.f32.gmra.mrb[56].mxu0 %vm5236_vm0, %v5128_v50 }
 0x50e   :  { %v4106_v41 = vadd.f32 %v21448_v44, %v21446_v9  ;;  %v4874_v61 = vadd.f32 %v21450_v43, %v13980_v7  ;;  %v21451_v52 = vmax.f32 %v17511_v29, 0.0  ;;  %v21453_v11 = vmax.f32 %v21452_v2, 0.0  ;;  %v21461_v29 = vld [vmem:[#allocation345_spill] sm:$0xff] }
 0x50f   :  { %v4681_v60 = vadd.f32 %v21449_v34, %v4169_v56  ;;  %v5129_v57 = vadd.f32 %v5001_v24, %v4617_v12  ;;  %v21455_v14 = vmax.f32 %v21454_v49, 0.0  ;;  %v4938_v6 = vadd.f32 %v21456_v4, %v13980_v7  ;;  %8367 = vmatmul.mubr.msk.f32.gmra.mrb[56].mxu1 %vm5236_vm0, %v5192_v40  ;;  %v21474_v24 = vld [vmem:[#allocation346_spill] sm:$0xff]  ;;  %v21476_v44 = vld [vmem:[#allocation445_spill] sm:$0xff] }
 0x510   :  { %v4618_v63 = vadd.f32 %v21451_v52, %v4106_v41  ;;  %v5002_v53 = vmax.f32 %v4874_v61, 0.0  ;;  %v21458_v1 = vmax.f32 %v21457_v36, 0.0  ;;  %v21460_v45 = vmax.f32 %v21459_v10, 0.0  ;;  %v21478_v40 = vld [vmem:[#allocation169_spill] sm:$0xff]  ;;  %v21491_v10 = vld [vmem:[#allocation380_spill] sm:$0xff] }
 0x511   :  { %v4170_v26 = vadd.f32 %v21455_v14, %v21453_v11  ;;  %v5193_v38 = vadd.f32 %v5065_v28, %v4681_v60  ;;  %v4875_v55 = vadd.f32 %v21461_v29, %v13980_v7  ;;  %8273 = vmatprep.mubr.msk.f32.mxu0 %vm5236_vm0, %v5129_v57  ;;  %v21462_v51 = vmax.f32 %v17643_v39, 0.0  ;;  %v21471_v39 = vld [vmem:[#allocation105_spill] sm:$0xff]  ;;  %v21480_v28 = vld [vmem:[#allocation379_spill] sm:$0xff] }
 0x512   :  { %v4107_v25 = vadd.f32 %v21460_v45, %v21458_v1  ;;  %v5066_v19 = vmax.f32 %v4938_v6, 0.0  ;;  %v21464_v16 = vmax.f32 %v21463_v37, 0.0  ;;  %v21466_v8 = vmax.f32 %v21465_v31, 0.0  ;;  %v21481_v57 = vld [vmem:[#allocation413_spill] sm:$0xff]  ;;  %v21487_v6 = vld [vmem:[#allocation446_spill] sm:$0xff] }
 0x513   :  { %v4682_v27 = vadd.f32 %v21462_v51, %v4170_v26  ;;  %v4939_v58 = vadd.f32 %v21467_v59, %v13980_v7  ;;  %8369 = vmatprep.mubr.msk.f32.mxu1 %vm5236_vm0, %v5193_v38  ;;  %v5130_v62 = vadd.f32 %v5002_v53, %v4618_v63  ;;  %v21468_v20 = vmax.f32 %v17515_v48, 0.0  ;;  %v21483_v63 = vld [vmem:[#allocation106_spill] sm:$0xff] }
 0x514   :  { %v4171_v21 = vadd.f32 %v21466_v8, %v21464_v16  ;;  %v5003_v22 = vmax.f32 %v4875_v55, 0.0  ;;  %v21470_v13 = vmax.f32 %v21469_v46, 0.0  ;;  %v21472_v56 = vmax.f32 %v21471_v39, 0.0  ;;  %v21489_v53 = vld [vmem:[#allocation170_spill] sm:$0xff] }
 0x515   :  { %v4619_v54 = vadd.f32 %v21468_v20, %v4107_v25  ;;  %v5194_v3 = vadd.f32 %v5066_v19, %v4682_v27  ;;  %v21473_v50 = vmax.f32 %v17647_v18, 0.0  ;;  %v5067_v12 = vmax.f32 %v4939_v58, 0.0  ;;  %8274 = vmatmul.mubr.msk.f32.gmra.mrb[58].mxu0 %vm5236_vm0, %v5130_v62  ;;  %v21493_v27 = vld [vmem:[#allocation414_spill] sm:$0xff]  ;;  %v21498_v58 = vld [vmem:[#allocation348_spill] sm:$0xff] }
 0x516   :  { %v4108_v32 = vadd.f32 %v21472_v56, %v21470_v13  ;;  %v4876_v23 = vadd.f32 %v21474_v24, %v13980_v7  ;;  %v21475_v48 = vmax.f32 %v17519_v30, 0.0  ;;  %v21477_v41 = vmax.f32 %v21476_v44, 0.0  ;;  %v21485_v30 = vld [vmem:[#allocation347_spill] sm:$0xff]  ;;  %v21506_v24 = vld [vmem:[#allocation236_spill] sm:$0xff] }
 0x517   :  { %v4683_v42 = vadd.f32 %v21473_v50, %v4171_v21  ;;  %v5131_v9 = vadd.f32 %v5003_v22, %v4619_v54  ;;  %v21479_v34 = vmax.f32 %v21478_v40, 0.0  ;;  %v4940_v43 = vadd.f32 %v21480_v28, %v13980_v7  ;;  %8370 = vmatmul.mubr.msk.f32.gmra.mrb[58].mxu1 %vm5236_vm0, %v5194_v3  ;;  %v21500_v22 = vld [vmem:[#allocation447_spill] sm:$0xff] }
 0x518   :  { %v4620_v15 = vadd.f32 %v21475_v48, %v4108_v32  ;;  %v5004_v61 = vmax.f32 %v4876_v23, 0.0  ;;  %v21482_v52 = vmax.f32 %v21481_v57, 0.0  ;;  %v21484_v2 = vmax.f32 %v21483_v63, 0.0  ;;  %v21502_v13 = vld [vmem:[#allocation171_spill] sm:$0xff]  ;;  %v21504_v32 = vld [vmem:[#allocation381_spill] sm:$0xff] }
 0x519   :  { %v4172_v60 = vadd.f32 %v21479_v34, %v21477_v41  ;;  %v5195_v18 = vadd.f32 %v5067_v12, %v4683_v42  ;;  %v4877_v49 = vadd.f32 %v21485_v30, %v13980_v7  ;;  %8276 = vmatprep.mubr.msk.f32.mxu0 %vm5236_vm0, %v5131_v9  ;;  %v21486_v14 = vmax.f32 %v17651_v33, 0.0  ;;  %v21495_v33 = vld [vmem:[#allocation107_spill] sm:$0xff]  ;;  %v21508_v41 = vld [vmem:[#allocation50_spill] sm:$0xff] }
 0x51a   :  { %v4109_v11 = vadd.f32 %v21484_v2, %v21482_v52  ;;  %v5068_v4 = vmax.f32 %v4940_v43, 0.0  ;;  %v21488_v38 = vmax.f32 %v21487_v6, 0.0  ;;  %v21490_v36 = vmax.f32 %v21489_v53, 0.0  ;;  %v21505_v42 = vld [vmem:[#allocation19_spill] sm:$0xff]  ;;  %v21509_v43 = vld [vmem:[#allocation172_spill] sm:$0xff] }
 0x51b   :  { %v4684_v26 = vadd.f32 %v21486_v14, %v4172_v60  ;;  %v4941_v45 = vadd.f32 %v21491_v10, %v13980_v7  ;;  %8372 = vmatprep.mubr.msk.f32.mxu1 %vm5236_vm0, %v5195_v18  ;;  %v5132_v25 = vadd.f32 %v5004_v61, %v4620_v15  ;;  %v21492_v29 = vmax.f32 %v17523_v47, 0.0  ;;  %v10200_v15 = vld [vmem:[%s19680_s3 + $0xd00] sm:$0xff]  ;;  %v21510_v52 = vld [vmem:[#allocation300_spill] sm:$0xff]  ;;  %v10202_v10 = vld [vmem:[%s19680_s3 + $0xd08] sm:$0xff] }
 0x51c   :  { %v4173_v1 = vadd.f32 %v21490_v36, %v21488_v38  ;;  %v5005_v51 = vmax.f32 %v4877_v49, 0.0  ;;  %v21494_v19 = vmax.f32 %v21493_v27, 0.0  ;;  %v21496_v37 = vmax.f32 %v21495_v33, 0.0  ;;  %v21511_v2 = vld [vmem:[#allocation108_spill] sm:$0xff]  ;;  %v10201_v14 = vld [vmem:[%s19680_s3 + $0xf00] sm:$0xff]  ;;  %v21514_v36 = vld [vmem:[#allocation237_spill] sm:$0xff] }
 0x51d   :  { %v4621_v55 = vadd.f32 %v21492_v29, %v4109_v11  ;;  %v5196_v31 = vadd.f32 %v5068_v4, %v4684_v26  ;;  %v21497_v8 = vmax.f32 %v17655_v5, 0.0  ;;  %v5069_v59 = vmax.f32 %v4941_v45, 0.0  ;;  %8277 = vmatmul.mubr.msk.f32.gmra.mrb[60].mxu0 %vm5236_vm0, %v5132_v25  ;;  %v21513_v4 = vld [vmem:[#allocation20_spill] sm:$0xff]  ;;  %v21515_v33 = vld [vmem:[#allocation51_spill] sm:$0xff] }
 0x51e   :  { %v4110_v16 = vadd.f32 %v21496_v37, %v21494_v19  ;;  %v4878_v62 = vadd.f32 %v21498_v58, %v13980_v7  ;;  %v21499_v47 = vmax.f32 %v17527_v17, 0.0  ;;  %v21501_v46 = vmax.f32 %v21500_v22, 0.0  ;;  %v21517_v58 = vld [vmem:[#allocation109_spill] sm:$0xff] }
 0x51f   :  { %v4685_v21 = vadd.f32 %v21497_v8, %v4173_v1  ;;  %v5133_v20 = vadd.f32 %v5005_v51, %v4621_v55  ;;  %v21503_v39 = vmax.f32 %v21502_v13, 0.0  ;;  %v4942_v3 = vadd.f32 %v21504_v32, %v13980_v7  ;;  %8373 = vmatmul.mubr.msk.f32.gmra.mrb[60].mxu1 %vm5236_vm0, %v5196_v31  ;;  %v10203_v32 = vld [vmem:[%s19680_s3 + $0xf08] sm:$0xff] }
 0x520   :  { %v4622_v54 = vadd.f32 %v21499_v47, %v4110_v16  ;;  %v5006_v50 = vmax.f32 %v4878_v62, 0.0  ;;  %v3471_v12 = vadd.f32 %v13980_v7, %v21505_v42  ;;  %v4367_v23 = vadd.f32 %v21506_v24, %v13980_v7  ;;  %v21516_v16 = vld [vmem:[#allocation173_spill] sm:$0xff]  ;;  %v21521_v24 = vld [vmem:[#allocation238_spill] sm:$0xff] }
 0x521   :  { %v4174_v56 = vadd.f32 %v21503_v39, %v21501_v46  ;;  %v5197_v5 = vadd.f32 %v5069_v59, %v4685_v21  ;;  %8279 = vmatprep.mubr.msk.f32.mxu0 %vm5236_vm0, %v5133_v20  ;;  %v21507_v17 = vmax.f32 %v17659_v35, 0.0  ;;  %v5070_v48 = vmax.f32 %v4942_v3, 0.0  ;;  %v21519_v46 = vld [vmem:[#allocation301_spill] sm:$0xff] }
 0x522   :  { %v4751_v44 = vmul.f32 %v10200_v15, %v21200_v0  ;;  %v3535_v40 = vadd.f32 %v13980_v7, %v21508_v41  ;;  %v5134_v34 = vadd.f32 %v5006_v50, %v4622_v54  ;;  %v3599_v60 = vmax.f32 %v3471_v12, 0.0  ;;  %v21522_v41 = vld [vmem:[#allocation52_spill] sm:$0xff] }
 0x523   :  { %v4686_v9 = vadd.f32 %v21507_v17, %v4174_v56  ;;  %8375 = vmatprep.mubr.msk.f32.mxu1 %vm5236_vm0, %v5197_v5  ;;  %v4495_v28 = vmax.f32 %v4367_v23, 0.0  ;;  %v3919_v18 = vadd.f32 %v21509_v43, %v13980_v7  ;;  %v4431_v63 = vadd.f32 %v21510_v52, %v13980_v7  ;;  %v21520_v5 = vld [vmem:[#allocation21_spill] sm:$0xff]  ;;  %v10204_v17 = vld [vmem:[%s19680_s3 + $0xd10] sm:$0xff]  ;;  %v21523_v43 = vld [vmem:[#allocation174_spill] sm:$0xff] }
 0x524   :  { %v4879_v61 = vadd.f32 %v4751_v44, %v13980_v7  ;;  %v3663_v57 = vmax.f32 %v3535_v40, 0.0  ;;  %8280 = vmatmul.mubr.msk.f32.gmra.mrb[62].mxu0 %vm5236_vm0, %v5134_v34  ;;  %v21512_v11 = vmax.f32 %v21511_v2, 0.0  ;;  %v4815_v26 = vmul.f32 %v10201_v14, %v21200_v0  ;;  %v21526_v2 = vld [vmem:[#allocation302_spill] sm:$0xff]  ;;  %v10205_v14 = vld [vmem:[%s19680_s3 + $0xf10] sm:$0xff] }
 0x525   :  { %v5198_v35 = vadd.f32 %v5070_v48, %v4686_v9  ;;  %v4047_v49 = vmax.f32 %v3919_v18, 0.0  ;;  %v3472_v6 = vadd.f32 %v13980_v7, %v21513_v4  ;;  %v4559_v53 = vmax.f32 %v4431_v63, 0.0  ;;  %v21527_v4 = vld [vmem:[#allocation22_spill] sm:$0xff] }
 0x526   :  { %v4111_v30 = vadd.f32 %v21512_v11, %v3599_v60  ;;  %v5007_v38 = vmax.f32 %v4879_v61, 0.0  ;;  %v4368_v1 = vadd.f32 %v21514_v36, %v13980_v7  ;;  %v4752_v45 = vmul.f32 %v10202_v10, %v21200_v0  ;;  %v21524_v61 = vld [vmem:[#allocation110_spill] sm:$0xff] }
 0x527   :  { %8376 = vmatmul.mubr.msk.f32.gmra.mrb[62].mxu1 %vm5236_vm0, %v5198_v35  ;;  %v4175_v29 = vadd.f32 %v4047_v49, %v3663_v57  ;;  %v4943_v55 = vadd.f32 %v4815_v26, %v13980_v7  ;;  %v3600_v51 = vmax.f32 %v3472_v6, 0.0  ;;  %v3536_v37 = vadd.f32 %v13980_v7, %v21515_v33  ;;  %v21529_v33 = vld [vmem:[#allocation53_spill] sm:$0xff] }
 0x528   :  { %v4623_v25 = vadd.f32 %v4495_v28, %v4111_v30  ;;  %v4496_v27 = vmax.f32 %v4368_v1, 0.0  ;;  %v4880_v19 = vadd.f32 %v4752_v45, %v13980_v7  ;;  %v3920_v31 = vadd.f32 %v21516_v16, %v13980_v7  ;;  %v21528_v1 = vld [vmem:[#allocation239_spill] sm:$0xff] }
 0x529   :  { %v4687_v21 = vadd.f32 %v4559_v53, %v4175_v29  ;;  %v5071_v59 = vmax.f32 %v4943_v55, 0.0  ;;  %v21518_v62 = vmax.f32 %v21517_v58, 0.0  ;;  %v3664_v54 = vmax.f32 %v3536_v37, 0.0  ;;  %v10206_v55 = vld [vmem:[%s19680_s3 + $0xd18] sm:$0xff]  ;;  %v21530_v16 = vld [vmem:[#allocation175_spill] sm:$0xff] }
 0x52a   :  { %v5135_v8 = vadd.f32 %v5007_v38, %v4623_v25  ;;  %v5008_v47 = vmax.f32 %v4880_v19, 0.0  ;;  %v4048_v22 = vmax.f32 %v3920_v31, 0.0  ;;  %v4432_v13 = vadd.f32 %v21519_v46, %v13980_v7 }
 0x52b   :  { %v4112_v20 = vadd.f32 %v21518_v62, %v3600_v51  ;;  %v5199_v39 = vadd.f32 %v5071_v59, %v4687_v21  ;;  %v4816_v3 = vmul.f32 %v10203_v32, %v21200_v0  ;;  %v3473_v50 = vadd.f32 %v13980_v7, %v21520_v5  ;;  %v21531_v59 = vld [vmem:[#allocation111_spill] sm:$0xff] }
 0x52c   :  { %8282 = vmatprep.mubr.msk.f32.mxu0 %vm5236_vm0, %v5135_v8  ;;  %v4176_v42 = vadd.f32 %v4048_v22, %v3664_v54  ;;  %v4560_v12 = vmax.f32 %v4432_v13, 0.0  ;;  %v4369_v23 = vadd.f32 %v21521_v24, %v13980_v7  ;;  %v4753_v9 = vmul.f32 %v10204_v17, %v21200_v0  ;;  %v21533_v22 = vld [vmem:[#allocation303_spill] sm:$0xff]  ;;  %v10207_v13 = vld [vmem:[%s19680_s3 + $0xf18] sm:$0xff] }
 0x52d   :  { %v4624_v56 = vadd.f32 %v4496_v27, %v4112_v20  ;;  %8378 = vmatprep.mubr.msk.f32.mxu1 %vm5236_vm0, %v5199_v39  ;;  %v4944_v15 = vadd.f32 %v4816_v3, %v13980_v7  ;;  %v3601_v44 = vmax.f32 %v3473_v50, 0.0  ;;  %v3537_v40 = vadd.f32 %v13980_v7, %v21522_v41  ;;  %v21534_v5 = vld [vmem:[#allocation23_spill] sm:$0xff]  ;;  %v21536_v41 = vld [vmem:[#allocation54_spill] sm:$0xff] }
 0x52e   :  { %v4688_v34 = vadd.f32 %v4560_v12, %v4176_v42  ;;  %v4497_v60 = vmax.f32 %v4369_v23, 0.0  ;;  %v4881_v28 = vadd.f32 %v4753_v9, %v13980_v7  ;;  %v3921_v18 = vadd.f32 %v21523_v43, %v13980_v7  ;;  %v21535_v23 = vld [vmem:[#allocation240_spill] sm:$0xff] }
 0x52f   :  { %v5136_v48 = vadd.f32 %v5008_v47, %v4624_v56  ;;  %v5072_v35 = vmax.f32 %v4944_v15, 0.0  ;;  %v21525_v57 = vmax.f32 %v21524_v61, 0.0  ;;  %v3665_v63 = vmax.f32 %v3537_v40, 0.0  ;;  %v10208_v15 = vld [vmem:[%s19680_s3 + $0xd20] sm:$0xff]  ;;  %v21537_v43 = vld [vmem:[#allocation176_spill] sm:$0xff] }
 0x530   :  { %v4433_v11 = vadd.f32 %v21526_v2, %v13980_v7  ;;  %v5009_v30 = vmax.f32 %v4881_v28, 0.0  ;;  %v4049_v49 = vmax.f32 %v3921_v18, 0.0  ;;  %v4817_v26 = vmul.f32 %v10205_v14, %v21200_v0  ;;  %v21540_v2 = vld [vmem:[#allocation304_spill] sm:$0xff]  ;;  %v10209_v14 = vld [vmem:[%s19680_s3 + $0xf20] sm:$0xff] }
 0x531   :  { %8283 = vmatmul.mubr.msk.f32.gmra.mrb[64].mxu0 %vm5236_vm0, %v5136_v48  ;;  %v4113_v52 = vadd.f32 %v21525_v57, %v3601_v44  ;;  %v3474_v6 = vadd.f32 %v13980_v7, %v21527_v4  ;;  %v5200_v38 = vadd.f32 %v5072_v35, %v4688_v34  ;;  %v4370_v10 = vadd.f32 %v21528_v1, %v13980_v7  ;;  %v21538_v35 = vld [vmem:[#allocation112_spill] sm:$0xff]  ;;  %v21542_v1 = vld [vmem:[#allocation241_spill] sm:$0xff] }
 0x532   :  { %v4561_v36 = vmax.f32 %v4433_v11, 0.0  ;;  %v4177_v45 = vadd.f32 %v4049_v49, %v3665_v63  ;;  %v4945_v25 = vadd.f32 %v4817_v26, %v13980_v7  ;;  %v4754_v51 = vmul.f32 %v10206_v55, %v21200_v0  ;;  %v21541_v4 = vld [vmem:[#allocation24_spill] sm:$0xff]  ;;  %v10210_v55 = vld [vmem:[%s19680_s3 + $0xd28] sm:$0xff] }
 0x533   :  { %v4625_v53 = vadd.f32 %v4497_v60, %v4113_v52  ;;  %v3602_v29 = vmax.f32 %v3474_v6, 0.0  ;;  %8379 = vmatmul.mubr.msk.f32.gmra.mrb[64].mxu1 %vm5236_vm0, %v5200_v38  ;;  %v4498_v19 = vmax.f32 %v4370_v10, 0.0  ;;  %v3538_v37 = vadd.f32 %v13980_v7, %v21529_v33  ;;  %v21543_v33 = vld [vmem:[#allocation55_spill] sm:$0xff] }
 0x534   :  { %v3922_v31 = vadd.f32 %v21530_v16, %v13980_v7  ;;  %v4689_v8 = vadd.f32 %v4561_v36, %v4177_v45  ;;  %v5073_v21 = vmax.f32 %v4945_v25, 0.0  ;;  %v21532_v58 = vmax.f32 %v21531_v59, 0.0  ;;  %v21544_v16 = vld [vmem:[#allocation177_spill] sm:$0xff] }
 0x535   :  { %v5137_v27 = vadd.f32 %v5009_v30, %v4625_v53  ;;  %v4882_v20 = vadd.f32 %v4754_v51, %v13980_v7  ;;  %v3666_v47 = vmax.f32 %v3538_v37, 0.0  ;;  %v4434_v46 = vadd.f32 %v21533_v22, %v13980_v7  ;;  %v21545_v59 = vld [vmem:[#allocation113_spill] sm:$0xff] }
 0x536   :  { %v4114_v62 = vadd.f32 %v21532_v58, %v3602_v29  ;;  %v4050_v54 = vmax.f32 %v3922_v31, 0.0  ;;  %v4818_v39 = vmul.f32 %v10207_v13, %v21200_v0  ;;  %v5201_v56 = vadd.f32 %v5073_v21, %v4689_v8  ;;  %v21547_v22 = vld [vmem:[#allocation305_spill] sm:$0xff]  ;;  %v10211_v13 = vld [vmem:[%s19680_s3 + $0xf28] sm:$0xff] }
 0x537   :  { %8285 = vmatprep.mubr.msk.f32.mxu0 %vm5236_vm0, %v5137_v27  ;;  %v5010_v3 = vmax.f32 %v4882_v20, 0.0  ;;  %v3475_v50 = vadd.f32 %v13980_v7, %v21534_v5  ;;  %v4562_v12 = vmax.f32 %v4434_v46, 0.0  ;;  %v4371_v17 = vadd.f32 %v21535_v23, %v13980_v7  ;;  %v21548_v5 = vld [vmem:[#allocation25_spill] sm:$0xff]  ;;  %v21549_v23 = vld [vmem:[#allocation242_spill] sm:$0xff] }
 0x538   :  { %v4626_v32 = vadd.f32 %v4498_v19, %v4114_v62  ;;  %v4178_v42 = vadd.f32 %v4050_v54, %v3666_v47  ;;  %v4946_v24 = vadd.f32 %v4818_v39, %v13980_v7  ;;  %8381 = vmatprep.mubr.msk.f32.mxu1 %vm5236_vm0, %v5201_v56  ;;  %v4755_v44 = vmul.f32 %v10208_v15, %v21200_v0  ;;  %v10212_v15 = vld [vmem:[%s19680_s3 + $0xd30] sm:$0xff] }
 0x539   :  { %v3603_v48 = vmax.f32 %v3475_v50, 0.0  ;;  %v3539_v40 = vadd.f32 %v13980_v7, %v21536_v41  ;;  %v4499_v28 = vmax.f32 %v4371_v17, 0.0  ;;  %v3923_v18 = vadd.f32 %v21537_v43, %v13980_v7  ;;  %v21550_v41 = vld [vmem:[#allocation56_spill] sm:$0xff]  ;;  %v21551_v43 = vld [vmem:[#allocation178_spill] sm:$0xff] }
 0x53a   :  { %v5138_v9 = vadd.f32 %v5010_v3, %v4626_v32  ;;  %v4690_v34 = vadd.f32 %v4562_v12, %v4178_v42  ;;  %v5074_v60 = vmax.f32 %v4946_v24, 0.0  ;;  %v21539_v61 = vmax.f32 %v21538_v35, 0.0  ;;  %v21552_v35 = vld [vmem:[#allocation114_spill] sm:$0xff] }
 0x53b   :  { %v4883_v52 = vadd.f32 %v4755_v44, %v13980_v7  ;;  %v3667_v63 = vmax.f32 %v3539_v40, 0.0  ;;  %v4435_v11 = vadd.f32 %v21540_v2, %v13980_v7  ;;  %v4051_v49 = vmax.f32 %v3923_v18, 0.0  ;;  %v21554_v2 = vld [vmem:[#allocation306_spill] sm:$0xff] }
 0x53c   :  { %8286 = vmatmul.mubr.msk.f32.gmra.mrb[66].mxu0 %vm5236_vm0, %v5138_v9  ;;  %v4115_v57 = vadd.f32 %v21539_v61, %v3603_v48  ;;  %v5202_v30 = vadd.f32 %v5074_v60, %v4690_v34  ;;  %v4819_v26 = vmul.f32 %v10209_v14, %v21200_v0  ;;  %v3476_v6 = vadd.f32 %v13980_v7, %v21541_v4  ;;  %v10213_v14 = vld [vmem:[%s19680_s3 + $0xf30] sm:$0xff]  ;;  %v21555_v4 = vld [vmem:[#allocation26_spill] sm:$0xff] }
 0x53d   :  { %v5011_v53 = vmax.f32 %v4883_v52, 0.0  ;;  %v4563_v36 = vmax.f32 %v4435_v11, 0.0  ;;  %v4372_v10 = vadd.f32 %v21542_v1, %v13980_v7  ;;  %v4179_v45 = vadd.f32 %v4051_v49, %v3667_v63  ;;  %v21556_v1 = vld [vmem:[#allocation243_spill] sm:$0xff] }
 0x53e   :  { %v4627_v38 = vadd.f32 %v4499_v28, %v4115_v57  ;;  %8382 = vmatmul.mubr.msk.f32.gmra.mrb[66].mxu1 %vm5236_vm0, %v5202_v30  ;;  %v4947_v25 = vadd.f32 %v4819_v26, %v13980_v7  ;;  %v3604_v29 = vmax.f32 %v3476_v6, 0.0  ;;  %v4756_v51 = vmul.f32 %v10210_v55, %v21200_v0  ;;  %v10214_v55 = vld [vmem:[%s19680_s3 + $0xd38] sm:$0xff] }
 0x53f   :  { %v4500_v19 = vmax.f32 %v4372_v10, 0.0  ;;  %v3540_v37 = vadd.f32 %v13980_v7, %v21543_v33  ;;  %v3924_v31 = vadd.f32 %v21544_v16, %v13980_v7  ;;  %v4691_v8 = vadd.f32 %v4563_v36, %v4179_v45  ;;  %v21557_v33 = vld [vmem:[#allocation57_spill] sm:$0xff]  ;;  %v21558_v16 = vld [vmem:[#allocation179_spill] sm:$0xff] }
 0x540   :  { %v5139_v27 = vadd.f32 %v5011_v53, %v4627_v38  ;;  %v5075_v21 = vmax.f32 %v4947_v25, 0.0  ;;  %v21546_v58 = vmax.f32 %v21545_v59, 0.0  ;;  %v4884_v20 = vadd.f32 %v4756_v51, %v13980_v7  ;;  %v21559_v59 = vld [vmem:[#allocation115_spill] sm:$0xff] }
 0x541   :  { %v3668_v47 = vmax.f32 %v3540_v37, 0.0  ;;  %v4052_v54 = vmax.f32 %v3924_v31, 0.0  ;;  %v4436_v46 = vadd.f32 %v21547_v22, %v13980_v7  ;;  %v4820_v39 = vmul.f32 %v10211_v13, %v21200_v0  ;;  %v21561_v22 = vld [vmem:[#allocation307_spill] sm:$0xff]  ;;  %v10215_v13 = vld [vmem:[%s19680_s3 + $0xf38] sm:$0xff] }
 0x542   :  { %v4116_v62 = vadd.f32 %v21546_v58, %v3604_v29  ;;  %8288 = vmatprep.mubr.msk.f32.mxu0 %vm5236_vm0, %v5139_v27  ;;  %v5203_v56 = vadd.f32 %v5075_v21, %v4691_v8  ;;  %v5012_v3 = vmax.f32 %v4884_v20, 0.0  ;;  %v3477_v50 = vadd.f32 %v13980_v7, %v21548_v5  ;;  %v21562_v5 = vld [vmem:[#allocation27_spill] sm:$0xff] }
 0x543   :  { %v4180_v42 = vadd.f32 %v4052_v54, %v3668_v47  ;;  %v4564_v12 = vmax.f32 %v4436_v46, 0.0  ;;  %v4948_v24 = vadd.f32 %v4820_v39, %v13980_v7  ;;  %v4373_v17 = vadd.f32 %v21549_v23, %v13980_v7  ;;  %v21563_v23 = vld [vmem:[#allocation244_spill] sm:$0xff] }
 0x544   :  { %v4628_v32 = vadd.f32 %v4500_v19, %v4116_v62  ;;  %8384 = vmatprep.mubr.msk.f32.mxu1 %vm5236_vm0, %v5203_v56  ;;  %v3605_v48 = vmax.f32 %v3477_v50, 0.0  ;;  %v4757_v44 = vmul.f32 %v10212_v15, %v21200_v0  ;;  %v3541_v40 = vadd.f32 %v13980_v7, %v21550_v41  ;;  %v10216_v15 = vld [vmem:[%s19680_s3 + $0xd40] sm:$0xff] }
 0x545   :  { %v4692_v34 = vadd.f32 %v4564_v12, %v4180_v42  ;;  %v5076_v60 = vmax.f32 %v4948_v24, 0.0  ;;  %v4501_v28 = vmax.f32 %v4373_v17, 0.0  ;;  %v3925_v18 = vadd.f32 %v21551_v43, %v13980_v7  ;;  %v21564_v41 = vld [vmem:[#allocation58_spill] sm:$0xff]  ;;  %v21565_v43 = vld [vmem:[#allocation180_spill] sm:$0xff] }
 0x546   :  { %v5140_v9 = vadd.f32 %v5012_v3, %v4628_v32  ;;  %v21553_v61 = vmax.f32 %v21552_v35, 0.0  ;;  %v4885_v52 = vadd.f32 %v4757_v44, %v13980_v7  ;;  %v3669_v63 = vmax.f32 %v3541_v40, 0.0  ;;  %v21566_v35 = vld [vmem:[#allocation116_spill] sm:$0xff] }
 0x547   :  { %v4437_v11 = vadd.f32 %v21554_v2, %v13980_v7  ;;  %v5204_v30 = vadd.f32 %v5076_v60, %v4692_v34  ;;  %v4053_v49 = vmax.f32 %v3925_v18, 0.0  ;;  %v4821_v26 = vmul.f32 %v10213_v14, %v21200_v0  ;;  %v21568_v2 = vld [vmem:[#allocation308_spill] sm:$0xff]  ;;  %v10217_v14 = vld [vmem:[%s19680_s3 + $0xf40] sm:$0xff] }
 0x548   :  { %8289 = vmatmul.mubr.msk.f32.gmra.mrb[68].mxu0 %vm5236_vm0, %v5140_v9  ;;  %v4117_v57 = vadd.f32 %v21553_v61, %v3605_v48  ;;  %v3478_v6 = vadd.f32 %v13980_v7, %v21555_v4  ;;  %v5013_v53 = vmax.f32 %v4885_v52, 0.0  ;;  %v4374_v10 = vadd.f32 %v21556_v1, %v13980_v7  ;;  %v21569_v4 = vld [vmem:[#allocation28_spill] sm:$0xff]  ;;  %v21570_v1 = vld [vmem:[#allocation245_spill] sm:$0xff] }
 0x549   :  { %v4565_v36 = vmax.f32 %v4437_v11, 0.0  ;;  %8385 = vmatmul.mubr.msk.f32.gmra.mrb[68].mxu1 %vm5236_vm0, %v5204_v30  ;;  %v4181_v45 = vadd.f32 %v4053_v49, %v3669_v63  ;;  %v4949_v25 = vadd.f32 %v4821_v26, %v13980_v7  ;;  %v4758_v51 = vmul.f32 %v10214_v55, %v21200_v0  ;;  %v10218_v55 = vld [vmem:[%s19680_s3 + $0xd48] sm:$0xff] }
 0x54a   :  { %v4629_v38 = vadd.f32 %v4501_v28, %v4117_v57  ;;  %v3606_v29 = vmax.f32 %v3478_v6, 0.0  ;;  %v4502_v19 = vmax.f32 %v4374_v10, 0.0  ;;  %v3542_v37 = vadd.f32 %v13980_v7, %v21557_v33  ;;  %v21571_v33 = vld [vmem:[#allocation59_spill] sm:$0xff] }
 0x54b   :  { %v3926_v31 = vadd.f32 %v21558_v16, %v13980_v7  ;;  %v4693_v8 = vadd.f32 %v4565_v36, %v4181_v45  ;;  %v5077_v21 = vmax.f32 %v4949_v25, 0.0  ;;  %v21560_v58 = vmax.f32 %v21559_v59, 0.0  ;;  %v21572_v16 = vld [vmem:[#allocation181_spill] sm:$0xff] }
 0x54c   :  { %v5141_v27 = vadd.f32 %v5013_v53, %v4629_v38  ;;  %v4886_v20 = vadd.f32 %v4758_v51, %v13980_v7  ;;  %v3670_v47 = vmax.f32 %v3542_v37, 0.0  ;;  %v4438_v46 = vadd.f32 %v21561_v22, %v13980_v7  ;;  %v21573_v59 = vld [vmem:[#allocation117_spill] sm:$0xff] }
 0x54d   :  { %v4118_v62 = vadd.f32 %v21560_v58, %v3606_v29  ;;  %v4054_v54 = vmax.f32 %v3926_v31, 0.0  ;;  %v4822_v39 = vmul.f32 %v10215_v13, %v21200_v0  ;;  %v5205_v56 = vadd.f32 %v5077_v21, %v4693_v8  ;;  %v21575_v22 = vld [vmem:[#allocation309_spill] sm:$0xff]  ;;  %v10219_v13 = vld [vmem:[%s19680_s3 + $0xf48] sm:$0xff] }
 0x54e   :  { %8291 = vmatprep.mubr.msk.f32.mxu0 %vm5236_vm0, %v5141_v27  ;;  %v5014_v3 = vmax.f32 %v4886_v20, 0.0  ;;  %v3479_v50 = vadd.f32 %v13980_v7, %v21562_v5  ;;  %v4566_v12 = vmax.f32 %v4438_v46, 0.0  ;;  %v4375_v17 = vadd.f32 %v21563_v23, %v13980_v7  ;;  %v21576_v5 = vld [vmem:[#allocation29_spill] sm:$0xff]  ;;  %v21577_v23 = vld [vmem:[#allocation246_spill] sm:$0xff] }
 0x54f   :  { %v4630_v32 = vadd.f32 %v4502_v19, %v4118_v62  ;;  %v4182_v42 = vadd.f32 %v4054_v54, %v3670_v47  ;;  %v4950_v24 = vadd.f32 %v4822_v39, %v13980_v7  ;;  %8387 = vmatprep.mubr.msk.f32.mxu1 %vm5236_vm0, %v5205_v56  ;;  %v4759_v44 = vmul.f32 %v10216_v15, %v21200_v0  ;;  %v10220_v15 = vld [vmem:[%s19680_s3 + $0xd50] sm:$0xff] }
 0x550   :  { %v3607_v48 = vmax.f32 %v3479_v50, 0.0  ;;  %v3543_v40 = vadd.f32 %v13980_v7, %v21564_v41  ;;  %v4503_v28 = vmax.f32 %v4375_v17, 0.0  ;;  %v3927_v18 = vadd.f32 %v21565_v43, %v13980_v7  ;;  %v21578_v41 = vld [vmem:[#allocation60_spill] sm:$0xff]  ;;  %v21579_v43 = vld [vmem:[#allocation182_spill] sm:$0xff] }
 0x551   :  { %v5142_v9 = vadd.f32 %v5014_v3, %v4630_v32  ;;  %v4694_v34 = vadd.f32 %v4566_v12, %v4182_v42  ;;  %v5078_v60 = vmax.f32 %v4950_v24, 0.0  ;;  %v21567_v61 = vmax.f32 %v21566_v35, 0.0  ;;  %v21580_v35 = vld [vmem:[#allocation118_spill] sm:$0xff] }
 0x552   :  { %v4887_v52 = vadd.f32 %v4759_v44, %v13980_v7  ;;  %v3671_v63 = vmax.f32 %v3543_v40, 0.0  ;;  %v4439_v11 = vadd.f32 %v21568_v2, %v13980_v7  ;;  %v4055_v49 = vmax.f32 %v3927_v18, 0.0  ;;  %v21582_v2 = vld [vmem:[#allocation310_spill] sm:$0xff] }
 0x553   :  { %8292 = vmatmul.mubr.msk.f32.gmra.mrb[70].mxu0 %vm5236_vm0, %v5142_v9  ;;  %v4119_v57 = vadd.f32 %v21567_v61, %v3607_v48  ;;  %v5206_v30 = vadd.f32 %v5078_v60, %v4694_v34  ;;  %v4823_v26 = vmul.f32 %v10217_v14, %v21200_v0  ;;  %v3480_v6 = vadd.f32 %v13980_v7, %v21569_v4  ;;  %v10221_v14 = vld [vmem:[%s19680_s3 + $0xf50] sm:$0xff]  ;;  %v21583_v4 = vld [vmem:[#allocation30_spill] sm:$0xff] }
 0x554   :  { %v5015_v53 = vmax.f32 %v4887_v52, 0.0  ;;  %v4567_v36 = vmax.f32 %v4439_v11, 0.0  ;;  %v4376_v10 = vadd.f32 %v21570_v1, %v13980_v7  ;;  %v4183_v45 = vadd.f32 %v4055_v49, %v3671_v63  ;;  %v21584_v1 = vld [vmem:[#allocation247_spill] sm:$0xff] }
 0x555   :  { %v4631_v38 = vadd.f32 %v4503_v28, %v4119_v57  ;;  %8388 = vmatmul.mubr.msk.f32.gmra.mrb[70].mxu1 %vm5236_vm0, %v5206_v30  ;;  %v4951_v25 = vadd.f32 %v4823_v26, %v13980_v7  ;;  %v3608_v29 = vmax.f32 %v3480_v6, 0.0  ;;  %v4760_v51 = vmul.f32 %v10218_v55, %v21200_v0  ;;  %v10222_v55 = vld [vmem:[%s19680_s3 + $0xd58] sm:$0xff] }
 0x556   :  { %v4504_v19 = vmax.f32 %v4376_v10, 0.0  ;;  %v3544_v37 = vadd.f32 %v13980_v7, %v21571_v33  ;;  %v3928_v31 = vadd.f32 %v21572_v16, %v13980_v7  ;;  %v4695_v8 = vadd.f32 %v4567_v36, %v4183_v45  ;;  %v21585_v33 = vld [vmem:[#allocation61_spill] sm:$0xff]  ;;  %v21586_v16 = vld [vmem:[#allocation183_spill] sm:$0xff] }
 0x557   :  { %v5143_v27 = vadd.f32 %v5015_v53, %v4631_v38  ;;  %v5079_v21 = vmax.f32 %v4951_v25, 0.0  ;;  %v21574_v58 = vmax.f32 %v21573_v59, 0.0  ;;  %v4888_v20 = vadd.f32 %v4760_v51, %v13980_v7  ;;  %v21587_v59 = vld [vmem:[#allocation119_spill] sm:$0xff] }
 0x558   :  { %v3672_v47 = vmax.f32 %v3544_v37, 0.0  ;;  %v4056_v54 = vmax.f32 %v3928_v31, 0.0  ;;  %v4440_v46 = vadd.f32 %v21575_v22, %v13980_v7  ;;  %v4824_v39 = vmul.f32 %v10219_v13, %v21200_v0  ;;  %v21589_v22 = vld [vmem:[#allocation311_spill] sm:$0xff]  ;;  %v10223_v13 = vld [vmem:[%s19680_s3 + $0xf58] sm:$0xff] }
 0x559   :  { %v4120_v62 = vadd.f32 %v21574_v58, %v3608_v29  ;;  %8294 = vmatprep.mubr.msk.f32.mxu0 %vm5236_vm0, %v5143_v27  ;;  %v5207_v56 = vadd.f32 %v5079_v21, %v4695_v8  ;;  %v5016_v3 = vmax.f32 %v4888_v20, 0.0  ;;  %v3481_v50 = vadd.f32 %v13980_v7, %v21576_v5  ;;  %v21590_v5 = vld [vmem:[#allocation31_spill] sm:$0xff] }
 0x55a   :  { %v4184_v42 = vadd.f32 %v4056_v54, %v3672_v47  ;;  %v4568_v12 = vmax.f32 %v4440_v46, 0.0  ;;  %v4952_v24 = vadd.f32 %v4824_v39, %v13980_v7  ;;  %v4377_v17 = vadd.f32 %v21577_v23, %v13980_v7  ;;  %v21591_v23 = vld [vmem:[#allocation248_spill] sm:$0xff] }
 0x55b   :  { %v4632_v32 = vadd.f32 %v4504_v19, %v4120_v62  ;;  %8390 = vmatprep.mubr.msk.f32.mxu1 %vm5236_vm0, %v5207_v56  ;;  %v3609_v48 = vmax.f32 %v3481_v50, 0.0  ;;  %v4761_v44 = vmul.f32 %v10220_v15, %v21200_v0  ;;  %v3545_v40 = vadd.f32 %v13980_v7, %v21578_v41  ;;  %v10224_v15 = vld [vmem:[%s19680_s3 + $0xd60] sm:$0xff] }
 0x55c   :  { %v4696_v34 = vadd.f32 %v4568_v12, %v4184_v42  ;;  %v5080_v60 = vmax.f32 %v4952_v24, 0.0  ;;  %v4505_v28 = vmax.f32 %v4377_v17, 0.0  ;;  %v3929_v18 = vadd.f32 %v21579_v43, %v13980_v7  ;;  %v21592_v41 = vld [vmem:[#allocation62_spill] sm:$0xff]  ;;  %v21593_v43 = vld [vmem:[#allocation184_spill] sm:$0xff] }
 0x55d   :  { %v5144_v9 = vadd.f32 %v5016_v3, %v4632_v32  ;;  %v21581_v61 = vmax.f32 %v21580_v35, 0.0  ;;  %v4889_v52 = vadd.f32 %v4761_v44, %v13980_v7  ;;  %v3673_v63 = vmax.f32 %v3545_v40, 0.0  ;;  %v21594_v35 = vld [vmem:[#allocation120_spill] sm:$0xff] }
 0x55e   :  { %v4441_v11 = vadd.f32 %v21582_v2, %v13980_v7  ;;  %v5208_v30 = vadd.f32 %v5080_v60, %v4696_v34  ;;  %v4057_v49 = vmax.f32 %v3929_v18, 0.0  ;;  %v4825_v26 = vmul.f32 %v10221_v14, %v21200_v0  ;;  %v21596_v2 = vld [vmem:[#allocation312_spill] sm:$0xff]  ;;  %v10225_v14 = vld [vmem:[%s19680_s3 + $0xf60] sm:$0xff] }
 0x55f   :  { %8295 = vmatmul.mubr.msk.f32.gmra.mrb[72].mxu0 %vm5236_vm0, %v5144_v9  ;;  %v4121_v57 = vadd.f32 %v21581_v61, %v3609_v48  ;;  %v3482_v6 = vadd.f32 %v13980_v7, %v21583_v4  ;;  %v5017_v53 = vmax.f32 %v4889_v52, 0.0  ;;  %v4378_v10 = vadd.f32 %v21584_v1, %v13980_v7  ;;  %v21597_v4 = vld [vmem:[#allocation32_spill] sm:$0xff]  ;;  %v21598_v1 = vld [vmem:[#allocation249_spill] sm:$0xff] }
 0x560   :  { %v4569_v36 = vmax.f32 %v4441_v11, 0.0  ;;  %8391 = vmatmul.mubr.msk.f32.gmra.mrb[72].mxu1 %vm5236_vm0, %v5208_v30  ;;  %v4185_v45 = vadd.f32 %v4057_v49, %v3673_v63  ;;  %v4953_v25 = vadd.f32 %v4825_v26, %v13980_v7  ;;  %v4762_v51 = vmul.f32 %v10222_v55, %v21200_v0  ;;  %v10226_v55 = vld [vmem:[%s19680_s3 + $0xd68] sm:$0xff] }
 0x561   :  { %v4633_v38 = vadd.f32 %v4505_v28, %v4121_v57  ;;  %v3610_v29 = vmax.f32 %v3482_v6, 0.0  ;;  %v4506_v19 = vmax.f32 %v4378_v10, 0.0  ;;  %v3546_v37 = vadd.f32 %v13980_v7, %v21585_v33  ;;  %v21599_v33 = vld [vmem:[#allocation63_spill] sm:$0xff] }
 0x562   :  { %v3930_v31 = vadd.f32 %v21586_v16, %v13980_v7  ;;  %v4697_v8 = vadd.f32 %v4569_v36, %v4185_v45  ;;  %v5081_v21 = vmax.f32 %v4953_v25, 0.0  ;;  %v21588_v58 = vmax.f32 %v21587_v59, 0.0  ;;  %v21600_v16 = vld [vmem:[#allocation185_spill] sm:$0xff] }
 0x563   :  { %v5145_v27 = vadd.f32 %v5017_v53, %v4633_v38  ;;  %v4890_v20 = vadd.f32 %v4762_v51, %v13980_v7  ;;  %v3674_v47 = vmax.f32 %v3546_v37, 0.0  ;;  %v4442_v46 = vadd.f32 %v21589_v22, %v13980_v7  ;;  %v21601_v59 = vld [vmem:[#allocation121_spill] sm:$0xff] }
 0x564   :  { %v4122_v62 = vadd.f32 %v21588_v58, %v3610_v29  ;;  %v4058_v54 = vmax.f32 %v3930_v31, 0.0  ;;  %v4826_v39 = vmul.f32 %v10223_v13, %v21200_v0  ;;  %v5209_v56 = vadd.f32 %v5081_v21, %v4697_v8  ;;  %v21603_v22 = vld [vmem:[#allocation313_spill] sm:$0xff]  ;;  %v10227_v13 = vld [vmem:[%s19680_s3 + $0xf68] sm:$0xff] }
 0x565   :  { %8297 = vmatprep.mubr.msk.f32.mxu0 %vm5236_vm0, %v5145_v27  ;;  %v5018_v3 = vmax.f32 %v4890_v20, 0.0  ;;  %v3483_v50 = vadd.f32 %v13980_v7, %v21590_v5  ;;  %v4570_v12 = vmax.f32 %v4442_v46, 0.0  ;;  %v4379_v17 = vadd.f32 %v21591_v23, %v13980_v7  ;;  %v21604_v5 = vld [vmem:[#allocation33_spill] sm:$0xff]  ;;  %v21605_v23 = vld [vmem:[#allocation250_spill] sm:$0xff] }
 0x566   :  { %v4634_v32 = vadd.f32 %v4506_v19, %v4122_v62  ;;  %v4186_v42 = vadd.f32 %v4058_v54, %v3674_v47  ;;  %v4954_v24 = vadd.f32 %v4826_v39, %v13980_v7  ;;  %8393 = vmatprep.mubr.msk.f32.mxu1 %vm5236_vm0, %v5209_v56  ;;  %v4763_v44 = vmul.f32 %v10224_v15, %v21200_v0  ;;  %v10228_v15 = vld [vmem:[%s19680_s3 + $0xd70] sm:$0xff] }
 0x567   :  { %v3611_v48 = vmax.f32 %v3483_v50, 0.0  ;;  %v3547_v40 = vadd.f32 %v13980_v7, %v21592_v41  ;;  %v4507_v28 = vmax.f32 %v4379_v17, 0.0  ;;  %v3931_v18 = vadd.f32 %v21593_v43, %v13980_v7  ;;  %v21606_v41 = vld [vmem:[#allocation64_spill] sm:$0xff]  ;;  %v21607_v43 = vld [vmem:[#allocation186_spill] sm:$0xff] }
 0x568   :  { %v5146_v9 = vadd.f32 %v5018_v3, %v4634_v32  ;;  %v4698_v34 = vadd.f32 %v4570_v12, %v4186_v42  ;;  %v5082_v60 = vmax.f32 %v4954_v24, 0.0  ;;  %v21595_v61 = vmax.f32 %v21594_v35, 0.0  ;;  %v21608_v35 = vld [vmem:[#allocation122_spill] sm:$0xff] }
 0x569   :  { %v4891_v52 = vadd.f32 %v4763_v44, %v13980_v7  ;;  %v3675_v63 = vmax.f32 %v3547_v40, 0.0  ;;  %v4443_v11 = vadd.f32 %v21596_v2, %v13980_v7  ;;  %v4059_v49 = vmax.f32 %v3931_v18, 0.0  ;;  %v21610_v2 = vld [vmem:[#allocation314_spill] sm:$0xff] }
 0x56a   :  { %8298 = vmatmul.mubr.msk.f32.gmra.mrb[74].mxu0 %vm5236_vm0, %v5146_v9  ;;  %v4123_v57 = vadd.f32 %v21595_v61, %v3611_v48  ;;  %v5210_v30 = vadd.f32 %v5082_v60, %v4698_v34  ;;  %v4827_v26 = vmul.f32 %v10225_v14, %v21200_v0  ;;  %v3484_v6 = vadd.f32 %v13980_v7, %v21597_v4  ;;  %v10229_v14 = vld [vmem:[%s19680_s3 + $0xf70] sm:$0xff]  ;;  %v21611_v4 = vld [vmem:[#allocation34_spill] sm:$0xff] }
 0x56b   :  { %v5019_v53 = vmax.f32 %v4891_v52, 0.0  ;;  %v4571_v36 = vmax.f32 %v4443_v11, 0.0  ;;  %v4380_v10 = vadd.f32 %v21598_v1, %v13980_v7  ;;  %v4187_v45 = vadd.f32 %v4059_v49, %v3675_v63  ;;  %v21612_v1 = vld [vmem:[#allocation251_spill] sm:$0xff] }
 0x56c   :  { %v4635_v38 = vadd.f32 %v4507_v28, %v4123_v57  ;;  %8394 = vmatmul.mubr.msk.f32.gmra.mrb[74].mxu1 %vm5236_vm0, %v5210_v30  ;;  %v4955_v25 = vadd.f32 %v4827_v26, %v13980_v7  ;;  %v3612_v29 = vmax.f32 %v3484_v6, 0.0  ;;  %v4764_v51 = vmul.f32 %v10226_v55, %v21200_v0  ;;  %v10230_v55 = vld [vmem:[%s19680_s3 + $0xd78] sm:$0xff] }
 0x56d   :  { %v4508_v19 = vmax.f32 %v4380_v10, 0.0  ;;  %v3548_v37 = vadd.f32 %v13980_v7, %v21599_v33  ;;  %v3932_v31 = vadd.f32 %v21600_v16, %v13980_v7  ;;  %v4699_v8 = vadd.f32 %v4571_v36, %v4187_v45  ;;  %v21613_v33 = vld [vmem:[#allocation65_spill] sm:$0xff]  ;;  %v21614_v16 = vld [vmem:[#allocation187_spill] sm:$0xff] }
 0x56e   :  { %v5147_v27 = vadd.f32 %v5019_v53, %v4635_v38  ;;  %v5083_v21 = vmax.f32 %v4955_v25, 0.0  ;;  %v21602_v58 = vmax.f32 %v21601_v59, 0.0  ;;  %v4892_v20 = vadd.f32 %v4764_v51, %v13980_v7  ;;  %v21615_v59 = vld [vmem:[#allocation123_spill] sm:$0xff] }
 0x56f   :  { %v3676_v47 = vmax.f32 %v3548_v37, 0.0  ;;  %v4060_v54 = vmax.f32 %v3932_v31, 0.0  ;;  %v4444_v46 = vadd.f32 %v21603_v22, %v13980_v7  ;;  %v4828_v39 = vmul.f32 %v10227_v13, %v21200_v0  ;;  %v21617_v22 = vld [vmem:[#allocation315_spill] sm:$0xff]  ;;  %v10231_v13 = vld [vmem:[%s19680_s3 + $0xf78] sm:$0xff] }
 0x570   :  { %v4124_v62 = vadd.f32 %v21602_v58, %v3612_v29  ;;  %8300 = vmatprep.mubr.msk.f32.mxu0 %vm5236_vm0, %v5147_v27  ;;  %v5211_v56 = vadd.f32 %v5083_v21, %v4699_v8  ;;  %v5020_v3 = vmax.f32 %v4892_v20, 0.0  ;;  %v3485_v50 = vadd.f32 %v13980_v7, %v21604_v5  ;;  %v21618_v5 = vld [vmem:[#allocation415_spill] sm:$0xff] }
 0x571   :  { %v4188_v42 = vadd.f32 %v4060_v54, %v3676_v47  ;;  %v4572_v12 = vmax.f32 %v4444_v46, 0.0  ;;  %v4956_v24 = vadd.f32 %v4828_v39, %v13980_v7  ;;  %v4381_v17 = vadd.f32 %v21605_v23, %v13980_v7 }
 0x572   :  { %v4636_v32 = vadd.f32 %v4508_v19, %v4124_v62  ;;  %8396 = vmatprep.mubr.msk.f32.mxu1 %vm5236_vm0, %v5211_v56  ;;  %v3613_v48 = vmax.f32 %v3485_v50, 0.0  ;;  %v4765_v44 = vmul.f32 %v10228_v15, %v21200_v0  ;;  %v3549_v40 = vadd.f32 %v13980_v7, %v21606_v41  ;;  %v21623_v41 = vld [vmem:[#allocation205_spill] sm:$0xff] }
 0x573   :  { %v4700_v34 = vadd.f32 %v4572_v12, %v4188_v42  ;;  %v5084_v60 = vmax.f32 %v4956_v24, 0.0  ;;  %v4509_v28 = vmax.f32 %v4381_v17, 0.0  ;;  %v3933_v18 = vadd.f32 %v21607_v43, %v13980_v7  ;;  %v21620_v42 = vld [vmem:[#allocation124_spill] sm:$0xff] }
 0x574   :  { %v5148_v9 = vadd.f32 %v5020_v3, %v4636_v32  ;;  %v21609_v61 = vmax.f32 %v21608_v35, 0.0  ;;  %v4893_v52 = vadd.f32 %v4765_v44, %v13980_v7  ;;  %v3677_v63 = vmax.f32 %v3549_v40, 0.0  ;;  %v21629_v35 = vld [vmem:[#allocation382_spill] sm:$0xff] }
 0x575   :  { %v4445_v11 = vadd.f32 %v21610_v2, %v13980_v7  ;;  %v5212_v30 = vadd.f32 %v5084_v60, %v4700_v34  ;;  %v4061_v49 = vmax.f32 %v3933_v18, 0.0  ;;  %v4829_v26 = vmul.f32 %v10229_v14, %v21200_v0  ;;  %v21625_v34 = vld [vmem:[#allocation448_spill] sm:$0xff] }
 0x576   :  { %8301 = vmatmul.mubr.msk.f32.gmra.mrb[76].mxu0 %vm5236_vm0, %v5148_v9  ;;  %v4125_v57 = vadd.f32 %v21609_v61, %v3613_v48  ;;  %v3486_v6 = vadd.f32 %v13980_v7, %v21611_v4  ;;  %v5021_v53 = vmax.f32 %v4893_v52, 0.0  ;;  %v4382_v10 = vadd.f32 %v21612_v1, %v13980_v7  ;;  %v21622_v48 = vld [vmem:[#allocation349_spill] sm:$0xff]  ;;  %v21630_v2 = vld [vmem:[#allocation416_spill] sm:$0xff] }
 0x577   :  { %v4573_v36 = vmax.f32 %v4445_v11, 0.0  ;;  %8397 = vmatmul.mubr.msk.f32.gmra.mrb[76].mxu1 %vm5236_vm0, %v5212_v30  ;;  %v4189_v45 = vadd.f32 %v4061_v49, %v3677_v63  ;;  %v4957_v25 = vadd.f32 %v4829_v26, %v13980_v7  ;;  %v4766_v51 = vmul.f32 %v10230_v55, %v21200_v0  ;;  %v21632_v30 = vld [vmem:[#allocation125_spill] sm:$0xff]  ;;  %v21634_v26 = vld [vmem:[#allocation235_spill] sm:$0xff] }
 0x578   :  { %v4637_v38 = vadd.f32 %v4509_v28, %v4125_v57  ;;  %v3614_v29 = vmax.f32 %v3486_v6, 0.0  ;;  %v4510_v19 = vmax.f32 %v4382_v10, 0.0  ;;  %v3550_v37 = vadd.f32 %v13980_v7, %v21613_v33  ;;  %v21627_v28 = vld [vmem:[#allocation188_spill] sm:$0xff]  ;;  %v21637_v1 = vld [vmem:[#allocation449_spill] sm:$0xff] }
 0x579   :  { %v3934_v31 = vadd.f32 %v21614_v16, %v13980_v7  ;;  %v4701_v8 = vadd.f32 %v4573_v36, %v4189_v45  ;;  %v5085_v21 = vmax.f32 %v4957_v25, 0.0  ;;  %v21616_v58 = vmax.f32 %v21615_v59, 0.0  ;;  %v21639_v45 = vld [vmem:[#allocation189_spill] sm:$0xff] }
 0x57a   :  { %v5149_v27 = vadd.f32 %v5021_v53, %v4637_v38  ;;  %v4894_v20 = vadd.f32 %v4766_v51, %v13980_v7  ;;  %v3678_v47 = vmax.f32 %v3550_v37, 0.0  ;;  %v4446_v46 = vadd.f32 %v21617_v22, %v13980_v7  ;;  %v21636_v53 = vld [vmem:[#allocation350_spill] sm:$0xff]  ;;  %v21643_v37 = vld [vmem:[#allocation383_spill] sm:$0xff] }
 0x57b   :  { %v4126_v62 = vadd.f32 %v21616_v58, %v3614_v29  ;;  %v4062_v54 = vmax.f32 %v3934_v31, 0.0  ;;  %v4830_v39 = vmul.f32 %v10231_v13, %v21200_v0  ;;  %v5213_v56 = vadd.f32 %v5085_v21, %v4701_v8  ;;  %v21644_v21 = vld [vmem:[#allocation252_spill] sm:$0xff]  ;;  %v21650_v13 = vld [vmem:[#allocation351_spill] sm:$0xff] }
 0x57c   :  { %8303 = vmatprep.mubr.msk.f32.mxu0 %vm5236_vm0, %v5149_v27  ;;  %v5022_v3 = vmax.f32 %v4894_v20, 0.0  ;;  %v21619_v50 = vmax.f32 %v21618_v5, 0.0  ;;  %v21621_v12 = vmax.f32 %v21620_v42, 0.0  ;;  %v4574_v17 = vmax.f32 %v4446_v46, 0.0  ;;  %v21641_v27 = vld [vmem:[#allocation220_spill] sm:$0xff] }
 0x57d   :  { %v4638_v32 = vadd.f32 %v4510_v19, %v4126_v62  ;;  %v4190_v23 = vadd.f32 %v4062_v54, %v3678_v47  ;;  %v4958_v9 = vadd.f32 %v4830_v39, %v13980_v7  ;;  %v4895_v15 = vadd.f32 %v21622_v48, %v13980_v7  ;;  %8399 = vmatprep.mubr.msk.f32.mxu1 %vm5236_vm0, %v5213_v56  ;;  %v21646_v62 = vld [vmem:[#allocation417_spill] sm:$0xff]  ;;  %v21648_v47 = vld [vmem:[#allocation126_spill] sm:$0xff]  ;;  %v21655_v42 = vld [vmem:[#allocation384_spill] sm:$0xff] }
 0x57e   :  { %v4127_v24 = vadd.f32 %v21621_v12, %v21619_v50  ;;  %v21624_v0 = vmax.f32 %v21623_v41, 0.0  ;;  %v21626_v60 = vmax.f32 %v21625_v34, 0.0  ;;  %v21628_v43 = vmax.f32 %v21627_v28, 0.0  ;;  %v21651_v56 = vld [vmem:[#allocation450_spill] sm:$0xff] }
 0x57f   :  { %v5150_v44 = vadd.f32 %v5022_v3, %v4638_v32  ;;  %v4959_v61 = vadd.f32 %v21629_v35, %v13980_v7  ;;  %v4702_v57 = vadd.f32 %v4574_v17, %v4190_v23  ;;  %v5086_v52 = vmax.f32 %v4958_v9, 0.0  ;;  %v21653_v3 = vld [vmem:[#allocation190_spill] sm:$0xff]  ;;  %v21656_v23 = vld [vmem:[#allocation221_spill] sm:$0xff] }
 0x580   :  { %v4639_v40 = vadd.f32 %v21624_v0, %v4127_v24  ;;  %v4191_v18 = vadd.f32 %v21628_v43, %v21626_v60  ;;  %v5023_v63 = vmax.f32 %v4895_v15, 0.0  ;;  %v21631_v11 = vmax.f32 %v21630_v2, 0.0  ;;  %v21658_v48 = vld [vmem:[#allocation418_spill] sm:$0xff]  ;;  %v21663_v43 = vld [vmem:[#allocation253_spill] sm:$0xff] }
 0x581   :  { %v21633_v49 = vmax.f32 %v21632_v30, 0.0  ;;  %8304 = vmatmul.mubr.msk.f32.gmra.mrb[78].mxu0 %vm5236_vm0, %v5150_v44  ;;  %v21635_v4 = vmax.f32 %v21634_v26, 0.0  ;;  %v5087_v38 = vmax.f32 %v4959_v61, 0.0  ;;  %v4896_v36 = vadd.f32 %v21636_v53, %v13980_v7  ;;  %v21660_v44 = vld [vmem:[#allocation127_spill] sm:$0xff] }
 0x582   :  { %v21638_v10 = vmax.f32 %v21637_v1, 0.0  ;;  %v21640_v25 = vmax.f32 %v21639_v45, 0.0  ;;  %v5214_v55 = vadd.f32 %v5086_v52, %v4702_v57  ;;  %v5151_v51 = vadd.f32 %v5023_v63, %v4639_v40  ;;  %v21662_v40 = vld [vmem:[#allocation352_spill] sm:$0xff]  ;;  %v21665_v57 = vld [vmem:[#allocation222_spill] sm:$0xff] }
 0x583   :  { %v4128_v14 = vadd.f32 %v21633_v49, %v21631_v11  ;;  %v4703_v6 = vadd.f32 %v21635_v4, %v4191_v18  ;;  %v21642_v19 = vmax.f32 %v21641_v27, 0.0  ;;  %v4960_v16 = vadd.f32 %v21643_v37, %v13980_v7  ;;  %v21667_v11 = vld [vmem:[#allocation451_spill] sm:$0xff]  ;;  %v21671_v4 = vld [vmem:[#allocation385_spill] sm:$0xff]  ;;  %v21677_v27 = vld [vmem:[#allocation254_spill] sm:$0xff] }
 0x584   :  { %v4192_v29 = vadd.f32 %v21640_v25, %v21638_v10  ;;  %v5024_v8 = vmax.f32 %v4896_v36, 0.0  ;;  %v21645_v59 = vmax.f32 %v21644_v21, 0.0  ;;  %v21647_v20 = vmax.f32 %v21646_v62, 0.0  ;;  %8400 = vmatmul.mubr.msk.f32.gmra.mrb[78].mxu1 %vm5236_vm0, %v5214_v55  ;;  %8306 = vmatprep.mubr.msk.f32.mxu0 %vm5236_vm0, %v5151_v51  ;;  %v21669_v49 = vld [vmem:[#allocation191_spill] sm:$0xff]  ;;  %v21674_v10 = vld [vmem:[#allocation128_spill] sm:$0xff] }
 0x585   :  { %v4640_v33 = vadd.f32 %v21642_v19, %v4128_v14  ;;  %v5215_v31 = vadd.f32 %v5087_v38, %v4703_v6  ;;  %v21649_v54 = vmax.f32 %v21648_v47, 0.0  ;;  %v5088_v46 = vmax.f32 %v4960_v16, 0.0  ;;  %v21672_v36 = vld [vmem:[#allocation419_spill] sm:$0xff]  ;;  %v21679_v16 = vld [vmem:[#allocation452_spill] sm:$0xff] }
 0x586   :  { %v4704_v58 = vadd.f32 %v21645_v59, %v4192_v29  ;;  %v4897_v39 = vadd.f32 %v21650_v13, %v13980_v7  ;;  %v21652_v32 = vmax.f32 %v21651_v56, 0.0  ;;  %v21654_v5 = vmax.f32 %v21653_v3, 0.0  ;;  %v21676_v29 = vld [vmem:[#allocation353_spill] sm:$0xff]  ;;  %v21683_v62 = vld [vmem:[#allocation223_spill] sm:$0xff]  ;;  %v21686_v13 = vld [vmem:[#allocation420_spill] sm:$0xff] }
 0x587   :  { %v4129_v22 = vadd.f32 %v21649_v54, %v21647_v20  ;;  %v4961_v12 = vadd.f32 %v21655_v42, %v13980_v7  ;;  %8402 = vmatprep.mubr.msk.f32.mxu1 %vm5236_vm0, %v5215_v31  ;;  %v5152_v24 = vadd.f32 %v5024_v8, %v4640_v33  ;;  %v21657_v17 = vmax.f32 %v21656_v23, 0.0  ;;  %v21681_v8 = vld [vmem:[#allocation192_spill] sm:$0xff]  ;;  %v21688_v56 = vld [vmem:[#allocation129_spill] sm:$0xff] }
 0x588   :  { %v4193_v50 = vadd.f32 %v21654_v5, %v21652_v32  ;;  %v21659_v15 = vmax.f32 %v21658_v48, 0.0  ;;  %v21661_v41 = vmax.f32 %v21660_v44, 0.0  ;;  %v4898_v34 = vadd.f32 %v21662_v40, %v13980_v7  ;;  %v18946_v5 = vpop.f32.mrb[32].mxu1  ;;  %v21693_v48 = vld [vmem:[#allocation66_spill] sm:$0xff]  ;;  %v21695_v44 = vld [vmem:[#allocation193_spill] sm:$0xff] }
 0x589   :  { %v4641_v9 = vadd.f32 %v21657_v17, %v4129_v22  ;;  %v5216_v60 = vadd.f32 %v5088_v46, %v4704_v58  ;;  %v5025_v28 = vmax.f32 %v4897_v39, 0.0  ;;  %v21664_v18 = vmax.f32 %v21663_v43, 0.0  ;;  %8307 = vmatmul.mubr.msk.f32.gmra.mrb[80].mxu0 %vm5236_vm0, %v5152_v24  ;;  %v18934_v58 = vpop.f32.mrb[32].mxu0  ;;  %v21685_v22 = vld [vmem:[#allocation386_spill] sm:$0xff]  ;;  %v18959_v40 = vpop.f32.mrb[33].mxu1  ;;  %6392 = vst.msk [vmem:[%s19684_s4 + $0x208] sm:$0xff] %vm6326_vm1, %v18946_v5 }
 0x58a   :  { %v4130_v0 = vadd.f32 %v21661_v41, %v21659_v15  ;;  %v5089_v61 = vmax.f32 %v4961_v12, 0.0  ;;  %v21666_v52 = vmax.f32 %v21665_v57, 0.0  ;;  %v5026_v2 = vmax.f32 %v4898_v34, 0.0  ;;  %v21690_v12 = vld [vmem:[#allocation255_spill] sm:$0xff]  ;;  %v21692_v17 = vld [vmem:[#allocation354_spill] sm:$0xff]  ;;  %6328 = vst.msk [vmem:[%s19684_s4 + $0x8] sm:$0xff] %vm6326_vm1, %v18934_v58 }
 0x58b   :  { %v4705_v35 = vadd.f32 %v21664_v18, %v4193_v50  ;;  %v21668_v30 = vmax.f32 %v21667_v11, 0.0  ;;  %v21670_v14 = vmax.f32 %v21669_v49, 0.0  ;;  %v4962_v6 = vadd.f32 %v21671_v4, %v13980_v7  ;;  %8403 = vmatmul.mubr.msk.f32.gmra.mrb[80].mxu1 %vm5236_vm0, %v5216_v60  ;;  %v18948_v50 = vpop.f32.mrb[33].mxu0  ;;  %v21702_v11 = vld [vmem:[#allocation421_spill] sm:$0xff]  ;;  %v21704_v49 = vld [vmem:[#allocation130_spill] sm:$0xff]  ;;  %v21706_v4 = vld [vmem:[#allocation355_spill] sm:$0xff] }
 0x58c   :  { %v4642_v63 = vadd.f32 %v21666_v52, %v4130_v0  ;;  %v5153_v38 = vadd.f32 %v5025_v28, %v4641_v9  ;;  %v21673_v1 = vmax.f32 %v21672_v36, 0.0  ;;  %v21675_v45 = vmax.f32 %v21674_v10, 0.0  ;;  %v21697_v28 = vld [vmem:[#allocation224_spill] sm:$0xff]  ;;  %v21707_v36 = vld [vmem:[#allocation67_spill] sm:$0xff]  ;;  %v21709_v10 = vld [vmem:[#allocation194_spill] sm:$0xff]  ;;  %6327 = vst.msk [vmem:[%s19684_s4] sm:$0xff] %vm6326_vm1, %v18948_v50 }
 0x58d   :  { %v4194_v26 = vadd.f32 %v21670_v14, %v21668_v30  ;;  %v5217_v53 = vadd.f32 %v5089_v61, %v4705_v35  ;;  %v4899_v55 = vadd.f32 %v21676_v29, %v13980_v7  ;;  %v21678_v19 = vmax.f32 %v21677_v27, 0.0  ;;  %v21699_v35 = vld [vmem:[#allocation387_spill] sm:$0xff]  ;;  %v21700_v52 = vld [vmem:[#allocation256_spill] sm:$0xff]  ;;  %v21712_v27 = vld [vmem:[#allocation225_spill] sm:$0xff]  ;;  %6391 = vst.msk [vmem:[%s19684_s4 + $0x200] sm:$0xff] %vm6326_vm1, %v18959_v40 }
 0x58e   :  { %v4131_v25 = vadd.f32 %v21675_v45, %v21673_v1  ;;  %v5154_v51 = vadd.f32 %v5026_v2, %v4642_v63  ;;  %v5090_v37 = vmax.f32 %v4962_v6, 0.0  ;;  %v21680_v31 = vmax.f32 %v21679_v16, 0.0  ;;  %8309 = vmatprep.mubr.msk.f32.mxu0 %vm5236_vm0, %v5153_v38  ;;  %v21711_v29 = vld [vmem:[#allocation388_spill] sm:$0xff]  ;;  %v21714_v16 = vld [vmem:[#allocation422_spill] sm:$0xff] }
 0x58f   :  { %v4706_v33 = vadd.f32 %v21678_v19, %v4194_v26  ;;  %v21682_v21 = vmax.f32 %v21681_v8, 0.0  ;;  %8405 = vmatprep.mubr.msk.f32.mxu1 %vm5236_vm0, %v5217_v53  ;;  %v21684_v20 = vmax.f32 %v21683_v62, 0.0  ;;  %v5027_v54 = vmax.f32 %v4899_v55, 0.0  ;;  %v21716_v8 = vld [vmem:[#allocation131_spill] sm:$0xff] }
 0x590   :  { %v4963_v46 = vadd.f32 %v21685_v22, %v13980_v7  ;;  %v21687_v39 = vmax.f32 %v21686_v13, 0.0  ;;  %v21689_v32 = vmax.f32 %v21688_v56, 0.0  ;;  %8310 = vmatmul.mubr.msk.f32.gmra.mrb[82].mxu0 %vm5236_vm0, %v5154_v51  ;;  %v21691_v24 = vmax.f32 %v21690_v12, 0.0  ;;  %v21721_v56 = vld [vmem:[#allocation226_spill] sm:$0xff] }
 0x591   :  { %v4195_v59 = vadd.f32 %v21682_v21, %v21680_v31  ;;  %v4643_v47 = vadd.f32 %v21684_v20, %v4131_v25  ;;  %v5218_v42 = vadd.f32 %v5090_v37, %v4706_v33  ;;  %v4900_v9 = vadd.f32 %v21692_v17, %v13980_v7  ;;  %v21718_v20 = vld [vmem:[#allocation257_spill] sm:$0xff] }
 0x592   :  { %v4132_v3 = vadd.f32 %v21689_v32, %v21687_v39  ;;  %v21694_v15 = vmax.f32 %v21693_v48, 0.0  ;;  %v21696_v41 = vmax.f32 %v21695_v44, 0.0  ;;  %v5091_v60 = vmax.f32 %v4963_v46, 0.0  ;;  %v21720_v46 = vld [vmem:[#allocation356_spill] sm:$0xff] }
 0x593   :  { %v4707_v23 = vadd.f32 %v21691_v24, %v4195_v59  ;;  %v5155_v34 = vadd.f32 %v5027_v54, %v4643_v47  ;;  %v21698_v43 = vmax.f32 %v21697_v28, 0.0  ;;  %v4964_v61 = vadd.f32 %v21699_v35, %v13980_v7  ;;  %8406 = vmatmul.mubr.msk.f32.gmra.mrb[82].mxu1 %vm5236_vm0, %v5218_v42  ;;  %v21723_v42 = vld [vmem:[#allocation68_spill] sm:$0xff]  ;;  %v21725_v24 = vld [vmem:[#allocation195_spill] sm:$0xff]  ;;  %v19008_v35 = vpop.f32.mrb[34].mxu0 }
 0x594   :  { %v4196_v0 = vadd.f32 %v21696_v41, %v21694_v15  ;;  %v5028_v57 = vmax.f32 %v4900_v9, 0.0  ;;  %v21701_v63 = vmax.f32 %v21700_v52, 0.0  ;;  %v21703_v30 = vmax.f32 %v21702_v11, 0.0  ;;  %v21727_v9 = vld [vmem:[#allocation389_spill] sm:$0xff]  ;;  %v21728_v41 = vld [vmem:[#allocation423_spill] sm:$0xff]  ;;  %6330 = vst.msk [vmem:[%s19684_s4 + $0x18] sm:$0xff] %vm6326_vm1, %v19008_v35 }
 0x595   :  { %v4644_v18 = vadd.f32 %v21698_v43, %v4132_v3  ;;  %v21705_v14 = vmax.f32 %v21704_v49, 0.0  ;;  %v4901_v6 = vadd.f32 %v21706_v4, %v13980_v7  ;;  %8312 = vmatprep.mubr.msk.f32.mxu0 %vm5236_vm0, %v5155_v34  ;;  %v5219_v38 = vadd.f32 %v5091_v60, %v4707_v23  ;;  %v21730_v34 = vld [vmem:[#allocation132_spill] sm:$0xff]  ;;  %v21732_v43 = vld [vmem:[#allocation357_spill] sm:$0xff] }
 0x596   :  { %v4708_v2 = vadd.f32 %v21701_v63, %v4196_v0  ;;  %v5092_v53 = vmax.f32 %v4964_v61, 0.0  ;;  %v21708_v1 = vmax.f32 %v21707_v36, 0.0  ;;  %v21710_v45 = vmax.f32 %v21709_v10, 0.0  ;;  %v21733_v61 = vld [vmem:[#allocation258_spill] sm:$0xff] }
 0x597   :  { %v4133_v26 = vadd.f32 %v21705_v14, %v21703_v30  ;;  %v4965_v55 = vadd.f32 %v21711_v29, %v13980_v7  ;;  %v5156_v51 = vadd.f32 %v5028_v57, %v4644_v18  ;;  %v21713_v19 = vmax.f32 %v21712_v27, 0.0  ;;  %8408 = vmatprep.mubr.msk.f32.mxu1 %vm5236_vm0, %v5219_v38  ;;  %v21737_v30 = vld [vmem:[#allocation196_spill] sm:$0xff]  ;;  %v21744_v29 = vld [vmem:[#allocation133_spill] sm:$0xff] }
 0x598   :  { %v4197_v25 = vadd.f32 %v21710_v45, %v21708_v1  ;;  %v5029_v37 = vmax.f32 %v4901_v6, 0.0  ;;  %v21715_v31 = vmax.f32 %v21714_v16, 0.0  ;;  %v21717_v21 = vmax.f32 %v21716_v8, 0.0  ;;  %v19019_v6 = vpop.f32.mrb[35].mxu0  ;;  %v21742_v45 = vld [vmem:[#allocation424_spill] sm:$0xff] }
 0x599   :  { %v4645_v33 = vadd.f32 %v21713_v19, %v4133_v26  ;;  %v5220_v62 = vadd.f32 %v5092_v53, %v4708_v2  ;;  %v21719_v47 = vmax.f32 %v21718_v20, 0.0  ;;  %v5093_v22 = vmax.f32 %v4965_v55, 0.0  ;;  %8313 = vmatmul.mubr.msk.f32.gmra.mrb[84].mxu0 %vm5236_vm0, %v5156_v51  ;;  %v21735_v2 = vld [vmem:[#allocation69_spill] sm:$0xff]  ;;  %v21739_v26 = vld [vmem:[#allocation390_spill] sm:$0xff]  ;;  %v21740_v53 = vld [vmem:[#allocation227_spill] sm:$0xff]  ;;  %6329 = vst.msk [vmem:[%s19684_s4 + $0x10] sm:$0xff] %vm6326_vm1, %v19019_v6 }
 0x59a   :  { %v4134_v59 = vadd.f32 %v21717_v21, %v21715_v31  ;;  %v4902_v13 = vadd.f32 %v21720_v46, %v13980_v7  ;;  %v21722_v32 = vmax.f32 %v21721_v56, 0.0  ;;  %v21724_v12 = vmax.f32 %v21723_v42, 0.0  ;;  %v21746_v19 = vld [vmem:[#allocation259_spill] sm:$0xff]  ;;  %v21748_v31 = vld [vmem:[#allocation358_spill] sm:$0xff]  ;;  %v19032_v21 = vpop.f32.mrb[34].mxu1  ;;  %v21753_v46 = vld [vmem:[#allocation197_spill] sm:$0xff] }
 0x59b   :  { %v4709_v54 = vadd.f32 %v21719_v47, %v4197_v25  ;;  %v5157_v39 = vadd.f32 %v5029_v37, %v4645_v33  ;;  %v21726_v23 = vmax.f32 %v21725_v24, 0.0  ;;  %v4966_v48 = vadd.f32 %v21727_v9, %v13980_v7  ;;  %8409 = vmatmul.mubr.msk.f32.gmra.mrb[84].mxu1 %vm5236_vm0, %v5220_v62  ;;  %v21749_v62 = vld [vmem:[#allocation228_spill] sm:$0xff]  ;;  %v21755_v56 = vld [vmem:[#allocation391_spill] sm:$0xff]  ;;  %v21756_v24 = vld [vmem:[#allocation425_spill] sm:$0xff]  ;;  %6394 = vst.msk [vmem:[%s19684_s4 + $0x218] sm:$0xff] %vm6326_vm1, %v19032_v21 }
 0x59c   :  { %v4646_v3 = vadd.f32 %v21722_v32, %v4134_v59  ;;  %v5030_v44 = vmax.f32 %v4902_v13, 0.0  ;;  %v21729_v0 = vmax.f32 %v21728_v41, 0.0  ;;  %v21731_v60 = vmax.f32 %v21730_v34, 0.0  ;;  %v21761_v41 = vld [vmem:[#allocation260_spill] sm:$0xff] }
 0x59d   :  { %v4198_v17 = vadd.f32 %v21726_v23, %v21724_v12  ;;  %v5221_v15 = vadd.f32 %v5093_v22, %v4709_v54  ;;  %v4903_v18 = vadd.f32 %v21732_v43, %v13980_v7  ;;  %8315 = vmatprep.mubr.msk.f32.mxu0 %vm5236_vm0, %v5157_v39  ;;  %v21734_v57 = vmax.f32 %v21733_v61, 0.0  ;;  %v21751_v54 = vld [vmem:[#allocation70_spill] sm:$0xff] }
 0x59e   :  { %v4135_v28 = vadd.f32 %v21731_v60, %v21729_v0  ;;  %v5094_v63 = vmax.f32 %v4966_v48, 0.0  ;;  %v21736_v11 = vmax.f32 %v21735_v2, 0.0  ;;  %v21738_v49 = vmax.f32 %v21737_v30, 0.0 }
 0x59f   :  { %v4710_v52 = vadd.f32 %v21734_v57, %v4198_v17  ;;  %v4967_v4 = vadd.f32 %v21739_v26, %v13980_v7  ;;  %8411 = vmatprep.mubr.msk.f32.mxu1 %vm5236_vm0, %v5221_v15  ;;  %v5158_v38 = vadd.f32 %v5030_v44, %v4646_v3  ;;  %v21741_v36 = vmax.f32 %v21740_v53, 0.0  ;;  %v19043_v3 = vpop.f32.mrb[35].mxu1  ;;  %v21758_v17 = vld [vmem:[#allocation134_spill] sm:$0xff]  ;;  %v21760_v15 = vld [vmem:[#allocation359_spill] sm:$0xff] }
 0x5a0   :  { %v4199_v14 = vadd.f32 %v21738_v49, %v21736_v11  ;;  %v5031_v10 = vmax.f32 %v4903_v18, 0.0  ;;  %v21743_v25 = vmax.f32 %v21742_v45, 0.0  ;;  %v21745_v55 = vmax.f32 %v21744_v29, 0.0  ;;  %v21765_v18 = vld [vmem:[#allocation198_spill] sm:$0xff]  ;;  %v21768_v11 = vld [vmem:[#allocation229_spill] sm:$0xff]  ;;  %6393 = vst.msk [vmem:[%s19684_s4 + $0x210] sm:$0xff] %vm6326_vm1, %v19043_v3 }
 0x5a1   :  { %v4647_v1 = vadd.f32 %v21741_v36, %v4135_v28  ;;  %v5222_v27 = vadd.f32 %v5094_v63, %v4710_v52  ;;  %v21747_v33 = vmax.f32 %v21746_v19, 0.0  ;;  %v5095_v16 = vmax.f32 %v4967_v4, 0.0  ;;  %8316 = vmatmul.mubr.msk.f32.gmra.mrb[86].mxu0 %vm5236_vm0, %v5158_v38  ;;  %v21763_v28 = vld [vmem:[#allocation71_spill] sm:$0xff]  ;;  %v21767_v52 = vld [vmem:[#allocation392_spill] sm:$0xff]  ;;  %v21770_v26 = vld [vmem:[#allocation426_spill] sm:$0xff] }
 0x5a2   :  { %v4136_v51 = vadd.f32 %v21745_v55, %v21743_v25  ;;  %v4904_v8 = vadd.f32 %v21748_v31, %v13980_v7  ;;  %v21750_v20 = vmax.f32 %v21749_v62, 0.0  ;;  %v21752_v22 = vmax.f32 %v21751_v54, 0.0  ;;  %v21772_v38 = vld [vmem:[#allocation135_spill] sm:$0xff]  ;;  %v21776_v55 = vld [vmem:[#allocation360_spill] sm:$0xff]  ;;  %v21777_v19 = vld [vmem:[#allocation230_spill] sm:$0xff] }
 0x5a3   :  { %v4711_v37 = vadd.f32 %v21747_v33, %v4199_v14  ;;  %v5159_v59 = vadd.f32 %v5031_v10, %v4647_v1  ;;  %v21754_v13 = vmax.f32 %v21753_v46, 0.0  ;;  %v4968_v32 = vadd.f32 %v21755_v56, %v13980_v7  ;;  %8412 = vmatmul.mubr.msk.f32.gmra.mrb[86].mxu1 %vm5236_vm0, %v5222_v27  ;;  %v21774_v10 = vld [vmem:[#allocation261_spill] sm:$0xff]  ;;  %v21784_v46 = vld [vmem:[#allocation427_spill] sm:$0xff] }
 0x5a4   :  { %v4648_v47 = vadd.f32 %v21750_v20, %v4136_v51  ;;  %v5032_v12 = vmax.f32 %v4904_v8, 0.0  ;;  %v21757_v23 = vmax.f32 %v21756_v24, 0.0  ;;  %v21759_v9 = vmax.f32 %v21758_v17, 0.0  ;;  %v21781_v8 = vld [vmem:[#allocation199_spill] sm:$0xff]  ;;  %v21783_v20 = vld [vmem:[#allocation393_spill] sm:$0xff]  ;;  %v21789_v24 = vld [vmem:[#allocation262_spill] sm:$0xff] }
 0x5a5   :  { %v4200_v39 = vadd.f32 %v21754_v13, %v21752_v22  ;;  %v5223_v42 = vadd.f32 %v5095_v16, %v4711_v37  ;;  %v4905_v44 = vadd.f32 %v21760_v15, %v13980_v7  ;;  %8318 = vmatprep.mubr.msk.f32.mxu0 %vm5236_vm0, %v5159_v59  ;;  %v21762_v0 = vmax.f32 %v21761_v41, 0.0  ;;  %v21779_v16 = vld [vmem:[#allocation72_spill] sm:$0xff] }
 0x5a6   :  { %v4137_v48 = vadd.f32 %v21759_v9, %v21757_v23  ;;  %v5096_v60 = vmax.f32 %v4968_v32, 0.0  ;;  %v21764_v43 = vmax.f32 %v21763_v28, 0.0  ;;  %v21766_v61 = vmax.f32 %v21765_v18, 0.0  ;;  %v8242_v28 = vpop.f32.mrb[36].mxu0  ;;  %v21796_v18 = vld [vmem:[#allocation231_spill] sm:$0xff] }
 0x5a7   :  { %v4712_v34 = vadd.f32 %v21762_v0, %v4200_v39  ;;  %v4969_v63 = vadd.f32 %v21767_v52, %v13980_v7  ;;  %8414 = vmatprep.mubr.msk.f32.mxu1 %vm5236_vm0, %v5223_v42  ;;  %v5160_v2 = vadd.f32 %v5032_v12, %v4648_v47  ;;  %v21769_v30 = vmax.f32 %v21768_v11, 0.0  ;;  %v21786_v39 = vld [vmem:[#allocation136_spill] sm:$0xff]  ;;  %v21788_v42 = vld [vmem:[#allocation361_spill] sm:$0xff]  ;;  %6332 = vst.msk [vmem:[%s19684_s4 + $0x28] sm:$0xff] %vm6326_vm1, %v8242_v28 }
 0x5a8   :  { %v4201_v57 = vadd.f32 %v21766_v61, %v21764_v43  ;;  %v5033_v14 = vmax.f32 %v4905_v44, 0.0  ;;  %v21771_v4 = vmax.f32 %v21770_v26, 0.0  ;;  %v21773_v53 = vmax.f32 %v21772_v38, 0.0  ;;  %v21793_v44 = vld [vmem:[#allocation200_spill] sm:$0xff]  ;;  %v21800_v11 = vld [vmem:[#allocation137_spill] sm:$0xff] }
 0x5a9   :  { %v4649_v49 = vadd.f32 %v21769_v30, %v4137_v48  ;;  %v5224_v1 = vadd.f32 %v5096_v60, %v4712_v34  ;;  %v21775_v45 = vmax.f32 %v21774_v10, 0.0  ;;  %v5097_v29 = vmax.f32 %v4969_v63, 0.0  ;;  %8319 = vmatmul.mubr.msk.f32.gmra.mrb[88].mxu0 %vm5236_vm0, %v5160_v2  ;;  %v21791_v48 = vld [vmem:[#allocation73_spill] sm:$0xff]  ;;  %v21795_v34 = vld [vmem:[#allocation394_spill] sm:$0xff]  ;;  %v21798_v63 = vld [vmem:[#allocation428_spill] sm:$0xff] }
 0x5aa   :  { %v4138_v36 = vadd.f32 %v21773_v53, %v21771_v4  ;;  %v4906_v51 = vadd.f32 %v21776_v55, %v13980_v7  ;;  %v21778_v33 = vmax.f32 %v21777_v19, 0.0  ;;  %v21780_v31 = vmax.f32 %v21779_v16, 0.0  ;;  %v21802_v4 = vld [vmem:[#allocation263_spill] sm:$0xff]  ;;  %v21809_v19 = vld [vmem:[#allocation201_spill] sm:$0xff] }
 0x5ab   :  { %v4713_v25 = vadd.f32 %v21775_v45, %v4201_v57  ;;  %v5161_v27 = vadd.f32 %v5033_v14, %v4649_v49  ;;  %v21782_v59 = vmax.f32 %v21781_v8, 0.0  ;;  %v4970_v47 = vadd.f32 %v21783_v20, %v13980_v7  ;;  %8415 = vmatmul.mubr.msk.f32.gmra.mrb[88].mxu1 %vm5236_vm0, %v5224_v1  ;;  %v5707_v14 = vpop.f32.mrb[37].mxu0  ;;  %v21804_v1 = vld [vmem:[#allocation362_spill] sm:$0xff]  ;;  %v21811_v16 = vld [vmem:[#allocation395_spill] sm:$0xff]  ;;  %v8338_v8 = vpop.f32.mrb[36].mxu1  ;;  %v21812_v20 = vld [vmem:[#allocation429_spill] sm:$0xff] }
 0x5ac   :  { %v4650_v37 = vadd.f32 %v21778_v33, %v4138_v36  ;;  %v5034_v22 = vmax.f32 %v4906_v51, 0.0  ;;  %v21785_v13 = vmax.f32 %v21784_v46, 0.0  ;;  %v21787_v56 = vmax.f32 %v21786_v39, 0.0  ;;  %v21807_v51 = vld [vmem:[#allocation74_spill] sm:$0xff]  ;;  %6396 = vst.msk [vmem:[%s19684_s4 + $0x228] sm:$0xff] %vm6326_vm1, %v8338_v8  ;;  %6331 = vst.msk [vmem:[%s19684_s4 + $0x20] sm:$0xff] %vm6326_vm1, %v5707_v14 }
 0x5ad   :  { %v4202_v62 = vadd.f32 %v21782_v59, %v21780_v31  ;;  %v5225_v54 = vadd.f32 %v5097_v29, %v4713_v25  ;;  %v4907_v12 = vadd.f32 %v21788_v42, %v13980_v7  ;;  %8321 = vmatprep.mubr.msk.f32.mxu0 %vm5236_vm0, %v5161_v27  ;;  %v21790_v23 = vmax.f32 %v21789_v24, 0.0  ;;  %v21805_v25 = vld [vmem:[#allocation232_spill] sm:$0xff]  ;;  %v8245_v58 = vpop.f32.mrb[38].mxu0 }
 0x5ae   :  { %v4139_v32 = vadd.f32 %v21787_v56, %v21785_v13  ;;  %v5098_v9 = vmax.f32 %v4970_v47, 0.0  ;;  %v21792_v15 = vmax.f32 %v21791_v48, 0.0  ;;  %v21794_v41 = vmax.f32 %v21793_v44, 0.0  ;;  %v21816_v13 = vld [vmem:[#allocation363_spill] sm:$0xff]  ;;  %v6027_v56 = vpop.f32.mrb[37].mxu1  ;;  %v21823_v44 = vld [vmem:[#allocation396_spill] sm:$0xff] }
 0x5af   :  { %v4714_v17 = vadd.f32 %v21790_v23, %v4202_v62  ;;  %v4971_v60 = vadd.f32 %v21795_v34, %v13980_v7  ;;  %8417 = vmatprep.mubr.msk.f32.mxu1 %vm5236_vm0, %v5225_v54  ;;  %v5162_v43 = vadd.f32 %v5034_v22, %v4650_v37  ;;  %v21797_v61 = vmax.f32 %v21796_v18, 0.0  ;;  %v21814_v54 = vld [vmem:[#allocation138_spill] sm:$0xff]  ;;  %v21819_v23 = vld [vmem:[#allocation75_spill] sm:$0xff]  ;;  %v21824_v34 = vld [vmem:[#allocation233_spill] sm:$0xff]  ;;  %6395 = vst.msk [vmem:[%s19684_s4 + $0x220] sm:$0xff] %vm6326_vm1, %v6027_v56  ;;  %v5717_v50 = vpop.f32.mrb[39].mxu0 }
 0x5b0   :  { %v4203_v0 = vadd.f32 %v21794_v41, %v21792_v15  ;;  %v5035_v52 = vmax.f32 %v4907_v12, 0.0  ;;  %v21799_v2 = vmax.f32 %v21798_v63, 0.0  ;;  %v21801_v30 = vmax.f32 %v21800_v11, 0.0  ;;  %6334 = vst.msk [vmem:[%s19684_s4 + $0x38] sm:$0xff] %vm6326_vm1, %v8245_v58  ;;  %6333 = vst.msk [vmem:[%s19684_s4 + $0x30] sm:$0xff] %vm6326_vm1, %v5717_v50  ;;  %v8341_v40 = vpop.f32.mrb[38].mxu1 }
 0x5b1   :  { %v4651_v57 = vadd.f32 %v21797_v61, %v4139_v32  ;;  %v5226_v26 = vadd.f32 %v5098_v9, %v4714_v17  ;;  %v21803_v38 = vmax.f32 %v21802_v4, 0.0  ;;  %v5099_v36 = vmax.f32 %v4971_v60, 0.0  ;;  %8322 = vmatmul.mubr.msk.f32.gmra.mrb[90].mxu0 %vm5236_vm0, %v5162_v43  ;;  %v21817_v32 = vld [vmem:[#allocation264_spill] sm:$0xff]  ;;  %v21821_v9 = vld [vmem:[#allocation202_spill] sm:$0xff]  ;;  %6398 = vst.msk [vmem:[%s19684_s4 + $0x238] sm:$0xff] %vm6326_vm1, %v8341_v40  ;;  %v6037_v35 = vpop.f32.mrb[39].mxu1 }
 0x5b2   :  { %v4140_v49 = vadd.f32 %v21801_v30, %v21799_v2  ;;  %v4908_v10 = vadd.f32 %v21804_v1, %v13980_v7  ;;  %v21806_v29 = vmax.f32 %v21805_v25, 0.0  ;;  %v21808_v27 = vmax.f32 %v21807_v51, 0.0  ;;  %v21826_v61 = vld [vmem:[#allocation430_spill] sm:$0xff]  ;;  %v21830_v30 = vld [vmem:[#allocation265_spill] sm:$0xff]  ;;  %v21835_v25 = vld [vmem:[#allocation76_spill] sm:$0xff]  ;;  %6397 = vst.msk [vmem:[%s19684_s4 + $0x230] sm:$0xff] %vm6326_vm1, %v6037_v35 }
 0x5b3   :  { %v4715_v53 = vadd.f32 %v21803_v38, %v4203_v0  ;;  %v5163_v45 = vadd.f32 %v5035_v52, %v4651_v57  ;;  %v21810_v33 = vmax.f32 %v21809_v19, 0.0  ;;  %v4972_v31 = vadd.f32 %v21811_v16, %v13980_v7  ;;  %8418 = vmatmul.mubr.msk.f32.gmra.mrb[90].mxu1 %vm5236_vm0, %v5226_v26  ;;  %v21828_v52 = vld [vmem:[#allocation139_spill] sm:$0xff]  ;;  %v21832_v38 = vld [vmem:[#allocation364_spill] sm:$0xff]  ;;  %v21833_v1 = vld [vmem:[#allocation234_spill] sm:$0xff]  ;;  %v8248_v6 = vpop.f32.mrb[40].mxu0  ;;  %v8344_v3 = vpop.f32.mrb[40].mxu1 }
 0x5b4   :  { %v4652_v55 = vadd.f32 %v21806_v29, %v4140_v49  ;;  %v5036_v62 = vmax.f32 %v4908_v10, 0.0  ;;  %v21813_v47 = vmax.f32 %v21812_v20, 0.0  ;;  %v21815_v22 = vmax.f32 %v21814_v54, 0.0  ;;  %v21839_v19 = vld [vmem:[#allocation397_spill] sm:$0xff]  ;;  %6336 = vst.msk [vmem:[%s19684_s4 + $0x48] sm:$0xff] %vm6326_vm1, %v8248_v6  ;;  %v5727_v21 = vpop.f32.mrb[41].mxu0 }
 0x5b5   :  { %v4204_v37 = vadd.f32 %v21810_v33, %v21808_v27  ;;  %v5227_v59 = vadd.f32 %v5099_v36, %v4715_v53  ;;  %v4909_v39 = vadd.f32 %v21816_v13, %v13980_v7  ;;  %8324 = vmatprep.mubr.msk.f32.mxu0 %vm5236_vm0, %v5163_v45  ;;  %v21818_v42 = vmax.f32 %v21817_v32, 0.0  ;;  %6335 = vst.msk [vmem:[%s19684_s4 + $0x40] sm:$0xff] %vm6326_vm1, %v5727_v21  ;;  %v6047_v28 = vpop.f32.mrb[41].mxu1  ;;  %v8251_v14 = vpop.f32.mrb[42].mxu0 }
 0x5b6   :  { %v4141_v46 = vadd.f32 %v21815_v22, %v21813_v47  ;;  %v5100_v24 = vmax.f32 %v4972_v31, 0.0  ;;  %v21820_v17 = vmax.f32 %v21819_v23, 0.0  ;;  %v21822_v48 = vmax.f32 %v21821_v9, 0.0  ;;  %v21840_v31 = vld [vmem:[#allocation266_spill] sm:$0xff]  ;;  %6400 = vst.msk [vmem:[%s19684_s4 + $0x248] sm:$0xff] %vm6326_vm1, %v8344_v3  ;;  %6399 = vst.msk [vmem:[%s19684_s4 + $0x240] sm:$0xff] %vm6326_vm1, %v6047_v28 }
 0x5b7   :  { %v4716_v12 = vadd.f32 %v21818_v42, %v4204_v37  ;;  %v4973_v41 = vadd.f32 %v21823_v44, %v13980_v7  ;;  %8420 = vmatprep.mubr.msk.f32.mxu1 %vm5236_vm0, %v5227_v59  ;;  %v5164_v0 = vadd.f32 %v5036_v62, %v4652_v55  ;;  %v21825_v60 = vmax.f32 %v21824_v34, 0.0  ;;  %v21837_v55 = vld [vmem:[#allocation203_spill] sm:$0xff]  ;;  %6338 = vst.msk [vmem:[%s19684_s4 + $0x58] sm:$0xff] %vm6326_vm1, %v8251_v14  ;;  %v5737_v8 = vpop.f32.mrb[43].mxu0  ;;  %v8347_v47 = vpop.f32.mrb[42].mxu1 }
 0x5b8   :  { %v4205_v15 = vadd.f32 %v21822_v48, %v21820_v17  ;;  %v5037_v18 = vmax.f32 %v4909_v39, 0.0  ;;  %v21827_v57 = vmax.f32 %v21826_v61, 0.0  ;;  %v21829_v63 = vmax.f32 %v21828_v52, 0.0  ;;  %6337 = vst.msk [vmem:[%s19684_s4 + $0x50] sm:$0xff] %vm6326_vm1, %v5737_v8  ;;  %6402 = vst.msk [vmem:[%s19684_s4 + $0x258] sm:$0xff] %vm6326_vm1, %v8347_v47  ;;  %v6057_v54 = vpop.f32.mrb[43].mxu1 }
 0x5b9   :  { %v4653_v43 = vadd.f32 %v21825_v60, %v4141_v46  ;;  %v5228_v11 = vadd.f32 %v5100_v24, %v4716_v12  ;;  %v21831_v49 = vmax.f32 %v21830_v30, 0.0  ;;  %v5101_v4 = vmax.f32 %v4973_v41, 0.0  ;;  %8325 = vmatmul.mubr.msk.f32.gmra.mrb[92].mxu0 %vm5236_vm0, %v5164_v0  ;;  %6401 = vst.msk [vmem:[%s19684_s4 + $0x250] sm:$0xff] %vm6326_vm1, %v6057_v54  ;;  %v8254_v22 = vpop.f32.mrb[44].mxu0  ;;  %v8350_v13 = vpop.f32.mrb[44].mxu1 }
 0x5ba   :  { %v4142_v2 = vadd.f32 %v21829_v63, %v21827_v57  ;;  %v4910_v53 = vadd.f32 %v21832_v38, %v13980_v7  ;;  %v21834_v10 = vmax.f32 %v21833_v1, 0.0  ;;  %v21836_v29 = vmax.f32 %v21835_v25, 0.0  ;;  %6340 = vst.msk [vmem:[%s19684_s4 + $0x68] sm:$0xff] %vm6326_vm1, %v8254_v22  ;;  %v5747_v46 = vpop.f32.mrb[45].mxu0  ;;  %6404 = vst.msk [vmem:[%s19684_s4 + $0x268] sm:$0xff] %vm6326_vm1, %v8350_v13  ;;  %v6067_v39 = vpop.f32.mrb[45].mxu1 }
 0x5bb   :  { %v4717_v26 = vadd.f32 %v21831_v49, %v4205_v15  ;;  %v5165_v36 = vadd.f32 %v5037_v18, %v4653_v43  ;;  %v21838_v51 = vmax.f32 %v21837_v55, 0.0  ;;  %v4974_v33 = vadd.f32 %v21839_v19, %v13980_v7  ;;  %8421 = vmatmul.mubr.msk.f32.gmra.mrb[92].mxu1 %vm5236_vm0, %v5228_v11  ;;  %6339 = vst.msk [vmem:[%s19684_s4 + $0x60] sm:$0xff] %vm6326_vm1, %v5747_v46  ;;  %v8257_v56 = vpop.f32.mrb[46].mxu0  ;;  %v8353_v42 = vpop.f32.mrb[46].mxu1 }
 0x5bc   :  { %v4654_v45 = vadd.f32 %v21834_v10, %v4142_v2  ;;  %v5038_v16 = vmax.f32 %v4910_v53, 0.0  ;;  %v21841_v59 = vmax.f32 %v21840_v31, 0.0  ;;  %6403 = vst.msk [vmem:[%s19684_s4 + $0x260] sm:$0xff] %vm6326_vm1, %v6067_v39  ;;  %6342 = vst.msk [vmem:[%s19684_s4 + $0x78] sm:$0xff] %vm6326_vm1, %v8257_v56  ;;  %v5757_v32 = vpop.f32.mrb[47].mxu0  ;;  %v6077_v12 = vpop.f32.mrb[47].mxu1 }
 0x5bd   :  { %v4206_v27 = vadd.f32 %v21838_v51, %v21836_v29  ;;  %v5229_v37 = vadd.f32 %v5101_v4, %v4717_v26  ;;  %8327 = vmatprep.mubr.msk.f32.mxu0 %vm5236_vm0, %v5165_v36  ;;  %v5102_v20 = vmax.f32 %v4974_v33, 0.0  ;;  %6341 = vst.msk [vmem:[%s19684_s4 + $0x70] sm:$0xff] %vm6326_vm1, %v5757_v32  ;;  %6406 = vst.msk [vmem:[%s19684_s4 + $0x278] sm:$0xff] %vm6326_vm1, %v8353_v42 }
 0x5be   :  { %v5166_v7 = vadd.f32 %v5038_v16, %v4654_v45  ;;  %6405 = vst.msk [vmem:[%s19684_s4 + $0x270] sm:$0xff] %vm6326_vm1, %v6077_v12 }
 0x5bf   :  { %v4718_v62 = vadd.f32 %v21841_v59, %v4206_v27  ;;  %8423 = vmatprep.mubr.msk.f32.mxu1 %vm5236_vm0, %v5229_v37 }
 0x5c0   :  { %8328 = vmatmul.mubr.msk.f32.gmra.mrb[94].mxu0 %vm5236_vm0, %v5166_v7  ;;  %v8260_v24 = vpop.f32.mrb[48].mxu0 }
 0x5c1   :  { %v5230_v5 = vadd.f32 %v5102_v20, %v4718_v62  ;;  %6344 = vst.msk [vmem:[%s19684_s4 + $0x88] sm:$0xff] %vm6326_vm1, %v8260_v24  ;;  %v5767_v17 = vpop.f32.mrb[49].mxu0 }
 0x5c2   :  { %v8356_v23 = vpop.f32.mrb[48].mxu1  ;;  %6343 = vst.msk [vmem:[%s19684_s4 + $0x80] sm:$0xff] %vm6326_vm1, %v5767_v17 }
 0x5c3   :  { %8424 = vmatmul.mubr.msk.f32.gmra.mrb[94].mxu1 %vm5236_vm0, %v5230_v5  ;;  %6408 = vst.msk [vmem:[%s19684_s4 + $0x288] sm:$0xff] %vm6326_vm1, %v8356_v23  ;;  %v6087_v9 = vpop.f32.mrb[49].mxu1 }
 0x5c4   :  { %6407 = vst.msk [vmem:[%s19684_s4 + $0x280] sm:$0xff] %vm6326_vm1, %v6087_v9 }
 0x5c7   :  { %v8263_v48 = vpop.f32.mrb[50].mxu0 }
 0x5c8   :  { %6346 = vst.msk [vmem:[%s19684_s4 + $0x98] sm:$0xff] %vm6326_vm1, %v8263_v48  ;;  %v5777_v15 = vpop.f32.mrb[51].mxu0 }
 0x5c9   :  { %6345 = vst.msk [vmem:[%s19684_s4 + $0x90] sm:$0xff] %vm6326_vm1, %v5777_v15 }
 0x5ca   :  { %v8359_v44 = vpop.f32.mrb[50].mxu1 }
 0x5cb   :  { %6410 = vst.msk [vmem:[%s19684_s4 + $0x298] sm:$0xff] %vm6326_vm1, %v8359_v44  ;;  %v6097_v41 = vpop.f32.mrb[51].mxu1 }
 0x5cc   :  { %6409 = vst.msk [vmem:[%s19684_s4 + $0x290] sm:$0xff] %vm6326_vm1, %v6097_v41 }
 0x5d0   :  { %v8266_v0 = vpop.f32.mrb[52].mxu0 }
 0x5d1   :  { %6348 = vst.msk [vmem:[%s19684_s4 + $0xa8] sm:$0xff] %vm6326_vm1, %v8266_v0  ;;  %v5787_v60 = vpop.f32.mrb[53].mxu0 }
 0x5d2   :  { %v8362_v34 = vpop.f32.mrb[52].mxu1  ;;  %6347 = vst.msk [vmem:[%s19684_s4 + $0xa0] sm:$0xff] %vm6326_vm1, %v5787_v60 }
 0x5d3   :  { %6412 = vst.msk [vmem:[%s19684_s4 + $0x2a8] sm:$0xff] %vm6326_vm1, %v8362_v34  ;;  %v6107_v43 = vpop.f32.mrb[53].mxu1 }
 0x5d4   :  { %6411 = vst.msk [vmem:[%s19684_s4 + $0x2a0] sm:$0xff] %vm6326_vm1, %v6107_v43 }
 0x5d8   :  { %v8269_v18 = vpop.f32.mrb[54].mxu0 }
 0x5d9   :  { %6350 = vst.msk [vmem:[%s19684_s4 + $0xb8] sm:$0xff] %vm6326_vm1, %v8269_v18  ;;  %v5797_v57 = vpop.f32.mrb[55].mxu0 }
 0x5da   :  { %v8365_v61 = vpop.f32.mrb[54].mxu1  ;;  %6349 = vst.msk [vmem:[%s19684_s4 + $0xb0] sm:$0xff] %vm6326_vm1, %v5797_v57 }
 0x5db   :  { %6414 = vst.msk [vmem:[%s19684_s4 + $0x2b8] sm:$0xff] %vm6326_vm1, %v8365_v61  ;;  %v6117_v52 = vpop.f32.mrb[55].mxu1 }
 0x5dc   :  { %6413 = vst.msk [vmem:[%s19684_s4 + $0x2b0] sm:$0xff] %vm6326_vm1, %v6117_v52 }
 0x5e0   :  { %v8272_v63 = vpop.f32.mrb[56].mxu0 }
 0x5e1   :  { %6352 = vst.msk [vmem:[%s19684_s4 + $0xc8] sm:$0xff] %vm6326_vm1, %v8272_v63  ;;  %v5807_v11 = vpop.f32.mrb[57].mxu0 }
 0x5e2   :  { %v8368_v2 = vpop.f32.mrb[56].mxu1  ;;  %6351 = vst.msk [vmem:[%s19684_s4 + $0xc0] sm:$0xff] %vm6326_vm1, %v5807_v11 }
 0x5e3   :  { %6416 = vst.msk [vmem:[%s19684_s4 + $0x2c8] sm:$0xff] %vm6326_vm1, %v8368_v2  ;;  %v6127_v30 = vpop.f32.mrb[57].mxu1 }
 0x5e4   :  { %6415 = vst.msk [vmem:[%s19684_s4 + $0x2c0] sm:$0xff] %vm6326_vm1, %v6127_v30 }
 0x5e8   :  { %v8275_v49 = vpop.f32.mrb[58].mxu0 }
 0x5e9   :  { %6354 = vst.msk [vmem:[%s19684_s4 + $0xd8] sm:$0xff] %vm6326_vm1, %v8275_v49  ;;  %v5817_v4 = vpop.f32.mrb[59].mxu0 }
 0x5ea   :  { %v8371_v26 = vpop.f32.mrb[58].mxu1  ;;  %6353 = vst.msk [vmem:[%s19684_s4 + $0xd0] sm:$0xff] %vm6326_vm1, %v5817_v4 }
 0x5eb   :  { %6418 = vst.msk [vmem:[%s19684_s4 + $0x2d8] sm:$0xff] %vm6326_vm1, %v8371_v26  ;;  %v6137_v38 = vpop.f32.mrb[59].mxu1 }
 0x5ec   :  { %6417 = vst.msk [vmem:[%s19684_s4 + $0x2d0] sm:$0xff] %vm6326_vm1, %v6137_v38 }
 0x5f0   :  { %v8278_v53 = vpop.f32.mrb[60].mxu0 }
 0x5f1   :  { %6356 = vst.msk [vmem:[%s19684_s4 + $0xe8] sm:$0xff] %vm6326_vm1, %v8278_v53  ;;  %v5827_v1 = vpop.f32.mrb[61].mxu0 }
 0x5f2   :  { %v8374_v36 = vpop.f32.mrb[60].mxu1  ;;  %6355 = vst.msk [vmem:[%s19684_s4 + $0xe0] sm:$0xff] %vm6326_vm1, %v5827_v1 }
 0x5f3   :  { %6420 = vst.msk [vmem:[%s19684_s4 + $0x2e8] sm:$0xff] %vm6326_vm1, %v8374_v36  ;;  %v6147_v10 = vpop.f32.mrb[61].mxu1 }
 0x5f4   :  { %6419 = vst.msk [vmem:[%s19684_s4 + $0x2e0] sm:$0xff] %vm6326_vm1, %v6147_v10 }
 0x5f7   :  { %v8281_v45 = vpop.f32.mrb[62].mxu0 }
 0x5f8   :  { %6358 = vst.msk [vmem:[%s19684_s4 + $0xf8] sm:$0xff] %vm6326_vm1, %v8281_v45  ;;  %v5837_v29 = vpop.f32.mrb[63].mxu0 }
 0x5f9   :  { %6357 = vst.msk [vmem:[%s19684_s4 + $0xf0] sm:$0xff] %vm6326_vm1, %v5837_v29 }
 0x5fa   :  { %v8377_v25 = vpop.f32.mrb[62].mxu1 }
 0x5fb   :  { %6422 = vst.msk [vmem:[%s19684_s4 + $0x2f8] sm:$0xff] %vm6326_vm1, %v8377_v25  ;;  %v6157_v55 = vpop.f32.mrb[63].mxu1 }
 0x5fc   :  { %6421 = vst.msk [vmem:[%s19684_s4 + $0x2f0] sm:$0xff] %vm6326_vm1, %v6157_v55 }
 0x604   :  { %v8284_v51 = vpop.f32.mrb[64].mxu0 }
 0x605   :  { %6360 = vst.msk [vmem:[%s19684_s4 + $0x108] sm:$0xff] %vm6326_vm1, %v8284_v51  ;;  %v5847_v27 = vpop.f32.mrb[65].mxu0 }
 0x606   :  { %6359 = vst.msk [vmem:[%s19684_s4 + $0x100] sm:$0xff] %vm6326_vm1, %v5847_v27  ;;  %v8380_v19 = vpop.f32.mrb[64].mxu1 }
 0x607   :  { %6424 = vst.msk [vmem:[%s19684_s4 + $0x308] sm:$0xff] %vm6326_vm1, %v8380_v19  ;;  %v6167_v33 = vpop.f32.mrb[65].mxu1 }
 0x608   :  { %6423 = vst.msk [vmem:[%s19684_s4 + $0x300] sm:$0xff] %vm6326_vm1, %v6167_v33 }
 0x60f   :  { %v8287_v37 = vpop.f32.mrb[66].mxu0 }
 0x610   :  { %6362 = vst.msk [vmem:[%s19684_s4 + $0x118] sm:$0xff] %vm6326_vm1, %v8287_v37  ;;  %v5857_v16 = vpop.f32.mrb[67].mxu0 }
 0x611   :  { %6361 = vst.msk [vmem:[%s19684_s4 + $0x110] sm:$0xff] %vm6326_vm1, %v5857_v16  ;;  %v8383_v31 = vpop.f32.mrb[66].mxu1 }
 0x612   :  { %6426 = vst.msk [vmem:[%s19684_s4 + $0x318] sm:$0xff] %vm6326_vm1, %v8383_v31  ;;  %v6177_v59 = vpop.f32.mrb[67].mxu1 }
 0x613   :  { %6425 = vst.msk [vmem:[%s19684_s4 + $0x310] sm:$0xff] %vm6326_vm1, %v6177_v59 }
 0x61b   :  { %v8290_v62 = vpop.f32.mrb[68].mxu0 }
 0x61c   :  { %6364 = vst.msk [vmem:[%s19684_s4 + $0x128] sm:$0xff] %vm6326_vm1, %v8290_v62  ;;  %v5867_v20 = vpop.f32.mrb[69].mxu0  ;;  %v8386_v7 = vpop.f32.mrb[68].mxu1 }
 0x61d   :  { %6363 = vst.msk [vmem:[%s19684_s4 + $0x120] sm:$0xff] %vm6326_vm1, %v5867_v20  ;;  %6428 = vst.msk [vmem:[%s19684_s4 + $0x328] sm:$0xff] %vm6326_vm1, %v8386_v7  ;;  %v6187_v58 = vpop.f32.mrb[69].mxu1 }
 0x61e   :  { %6427 = vst.msk [vmem:[%s19684_s4 + $0x320] sm:$0xff] %vm6326_vm1, %v6187_v58 }
 0x626   :  { %v8293_v5 = vpop.f32.mrb[70].mxu0 }
 0x627   :  { %6366 = vst.msk [vmem:[%s19684_s4 + $0x138] sm:$0xff] %vm6326_vm1, %v8293_v5  ;;  %v5877_v50 = vpop.f32.mrb[71].mxu0 }
 0x628   :  { %6365 = vst.msk [vmem:[%s19684_s4 + $0x130] sm:$0xff] %vm6326_vm1, %v5877_v50  ;;  %v8389_v40 = vpop.f32.mrb[70].mxu1 }
 0x629   :  { %6430 = vst.msk [vmem:[%s19684_s4 + $0x338] sm:$0xff] %vm6326_vm1, %v8389_v40  ;;  %v6197_v35 = vpop.f32.mrb[71].mxu1 }
 0x62a   :  { %6429 = vst.msk [vmem:[%s19684_s4 + $0x330] sm:$0xff] %vm6326_vm1, %v6197_v35 }
 0x632   :  { %v8296_v6 = vpop.f32.mrb[72].mxu0 }
 0x633   :  { %6368 = vst.msk [vmem:[%s19684_s4 + $0x148] sm:$0xff] %vm6326_vm1, %v8296_v6  ;;  %v5887_v21 = vpop.f32.mrb[73].mxu0  ;;  %v8392_v3 = vpop.f32.mrb[72].mxu1 }
 0x634   :  { %6367 = vst.msk [vmem:[%s19684_s4 + $0x140] sm:$0xff] %vm6326_vm1, %v5887_v21  ;;  %6432 = vst.msk [vmem:[%s19684_s4 + $0x348] sm:$0xff] %vm6326_vm1, %v8392_v3  ;;  %v6207_v28 = vpop.f32.mrb[73].mxu1 }
 0x635   :  { %6431 = vst.msk [vmem:[%s19684_s4 + $0x340] sm:$0xff] %vm6326_vm1, %v6207_v28 }
 0x63d   :  { %v8299_v14 = vpop.f32.mrb[74].mxu0 }
 0x63e   :  { %6370 = vst.msk [vmem:[%s19684_s4 + $0x158] sm:$0xff] %vm6326_vm1, %v8299_v14  ;;  %v5897_v8 = vpop.f32.mrb[75].mxu0 }
 0x63f   :  { %6369 = vst.msk [vmem:[%s19684_s4 + $0x150] sm:$0xff] %vm6326_vm1, %v5897_v8  ;;  %v8395_v47 = vpop.f32.mrb[74].mxu1 }
 0x640   :  { %6434 = vst.msk [vmem:[%s19684_s4 + $0x358] sm:$0xff] %vm6326_vm1, %v8395_v47  ;;  %v6217_v54 = vpop.f32.mrb[75].mxu1 }
 0x641   :  { %6433 = vst.msk [vmem:[%s19684_s4 + $0x350] sm:$0xff] %vm6326_vm1, %v6217_v54 }
 0x649   :  { %v8302_v22 = vpop.f32.mrb[76].mxu0 }
 0x64a   :  { %6372 = vst.msk [vmem:[%s19684_s4 + $0x168] sm:$0xff] %vm6326_vm1, %v8302_v22  ;;  %v5907_v46 = vpop.f32.mrb[77].mxu0  ;;  %v8398_v13 = vpop.f32.mrb[76].mxu1 }
 0x64b   :  { %6371 = vst.msk [vmem:[%s19684_s4 + $0x160] sm:$0xff] %vm6326_vm1, %v5907_v46  ;;  %6436 = vst.msk [vmem:[%s19684_s4 + $0x368] sm:$0xff] %vm6326_vm1, %v8398_v13  ;;  %v6227_v39 = vpop.f32.mrb[77].mxu1 }
 0x64c   :  { %6435 = vst.msk [vmem:[%s19684_s4 + $0x360] sm:$0xff] %vm6326_vm1, %v6227_v39 }
 0x654   :  { %v8305_v56 = vpop.f32.mrb[78].mxu0 }
 0x655   :  { %6374 = vst.msk [vmem:[%s19684_s4 + $0x178] sm:$0xff] %vm6326_vm1, %v8305_v56  ;;  %v5917_v32 = vpop.f32.mrb[79].mxu0 }
 0x656   :  { %6373 = vst.msk [vmem:[%s19684_s4 + $0x170] sm:$0xff] %vm6326_vm1, %v5917_v32 }
 0x657   :  { %v8401_v42 = vpop.f32.mrb[78].mxu1 }
 0x658   :  { %6438 = vst.msk [vmem:[%s19684_s4 + $0x378] sm:$0xff] %vm6326_vm1, %v8401_v42  ;;  %v6237_v12 = vpop.f32.mrb[79].mxu1 }
 0x659   :  { %6437 = vst.msk [vmem:[%s19684_s4 + $0x370] sm:$0xff] %vm6326_vm1, %v6237_v12 }
 0x65c   :  { %v8308_v24 = vpop.f32.mrb[80].mxu0 }
 0x65d   :  { %6376 = vst.msk [vmem:[%s19684_s4 + $0x188] sm:$0xff] %vm6326_vm1, %v8308_v24  ;;  %v5927_v17 = vpop.f32.mrb[81].mxu0 }
 0x65e   :  { %v8404_v23 = vpop.f32.mrb[80].mxu1  ;;  %6375 = vst.msk [vmem:[%s19684_s4 + $0x180] sm:$0xff] %vm6326_vm1, %v5927_v17 }
 0x65f   :  { %6440 = vst.msk [vmem:[%s19684_s4 + $0x388] sm:$0xff] %vm6326_vm1, %v8404_v23  ;;  %v6247_v9 = vpop.f32.mrb[81].mxu1 }
 0x660   :  { %6439 = vst.msk [vmem:[%s19684_s4 + $0x380] sm:$0xff] %vm6326_vm1, %v6247_v9 }
 0x663   :  { %v8311_v48 = vpop.f32.mrb[82].mxu0 }
 0x664   :  { %6378 = vst.msk [vmem:[%s19684_s4 + $0x198] sm:$0xff] %vm6326_vm1, %v8311_v48  ;;  %v5937_v15 = vpop.f32.mrb[83].mxu0 }
 0x665   :  { %6377 = vst.msk [vmem:[%s19684_s4 + $0x190] sm:$0xff] %vm6326_vm1, %v5937_v15 }
 0x666   :  { %v8407_v44 = vpop.f32.mrb[82].mxu1 }
 0x667   :  { %6442 = vst.msk [vmem:[%s19684_s4 + $0x398] sm:$0xff] %vm6326_vm1, %v8407_v44  ;;  %v6257_v41 = vpop.f32.mrb[83].mxu1 }
 0x668   :  { %6441 = vst.msk [vmem:[%s19684_s4 + $0x390] sm:$0xff] %vm6326_vm1, %v6257_v41 }
 0x66c   :  { %v8314_v0 = vpop.f32.mrb[84].mxu0 }
 0x66d   :  { %6380 = vst.msk [vmem:[%s19684_s4 + $0x1a8] sm:$0xff] %vm6326_vm1, %v8314_v0  ;;  %v5947_v60 = vpop.f32.mrb[85].mxu0 }
 0x66e   :  { %v8410_v34 = vpop.f32.mrb[84].mxu1  ;;  %6379 = vst.msk [vmem:[%s19684_s4 + $0x1a0] sm:$0xff] %vm6326_vm1, %v5947_v60 }
 0x66f   :  { %6444 = vst.msk [vmem:[%s19684_s4 + $0x3a8] sm:$0xff] %vm6326_vm1, %v8410_v34  ;;  %v6267_v43 = vpop.f32.mrb[85].mxu1 }
 0x670   :  { %6443 = vst.msk [vmem:[%s19684_s4 + $0x3a0] sm:$0xff] %vm6326_vm1, %v6267_v43 }
 0x674   :  { %v8317_v18 = vpop.f32.mrb[86].mxu0 }
 0x675   :  { %6382 = vst.msk [vmem:[%s19684_s4 + $0x1b8] sm:$0xff] %vm6326_vm1, %v8317_v18  ;;  %v5957_v57 = vpop.f32.mrb[87].mxu0 }
 0x676   :  { %v8413_v61 = vpop.f32.mrb[86].mxu1  ;;  %6381 = vst.msk [vmem:[%s19684_s4 + $0x1b0] sm:$0xff] %vm6326_vm1, %v5957_v57 }
 0x677   :  { %6446 = vst.msk [vmem:[%s19684_s4 + $0x3b8] sm:$0xff] %vm6326_vm1, %v8413_v61  ;;  %v6277_v52 = vpop.f32.mrb[87].mxu1 }
 0x678   :  { %6445 = vst.msk [vmem:[%s19684_s4 + $0x3b0] sm:$0xff] %vm6326_vm1, %v6277_v52 }
 0x67c   :  { %v8320_v63 = vpop.f32.mrb[88].mxu0 }
 0x67d   :  { %6384 = vst.msk [vmem:[%s19684_s4 + $0x1c8] sm:$0xff] %vm6326_vm1, %v8320_v63  ;;  %v5967_v11 = vpop.f32.mrb[89].mxu0 }
 0x67e   :  { %v8416_v2 = vpop.f32.mrb[88].mxu1  ;;  %6383 = vst.msk [vmem:[%s19684_s4 + $0x1c0] sm:$0xff] %vm6326_vm1, %v5967_v11 }
 0x67f   :  { %6448 = vst.msk [vmem:[%s19684_s4 + $0x3c8] sm:$0xff] %vm6326_vm1, %v8416_v2  ;;  %v6287_v30 = vpop.f32.mrb[89].mxu1 }
 0x680   :  { %6447 = vst.msk [vmem:[%s19684_s4 + $0x3c0] sm:$0xff] %vm6326_vm1, %v6287_v30 }
 0x684   :  { %v8323_v49 = vpop.f32.mrb[90].mxu0 }
 0x685   :  { %6386 = vst.msk [vmem:[%s19684_s4 + $0x1d8] sm:$0xff] %vm6326_vm1, %v8323_v49  ;;  %v5977_v4 = vpop.f32.mrb[91].mxu0 }
 0x686   :  { %v8419_v26 = vpop.f32.mrb[90].mxu1  ;;  %6385 = vst.msk [vmem:[%s19684_s4 + $0x1d0] sm:$0xff] %vm6326_vm1, %v5977_v4 }
 0x687   :  { %6450 = vst.msk [vmem:[%s19684_s4 + $0x3d8] sm:$0xff] %vm6326_vm1, %v8419_v26  ;;  %v6297_v38 = vpop.f32.mrb[91].mxu1 }
 0x688   :  { %6449 = vst.msk [vmem:[%s19684_s4 + $0x3d0] sm:$0xff] %vm6326_vm1, %v6297_v38 }
 0x68c   :  { %v8326_v53 = vpop.f32.mrb[92].mxu0 }
 0x68d   :  { %6388 = vst.msk [vmem:[%s19684_s4 + $0x1e8] sm:$0xff] %vm6326_vm1, %v8326_v53  ;;  %v5987_v1 = vpop.f32.mrb[93].mxu0 }
 0x68e   :  { %v8422_v36 = vpop.f32.mrb[92].mxu1  ;;  %6387 = vst.msk [vmem:[%s19684_s4 + $0x1e0] sm:$0xff] %vm6326_vm1, %v5987_v1 }
 0x68f   :  { %6452 = vst.msk [vmem:[%s19684_s4 + $0x3e8] sm:$0xff] %vm6326_vm1, %v8422_v36  ;;  %v6307_v10 = vpop.f32.mrb[93].mxu1 }
 0x690   :  { %6451 = vst.msk [vmem:[%s19684_s4 + $0x3e0] sm:$0xff] %vm6326_vm1, %v6307_v10 }
 0x693   :  { %v8329_v45 = vpop.f32.mrb[94].mxu0 }
 0x694   :  { %6390 = vst.msk [vmem:[%s19684_s4 + $0x1f8] sm:$0xff] %vm6326_vm1, %v8329_v45  ;;  %v5997_v29 = vpop.f32.mrb[95].mxu0 }
 0x695   :  { %6389 = vst.msk [vmem:[%s19684_s4 + $0x1f0] sm:$0xff] %vm6326_vm1, %v5997_v29 }
 0x696   :  { %v8425_v25 = vpop.f32.mrb[94].mxu1 }
 0x697   :  { %6454 = vst.msk [vmem:[%s19684_s4 + $0x3f8] sm:$0xff] %vm6326_vm1, %v8425_v25  ;;  %v6317_v55 = vpop.f32.mrb[95].mxu1 }
 0x698   :  { %6453 = vst.msk [vmem:[%s19684_s4 + $0x3f0] sm:$0xff] %vm6326_vm1, %v6317_v55 }

</bundles_post_ra>
